<compile_context>
chip_gen: v6e
topology: v6e:2x2x1
jax: 0.10.0
libtpu: 0.0.40
codegen_flags: <defaults>
</compile_context>

<pallas_src>
import functools

import jax
import jax.numpy as jnp
from jax.experimental import pallas as pl
from jax.experimental.pallas import tpu as pltpu


def _rup(x, m):
    return ((x + m - 1) // m) * m


def _row_tile(M, cap):
    """Largest power-of-two-ish row tile <= cap that divides M (M is always a
    multiple of 16 at our call sites, so this never drops below 16 unless
    M itself is smaller)."""
    t = min(cap, M)
    while M % t:
        t //= 2
    return max(t, 1)


# ----------------------------------------------------------------------------
# Pallas kernels
# ----------------------------------------------------------------------------
def _matmul_kernel(a_ref, w_ref, o_ref):
    # Single K block (K <= 512 for every layer): no K grid axis, no accumulator.
    o_ref[...] = jnp.dot(a_ref[...], w_ref[...],
                         preferred_element_type=jnp.float32).astype(o_ref.dtype)


def _bn_relu_matmul_kernel(scale_ref, shift_ref, a_ref, w_ref, o_ref):
    # LHS prologue: BatchNorm apply + ReLU + bf16 cast, riding the VPU slots
    # under the MXU.  scale/shift are per-channel (1, K) rows, a is the raw
    # (pre-BN) activation of the previous layer.
    a = a_ref[...].astype(jnp.float32) * scale_ref[...] + shift_ref[...]
    a = jnp.maximum(a, 0.0).astype(jnp.bfloat16)
    o_ref[...] = jnp.dot(a, w_ref[...],
                         preferred_element_type=jnp.float32).astype(o_ref.dtype)


def _bn_stats_kernel(y_ref, g_ref, b_ref, scale_ref, shift_ref,
                     sum_ref, sq_ref, *, count, eps):
    """Accumulate f32 sum / sum-of-squares over row tiles; on the last tile
    fold them into per-channel scale = gamma*rsqrt(var+eps) and
    shift = beta - mean*scale (training-mode BN, biased variance)."""
    @pl.when(pl.program_id(0) == 0)
    def _():
        sum_ref[...] = jnp.zeros_like(sum_ref)
        sq_ref[...] = jnp.zeros_like(sq_ref)

    y = y_ref[...].astype(jnp.float32)
    sum_ref[...] += jnp.sum(y, axis=0, keepdims=True)
    sq_ref[...] += jnp.sum(y * y, axis=0, keepdims=True)

    @pl.when(pl.program_id(0) == pl.num_programs(0) - 1)
    def _():
        inv_n = 1.0 / count
        mean = sum_ref[...] * inv_n
        var = jnp.maximum(sq_ref[...] * inv_n - mean * mean, 0.0)
        scale = g_ref[...] * jax.lax.rsqrt(var + eps)
        scale_ref[...] = scale
        shift_ref[...] = b_ref[...] - mean * scale


def _tanh_kernel(y_ref, o_ref):
    o_ref[...] = jnp.tanh(y_ref[...].astype(jnp.float32))


# ----------------------------------------------------------------------------
# Pallas wrappers
# ----------------------------------------------------------------------------
def pallas_matmul(a, w, *, scale=None, shift=None, out_dtype=jnp.bfloat16):
    """(M, K) @ (K, N) with bf16 MXU operands, f32 accumulation, single K block.
    If scale/shift ((1, K) f32) are given, applies BN + ReLU to the LHS first."""
    M, K = a.shape
    K2, N = w.shape
    assert K == K2 and K <= 512, (K,)        # single-K-block assumption

    tm = _row_tile(M, 512)
    if N % 512 == 0:
        tn = 512                              # fills the 256-wide MXU, fewer steps
    elif N % 128 == 0:
        tn = 128
    else:
        tn = N                                # e.g. layer-5 N=48 (== full dim)
    grid = (M // tm, N // tn)

    if scale is None:
        kernel = _matmul_kernel
        in_specs = [pl.BlockSpec((tm, K), lambda i, j: (i, 0)),
                    pl.BlockSpec((K, tn), lambda i, j: (0, j))]
        args = (a, w)
    else:
        kernel = _bn_relu_matmul_kernel
        in_specs = [pl.BlockSpec((1, K), lambda i, j: (0, 0)),
                    pl.BlockSpec((1, K), lambda i, j: (0, 0)),
                    pl.BlockSpec((tm, K), lambda i, j: (i, 0)),
                    pl.BlockSpec((K, tn), lambda i, j: (0, j))]
        args = (scale, shift, a, w)

    return pl.pallas_call(
        kernel,
        out_shape=jax.ShapeDtypeStruct((M, N), out_dtype),
        grid_spec=pltpu.PrefetchScalarGridSpec(
            num_scalar_prefetch=0,
            grid=grid,
            in_specs=in_specs,
            out_specs=pl.BlockSpec((tm, tn), lambda i, j: (i, j))),
        compiler_params=pltpu.CompilerParams(
            dimension_semantics=("parallel", "parallel")),
    )(*args)


def pallas_bn_scale_shift(y, gamma, beta, eps=1e-5):
    """y: (M, C) raw (pre-BN) activation, gamma/beta: (1, C).  Returns the
    folded per-channel (scale, shift) pair; the normalize+ReLU itself is fused
    into the next layer's matmul LHS prologue."""
    M, C = y.shape
    tm = _row_tile(M, 1024)
    return pl.pallas_call(
        functools.partial(_bn_stats_kernel, count=float(M), eps=float(eps)),
        out_shape=(jax.ShapeDtypeStruct((1, C), jnp.float32),
                   jax.ShapeDtypeStruct((1, C), jnp.float32)),
        grid_spec=pltpu.PrefetchScalarGridSpec(
            num_scalar_prefetch=0,
            grid=(M // tm,),
            in_specs=[pl.BlockSpec((tm, C), lambda i: (i, 0)),
                      pl.BlockSpec((1, C), lambda i: (0, 0)),
                      pl.BlockSpec((1, C), lambda i: (0, 0))],
            out_specs=(pl.BlockSpec((1, C), lambda i: (0, 0)),
                       pl.BlockSpec((1, C), lambda i: (0, 0))),
            scratch_shapes=[pltpu.VMEM((1, C), jnp.float32),
                            pltpu.VMEM((1, C), jnp.float32)]),
        compiler_params=pltpu.CompilerParams(
            dimension_semantics=("arbitrary",)),
    )(y, gamma, beta)


def pallas_tanh(y):
    """Elementwise tanh on a lane-dense 2-D slab (no padding needed here)."""
    M, N = y.shape
    tm = _row_tile(M, 512)
    return pl.pallas_call(
        _tanh_kernel,
        out_shape=jax.ShapeDtypeStruct((M, N), jnp.float32),
        grid_spec=pltpu.PrefetchScalarGridSpec(
            num_scalar_prefetch=0,
            grid=(M // tm,),
            in_specs=[pl.BlockSpec((tm, N), lambda i: (i, 0))],
            out_specs=pl.BlockSpec((tm, N), lambda i: (i, 0))),
        compiler_params=pltpu.CompilerParams(
            dimension_semantics=("parallel",)),
    )(y)


# ----------------------------------------------------------------------------
# ConvTranspose2d(k=4, s=2, p=1) glue: overlap-add (col2im) of tap contributions.
# TODO(synk): fold this interleave (plus the BN stats accumulation) into a
# Pallas per-layer kernel so contrib is read exactly once from HBM.
# ----------------------------------------------------------------------------
def _col2im_k4_s2(contrib, B, H, W, C):
    """Overlap-add the per-input-pixel 4x4 tap contributions of a
    ConvTranspose2d(k=4, s=2, p=1): tap (kh, kw) of input pixel (ih, iw) lands
    on output pixel (2*ih - 1 + kh, 2*iw - 1 + kw); out-of-range taps drop."""
    c = contrib.reshape(B, H, W, 4, 4, C)
    zr = jnp.zeros_like(c[:, :1, :, 0])
    even = c[:, :, :, 1] + jnp.concatenate([zr, c[:, :-1, :, 3]], axis=1)
    odd = c[:, :, :, 2] + jnp.concatenate([c[:, 1:, :, 0], zr], axis=1)
    z = jnp.stack([even, odd], axis=2).reshape(B, 2 * H, W, 4, C)
    zc = jnp.zeros_like(z[:, :, :1, 0])
    even_w = z[:, :, :, 1] + jnp.concatenate([zc, z[:, :, :-1, 3]], axis=2)
    odd_w = z[:, :, :, 2] + jnp.concatenate([z[:, :, 1:, 0], zc], axis=2)
    return jnp.stack([even_w, odd_w], axis=3).reshape(B, 2 * H, 2 * W, C)


# ----------------------------------------------------------------------------
# Parameters: raw PyTorch-layout init + one-time packing (hoisted weight prep).
# ----------------------------------------------------------------------------
def _convT_weight_matrix(W):
    """PyTorch ConvTranspose2d weight (Cin, Cout, K, K) -> (Cin, K*K*Cout),
    columns ordered (kh, kw, co)."""
    Cin, Cout, K, _ = W.shape
    return jnp.transpose(W, (0, 2, 3, 1)).reshape(Cin, K * K * Cout)


def init_params(key):
    ks = jax.random.split(key, 5)
    std = 0.02
    raw = {
        "W1": std * jax.random.normal(ks[0], (101, 512, 4, 4), jnp.float32),
        "W2": std * jax.random.normal(ks[1], (512, 256, 4, 4), jnp.float32),
        "W3": std * jax.random.normal(ks[2], (256, 128, 4, 4), jnp.float32),
        "W4": std * jax.random.normal(ks[3], (128, 64, 4, 4), jnp.float32),
        "W5": std * jax.random.normal(ks[4], (64, 3, 4, 4), jnp.float32),
    }
    for name, c in (("1", 512), ("2", 256), ("3", 128), ("4", 64)):
        raw["g" + name] = jnp.ones((c,), jnp.float32)    # BatchNorm2d weight init
        raw["b" + name] = jnp.zeros((c,), jnp.float32)   # BatchNorm2d bias init
    return raw


def prepare_params(raw):
    """One-time packing, hoisted out of the forward: bf16 (Cin, 16*Cout) matmul
    matrices (W1's K padded 101->128 once), BN gamma/beta as (1, C) rows."""
    p = {}
    w1 = _convT_weight_matrix(raw["W1"]).astype(jnp.bfloat16)       # (101, 8192)
    p["W1m"] = jnp.pad(w1, ((0, 128 - w1.shape[0]), (0, 0)))        # (128, 8192)
    for i in (2, 3, 4, 5):
        p["W%dm" % i] = _convT_weight_matrix(raw["W%d" % i]).astype(jnp.bfloat16)
    for i, c in ((1, 512), (2, 256), (3, 128), (4, 64)):
        p["g%d" % i] = raw["g%d" % i].reshape(1, c).astype(jnp.float32)
        p["b%d" % i] = raw["b%d" % i].reshape(1, c).astype(jnp.float32)
    return p


# ----------------------------------------------------------------------------
# Full forward (matches ACGANGenerator.forward)
# ----------------------------------------------------------------------------
def acgan_generator_forward(noise, params):
    eps = 1e-5
    B = noise.shape[0]
    x = noise.reshape(B, -1).astype(jnp.bfloat16)                 # (B, 101)
    Kp = params["W1m"].shape[0]                                   # 128
    Mp = _rup(B, 16)
    xp = jnp.pad(x, ((0, Mp - B), (0, Kp - x.shape[1])))          # tiny pad only

    # Layer 1: ConvTranspose2d(101, 512, k=4, s=1, p=0) on a 1x1 input == matmul.
    y = pallas_matmul(xp, params["W1m"], out_dtype=jnp.bfloat16)[:B]   # (B, 8192)
    y = y.reshape(B * 16, 512)                                    # NHWC rows
    scale, shift = pallas_bn_scale_shift(y, params["g1"], params["b1"], eps)

    # Layers 2-4: ConvTranspose2d(k=4, s=2, p=1) + BN + ReLU, scatter form.
    # BN apply + ReLU of the *previous* layer runs as this matmul's prologue.
    H = W = 4
    for w_key, g_key, b_key, cout in (("W2m", "g2", "b2", 256),
                                      ("W3m", "g3", "b3", 128),
                                      ("W4m", "g4", "b4", 64)):
        contrib = pallas_matmul(y, params[w_key], scale=scale, shift=shift,
                                out_dtype=jnp.bfloat16)           # (B*H*W, 16*cout)
        yn = _col2im_k4_s2(contrib, B, H, W, cout)                # (B, 2H, 2W, cout)
        H, W = 2 * H, 2 * W
        y = yn.reshape(B * H * W, cout)                           # raw pre-BN, bf16
        scale, shift = pallas_bn_scale_shift(y, params[g_key], params[b_key], eps)

    # Layer 5: ConvTranspose2d(64, 3, k=4, s=2, p=1) + Tanh (BN4+ReLU fused in).
    contrib = pallas_matmul(y, params["W5m"], scale=scale, shift=shift,
                            out_dtype=jnp.float32)                # (B*H*W, 48)
    y5 = _col2im_k4_s2(contrib, B, H, W, 3)                       # (B, 64, 64, 3)
    y5 = jnp.transpose(y5, (0, 3, 1, 2)).reshape(B * 3, (2 * H) * (2 * W))
    out = pallas_tanh(y5)                                         # lane-dense slab
    return out.reshape(B, 3, 2 * H, 2 * W)                        # (B, 3, 64, 64)


if __name__ == "__main__":
    key = jax.random.PRNGKey(0)
    pkey, nkey = jax.random.split(key)
    params = prepare_params(init_params(pkey))                    # one-time prep

    batch = 2
    noise = jax.random.normal(nkey, (batch, 101), jnp.float32)

    fwd = jax.jit(acgan_generator_forward)
    out = jax.block_until_ready(fwd(noise, params))

    assert out.shape == (batch, 3, 64, 64), out.shape
    assert bool(jnp.all(jnp.isfinite(out)))
    assert bool(jnp.all(jnp.abs(out) <= 1.0 + 1e-6))              # tanh range
    print("KERNEL_OK")
</pallas_src>

<mosaic_0001>
module attributes {stable_mosaic.version = 11 : i64} {
  func.func @_matmul_kernel(%arg0: i32, %arg1: i32, %arg2: memref<16x128xbf16, #tpu.memory_space<vmem>>, %arg3: memref<128x512xbf16, #tpu.memory_space<vmem>>, %arg4: memref<16x512xbf16, #tpu.memory_space<vmem>>) attributes {dimension_semantics = [#tpu.dimension_semantics<parallel>, #tpu.dimension_semantics<parallel>], iteration_bounds = array<i64: 1, 16>, scalar_prefetch = 0 : i64, scratch_operands = 0 : i64, tpu.core_type = #tpu.core_type<tc>, window_params = [{transform_indices = @transform_0, window_bounds = array<i64: 16, 128>}, {transform_indices = @transform_1, window_bounds = array<i64: 128, 512>}, {transform_indices = @transform_2, window_bounds = array<i64: 16, 512>}]} {
    %c0 = arith.constant 0 : index
    %c0_0 = arith.constant 0 : index
    %0 = vector.load %arg2[%c0, %c0_0] : memref<16x128xbf16, #tpu.memory_space<vmem>>, vector<16x128xbf16>
    %c0_1 = arith.constant 0 : index
    %c0_2 = arith.constant 0 : index
    %1 = vector.load %arg3[%c0_1, %c0_2] : memref<128x512xbf16, #tpu.memory_space<vmem>>, vector<128x512xbf16>
    %cst = arith.constant dense<0.000000e+00> : vector<16x512xf32>
    %2 = tpu.matmul %0, %1, %cst {dimension_numbers = #tpu.dot_dimension_numbers<[1], [0], [0], [1], [0, 0, 1, 1], [], []>} : vector<16x128xbf16>, vector<128x512xbf16>, vector<16x512xf32> -> vector<16x512xf32>
    %3 = arith.truncf %2 : vector<16x512xf32> to vector<16x512xbf16>
    %c0_3 = arith.constant 0 : index
    %c0_4 = arith.constant 0 : index
    %4 = vector.load %arg4[%c0_3, %c0_4] : memref<16x512xbf16, #tpu.memory_space<vmem>>, vector<16x512xbf16>
    tpu.vector_store %arg4[%c0_3, %c0_4], %3 {strides = array<i32>} : memref<16x512xbf16, #tpu.memory_space<vmem>>, vector<16x512xbf16>,
    return
  }
  func.func @transform_0(%arg0: i32, %arg1: i32) -> (i32, i32) {
    %c0_i32 = arith.constant 0 : i32
    %c0_i32_0 = arith.constant 0 : i32
    return %arg0, %c0_i32 : i32, i32
  }
  func.func @transform_1(%arg0: i32, %arg1: i32) -> (i32, i32) {
    %c0_i32 = arith.constant 0 : i32
    %c0_i32_0 = arith.constant 0 : i32
    return %c0_i32, %arg1 : i32, i32
  }
  func.func @transform_2(%arg0: i32, %arg1: i32) -> (i32, i32) {
    %c0_i32 = arith.constant 0 : i32
    return %arg0, %arg1 : i32, i32
  }
}

module attributes {stable_mosaic.version = 11 : i64} {
  func.func @_bn_stats_kernel(%arg0: i32, %arg1: memref<32x512xbf16, #tpu.memory_space<vmem>>, %arg2: memref<1x512xf32, #tpu.memory_space<vmem>>, %arg3: memref<1x512xf32, #tpu.memory_space<vmem>>, %arg4: memref<1x512xf32, #tpu.memory_space<vmem>>, %arg5: memref<1x512xf32, #tpu.memory_space<vmem>>, %arg6: memref<1x512xf32, #tpu.memory_space<vmem>>, %arg7: memref<1x512xf32, #tpu.memory_space<vmem>>) attributes {dimension_semantics = [#tpu.dimension_semantics<arbitrary>], iteration_bounds = array<i64: 1>, scalar_prefetch = 0 : i64, scratch_operands = 2 : i64, tpu.core_type = #tpu.core_type<tc>, window_params = [{transform_indices = @transform_0, window_bounds = array<i64: 32, 512>}, {pipeline_mode = #tpu.pipeline_mode<synchronous>, transform_indices = @transform_1, window_bounds = array<i64: 1, 512>}, {pipeline_mode = #tpu.pipeline_mode<synchronous>, transform_indices = @transform_2, window_bounds = array<i64: 1, 512>}, {pipeline_mode = #tpu.pipeline_mode<synchronous>, transform_indices = @transform_3, window_bounds = array<i64: 1, 512>}, {pipeline_mode = #tpu.pipeline_mode<synchronous>, transform_indices = @transform_4, window_bounds = array<i64: 1, 512>}]} {
    %c0_i32 = arith.constant 0 : i32
    %0 = arith.cmpi eq, %arg0, %c0_i32 : i32
    %1 = arith.extui %0 : i1 to i32
    %c0_i32_0 = arith.constant 0 : i32
    %2 = arith.cmpi ne, %1, %c0_i32_0 : i32
    scf.if %2 {
      %cst_13 = arith.constant 0.000000e+00 : f32
      %19 = vector.broadcast %cst_13 : f32 to vector<1x512xf32>
      %c0_14 = arith.constant 0 : index
      %c0_15 = arith.constant 0 : index
      %20 = vector.load %arg6[%c0_14, %c0_15] : memref<1x512xf32, #tpu.memory_space<vmem>>, vector<1x512xf32>
      tpu.vector_store %arg6[%c0_14, %c0_15], %19 {strides = array<i32>} : memref<1x512xf32, #tpu.memory_space<vmem>>, vector<1x512xf32>,
      %cst_16 = arith.constant 0.000000e+00 : f32
      %21 = vector.broadcast %cst_16 : f32 to vector<1x512xf32>
      %c0_17 = arith.constant 0 : index
      %c0_18 = arith.constant 0 : index
      %22 = vector.load %arg7[%c0_17, %c0_18] : memref<1x512xf32, #tpu.memory_space<vmem>>, vector<1x512xf32>
      tpu.vector_store %arg7[%c0_17, %c0_18], %21 {strides = array<i32>} : memref<1x512xf32, #tpu.memory_space<vmem>>, vector<1x512xf32>,
    } else {
    }
    %c0 = arith.constant 0 : index
    %c0_1 = arith.constant 0 : index
    %3 = vector.load %arg1[%c0, %c0_1] : memref<32x512xbf16, #tpu.memory_space<vmem>>, vector<32x512xbf16>
    %4 = arith.extf %3 : vector<32x512xbf16> to vector<32x512xf32>
    %c0_2 = arith.constant 0 : index
    %c0_3 = arith.constant 0 : index
    %5 = vector.load %arg6[%c0_2, %c0_3] : memref<1x512xf32, #tpu.memory_space<vmem>>, vector<1x512xf32>
    %cst = arith.constant dense<0.000000e+00> : vector<512xf32>
    %6 = vector.multi_reduction <add>, %4, %cst [0] : vector<32x512xf32> to vector<512xf32>
    %7 = vector.shape_cast %6 : vector<512xf32> to vector<1x512xf32>
    %8 = arith.addf %5, %7 : vector<1x512xf32>
    %c0_4 = arith.constant 0 : index
    %c0_5 = arith.constant 0 : index
    %9 = vector.load %arg6[%c0_4, %c0_5] : memref<1x512xf32, #tpu.memory_space<vmem>>, vector<1x512xf32>
    tpu.vector_store %arg6[%c0_4, %c0_5], %8 {strides = array<i32>} : memref<1x512xf32, #tpu.memory_space<vmem>>, vector<1x512xf32>,
    %c0_6 = arith.constant 0 : index
    %c0_7 = arith.constant 0 : index
    %10 = vector.load %arg7[%c0_6, %c0_7] : memref<1x512xf32, #tpu.memory_space<vmem>>, vector<1x512xf32>
    %11 = arith.mulf %4, %4 : vector<32x512xf32>
    %cst_8 = arith.constant dense<0.000000e+00> : vector<512xf32>
    %12 = vector.multi_reduction <add>, %11, %cst_8 [0] : vector<32x512xf32> to vector<512xf32>
    %13 = vector.shape_cast %12 : vector<512xf32> to vector<1x512xf32>
    %14 = arith.addf %10, %13 : vector<1x512xf32>
    %c0_9 = arith.constant 0 : index
    %c0_10 = arith.constant 0 : index
    %15 = vector.load %arg7[%c0_9, %c0_10] : memref<1x512xf32, #tpu.memory_space<vmem>>, vector<1x512xf32>
    tpu.vector_store %arg7[%c0_9, %c0_10], %14 {strides = array<i32>} : memref<1x512xf32, #tpu.memory_space<vmem>>, vector<1x512xf32>,
    %c0_i32_11 = arith.constant 0 : i32
    %16 = arith.cmpi eq, %arg0, %c0_i32_11 : i32
    %17 = arith.extui %16 : i1 to i32
    %c0_i32_12 = arith.constant 0 : i32
    %18 = arith.cmpi ne, %17, %c0_i32_12 : i32
    scf.if %18 {
      %c0_13 = arith.constant 0 : index
      %c0_14 = arith.constant 0 : index
      %19 = vector.load %arg6[%c0_13, %c0_14] : memref<1x512xf32, #tpu.memory_space<vmem>>, vector<1x512xf32>
      %cst_15 = arith.constant 3.125000e-02 : f32
      %20 = vector.broadcast %cst_15 : f32 to vector<1x512xf32>
      %21 = arith.mulf %19, %20 : vector<1x512xf32>
      %c0_16 = arith.constant 0 : index
      %c0_17 = arith.constant 0 : index
      %22 = vector.load %arg7[%c0_16, %c0_17] : memref<1x512xf32, #tpu.memory_space<vmem>>, vector<1x512xf32>
      %cst_18 = arith.constant 3.125000e-02 : f32
      %23 = vector.broadcast %cst_18 : f32 to vector<1x512xf32>
      %24 = arith.mulf %22, %23 : vector<1x512xf32>
      %25 = arith.mulf %21, %21 : vector<1x512xf32>
      %26 = arith.subf %24, %25 : vector<1x512xf32>
      %cst_19 = arith.constant 0.000000e+00 : f32
      %27 = vector.broadcast %cst_19 : f32 to vector<1x512xf32>
      %28 = arith.maximumf %26, %27 : vector<1x512xf32>
      %c0_20 = arith.constant 0 : index
      %c0_21 = arith.constant 0 : index
      %29 = vector.load %arg2[%c0_20, %c0_21] : memref<1x512xf32, #tpu.memory_space<vmem>>, vector<1x512xf32>
      %cst_22 = arith.constant 9.99999974E-6 : f32
      %30 = vector.broadcast %cst_22 : f32 to vector<1x512xf32>
      %31 = arith.addf %28, %30 : vector<1x512xf32>
      %32 = math.rsqrt %31 : vector<1x512xf32>
      %33 = arith.mulf %29, %32 : vector<1x512xf32>
      %c0_23 = arith.constant 0 : index
      %c0_24 = arith.constant 0 : index
      %34 = vector.load %arg4[%c0_23, %c0_24] : memref<1x512xf32, #tpu.memory_space<vmem>>, vector<1x512xf32>
      tpu.vector_store %arg4[%c0_23, %c0_24], %33 {strides = array<i32>} : memref<1x512xf32, #tpu.memory_space<vmem>>, vector<1x512xf32>,
      %c0_25 = arith.constant 0 : index
      %c0_26 = arith.constant 0 : index
      %35 = vector.load %arg3[%c0_25, %c0_26] : memref<1x512xf32, #tpu.memory_space<vmem>>, vector<1x512xf32>
      %36 = arith.mulf %21, %33 : vector<1x512xf32>
      %37 = arith.subf %35, %36 : vector<1x512xf32>
      %c0_27 = arith.constant 0 : index
      %c0_28 = arith.constant 0 : index
      %38 = vector.load %arg5[%c0_27, %c0_28] : memref<1x512xf32, #tpu.memory_space<vmem>>, vector<1x512xf32>
      tpu.vector_store %arg5[%c0_27, %c0_28], %37 {strides = array<i32>} : memref<1x512xf32, #tpu.memory_space<vmem>>, vector<1x512xf32>,
    } else {
    }
    return
  }
  func.func @transform_0(%arg0: i32) -> (i32, i32) {
    %c0_i32 = arith.constant 0 : i32
    %c0_i32_0 = arith.constant 0 : i32
    return %arg0, %c0_i32 : i32, i32
  }
  func.func @transform_1(%arg0: i32) -> (i32, i32) {
    %c0_i32 = arith.constant 0 : i32
    %c0_i32_0 = arith.constant 0 : i32
    %c0_i32_1 = arith.constant 0 : i32
    return %c0_i32, %c0_i32_0 : i32, i32
  }
  func.func @transform_2(%arg0: i32) -> (i32, i32) {
    %c0_i32 = arith.constant 0 : i32
    %c0_i32_0 = arith.constant 0 : i32
    %c0_i32_1 = arith.constant 0 : i32
    return %c0_i32, %c0_i32_0 : i32, i32
  }
  func.func @transform_3(%arg0: i32) -> (i32, i32) {
    %c0_i32 = arith.constant 0 : i32
    %c0_i32_0 = arith.constant 0 : i32
    %c0_i32_1 = arith.constant 0 : i32
    return %c0_i32, %c0_i32_0 : i32, i32
  }
  func.func @transform_4(%arg0: i32) -> (i32, i32) {
    %c0_i32 = arith.constant 0 : i32
    %c0_i32_0 = arith.constant 0 : i32
    %c0_i32_1 = arith.constant 0 : i32
    return %c0_i32, %c0_i32_0 : i32, i32
  }
}

module attributes {stable_mosaic.version = 11 : i64} {
  func.func @_bn_relu_matmul_kernel(%arg0: i32, %arg1: i32, %arg2: memref<1x512xf32, #tpu.memory_space<vmem>>, %arg3: memref<1x512xf32, #tpu.memory_space<vmem>>, %arg4: memref<32x512xbf16, #tpu.memory_space<vmem>>, %arg5: memref<512x512xbf16, #tpu.memory_space<vmem>>, %arg6: memref<32x512xbf16, #tpu.memory_space<vmem>>) attributes {dimension_semantics = [#tpu.dimension_semantics<parallel>, #tpu.dimension_semantics<parallel>], iteration_bounds = array<i64: 1, 8>, scalar_prefetch = 0 : i64, scratch_operands = 0 : i64, tpu.core_type = #tpu.core_type<tc>, window_params = [{pipeline_mode = #tpu.pipeline_mode<synchronous>, transform_indices = @transform_0, window_bounds = array<i64: 1, 512>}, {pipeline_mode = #tpu.pipeline_mode<synchronous>, transform_indices = @transform_1, window_bounds = array<i64: 1, 512>}, {transform_indices = @transform_2, window_bounds = array<i64: 32, 512>}, {transform_indices = @transform_3, window_bounds = array<i64: 512, 512>}, {transform_indices = @transform_4, window_bounds = array<i64: 32, 512>}]} {
    %c0 = arith.constant 0 : index
    %c0_0 = arith.constant 0 : index
    %0 = vector.load %arg4[%c0, %c0_0] : memref<32x512xbf16, #tpu.memory_space<vmem>>, vector<32x512xbf16>
    %1 = arith.extf %0 : vector<32x512xbf16> to vector<32x512xf32>
    %c0_1 = arith.constant 0 : index
    %c0_2 = arith.constant 0 : index
    %2 = vector.load %arg2[%c0_1, %c0_2] : memref<1x512xf32, #tpu.memory_space<vmem>>, vector<1x512xf32>
    %3 = vector.broadcast %2 : vector<1x512xf32> to vector<32x512xf32>
    %4 = arith.mulf %1, %3 : vector<32x512xf32>
    %c0_3 = arith.constant 0 : index
    %c0_4 = arith.constant 0 : index
    %5 = vector.load %arg3[%c0_3, %c0_4] : memref<1x512xf32, #tpu.memory_space<vmem>>, vector<1x512xf32>
    %6 = vector.broadcast %5 : vector<1x512xf32> to vector<32x512xf32>
    %7 = arith.addf %4, %6 : vector<32x512xf32>
    %cst = arith.constant 0.000000e+00 : f32
    %8 = vector.broadcast %cst : f32 to vector<32x512xf32>
    %9 = arith.maximumf %7, %8 : vector<32x512xf32>
    %10 = arith.truncf %9 : vector<32x512xf32> to vector<32x512xbf16>
    %c0_5 = arith.constant 0 : index
    %c0_6 = arith.constant 0 : index
    %11 = vector.load %arg5[%c0_5, %c0_6] : memref<512x512xbf16, #tpu.memory_space<vmem>>, vector<512x512xbf16>
    %cst_7 = arith.constant dense<0.000000e+00> : vector<32x512xf32>
    %12 = tpu.matmul %10, %11, %cst_7 {dimension_numbers = #tpu.dot_dimension_numbers<[1], [0], [0], [1], [0, 0, 1, 1], [], []>} : vector<32x512xbf16>, vector<512x512xbf16>, vector<32x512xf32> -> vector<32x512xf32>
    %13 = arith.truncf %12 : vector<32x512xf32> to vector<32x512xbf16>
    %c0_8 = arith.constant 0 : index
    %c0_9 = arith.constant 0 : index
    %14 = vector.load %arg6[%c0_8, %c0_9] : memref<32x512xbf16, #tpu.memory_space<vmem>>, vector<32x512xbf16>
    tpu.vector_store %arg6[%c0_8, %c0_9], %13 {strides = array<i32>} : memref<32x512xbf16, #tpu.memory_space<vmem>>, vector<32x512xbf16>,
    return
  }
  func.func @transform_0(%arg0: i32, %arg1: i32) -> (i32, i32) {
    %c0_i32 = arith.constant 0 : i32
    %c0_i32_0 = arith.constant 0 : i32
    %c0_i32_1 = arith.constant 0 : i32
    return %c0_i32, %c0_i32_0 : i32, i32
  }
  func.func @transform_1(%arg0: i32, %arg1: i32) -> (i32, i32) {
    %c0_i32 = arith.constant 0 : i32
    %c0_i32_0 = arith.constant 0 : i32
    %c0_i32_1 = arith.constant 0 : i32
    return %c0_i32, %c0_i32_0 : i32, i32
  }
  func.func @transform_2(%arg0: i32, %arg1: i32) -> (i32, i32) {
    %c0_i32 = arith.constant 0 : i32
    %c0_i32_0 = arith.constant 0 : i32
    return %arg0, %c0_i32 : i32, i32
  }
  func.func @transform_3(%arg0: i32, %arg1: i32) -> (i32, i32) {
    %c0_i32 = arith.constant 0 : i32
    %c0_i32_0 = arith.constant 0 : i32
    return %c0_i32, %arg1 : i32, i32
  }
  func.func @transform_4(%arg0: i32, %arg1: i32) -> (i32, i32) {
    %c0_i32 = arith.constant 0 : i32
    return %arg0, %arg1 : i32, i32
  }
}

module attributes {stable_mosaic.version = 11 : i64} {
  func.func @_bn_stats_kernel(%arg0: i32, %arg1: memref<128x256xbf16, #tpu.memory_space<vmem>>, %arg2: memref<1x256xf32, #tpu.memory_space<vmem>>, %arg3: memref<1x256xf32, #tpu.memory_space<vmem>>, %arg4: memref<1x256xf32, #tpu.memory_space<vmem>>, %arg5: memref<1x256xf32, #tpu.memory_space<vmem>>, %arg6: memref<1x256xf32, #tpu.memory_space<vmem>>, %arg7: memref<1x256xf32, #tpu.memory_space<vmem>>) attributes {dimension_semantics = [#tpu.dimension_semantics<arbitrary>], iteration_bounds = array<i64: 1>, scalar_prefetch = 0 : i64, scratch_operands = 2 : i64, tpu.core_type = #tpu.core_type<tc>, window_params = [{transform_indices = @transform_0, window_bounds = array<i64: 128, 256>}, {pipeline_mode = #tpu.pipeline_mode<synchronous>, transform_indices = @transform_1, window_bounds = array<i64: 1, 256>}, {pipeline_mode = #tpu.pipeline_mode<synchronous>, transform_indices = @transform_2, window_bounds = array<i64: 1, 256>}, {pipeline_mode = #tpu.pipeline_mode<synchronous>, transform_indices = @transform_3, window_bounds = array<i64: 1, 256>}, {pipeline_mode = #tpu.pipeline_mode<synchronous>, transform_indices = @transform_4, window_bounds = array<i64: 1, 256>}]} {
    %c0_i32 = arith.constant 0 : i32
    %0 = arith.cmpi eq, %arg0, %c0_i32 : i32
    %1 = arith.extui %0 : i1 to i32
    %c0_i32_0 = arith.constant 0 : i32
    %2 = arith.cmpi ne, %1, %c0_i32_0 : i32
    scf.if %2 {
      %cst_13 = arith.constant 0.000000e+00 : f32
      %19 = vector.broadcast %cst_13 : f32 to vector<1x256xf32>
      %c0_14 = arith.constant 0 : index
      %c0_15 = arith.constant 0 : index
      %20 = vector.load %arg6[%c0_14, %c0_15] : memref<1x256xf32, #tpu.memory_space<vmem>>, vector<1x256xf32>
      tpu.vector_store %arg6[%c0_14, %c0_15], %19 {strides = array<i32>} : memref<1x256xf32, #tpu.memory_space<vmem>>, vector<1x256xf32>,
      %cst_16 = arith.constant 0.000000e+00 : f32
      %21 = vector.broadcast %cst_16 : f32 to vector<1x256xf32>
      %c0_17 = arith.constant 0 : index
      %c0_18 = arith.constant 0 : index
      %22 = vector.load %arg7[%c0_17, %c0_18] : memref<1x256xf32, #tpu.memory_space<vmem>>, vector<1x256xf32>
      tpu.vector_store %arg7[%c0_17, %c0_18], %21 {strides = array<i32>} : memref<1x256xf32, #tpu.memory_space<vmem>>, vector<1x256xf32>,
    } else {
    }
    %c0 = arith.constant 0 : index
    %c0_1 = arith.constant 0 : index
    %3 = vector.load %arg1[%c0, %c0_1] : memref<128x256xbf16, #tpu.memory_space<vmem>>, vector<128x256xbf16>
    %4 = arith.extf %3 : vector<128x256xbf16> to vector<128x256xf32>
    %c0_2 = arith.constant 0 : index
    %c0_3 = arith.constant 0 : index
    %5 = vector.load %arg6[%c0_2, %c0_3] : memref<1x256xf32, #tpu.memory_space<vmem>>, vector<1x256xf32>
    %cst = arith.constant dense<0.000000e+00> : vector<256xf32>
    %6 = vector.multi_reduction <add>, %4, %cst [0] : vector<128x256xf32> to vector<256xf32>
    %7 = vector.shape_cast %6 : vector<256xf32> to vector<1x256xf32>
    %8 = arith.addf %5, %7 : vector<1x256xf32>
    %c0_4 = arith.constant 0 : index
    %c0_5 = arith.constant 0 : index
    %9 = vector.load %arg6[%c0_4, %c0_5] : memref<1x256xf32, #tpu.memory_space<vmem>>, vector<1x256xf32>
    tpu.vector_store %arg6[%c0_4, %c0_5], %8 {strides = array<i32>} : memref<1x256xf32, #tpu.memory_space<vmem>>, vector<1x256xf32>,
    %c0_6 = arith.constant 0 : index
    %c0_7 = arith.constant 0 : index
    %10 = vector.load %arg7[%c0_6, %c0_7] : memref<1x256xf32, #tpu.memory_space<vmem>>, vector<1x256xf32>
    %11 = arith.mulf %4, %4 : vector<128x256xf32>
    %cst_8 = arith.constant dense<0.000000e+00> : vector<256xf32>
    %12 = vector.multi_reduction <add>, %11, %cst_8 [0] : vector<128x256xf32> to vector<256xf32>
    %13 = vector.shape_cast %12 : vector<256xf32> to vector<1x256xf32>
    %14 = arith.addf %10, %13 : vector<1x256xf32>
    %c0_9 = arith.constant 0 : index
    %c0_10 = arith.constant 0 : index
    %15 = vector.load %arg7[%c0_9, %c0_10] : memref<1x256xf32, #tpu.memory_space<vmem>>, vector<1x256xf32>
    tpu.vector_store %arg7[%c0_9, %c0_10], %14 {strides = array<i32>} : memref<1x256xf32, #tpu.memory_space<vmem>>, vector<1x256xf32>,
    %c0_i32_11 = arith.constant 0 : i32
    %16 = arith.cmpi eq, %arg0, %c0_i32_11 : i32
    %17 = arith.extui %16 : i1 to i32
    %c0_i32_12 = arith.constant 0 : i32
    %18 = arith.cmpi ne, %17, %c0_i32_12 : i32
    scf.if %18 {
      %c0_13 = arith.constant 0 : index
      %c0_14 = arith.constant 0 : index
      %19 = vector.load %arg6[%c0_13, %c0_14] : memref<1x256xf32, #tpu.memory_space<vmem>>, vector<1x256xf32>
      %cst_15 = arith.constant 7.812500e-03 : f32
      %20 = vector.broadcast %cst_15 : f32 to vector<1x256xf32>
      %21 = arith.mulf %19, %20 : vector<1x256xf32>
      %c0_16 = arith.constant 0 : index
      %c0_17 = arith.constant 0 : index
      %22 = vector.load %arg7[%c0_16, %c0_17] : memref<1x256xf32, #tpu.memory_space<vmem>>, vector<1x256xf32>
      %cst_18 = arith.constant 7.812500e-03 : f32
      %23 = vector.broadcast %cst_18 : f32 to vector<1x256xf32>
      %24 = arith.mulf %22, %23 : vector<1x256xf32>
      %25 = arith.mulf %21, %21 : vector<1x256xf32>
      %26 = arith.subf %24, %25 : vector<1x256xf32>
      %cst_19 = arith.constant 0.000000e+00 : f32
      %27 = vector.broadcast %cst_19 : f32 to vector<1x256xf32>
      %28 = arith.maximumf %26, %27 : vector<1x256xf32>
      %c0_20 = arith.constant 0 : index
      %c0_21 = arith.constant 0 : index
      %29 = vector.load %arg2[%c0_20, %c0_21] : memref<1x256xf32, #tpu.memory_space<vmem>>, vector<1x256xf32>
      %cst_22 = arith.constant 9.99999974E-6 : f32
      %30 = vector.broadcast %cst_22 : f32 to vector<1x256xf32>
      %31 = arith.addf %28, %30 : vector<1x256xf32>
      %32 = math.rsqrt %31 : vector<1x256xf32>
      %33 = arith.mulf %29, %32 : vector<1x256xf32>
      %c0_23 = arith.constant 0 : index
      %c0_24 = arith.constant 0 : index
      %34 = vector.load %arg4[%c0_23, %c0_24] : memref<1x256xf32, #tpu.memory_space<vmem>>, vector<1x256xf32>
      tpu.vector_store %arg4[%c0_23, %c0_24], %33 {strides = array<i32>} : memref<1x256xf32, #tpu.memory_space<vmem>>, vector<1x256xf32>,
      %c0_25 = arith.constant 0 : index
      %c0_26 = arith.constant 0 : index
      %35 = vector.load %arg3[%c0_25, %c0_26] : memref<1x256xf32, #tpu.memory_space<vmem>>, vector<1x256xf32>
      %36 = arith.mulf %21, %33 : vector<1x256xf32>
      %37 = arith.subf %35, %36 : vector<1x256xf32>
      %c0_27 = arith.constant 0 : index
      %c0_28 = arith.constant 0 : index
      %38 = vector.load %arg5[%c0_27, %c0_28] : memref<1x256xf32, #tpu.memory_space<vmem>>, vector<1x256xf32>
      tpu.vector_store %arg5[%c0_27, %c0_28], %37 {strides = array<i32>} : memref<1x256xf32, #tpu.memory_space<vmem>>, vector<1x256xf32>,
    } else {
    }
    return
  }
  func.func @transform_0(%arg0: i32) -> (i32, i32) {
    %c0_i32 = arith.constant 0 : i32
    %c0_i32_0 = arith.constant 0 : i32
    return %arg0, %c0_i32 : i32, i32
  }
  func.func @transform_1(%arg0: i32) -> (i32, i32) {
    %c0_i32 = arith.constant 0 : i32
    %c0_i32_0 = arith.constant 0 : i32
    %c0_i32_1 = arith.constant 0 : i32
    return %c0_i32, %c0_i32_0 : i32, i32
  }
  func.func @transform_2(%arg0: i32) -> (i32, i32) {
    %c0_i32 = arith.constant 0 : i32
    %c0_i32_0 = arith.constant 0 : i32
    %c0_i32_1 = arith.constant 0 : i32
    return %c0_i32, %c0_i32_0 : i32, i32
  }
  func.func @transform_3(%arg0: i32) -> (i32, i32) {
    %c0_i32 = arith.constant 0 : i32
    %c0_i32_0 = arith.constant 0 : i32
    %c0_i32_1 = arith.constant 0 : i32
    return %c0_i32, %c0_i32_0 : i32, i32
  }
  func.func @transform_4(%arg0: i32) -> (i32, i32) {
    %c0_i32 = arith.constant 0 : i32
    %c0_i32_0 = arith.constant 0 : i32
    %c0_i32_1 = arith.constant 0 : i32
    return %c0_i32, %c0_i32_0 : i32, i32
  }
}

module attributes {stable_mosaic.version = 11 : i64} {
  func.func @_bn_relu_matmul_kernel(%arg0: i32, %arg1: i32, %arg2: memref<1x256xf32, #tpu.memory_space<vmem>>, %arg3: memref<1x256xf32, #tpu.memory_space<vmem>>, %arg4: memref<128x256xbf16, #tpu.memory_space<vmem>>, %arg5: memref<256x512xbf16, #tpu.memory_space<vmem>>, %arg6: memref<128x512xbf16, #tpu.memory_space<vmem>>) attributes {dimension_semantics = [#tpu.dimension_semantics<parallel>, #tpu.dimension_semantics<parallel>], iteration_bounds = array<i64: 1, 4>, scalar_prefetch = 0 : i64, scratch_operands = 0 : i64, tpu.core_type = #tpu.core_type<tc>, window_params = [{pipeline_mode = #tpu.pipeline_mode<synchronous>, transform_indices = @transform_0, window_bounds = array<i64: 1, 256>}, {pipeline_mode = #tpu.pipeline_mode<synchronous>, transform_indices = @transform_1, window_bounds = array<i64: 1, 256>}, {transform_indices = @transform_2, window_bounds = array<i64: 128, 256>}, {transform_indices = @transform_3, window_bounds = array<i64: 256, 512>}, {transform_indices = @transform_4, window_bounds = array<i64: 128, 512>}]} {
    %c0 = arith.constant 0 : index
    %c0_0 = arith.constant 0 : index
    %0 = vector.load %arg4[%c0, %c0_0] : memref<128x256xbf16, #tpu.memory_space<vmem>>, vector<128x256xbf16>
    %1 = arith.extf %0 : vector<128x256xbf16> to vector<128x256xf32>
    %c0_1 = arith.constant 0 : index
    %c0_2 = arith.constant 0 : index
    %2 = vector.load %arg2[%c0_1, %c0_2] : memref<1x256xf32, #tpu.memory_space<vmem>>, vector<1x256xf32>
    %3 = vector.broadcast %2 : vector<1x256xf32> to vector<128x256xf32>
    %4 = arith.mulf %1, %3 : vector<128x256xf32>
    %c0_3 = arith.constant 0 : index
    %c0_4 = arith.constant 0 : index
    %5 = vector.load %arg3[%c0_3, %c0_4] : memref<1x256xf32, #tpu.memory_space<vmem>>, vector<1x256xf32>
    %6 = vector.broadcast %5 : vector<1x256xf32> to vector<128x256xf32>
    %7 = arith.addf %4, %6 : vector<128x256xf32>
    %cst = arith.constant 0.000000e+00 : f32
    %8 = vector.broadcast %cst : f32 to vector<128x256xf32>
    %9 = arith.maximumf %7, %8 : vector<128x256xf32>
    %10 = arith.truncf %9 : vector<128x256xf32> to vector<128x256xbf16>
    %c0_5 = arith.constant 0 : index
    %c0_6 = arith.constant 0 : index
    %11 = vector.load %arg5[%c0_5, %c0_6] : memref<256x512xbf16, #tpu.memory_space<vmem>>, vector<256x512xbf16>
    %cst_7 = arith.constant dense<0.000000e+00> : vector<128x512xf32>
    %12 = tpu.matmul %10, %11, %cst_7 {dimension_numbers = #tpu.dot_dimension_numbers<[1], [0], [0], [1], [0, 0, 1, 1], [], []>} : vector<128x256xbf16>, vector<256x512xbf16>, vector<128x512xf32> -> vector<128x512xf32>
    %13 = arith.truncf %12 : vector<128x512xf32> to vector<128x512xbf16>
    %c0_8 = arith.constant 0 : index
    %c0_9 = arith.constant 0 : index
    %14 = vector.load %arg6[%c0_8, %c0_9] : memref<128x512xbf16, #tpu.memory_space<vmem>>, vector<128x512xbf16>
    tpu.vector_store %arg6[%c0_8, %c0_9], %13 {strides = array<i32>} : memref<128x512xbf16, #tpu.memory_space<vmem>>, vector<128x512xbf16>,
    return
  }
  func.func @transform_0(%arg0: i32, %arg1: i32) -> (i32, i32) {
    %c0_i32 = arith.constant 0 : i32
    %c0_i32_0 = arith.constant 0 : i32
    %c0_i32_1 = arith.constant 0 : i32
    return %c0_i32, %c0_i32_0 : i32, i32
  }
  func.func @transform_1(%arg0: i32, %arg1: i32) -> (i32, i32) {
    %c0_i32 = arith.constant 0 : i32
    %c0_i32_0 = arith.constant 0 : i32
    %c0_i32_1 = arith.constant 0 : i32
    return %c0_i32, %c0_i32_0 : i32, i32
  }
  func.func @transform_2(%arg0: i32, %arg1: i32) -> (i32, i32) {
    %c0_i32 = arith.constant 0 : i32
    %c0_i32_0 = arith.constant 0 : i32
    return %arg0, %c0_i32 : i32, i32
  }
  func.func @transform_3(%arg0: i32, %arg1: i32) -> (i32, i32) {
    %c0_i32 = arith.constant 0 : i32
    %c0_i32_0 = arith.constant 0 : i32
    return %c0_i32, %arg1 : i32, i32
  }
  func.func @transform_4(%arg0: i32, %arg1: i32) -> (i32, i32) {
    %c0_i32 = arith.constant 0 : i32
    return %arg0, %arg1 : i32, i32
  }
}

module attributes {stable_mosaic.version = 11 : i64} {
  func.func @_bn_stats_kernel(%arg0: i32, %arg1: memref<512x128xbf16, #tpu.memory_space<vmem>>, %arg2: memref<1x128xf32, #tpu.memory_space<vmem>>, %arg3: memref<1x128xf32, #tpu.memory_space<vmem>>, %arg4: memref<1x128xf32, #tpu.memory_space<vmem>>, %arg5: memref<1x128xf32, #tpu.memory_space<vmem>>, %arg6: memref<1x128xf32, #tpu.memory_space<vmem>>, %arg7: memref<1x128xf32, #tpu.memory_space<vmem>>) attributes {dimension_semantics = [#tpu.dimension_semantics<arbitrary>], iteration_bounds = array<i64: 1>, scalar_prefetch = 0 : i64, scratch_operands = 2 : i64, tpu.core_type = #tpu.core_type<tc>, window_params = [{transform_indices = @transform_0, window_bounds = array<i64: 512, 128>}, {pipeline_mode = #tpu.pipeline_mode<synchronous>, transform_indices = @transform_1, window_bounds = array<i64: 1, 128>}, {pipeline_mode = #tpu.pipeline_mode<synchronous>, transform_indices = @transform_2, window_bounds = array<i64: 1, 128>}, {pipeline_mode = #tpu.pipeline_mode<synchronous>, transform_indices = @transform_3, window_bounds = array<i64: 1, 128>}, {pipeline_mode = #tpu.pipeline_mode<synchronous>, transform_indices = @transform_4, window_bounds = array<i64: 1, 128>}]} {
    %c0_i32 = arith.constant 0 : i32
    %0 = arith.cmpi eq, %arg0, %c0_i32 : i32
    %1 = arith.extui %0 : i1 to i32
    %c0_i32_0 = arith.constant 0 : i32
    %2 = arith.cmpi ne, %1, %c0_i32_0 : i32
    scf.if %2 {
      %cst_13 = arith.constant 0.000000e+00 : f32
      %19 = vector.broadcast %cst_13 : f32 to vector<1x128xf32>
      %c0_14 = arith.constant 0 : index
      %c0_15 = arith.constant 0 : index
      %20 = vector.load %arg6[%c0_14, %c0_15] : memref<1x128xf32, #tpu.memory_space<vmem>>, vector<1x128xf32>
      tpu.vector_store %arg6[%c0_14, %c0_15], %19 {strides = array<i32>} : memref<1x128xf32, #tpu.memory_space<vmem>>, vector<1x128xf32>,
      %cst_16 = arith.constant 0.000000e+00 : f32
      %21 = vector.broadcast %cst_16 : f32 to vector<1x128xf32>
      %c0_17 = arith.constant 0 : index
      %c0_18 = arith.constant 0 : index
      %22 = vector.load %arg7[%c0_17, %c0_18] : memref<1x128xf32, #tpu.memory_space<vmem>>, vector<1x128xf32>
      tpu.vector_store %arg7[%c0_17, %c0_18], %21 {strides = array<i32>} : memref<1x128xf32, #tpu.memory_space<vmem>>, vector<1x128xf32>,
    } else {
    }
    %c0 = arith.constant 0 : index
    %c0_1 = arith.constant 0 : index
    %3 = vector.load %arg1[%c0, %c0_1] : memref<512x128xbf16, #tpu.memory_space<vmem>>, vector<512x128xbf16>
    %4 = arith.extf %3 : vector<512x128xbf16> to vector<512x128xf32>
    %c0_2 = arith.constant 0 : index
    %c0_3 = arith.constant 0 : index
    %5 = vector.load %arg6[%c0_2, %c0_3] : memref<1x128xf32, #tpu.memory_space<vmem>>, vector<1x128xf32>
    %cst = arith.constant dense<0.000000e+00> : vector<128xf32>
    %6 = vector.multi_reduction <add>, %4, %cst [0] : vector<512x128xf32> to vector<128xf32>
    %7 = vector.shape_cast %6 : vector<128xf32> to vector<1x128xf32>
    %8 = arith.addf %5, %7 : vector<1x128xf32>
    %c0_4 = arith.constant 0 : index
    %c0_5 = arith.constant 0 : index
    %9 = vector.load %arg6[%c0_4, %c0_5] : memref<1x128xf32, #tpu.memory_space<vmem>>, vector<1x128xf32>
    tpu.vector_store %arg6[%c0_4, %c0_5], %8 {strides = array<i32>} : memref<1x128xf32, #tpu.memory_space<vmem>>, vector<1x128xf32>,
    %c0_6 = arith.constant 0 : index
    %c0_7 = arith.constant 0 : index
    %10 = vector.load %arg7[%c0_6, %c0_7] : memref<1x128xf32, #tpu.memory_space<vmem>>, vector<1x128xf32>
    %11 = arith.mulf %4, %4 : vector<512x128xf32>
    %cst_8 = arith.constant dense<0.000000e+00> : vector<128xf32>
    %12 = vector.multi_reduction <add>, %11, %cst_8 [0] : vector<512x128xf32> to vector<128xf32>
    %13 = vector.shape_cast %12 : vector<128xf32> to vector<1x128xf32>
    %14 = arith.addf %10, %13 : vector<1x128xf32>
    %c0_9 = arith.constant 0 : index
    %c0_10 = arith.constant 0 : index
    %15 = vector.load %arg7[%c0_9, %c0_10] : memref<1x128xf32, #tpu.memory_space<vmem>>, vector<1x128xf32>
    tpu.vector_store %arg7[%c0_9, %c0_10], %14 {strides = array<i32>} : memref<1x128xf32, #tpu.memory_space<vmem>>, vector<1x128xf32>,
    %c0_i32_11 = arith.constant 0 : i32
    %16 = arith.cmpi eq, %arg0, %c0_i32_11 : i32
    %17 = arith.extui %16 : i1 to i32
    %c0_i32_12 = arith.constant 0 : i32
    %18 = arith.cmpi ne, %17, %c0_i32_12 : i32
    scf.if %18 {
      %c0_13 = arith.constant 0 : index
      %c0_14 = arith.constant 0 : index
      %19 = vector.load %arg6[%c0_13, %c0_14] : memref<1x128xf32, #tpu.memory_space<vmem>>, vector<1x128xf32>
      %cst_15 = arith.constant 0.001953125 : f32
      %20 = vector.broadcast %cst_15 : f32 to vector<1x128xf32>
      %21 = arith.mulf %19, %20 : vector<1x128xf32>
      %c0_16 = arith.constant 0 : index
      %c0_17 = arith.constant 0 : index
      %22 = vector.load %arg7[%c0_16, %c0_17] : memref<1x128xf32, #tpu.memory_space<vmem>>, vector<1x128xf32>
      %cst_18 = arith.constant 0.001953125 : f32
      %23 = vector.broadcast %cst_18 : f32 to vector<1x128xf32>
      %24 = arith.mulf %22, %23 : vector<1x128xf32>
      %25 = arith.mulf %21, %21 : vector<1x128xf32>
      %26 = arith.subf %24, %25 : vector<1x128xf32>
      %cst_19 = arith.constant 0.000000e+00 : f32
      %27 = vector.broadcast %cst_19 : f32 to vector<1x128xf32>
      %28 = arith.maximumf %26, %27 : vector<1x128xf32>
      %c0_20 = arith.constant 0 : index
      %c0_21 = arith.constant 0 : index
      %29 = vector.load %arg2[%c0_20, %c0_21] : memref<1x128xf32, #tpu.memory_space<vmem>>, vector<1x128xf32>
      %cst_22 = arith.constant 9.99999974E-6 : f32
      %30 = vector.broadcast %cst_22 : f32 to vector<1x128xf32>
      %31 = arith.addf %28, %30 : vector<1x128xf32>
      %32 = math.rsqrt %31 : vector<1x128xf32>
      %33 = arith.mulf %29, %32 : vector<1x128xf32>
      %c0_23 = arith.constant 0 : index
      %c0_24 = arith.constant 0 : index
      %34 = vector.load %arg4[%c0_23, %c0_24] : memref<1x128xf32, #tpu.memory_space<vmem>>, vector<1x128xf32>
      tpu.vector_store %arg4[%c0_23, %c0_24], %33 {strides = array<i32>} : memref<1x128xf32, #tpu.memory_space<vmem>>, vector<1x128xf32>,
      %c0_25 = arith.constant 0 : index
      %c0_26 = arith.constant 0 : index
      %35 = vector.load %arg3[%c0_25, %c0_26] : memref<1x128xf32, #tpu.memory_space<vmem>>, vector<1x128xf32>
      %36 = arith.mulf %21, %33 : vector<1x128xf32>
      %37 = arith.subf %35, %36 : vector<1x128xf32>
      %c0_27 = arith.constant 0 : index
      %c0_28 = arith.constant 0 : index
      %38 = vector.load %arg5[%c0_27, %c0_28] : memref<1x128xf32, #tpu.memory_space<vmem>>, vector<1x128xf32>
      tpu.vector_store %arg5[%c0_27, %c0_28], %37 {strides = array<i32>} : memref<1x128xf32, #tpu.memory_space<vmem>>, vector<1x128xf32>,
    } else {
    }
    return
  }
  func.func @transform_0(%arg0: i32) -> (i32, i32) {
    %c0_i32 = arith.constant 0 : i32
    %c0_i32_0 = arith.constant 0 : i32
    return %arg0, %c0_i32 : i32, i32
  }
  func.func @transform_1(%arg0: i32) -> (i32, i32) {
    %c0_i32 = arith.constant 0 : i32
    %c0_i32_0 = arith.constant 0 : i32
    %c0_i32_1 = arith.constant 0 : i32
    return %c0_i32, %c0_i32_0 : i32, i32
  }
  func.func @transform_2(%arg0: i32) -> (i32, i32) {
    %c0_i32 = arith.constant 0 : i32
    %c0_i32_0 = arith.constant 0 : i32
    %c0_i32_1 = arith.constant 0 : i32
    return %c0_i32, %c0_i32_0 : i32, i32
  }
  func.func @transform_3(%arg0: i32) -> (i32, i32) {
    %c0_i32 = arith.constant 0 : i32
    %c0_i32_0 = arith.constant 0 : i32
    %c0_i32_1 = arith.constant 0 : i32
    return %c0_i32, %c0_i32_0 : i32, i32
  }
  func.func @transform_4(%arg0: i32) -> (i32, i32) {
    %c0_i32 = arith.constant 0 : i32
    %c0_i32_0 = arith.constant 0 : i32
    %c0_i32_1 = arith.constant 0 : i32
    return %c0_i32, %c0_i32_0 : i32, i32
  }
}

module attributes {stable_mosaic.version = 11 : i64} {
  func.func @_bn_relu_matmul_kernel(%arg0: i32, %arg1: i32, %arg2: memref<1x128xf32, #tpu.memory_space<vmem>>, %arg3: memref<1x128xf32, #tpu.memory_space<vmem>>, %arg4: memref<512x128xbf16, #tpu.memory_space<vmem>>, %arg5: memref<128x512xbf16, #tpu.memory_space<vmem>>, %arg6: memref<512x512xbf16, #tpu.memory_space<vmem>>) attributes {dimension_semantics = [#tpu.dimension_semantics<parallel>, #tpu.dimension_semantics<parallel>], iteration_bounds = array<i64: 1, 2>, scalar_prefetch = 0 : i64, scratch_operands = 0 : i64, tpu.core_type = #tpu.core_type<tc>, window_params = [{pipeline_mode = #tpu.pipeline_mode<synchronous>, transform_indices = @transform_0, window_bounds = array<i64: 1, 128>}, {pipeline_mode = #tpu.pipeline_mode<synchronous>, transform_indices = @transform_1, window_bounds = array<i64: 1, 128>}, {transform_indices = @transform_2, window_bounds = array<i64: 512, 128>}, {transform_indices = @transform_3, window_bounds = array<i64: 128, 512>}, {transform_indices = @transform_4, window_bounds = array<i64: 512, 512>}]} {
    %c0 = arith.constant 0 : index
    %c0_0 = arith.constant 0 : index
    %0 = vector.load %arg4[%c0, %c0_0] : memref<512x128xbf16, #tpu.memory_space<vmem>>, vector<512x128xbf16>
    %1 = arith.extf %0 : vector<512x128xbf16> to vector<512x128xf32>
    %c0_1 = arith.constant 0 : index
    %c0_2 = arith.constant 0 : index
    %2 = vector.load %arg2[%c0_1, %c0_2] : memref<1x128xf32, #tpu.memory_space<vmem>>, vector<1x128xf32>
    %3 = vector.broadcast %2 : vector<1x128xf32> to vector<512x128xf32>
    %4 = arith.mulf %1, %3 : vector<512x128xf32>
    %c0_3 = arith.constant 0 : index
    %c0_4 = arith.constant 0 : index
    %5 = vector.load %arg3[%c0_3, %c0_4] : memref<1x128xf32, #tpu.memory_space<vmem>>, vector<1x128xf32>
    %6 = vector.broadcast %5 : vector<1x128xf32> to vector<512x128xf32>
    %7 = arith.addf %4, %6 : vector<512x128xf32>
    %cst = arith.constant 0.000000e+00 : f32
    %8 = vector.broadcast %cst : f32 to vector<512x128xf32>
    %9 = arith.maximumf %7, %8 : vector<512x128xf32>
    %10 = arith.truncf %9 : vector<512x128xf32> to vector<512x128xbf16>
    %c0_5 = arith.constant 0 : index
    %c0_6 = arith.constant 0 : index
    %11 = vector.load %arg5[%c0_5, %c0_6] : memref<128x512xbf16, #tpu.memory_space<vmem>>, vector<128x512xbf16>
    %cst_7 = arith.constant dense<0.000000e+00> : vector<512x512xf32>
    %12 = tpu.matmul %10, %11, %cst_7 {dimension_numbers = #tpu.dot_dimension_numbers<[1], [0], [0], [1], [0, 0, 1, 1], [], []>} : vector<512x128xbf16>, vector<128x512xbf16>, vector<512x512xf32> -> vector<512x512xf32>
    %13 = arith.truncf %12 : vector<512x512xf32> to vector<512x512xbf16>
    %c0_8 = arith.constant 0 : index
    %c0_9 = arith.constant 0 : index
    %14 = vector.load %arg6[%c0_8, %c0_9] : memref<512x512xbf16, #tpu.memory_space<vmem>>, vector<512x512xbf16>
    tpu.vector_store %arg6[%c0_8, %c0_9], %13 {strides = array<i32>} : memref<512x512xbf16, #tpu.memory_space<vmem>>, vector<512x512xbf16>,
    return
  }
  func.func @transform_0(%arg0: i32, %arg1: i32) -> (i32, i32) {
    %c0_i32 = arith.constant 0 : i32
    %c0_i32_0 = arith.constant 0 : i32
    %c0_i32_1 = arith.constant 0 : i32
    return %c0_i32, %c0_i32_0 : i32, i32
  }
  func.func @transform_1(%arg0: i32, %arg1: i32) -> (i32, i32) {
    %c0_i32 = arith.constant 0 : i32
    %c0_i32_0 = arith.constant 0 : i32
    %c0_i32_1 = arith.constant 0 : i32
    return %c0_i32, %c0_i32_0 : i32, i32
  }
  func.func @transform_2(%arg0: i32, %arg1: i32) -> (i32, i32) {
    %c0_i32 = arith.constant 0 : i32
    %c0_i32_0 = arith.constant 0 : i32
    return %arg0, %c0_i32 : i32, i32
  }
  func.func @transform_3(%arg0: i32, %arg1: i32) -> (i32, i32) {
    %c0_i32 = arith.constant 0 : i32
    %c0_i32_0 = arith.constant 0 : i32
    return %c0_i32, %arg1 : i32, i32
  }
  func.func @transform_4(%arg0: i32, %arg1: i32) -> (i32, i32) {
    %c0_i32 = arith.constant 0 : i32
    return %arg0, %arg1 : i32, i32
  }
}

module attributes {stable_mosaic.version = 11 : i64} {
  func.func @_bn_stats_kernel(%arg0: i32, %arg1: memref<1024x64xbf16, #tpu.memory_space<vmem>>, %arg2: memref<1x64xf32, #tpu.memory_space<vmem>>, %arg3: memref<1x64xf32, #tpu.memory_space<vmem>>, %arg4: memref<1x64xf32, #tpu.memory_space<vmem>>, %arg5: memref<1x64xf32, #tpu.memory_space<vmem>>, %arg6: memref<1x64xf32, #tpu.memory_space<vmem>>, %arg7: memref<1x64xf32, #tpu.memory_space<vmem>>) attributes {dimension_semantics = [#tpu.dimension_semantics<arbitrary>], iteration_bounds = array<i64: 2>, scalar_prefetch = 0 : i64, scratch_operands = 2 : i64, tpu.core_type = #tpu.core_type<tc>, window_params = [{transform_indices = @transform_0, window_bounds = array<i64: 1024, 64>}, {pipeline_mode = #tpu.pipeline_mode<synchronous>, transform_indices = @transform_1, window_bounds = array<i64: 1, 64>}, {pipeline_mode = #tpu.pipeline_mode<synchronous>, transform_indices = @transform_2, window_bounds = array<i64: 1, 64>}, {pipeline_mode = #tpu.pipeline_mode<synchronous>, transform_indices = @transform_3, window_bounds = array<i64: 1, 64>}, {pipeline_mode = #tpu.pipeline_mode<synchronous>, transform_indices = @transform_4, window_bounds = array<i64: 1, 64>}]} {
    %c0_i32 = arith.constant 0 : i32
    %0 = arith.cmpi eq, %arg0, %c0_i32 : i32
    %1 = arith.extui %0 : i1 to i32
    %c0_i32_0 = arith.constant 0 : i32
    %2 = arith.cmpi ne, %1, %c0_i32_0 : i32
    scf.if %2 {
      %cst_12 = arith.constant 0.000000e+00 : f32
      %19 = vector.broadcast %cst_12 : f32 to vector<1x64xf32>
      %c0_13 = arith.constant 0 : index
      %c0_14 = arith.constant 0 : index
      %20 = vector.load %arg6[%c0_13, %c0_14] : memref<1x64xf32, #tpu.memory_space<vmem>>, vector<1x64xf32>
      tpu.vector_store %arg6[%c0_13, %c0_14], %19 {strides = array<i32>} : memref<1x64xf32, #tpu.memory_space<vmem>>, vector<1x64xf32>,
      %cst_15 = arith.constant 0.000000e+00 : f32
      %21 = vector.broadcast %cst_15 : f32 to vector<1x64xf32>
      %c0_16 = arith.constant 0 : index
      %c0_17 = arith.constant 0 : index
      %22 = vector.load %arg7[%c0_16, %c0_17] : memref<1x64xf32, #tpu.memory_space<vmem>>, vector<1x64xf32>
      tpu.vector_store %arg7[%c0_16, %c0_17], %21 {strides = array<i32>} : memref<1x64xf32, #tpu.memory_space<vmem>>, vector<1x64xf32>,
    } else {
    }
    %c0 = arith.constant 0 : index
    %c0_1 = arith.constant 0 : index
    %3 = vector.load %arg1[%c0, %c0_1] : memref<1024x64xbf16, #tpu.memory_space<vmem>>, vector<1024x64xbf16>
    %4 = arith.extf %3 : vector<1024x64xbf16> to vector<1024x64xf32>
    %c0_2 = arith.constant 0 : index
    %c0_3 = arith.constant 0 : index
    %5 = vector.load %arg6[%c0_2, %c0_3] : memref<1x64xf32, #tpu.memory_space<vmem>>, vector<1x64xf32>
    %cst = arith.constant dense<0.000000e+00> : vector<64xf32>
    %6 = vector.multi_reduction <add>, %4, %cst [0] : vector<1024x64xf32> to vector<64xf32>
    %7 = vector.shape_cast %6 : vector<64xf32> to vector<1x64xf32>
    %8 = arith.addf %5, %7 : vector<1x64xf32>
    %c0_4 = arith.constant 0 : index
    %c0_5 = arith.constant 0 : index
    %9 = vector.load %arg6[%c0_4, %c0_5] : memref<1x64xf32, #tpu.memory_space<vmem>>, vector<1x64xf32>
    tpu.vector_store %arg6[%c0_4, %c0_5], %8 {strides = array<i32>} : memref<1x64xf32, #tpu.memory_space<vmem>>, vector<1x64xf32>,
    %c0_6 = arith.constant 0 : index
    %c0_7 = arith.constant 0 : index
    %10 = vector.load %arg7[%c0_6, %c0_7] : memref<1x64xf32, #tpu.memory_space<vmem>>, vector<1x64xf32>
    %11 = arith.mulf %4, %4 : vector<1024x64xf32>
    %cst_8 = arith.constant dense<0.000000e+00> : vector<64xf32>
    %12 = vector.multi_reduction <add>, %11, %cst_8 [0] : vector<1024x64xf32> to vector<64xf32>
    %13 = vector.shape_cast %12 : vector<64xf32> to vector<1x64xf32>
    %14 = arith.addf %10, %13 : vector<1x64xf32>
    %c0_9 = arith.constant 0 : index
    %c0_10 = arith.constant 0 : index
    %15 = vector.load %arg7[%c0_9, %c0_10] : memref<1x64xf32, #tpu.memory_space<vmem>>, vector<1x64xf32>
    tpu.vector_store %arg7[%c0_9, %c0_10], %14 {strides = array<i32>} : memref<1x64xf32, #tpu.memory_space<vmem>>, vector<1x64xf32>,
    %c1_i32 = arith.constant 1 : i32
    %16 = arith.cmpi eq, %arg0, %c1_i32 : i32
    %17 = arith.extui %16 : i1 to i32
    %c0_i32_11 = arith.constant 0 : i32
    %18 = arith.cmpi ne, %17, %c0_i32_11 : i32
    scf.if %18 {
      %c0_12 = arith.constant 0 : index
      %c0_13 = arith.constant 0 : index
      %19 = vector.load %arg6[%c0_12, %c0_13] : memref<1x64xf32, #tpu.memory_space<vmem>>, vector<1x64xf32>
      %cst_14 = arith.constant 4.8828125E-4 : f32
      %20 = vector.broadcast %cst_14 : f32 to vector<1x64xf32>
      %21 = arith.mulf %19, %20 : vector<1x64xf32>
      %c0_15 = arith.constant 0 : index
      %c0_16 = arith.constant 0 : index
      %22 = vector.load %arg7[%c0_15, %c0_16] : memref<1x64xf32, #tpu.memory_space<vmem>>, vector<1x64xf32>
      %cst_17 = arith.constant 4.8828125E-4 : f32
      %23 = vector.broadcast %cst_17 : f32 to vector<1x64xf32>
      %24 = arith.mulf %22, %23 : vector<1x64xf32>
      %25 = arith.mulf %21, %21 : vector<1x64xf32>
      %26 = arith.subf %24, %25 : vector<1x64xf32>
      %cst_18 = arith.constant 0.000000e+00 : f32
      %27 = vector.broadcast %cst_18 : f32 to vector<1x64xf32>
      %28 = arith.maximumf %26, %27 : vector<1x64xf32>
      %c0_19 = arith.constant 0 : index
      %c0_20 = arith.constant 0 : index
      %29 = vector.load %arg2[%c0_19, %c0_20] : memref<1x64xf32, #tpu.memory_space<vmem>>, vector<1x64xf32>
      %cst_21 = arith.constant 9.99999974E-6 : f32
      %30 = vector.broadcast %cst_21 : f32 to vector<1x64xf32>
      %31 = arith.addf %28, %30 : vector<1x64xf32>
      %32 = math.rsqrt %31 : vector<1x64xf32>
      %33 = arith.mulf %29, %32 : vector<1x64xf32>
      %c0_22 = arith.constant 0 : index
      %c0_23 = arith.constant 0 : index
      %34 = vector.load %arg4[%c0_22, %c0_23] : memref<1x64xf32, #tpu.memory_space<vmem>>, vector<1x64xf32>
      tpu.vector_store %arg4[%c0_22, %c0_23], %33 {strides = array<i32>} : memref<1x64xf32, #tpu.memory_space<vmem>>, vector<1x64xf32>,
      %c0_24 = arith.constant 0 : index
      %c0_25 = arith.constant 0 : index
      %35 = vector.load %arg3[%c0_24, %c0_25] : memref<1x64xf32, #tpu.memory_space<vmem>>, vector<1x64xf32>
      %36 = arith.mulf %21, %33 : vector<1x64xf32>
      %37 = arith.subf %35, %36 : vector<1x64xf32>
      %c0_26 = arith.constant 0 : index
      %c0_27 = arith.constant 0 : index
      %38 = vector.load %arg5[%c0_26, %c0_27] : memref<1x64xf32, #tpu.memory_space<vmem>>, vector<1x64xf32>
      tpu.vector_store %arg5[%c0_26, %c0_27], %37 {strides = array<i32>} : memref<1x64xf32, #tpu.memory_space<vmem>>, vector<1x64xf32>,
    } else {
    }
    return
  }
  func.func @transform_0(%arg0: i32) -> (i32, i32) {
    %c0_i32 = arith.constant 0 : i32
    %c0_i32_0 = arith.constant 0 : i32
    return %arg0, %c0_i32 : i32, i32
  }
  func.func @transform_1(%arg0: i32) -> (i32, i32) {
    %c0_i32 = arith.constant 0 : i32
    %c0_i32_0 = arith.constant 0 : i32
    %c0_i32_1 = arith.constant 0 : i32
    return %c0_i32, %c0_i32_0 : i32, i32
  }
  func.func @transform_2(%arg0: i32) -> (i32, i32) {
    %c0_i32 = arith.constant 0 : i32
    %c0_i32_0 = arith.constant 0 : i32
    %c0_i32_1 = arith.constant 0 : i32
    return %c0_i32, %c0_i32_0 : i32, i32
  }
  func.func @transform_3(%arg0: i32) -> (i32, i32) {
    %c0_i32 = arith.constant 0 : i32
    %c0_i32_0 = arith.constant 0 : i32
    %c0_i32_1 = arith.constant 0 : i32
    return %c0_i32, %c0_i32_0 : i32, i32
  }
  func.func @transform_4(%arg0: i32) -> (i32, i32) {
    %c0_i32 = arith.constant 0 : i32
    %c0_i32_0 = arith.constant 0 : i32
    %c0_i32_1 = arith.constant 0 : i32
    return %c0_i32, %c0_i32_0 : i32, i32
  }
}

module attributes {stable_mosaic.version = 11 : i64} {
  func.func @_bn_relu_matmul_kernel(%arg0: i32, %arg1: i32, %arg2: memref<1x64xf32, #tpu.memory_space<vmem>>, %arg3: memref<1x64xf32, #tpu.memory_space<vmem>>, %arg4: memref<512x64xbf16, #tpu.memory_space<vmem>>, %arg5: memref<64x48xbf16, #tpu.memory_space<vmem>>, %arg6: memref<512x48xf32, #tpu.memory_space<vmem>>) attributes {dimension_semantics = [#tpu.dimension_semantics<parallel>, #tpu.dimension_semantics<parallel>], iteration_bounds = array<i64: 4, 1>, scalar_prefetch = 0 : i64, scratch_operands = 0 : i64, tpu.core_type = #tpu.core_type<tc>, window_params = [{pipeline_mode = #tpu.pipeline_mode<synchronous>, transform_indices = @transform_0, window_bounds = array<i64: 1, 64>}, {pipeline_mode = #tpu.pipeline_mode<synchronous>, transform_indices = @transform_1, window_bounds = array<i64: 1, 64>}, {transform_indices = @transform_2, window_bounds = array<i64: 512, 64>}, {transform_indices = @transform_3, window_bounds = array<i64: 64, 48>}, {transform_indices = @transform_4, window_bounds = array<i64: 512, 48>}]} {
    %c0 = arith.constant 0 : index
    %c0_0 = arith.constant 0 : index
    %0 = vector.load %arg4[%c0, %c0_0] : memref<512x64xbf16, #tpu.memory_space<vmem>>, vector<512x64xbf16>
    %1 = arith.extf %0 : vector<512x64xbf16> to vector<512x64xf32>
    %c0_1 = arith.constant 0 : index
    %c0_2 = arith.constant 0 : index
    %2 = vector.load %arg2[%c0_1, %c0_2] : memref<1x64xf32, #tpu.memory_space<vmem>>, vector<1x64xf32>
    %3 = vector.broadcast %2 : vector<1x64xf32> to vector<512x64xf32>
    %4 = arith.mulf %1, %3 : vector<512x64xf32>
    %c0_3 = arith.constant 0 : index
    %c0_4 = arith.constant 0 : index
    %5 = vector.load %arg3[%c0_3, %c0_4] : memref<1x64xf32, #tpu.memory_space<vmem>>, vector<1x64xf32>
    %6 = vector.broadcast %5 : vector<1x64xf32> to vector<512x64xf32>
    %7 = arith.addf %4, %6 : vector<512x64xf32>
    %cst = arith.constant 0.000000e+00 : f32
    %8 = vector.broadcast %cst : f32 to vector<512x64xf32>
    %9 = arith.maximumf %7, %8 : vector<512x64xf32>
    %10 = arith.truncf %9 : vector<512x64xf32> to vector<512x64xbf16>
    %c0_5 = arith.constant 0 : index
    %c0_6 = arith.constant 0 : index
    %11 = vector.load %arg5[%c0_5, %c0_6] : memref<64x48xbf16, #tpu.memory_space<vmem>>, vector<64x48xbf16>
    %cst_7 = arith.constant dense<0.000000e+00> : vector<512x48xf32>
    %12 = tpu.matmul %10, %11, %cst_7 {dimension_numbers = #tpu.dot_dimension_numbers<[1], [0], [0], [1], [0, 0, 1, 1], [], []>} : vector<512x64xbf16>, vector<64x48xbf16>, vector<512x48xf32> -> vector<512x48xf32>
    %c0_8 = arith.constant 0 : index
    %c0_9 = arith.constant 0 : index
    %13 = vector.load %arg6[%c0_8, %c0_9] : memref<512x48xf32, #tpu.memory_space<vmem>>, vector<512x48xf32>
    tpu.vector_store %arg6[%c0_8, %c0_9], %12 {strides = array<i32>} : memref<512x48xf32, #tpu.memory_space<vmem>>, vector<512x48xf32>,
    return
  }
  func.func @transform_0(%arg0: i32, %arg1: i32) -> (i32, i32) {
    %c0_i32 = arith.constant 0 : i32
    %c0_i32_0 = arith.constant 0 : i32
    %c0_i32_1 = arith.constant 0 : i32
    return %c0_i32, %c0_i32_0 : i32, i32
  }
  func.func @transform_1(%arg0: i32, %arg1: i32) -> (i32, i32) {
    %c0_i32 = arith.constant 0 : i32
    %c0_i32_0 = arith.constant 0 : i32
    %c0_i32_1 = arith.constant 0 : i32
    return %c0_i32, %c0_i32_0 : i32, i32
  }
  func.func @transform_2(%arg0: i32, %arg1: i32) -> (i32, i32) {
    %c0_i32 = arith.constant 0 : i32
    %c0_i32_0 = arith.constant 0 : i32
    return %arg0, %c0_i32 : i32, i32
  }
  func.func @transform_3(%arg0: i32, %arg1: i32) -> (i32, i32) {
    %c0_i32 = arith.constant 0 : i32
    %c0_i32_0 = arith.constant 0 : i32
    return %c0_i32, %arg1 : i32, i32
  }
  func.func @transform_4(%arg0: i32, %arg1: i32) -> (i32, i32) {
    %c0_i32 = arith.constant 0 : i32
    return %arg0, %arg1 : i32, i32
  }
}

module attributes {stable_mosaic.version = 11 : i64} {
  func.func @_tanh_kernel(%arg0: i32, %arg1: memref<6x4096xf32, #tpu.memory_space<vmem>>, %arg2: memref<6x4096xf32, #tpu.memory_space<vmem>>) attributes {dimension_semantics = [#tpu.dimension_semantics<parallel>], iteration_bounds = array<i64: 1>, scalar_prefetch = 0 : i64, scratch_operands = 0 : i64, tpu.core_type = #tpu.core_type<tc>, window_params = [{transform_indices = @transform_0, window_bounds = array<i64: 6, 4096>}, {transform_indices = @transform_1, window_bounds = array<i64: 6, 4096>}]} {
    %c0 = arith.constant 0 : index
    %c0_0 = arith.constant 0 : index
    %0 = vector.load %arg1[%c0, %c0_0] : memref<6x4096xf32, #tpu.memory_space<vmem>>, vector<6x4096xf32>
    %1 = math.tanh %0 : vector<6x4096xf32>
    %c0_1 = arith.constant 0 : index
    %c0_2 = arith.constant 0 : index
    %2 = vector.load %arg2[%c0_1, %c0_2] : memref<6x4096xf32, #tpu.memory_space<vmem>>, vector<6x4096xf32>
    tpu.vector_store %arg2[%c0_1, %c0_2], %1 {strides = array<i32>} : memref<6x4096xf32, #tpu.memory_space<vmem>>, vector<6x4096xf32>,
    return
  }
  func.func @transform_0(%arg0: i32) -> (i32, i32) {
    %c0_i32 = arith.constant 0 : i32
    %c0_i32_0 = arith.constant 0 : i32
    return %arg0, %c0_i32 : i32, i32
  }
  func.func @transform_1(%arg0: i32) -> (i32, i32) {
    %c0_i32 = arith.constant 0 : i32
    %c0_i32_0 = arith.constant 0 : i32
    return %arg0, %c0_i32 : i32, i32
  }
}

</mosaic_0001>

<bundles_post_ra>
// kernel: acgan_generator_forward.10
= control target key start
LH: loop header
LB: loop body
LE: loop exit
PB: predicated region body
PF: predicated region fallthrough
CT: control target
= control target key end

     0   :  { %7 = vsyncpa [#allocation3], 0  ;;  %s1048_s0 = inlined_call_operand.vmem [shape: bf16[16,128], index: 0, kind: input, shape index: {}]   ;;  %s1049_s1 = inlined_call_operand.hbm [shape: bf16[128,8192], index: 1, kind: input, shape index: {}]   ;;  %s1050_s2 = inlined_call_operand.vmem [shape: bf16[16,8192], index: 2, kind: output, shape index: {}]  }
   0x1   :  { %9 = vsyncpa [#allocation3 + $0x1], 0  ;;  %s903_s9 = smov 0   ;;  %s905_s10 = smov 0  }
   0x2   :  { %s907_s11 = smov 0   ;;  %s909_s12 = smov 0  }
   0x3   :  { %s911_s13 = smov 0   ;;  %s913_s14 = smov 0  }
   0x4 LB: > { %s636_s15 = sadd.s32 4294967295, %s881_s14   ;;  %s24_s16 = sadd.s32 1, %s877_s13  ;;  %s881_s14 = sphi %s913_s14, %s15_s14   ;;  %s877_s13 = sphi %s911_s13, %s1059_s13   ;;  %s873_s12 = sphi %s909_s12, %s1058_s12   ;;  %s869_s11 = sphi %s907_s11, %s1057_s11   ;;  %s865_s10 = sphi %s905_s10, %s1056_s10   ;;  %s861_s9 = sphi %s903_s9, %s1055_s9  }
   0x5   : > { %p25_p0 = scmp.ge.s32.totalorder %s24_s16, 16  ;;  %s60_s17 = sadd.s32 1, %s869_s11 }
   0x6   : > { %p67_p1 = scmp.ne.s32.totalorder %s869_s11, %s865_s10  ;;  %p68_p2 = scmp.eq.s32.totalorder %s881_s14, 0 }
   0x7   : > { %s1061_s16 = smov (%p25_p0, %s24_s16), 0  ;;  %p73_p4 = scmp.ne.s32.totalorder %s865_s10, %s861_s9 }
   0x8   : > { %p939_p3 = por %p68_p2, %p67_p1  ;;  %s57_s19 = ssub.s32 %s877_s13, %s1061_s16 }
   0x9   : > { %p74_p5 = scmp.eq.s32.totalorder %s636_s15, 0  ;;  %p58_p6 = scmp.eq.s32.totalorder %s57_s19, 0 }
   0xa   : > { %p99_p7 = scmp.eq.s32.totalorder %s636_s15, 15  ;;  %p701_p10 = scmp.lt.s32.totalorder %s881_s14, 16 }
   0xb   : > { %p946_p8 = por %p74_p5, %p73_p4  ;;  %s134_s23 = sand.u32 1, %s869_s11  }
   0xc   : > { %s951_s21 = scalar_select %p58_p6, %s869_s11, %s60_s17  }
   0xd   : > { %p953_p9 = por %p99_p7, %p67_p1  ;;  %s689_s24 = sshll.u32 %s877_s13, 8 }
   0xe   : > { %s641_s25 = sshll.u32 %s134_s23, 8  ;;  %s144_s28 = scalar_lea.hbm %s1049_s1, %s689_s24 }
   0xf   : > { %s138_s29 = scalar_lea.vmem [#allocation2], %s641_s25  ;;  %p965_p11 = pnand %p701_p10, %p939_p3 }
  0x10   : > { %s145_s30 = sshll.u32 %s138_s29, 4  ;;  %p644_p12 = scmp.ge.s32.totalorder %s881_s14, 1  ;;  %s146_s30 = int_to_ptr.vmem [resolvable:$true] %s145_s30 }
  0x11   : > { %s135_s4 = scalar_lea.sflag [#allocation3], %s134_s23  ;;  %p805_p13 = pneg %p965_p11 }
  0x12   : > { %s816_s5 = scalar_lea.vmem %s146_s30, 4096  ;;  %s883_s6 = smov [#allocation2]  }
  0x13   : > { %p817_p0 = scmp.ne.s32.totalorder %s146_s30, %s816_s5  ;;  %s821_s7 = sshll.u32 %s883_s6, 4  ;;  %s822_s7 = int_to_ptr.vmem [resolvable:$false] %s821_s7 }
  0x14   : > { %s823_s8 = scalar_lea.vmem %s822_s7, 8192  ;;  %p824_p4 = scmp.lt.s32.totalorder %s146_s30, %s822_s7 }
  0x15   : > { %p819_p1 = pnand %p817_p0, %p805_p13  ;;  %p825_p5 = scmp.lt.s32.totalorder %s823_s8, %s816_s5 }
  0x17   : > { %p820_p2 = pneg %p819_p1  ;;  %p826_p3 = por %p825_p5, %p824_p4 }
  0x19   : > { %p827_p6 = pnand %p826_p3, %p820_p2 }
  0x1b   : > { %830 = shalt.err (!%p827_p6)
}
  0x1c   : > { %s884_s9 = smov 4096   ;;  %s885_s15 = smov 256  }
  0x1d   : > { %s886_s17 = smov 16   ;;  %p153_p7 = scmp.lt.s32.totalorder %s881_s14, 17 }
  0x1e   : > { %700 = dma.hbm_to_vmem [thread:$0]  (!%p965_p11), %s144_s28, 4096, %s146_s30, %s135_s4, %s884_s9, %s885_s15, %s886_s17  }
  0x1f   : > { %p154_p10 = pnand %p644_p12, %p153_p7 }
  0x20   : > { %s978_s18 = sand.u32 (!%p154_p10), 1, %s865_s10  }
  0x21   : > { %157 = sbr.rel (%p154_p10) target bundleno = 283 (0x11b), region = 28  ;;  %s645_s19 = sshll.u32 (!%p154_p10), %s978_s18, 8 }
  0x22   : > { %s160_s23 = scalar_lea.sflag (!%p154_p10), [#allocation3], %s978_s18  ;;  %s982_s24 = scalar_lea.vmem (!%p154_p10), [#allocation2], %s645_s19 }
  0x26   : > { %856 = dma.done.wait (%p946_p8), %s160_s23, 4096  }
  0x27   : > { %858 = vsyncadd (%p946_p8), %s160_s23, 4294963200  ;;  %v887_v0 = vmov 0   ;;  %v754_v1 = vld [vmem:[%s982_s24 + $0xe4] ss:$16 sps:$4 sm:$0xff]   ;;  %v756_v2 = vld [vmem:[%s982_s24 + $0xec] ss:$16 sps:$4 sm:$0xff]  }
  0x28   : > { %430 = vmatprep.mubr.bf16.mxu0 %v887_v0  ;;  %473 = vmatprep.mubr.bf16.mxu1 %v887_v0  ;;  %v758_v3 = vld [vmem:[%s982_s24 + $0xe0] ss:$16 sps:$4 sm:$0xff]   ;;  %v759_v4 = vld [vmem:[%s982_s24 + $0xe8] ss:$16 sps:$4 sm:$0xff]   ;;  %v760_v5 = vld [vmem:[%s982_s24 + $0xc4] ss:$16 sps:$4 sm:$0xff]  }
  0x29   : > { %398 = vmatprep.subr.bf16.mxu0 %v754_v1  ;;  %441 = vmatprep.subr.bf16.mxu1 %v756_v2  ;;  %v762_v6 = vld [vmem:[%s982_s24 + $0xcc] ss:$16 sps:$4 sm:$0xff]   ;;  %v764_v7 = vld [vmem:[%s982_s24 + $0xc0] ss:$16 sps:$4 sm:$0xff]   ;;  %v765_v8 = vld [vmem:[%s982_s24 + $0xc8] ss:$16 sps:$4 sm:$0xff]  }
  0x2a   : > { %399 = vmatpush1.bf16.msra.mxu0 %v758_v3  ;;  %442 = vmatpush1.bf16.msra.mxu1 %v759_v4  ;;  %v766_v9 = vld [vmem:[%s982_s24 + $0xa4] ss:$16 sps:$4 sm:$0xff]   ;;  %v768_v10 = vld [vmem:[%s982_s24 + $0xac] ss:$16 sps:$4 sm:$0xff]   ;;  %v770_v11 = vld [vmem:[%s982_s24 + $0xa0] ss:$16 sps:$4 sm:$0xff]  }
  0x2b   : > { %400 = vmatprep.subr.bf16.mxu0 %v760_v5  ;;  %443 = vmatprep.subr.bf16.mxu1 %v762_v6  ;;  %v771_v12 = vld [vmem:[%s982_s24 + $0xa8] ss:$16 sps:$4 sm:$0xff]   ;;  %v772_v13 = vld [vmem:[%s982_s24 + $0x84] ss:$16 sps:$4 sm:$0xff]   ;;  %v774_v14 = vld [vmem:[%s982_s24 + $0x8c] ss:$16 sps:$4 sm:$0xff]  }
  0x2c   : > { %v776_v15 = vld [vmem:[%s982_s24 + $0x80] ss:$16 sps:$4 sm:$0xff]   ;;  %v777_v16 = vld [vmem:[%s982_s24 + $0x88] ss:$16 sps:$4 sm:$0xff]   ;;  %v778_v17 = vld [vmem:[%s982_s24 + $0x64] ss:$16 sps:$4 sm:$0xff]  }
  0x2d   : > { %v780_v18 = vld [vmem:[%s982_s24 + $0x6c] ss:$16 sps:$4 sm:$0xff]   ;;  %v782_v19 = vld [vmem:[%s982_s24 + $0x60] ss:$16 sps:$4 sm:$0xff]   ;;  %v783_v20 = vld [vmem:[%s982_s24 + $0x68] ss:$16 sps:$4 sm:$0xff]  }
  0x2e   : > { %401 = vmatpush1.bf16.msra.mxu0 %v764_v7  ;;  %444 = vmatpush1.bf16.msra.mxu1 %v765_v8  ;;  %v784_v21 = vld [vmem:[%s982_s24 + $0x44] ss:$16 sps:$4 sm:$0xff]   ;;  %v786_v22 = vld [vmem:[%s982_s24 + $0x4c] ss:$16 sps:$4 sm:$0xff]   ;;  %v788_v23 = vld [vmem:[%s982_s24 + $0x40] ss:$16 sps:$4 sm:$0xff]  }
  0x2f   : > { %402 = vmatprep.subr.bf16.mxu0 %v766_v9  ;;  %445 = vmatprep.subr.bf16.mxu1 %v768_v10  ;;  %v789_v24 = vld [vmem:[%s982_s24 + $0x48] ss:$16 sps:$4 sm:$0xff]   ;;  %v790_v25 = vld [vmem:[%s982_s24 + $0x24] ss:$16 sps:$4 sm:$0xff]   ;;  %v792_v26 = vld [vmem:[%s982_s24 + $0x2c] ss:$16 sps:$4 sm:$0xff]  }
  0x30   : > { %v794_v27 = vld [vmem:[%s982_s24 + $0x20] ss:$16 sps:$4 sm:$0xff]   ;;  %v795_v28 = vld [vmem:[%s982_s24 + $0x28] ss:$16 sps:$4 sm:$0xff]   ;;  %v796_v29 = vld [vmem:[%s982_s24 + $0x4] ss:$16 sps:$4 sm:$0xff]  }
  0x31   : > { %v798_v30 = vld [vmem:[%s982_s24 + $0xc] ss:$16 sps:$4 sm:$0xff]   ;;  %v800_v31 = vld [vmem:[%s982_s24] ss:$16 sps:$4 sm:$0xff]   ;;  %v801_v32 = vld [vmem:[%s982_s24 + $0x8] ss:$16 sps:$4 sm:$0xff]  }
  0x32   : > { %403 = vmatpush1.bf16.msra.mxu0 %v770_v11  ;;  %446 = vmatpush1.bf16.msra.mxu1 %v771_v12  ;;  %v802_v33 = vld [vmem:[%s1048_s0] sm:$0xff]   ;;  %s646_s26 = sshll.u32 %s978_s18, 5  ;;  %s694_s28 = sshll.u32 (%p953_p9), %s873_s12, 4 }
  0x33   : > { %404 = vmatprep.subr.bf16.mxu0 %v772_v13  ;;  %447 = vmatprep.subr.bf16.mxu1 %v774_v14  ;;  %s187_s27 = scalar_lea.vmem [#allocation4], %s646_s26  ;;  %s524_s3 = scalar_lea.vmem (%p953_p9), %s1050_s2, %s694_s28 }
  0x36   : > { %405 = vmatpush1.bf16.msra.mxu0 %v776_v15  ;;  %448 = vmatpush1.bf16.msra.mxu1 %v777_v16 }
  0x37   : > { %406 = vmatprep.subr.bf16.mxu0 %v778_v17  ;;  %449 = vmatprep.subr.bf16.mxu1 %v780_v18 }
  0x3a   : > { %407 = vmatpush1.bf16.msra.mxu0 %v782_v19  ;;  %450 = vmatpush1.bf16.msra.mxu1 %v783_v20 }
  0x3b   : > { %408 = vmatprep.subr.bf16.mxu0 %v784_v21  ;;  %451 = vmatprep.subr.bf16.mxu1 %v786_v22 }
  0x3e   : > { %409 = vmatpush1.bf16.msra.mxu0 %v788_v23  ;;  %452 = vmatpush1.bf16.msra.mxu1 %v789_v24 }
  0x3f   : > { %410 = vmatprep.subr.bf16.mxu0 %v790_v25  ;;  %453 = vmatprep.subr.bf16.mxu1 %v792_v26 }
  0x42   : > { %411 = vmatpush1.bf16.msra.mxu0 %v794_v27  ;;  %454 = vmatpush1.bf16.msra.mxu1 %v795_v28 }
  0x43   : > { %412 = vmatprep.subr.bf16.mxu0 %v796_v29  ;;  %455 = vmatprep.subr.bf16.mxu1 %v798_v30 }
  0x46   : > { %413 = vmatpush1.bf16.msra.mxu0 %v800_v31  ;;  %456 = vmatpush1.bf16.msra.mxu1 %v801_v32 }
  0x49   : > { %431 = vmatmul.mubr.bf16.vlgmr.msra.gmra.mxu0 %v802_v33  ;;  %474 = vmatmul.mubr.bf16.vlgmr.msra.gmra.mxu1 %v802_v33 }
 0x109   : > { %v432_v34 = vpop.f32.mrf.mxu0  ;;  %v475_v35 = vpop.f32.mrf.mxu1 }
 0x10b   : > { %v434_v36 = vpop.f32.mrf.mxu0  ;;  %v477_v37 = vpop.f32.mrf.mxu1 }
 0x10c   : > { %v690_v38 = vpack.c.bf16 %v434_v36, %v432_v34  ;;  %v691_v39 = vpack.c.bf16 %v477_v37, %v475_v35 }
 0x10d   : > { %v436_v40 = vpop.f32.mrf.mxu0  ;;  %v479_v41 = vpop.f32.mrf.mxu1 }
 0x10e   : > { %508 = vst [vmem:[%s187_s27] sm:$0xff] %v690_v38  ;;  %509 = vst [vmem:[%s187_s27 + $0x8] sm:$0xff] %v691_v39  ;;  %518 = sbr.rel (!%p953_p9) target bundleno = 283 (0x11b), region = 36 }
 0x10f   : > { %v438_v42 = vpop.f32.mrf.mxu0  ;;  %v481_v43 = vpop.f32.mrf.mxu1 }
 0x110   : > { %v692_v44 = vpack.c.bf16 %v438_v42, %v436_v40  ;;  %v693_v45 = vpack.c.bf16 %v481_v43, %v479_v41 }
 0x112   : > { %510 = vst [vmem:[%s187_s27 + $0x10] sm:$0xff] %v692_v44  ;;  %511 = vst [vmem:[%s187_s27 + $0x18] sm:$0xff] %v693_v45 }
 0x115   : > { %v537_v46 = vld [vmem:[%s187_s27] sm:$0xff]  ;;  %v539_v47 = vld [vmem:[%s187_s27 + $0x8] sm:$0xff] }
 0x116   : > { %538 = vst [vmem:[%s524_s3] sm:$0xff] %v537_v46  ;;  %540 = vst [vmem:[%s524_s3 + $0x8] sm:$0xff] %v539_v47 }
 0x119   : > { %v541_v48 = vld [vmem:[%s187_s27 + $0x10] sm:$0xff]  ;;  %v543_v49 = vld [vmem:[%s187_s27 + $0x18] sm:$0xff] }
 0x11a   : > { %542 = vst [vmem:[%s524_s3 + $0x100] sm:$0xff] %v541_v48  ;;  %544 = vst [vmem:[%s524_s3 + $0x108] sm:$0xff] %v543_v49 }
 0x11b PF: > { %s15_s14 = sadd.s32 1, %s881_s14   ;;  %s1055_s9 = smov %s865_s10 }
 0x11c   : > { %p12_p8 = scmp.ge.s32.totalorder %s15_s14, 18   ;;  %s1056_s10 = smov %s869_s11 }
 0x11d   : > { %s1057_s11 = smov %s951_s21  ;;  %s1058_s12 = smov %s877_s13 }
 0x11e   : > { %s1059_s13 = smov %s1061_s16  ;;  %14 = sbr.rel (!%p12_p8) target bundleno = 4 (0x4), region = 94 }
 0x123   :  { %560 = vsyncpa [#allocation3], 1 }
 0x124   :  { %562 = vsyncpa [#allocation3 + $0x1], 1 }

// kernel: acgan_generator_forward.11
= control target key start
LH: loop header
LB: loop body
LE: loop exit
PB: predicated region body
PF: predicated region fallthrough
CT: control target
= control target key end

     0   :  { %v20_v0 = vlaneseq  ;;  %v277_v1 = vmov 1966171168   ;;  %v278_v13 = vmov 0.0   ;;  %s369_s0 = inlined_call_operand.vmem [shape: bf16[32,512], index: 0, kind: input, shape index: {}]   ;;  %s370_s1 = inlined_call_operand.vmem [shape: f32[1,512], index: 1, kind: input, shape index: {}]   ;;  %s371_s2 = inlined_call_operand.vmem [shape: f32[1,512], index: 2, kind: input, shape index: {}]   ;;  %s372_s3 = inlined_call_operand.vmem [shape: f32[1,512], index: 3, kind: output, shape index: {0}]   ;;  %s373_s4 = inlined_call_operand.vmem [shape: f32[1,512], index: 4, kind: output, shape index: {1}]  }
   0x1   :  { %v94_v2 = vunpack.c.l.s4 %v277_v1  ;;  %v26_v3 = vld [vmem:[%s369_s0] sm:$0xff]  ;;  %v27_v4 = vld [vmem:[%s369_s0 + $0x8] sm:$0xff]  ;;  %v28_v5 = vld [vmem:[%s369_s0 + $0x10] sm:$0xff] }
   0x2   :  { %vm314_vm0 = vcmp.lt.s32.totalorder %v20_v0, 512  ;;  %v318_v7 = vshrl.u32 %v20_v0, 7  ;;  %v29_v8 = vld [vmem:[%s369_s0 + $0x18] sm:$0xff]  ;;  %v30_v9 = vld [vmem:[%s369_s0 + $0x20] sm:$0xff]  ;;  %v31_v10 = vld [vmem:[%s369_s0 + $0x28] sm:$0xff]  ;;  %v34_v11 = vunpack.c.l.bf16 %v26_v3  ;;  %v35_v12 = vunpack.c.h.bf16 %v26_v3 }
   0x3   :  { %24 = vst.msk [vmem:[#allocation2] sm:$0xf] %vm314_vm0, %v278_v13  ;;  %v95_v14 = vunpack.c.0.s8 %v94_v2  ;;  %25 = vst.msk [vmem:[#allocation3] sm:$0xf] %vm314_vm0, %v278_v13  ;;  %v32_v15 = vld [vmem:[%s369_s0 + $0x30] sm:$0xff]  ;;  %v33_v16 = vld [vmem:[%s369_s0 + $0x38] sm:$0xff]  ;;  %v36_v17 = vunpack.c.l.bf16 %v27_v4  ;;  %v37_v18 = vunpack.c.h.bf16 %v27_v4  ;;  %v38_v19 = vunpack.c.l.bf16 %v28_v5 }
   0x4   :  { %v39_v20 = vunpack.c.h.bf16 %v28_v5  ;;  %v40_v21 = vunpack.c.l.bf16 %v29_v8  ;;  %v41_v22 = vunpack.c.h.bf16 %v29_v8  ;;  %v42_v23 = vunpack.c.l.bf16 %v30_v9 }
   0x5   :  { %v340_v24 = vsub.s32 %v95_v14, %v318_v7  ;;  %v43_v25 = vunpack.c.h.bf16 %v30_v9  ;;  %v44_v26 = vunpack.c.l.bf16 %v31_v10  ;;  %v45_v27 = vunpack.c.h.bf16 %v31_v10 }
   0x6   :  { %v46_v28 = vunpack.c.l.bf16 %v32_v15  ;;  %v47_v29 = vunpack.c.h.bf16 %v32_v15  ;;  %v48_v30 = vunpack.c.l.bf16 %v33_v16  ;;  %v49_v31 = vunpack.c.h.bf16 %v33_v16 }
   0x7   :  { %v51_v32 = vadd.f32 %v38_v19, %v34_v11  ;;  %v60_v33 = vadd.f32 %v39_v20, %v35_v12  ;;  %v69_v34 = vadd.f32 %v40_v21, %v36_v17  ;;  %v78_v35 = vadd.f32 %v41_v22, %v37_v18 }
   0x8   :  { %237 = vmul.bf16.f32.vacc0 %v26_v3, %v26_v3  ;;  %257 = vmul.bf16.f32.vacc1 %v27_v4, %v27_v4  ;;  %v279_v0 = vmov 1935823168  }
   0x9   :  { %v52_v36 = vadd.f32 %v51_v32, %v42_v23  ;;  %v61_v37 = vadd.f32 %v60_v33, %v43_v25  ;;  %v70_v38 = vadd.f32 %v69_v34, %v44_v26  ;;  %v79_v39 = vadd.f32 %v78_v35, %v45_v27 }
   0xa   :  { %238 = vmac.bf16.f32.vacc0 %v28_v5, %v28_v5  ;;  %258 = vmac.bf16.f32.vacc1 %v29_v8, %v29_v8  ;;  %v245_v1 = vunpack.c.l.s4 %v279_v0 }
   0xb   :  { %v53_v40 = vadd.f32 %v52_v36, %v46_v28  ;;  %v62_v41 = vadd.f32 %v61_v37, %v47_v29  ;;  %v71_v42 = vadd.f32 %v70_v38, %v48_v30  ;;  %v80_v43 = vadd.f32 %v79_v39, %v49_v31 }
   0xc   :  { %239 = vmac.bf16.f32.vacc0 %v30_v9, %v30_v9  ;;  %259 = vmac.bf16.f32.vacc1 %v31_v10, %v31_v10  ;;  %v246_v2 = vunpack.c.0.s8 %v245_v1 }
   0xd   :  { %v54_v44 = vrot.slane %v53_v40, 4  ;;  %v63_v45 = vrot.slane %v62_v41, 4  ;;  %v72_v46 = vrot.slane %v71_v42, 4  ;;  %v81_v47 = vrot.slane %v80_v43, 4 }
   0xe   :  { %240 = vmac.bf16.f32.vacc0 %v32_v15, %v32_v15  ;;  %v249_v3 = vsub.s32 %v246_v2, %v318_v7  ;;  %260 = vmac.bf16.f32.vacc1 %v33_v16, %v33_v16 }
   0xf   :  { %v55_v48 = vadd.f32 %v54_v44, %v53_v40  ;;  %v64_v49 = vadd.f32 %v63_v45, %v62_v41  ;;  %v73_v50 = vadd.f32 %v72_v46, %v71_v42  ;;  %v82_v51 = vadd.f32 %v81_v47, %v80_v43  ;;  %v50_v43 = vld [vmem:[#allocation2] sm:$0xf] }
  0x10   :  { %v241_v60 = vmovacc.add.low.vacc0  ;;  %v261_v8 = vmovacc.add.low.vacc1 }
  0x11   :  { %v56_v52 = vrot.slane %v55_v48, 2  ;;  %v65_v53 = vrot.slane %v64_v49, 2  ;;  %v74_v54 = vrot.slane %v73_v50, 2  ;;  %v83_v55 = vrot.slane %v82_v51, 2 }
  0x12   :  { %v242_v61 = vmovacc.add.high.vacc0  ;;  %v262_v9 = vmovacc.add.high.vacc1 }
  0x13   :  { %v57_v56 = vadd.f32 %v56_v52, %v55_v48  ;;  %v66_v57 = vadd.f32 %v65_v53, %v64_v49  ;;  %v75_v58 = vadd.f32 %v74_v54, %v73_v50  ;;  %v84_v59 = vadd.f32 %v83_v55, %v82_v51 }
  0x14   :  { %v243_v62 = vcombine.low %v241_v60, %v242_v61  ;;  %v244_v63 = vcombine.high %v241_v60, %v242_v61  ;;  %v263_v10 = vcombine.low %v261_v8, %v262_v9  ;;  %v264_v11 = vcombine.high %v261_v8, %v262_v9  ;;  %v216_v8 = vld [vmem:[%s370_s1] sm:$0xf] }
  0x15   :  { %v58_v14 = vrot.slane %v57_v56, 1  ;;  %v67_v15 = vrot.slane %v66_v57, 1  ;;  %v76_v17 = vrot.slane %v75_v58, 1  ;;  %v85_v18 = vrot.slane %v84_v59, 1 }
  0x16   :  { %v250_v4 = vrot.slane %v243_v62, %v249_v3  ;;  %v256_v5 = vrot.slane %v244_v63, %v249_v3  ;;  %v270_v12 = vrot.slane %v263_v10, %v249_v3  ;;  %v276_v13 = vrot.slane %v264_v11, %v249_v3 }
  0x17   :  { %v59_v23 = vadd.f32 %v58_v14, %v57_v56  ;;  %v68_v25 = vadd.f32 %v67_v15, %v66_v57  ;;  %v77_v7 = vadd.f32 %v76_v17, %v75_v58  ;;  %v86_v26 = vadd.f32 %v85_v18, %v84_v59  ;;  %v122_v59 = vld [vmem:[#allocation3] sm:$0xf] }
  0x18   :  { %v142_v19 = vrot.slane %v250_v4, 4  ;;  %v151_v20 = vrot.slane %v256_v5, 4  ;;  %v160_v21 = vrot.slane %v270_v12, 4  ;;  %v169_v22 = vrot.slane %v276_v13, 4 }
  0x19   :  { %v91_v30 = vcombine.low %v59_v23, %v68_v25  ;;  %v92_v31 = vcombine.low %v77_v7, %v86_v26 }
  0x1a   :  { %v143_v27 = vadd.f32 %v250_v4, %v142_v19  ;;  %v152_v16 = vadd.f32 %v256_v5, %v151_v20  ;;  %v161_v28 = vadd.f32 %v270_v12, %v160_v21  ;;  %v170_v29 = vadd.f32 %v276_v13, %v169_v22 }
  0x1b   :  { %v99_v36 = vrot.slane %v91_v30, %v340_v24  ;;  %v106_v37 = vrot.slane %v92_v31, %v340_v24 }
  0x1c   :  { %v144_v32 = vrot.slane %v143_v27, 2  ;;  %v153_v33 = vrot.slane %v152_v16, 2  ;;  %v162_v34 = vrot.slane %v161_v28, 2  ;;  %v171_v35 = vrot.slane %v170_v29, 2 }
  0x1d   :  { %v107_v42 = vcombine.low %v99_v36, %v106_v37 }
  0x1e   :  { %v145_v38 = vadd.f32 %v144_v32, %v143_v27  ;;  %v154_v39 = vadd.f32 %v153_v33, %v152_v16  ;;  %v163_v40 = vadd.f32 %v162_v34, %v161_v28  ;;  %v172_v41 = vadd.f32 %v171_v35, %v170_v29 }
  0x1f   :  { %v114_v48 = vrot.slane %v107_v42, %v340_v24 }
  0x20   :  { %v146_v44 = vrot.slane %v145_v38, 1  ;;  %v155_v45 = vrot.slane %v154_v39, 1  ;;  %v164_v46 = vrot.slane %v163_v40, 1  ;;  %v173_v47 = vrot.slane %v172_v41, 1 }
  0x21   :  { %v116_v53 = vadd.f32 %v114_v48, %v50_v43 }
  0x22   :  { %v147_v49 = vadd.f32 %v146_v44, %v145_v38  ;;  %v156_v50 = vadd.f32 %v155_v45, %v154_v39  ;;  %v165_v51 = vadd.f32 %v164_v46, %v163_v40  ;;  %v174_v52 = vadd.f32 %v173_v47, %v172_v41 }
  0x23   :  { %121 = vst.msk [vmem:[#allocation2] sm:$0xf] %vm314_vm0, %v116_v53 }
  0x24   :  { %v179_v54 = vcombine.low %v147_v49, %v156_v50  ;;  %v180_v55 = vcombine.low %v165_v51, %v174_v52 }
  0x26   :  { %v187_v56 = vrot.slane %v179_v54, %v340_v24  ;;  %v194_v57 = vrot.slane %v180_v55, %v340_v24 }
  0x28   :  { %v195_v58 = vcombine.low %v187_v56, %v194_v57 }
  0x2a   :  { %v202_v60 = vrot.slane %v195_v58, %v340_v24  ;;  %v209_v62 = vld [vmem:[#allocation2] sm:$0xf] }
  0x2b   :  { %v210_v63 = vmul.f32 0.03125, %v209_v62  ;;  %v221_v24 = vld [vmem:[%s371_s2] sm:$0xf] }
  0x2c   :  { %v204_v61 = vadd.f32 %v202_v60, %v122_v59 }
  0x2d   :  { %v213_v0 = vmul.f32 %v210_v63, %v210_v63 }
  0x2e   :  { %205 = vst.msk [vmem:[#allocation3] sm:$0xf] %vm314_vm0, %v204_v61 }
  0x35   :  { %v211_v1 = vld [vmem:[#allocation3] sm:$0xf] }
  0x36   :  { %v212_v2 = vmul.f32 0.03125, %v211_v1 }
  0x38   :  { %v214_v3 = vsub.f32 %v212_v2, %v213_v0 }
  0x3a   :  { %v215_v4 = vmax.f32 %v214_v3, 0.0 }
  0x3c   :  { %v217_v5 = vadd.f32 1e-05, %v215_v4 }
  0x3e   :  { %235 = vrsqrt.f32 %v217_v5 }
  0x4b   :  { %v236_v9 = vpop.eup %235 }
  0x4c   :  { %v219_v10 = vmul.f32 %v236_v9, %v216_v8 }
  0x4e   :  { %220 = vst.msk [vmem:[%s372_s3] sm:$0xf] %vm314_vm0, %v219_v10  ;;  %v222_v11 = vmul.f32 %v219_v10, %v210_v63 }
  0x50   :  { %v223_v12 = vsub.f32 %v221_v24, %v222_v11 }
  0x52   :  { %224 = vst.msk [vmem:[%s373_s4] sm:$0xf] %vm314_vm0, %v223_v12 }

// kernel: acgan_generator_forward.12
= control target key start
LH: loop header
LB: loop body
LE: loop exit
PB: predicated region body
PF: predicated region fallthrough
CT: control target
= control target key end

     0   :  { %9 = vsyncpa [#allocation3], 0  ;;  %s2433_s0 = inlined_call_operand.vmem [shape: f32[1,512], index: 0, kind: input, shape index: {}]   ;;  %s2434_s1 = inlined_call_operand.vmem [shape: f32[1,512], index: 1, kind: input, shape index: {}]   ;;  %s2435_s2 = inlined_call_operand.vmem [shape: bf16[32,512], index: 2, kind: input, shape index: {}]   ;;  %s2436_s3 = inlined_call_operand.hbm [shape: bf16[512,4096], index: 3, kind: input, shape index: {}]   ;;  %s2437_s4 = inlined_call_operand.vmem [shape: bf16[32,4096], index: 4, kind: output, shape index: {}]  }
   0x1   :  { %11 = vsyncpa [#allocation3 + $0x1], 0  ;;  %s2067_s15 = smov 0   ;;  %s2069_s16 = smov 0  }
   0x2   :  { %s2071_s17 = smov 0   ;;  %s2073_s18 = smov 0  }
   0x3   :  { %s2075_s19 = smov 0   ;;  %s2077_s20 = smov 0  }
   0x4 LB: > { %s1546_s21 = sadd.s32 4294967295, %s2036_s20   ;;  %s26_s22 = sadd.s32 1, %s2032_s19  ;;  %s2036_s20 = sphi %s2077_s20, %s17_s20   ;;  %s2032_s19 = sphi %s2075_s19, %s2446_s19   ;;  %s2028_s18 = sphi %s2073_s18, %s2445_s18   ;;  %s2024_s17 = sphi %s2071_s17, %s2444_s17   ;;  %s2020_s16 = sphi %s2069_s16, %s2443_s16   ;;  %s2016_s15 = sphi %s2067_s15, %s2442_s15  }
   0x5   : > { %p27_p0 = scmp.ge.s32.totalorder %s26_s22, 8  ;;  %s104_s23 = sadd.s32 1, %s2024_s17 }
   0x6   : > { %p111_p1 = scmp.ne.s32.totalorder %s2024_s17, %s2020_s16  ;;  %p112_p2 = scmp.eq.s32.totalorder %s2036_s20, 0 }
   0x7   : > { %s2448_s22 = smov (%p27_p0, %s26_s22), 0  ;;  %p117_p4 = scmp.ne.s32.totalorder %s2020_s16, %s2016_s15 }
   0x8   : > { %p2103_p3 = por %p112_p2, %p111_p1  ;;  %s101_s25 = ssub.s32 %s2032_s19, %s2448_s22 }
   0x9   : > { %p118_p5 = scmp.eq.s32.totalorder %s1546_s21, 0  ;;  %p102_p6 = scmp.eq.s32.totalorder %s101_s25, 0 }
   0xa   : > { %p143_p7 = scmp.eq.s32.totalorder %s1546_s21, 7  ;;  %p1714_p10 = scmp.lt.s32.totalorder %s2036_s20, 8 }
   0xb   : > { %p2110_p8 = por %p118_p5, %p117_p4  ;;  %s185_s29 = sand.u32 1, %s2024_s17  }
   0xc   : > { %s2115_s27 = scalar_select %p102_p6, %s2024_s17, %s104_s23  }
   0xd   : > { %p2117_p9 = por %p143_p7, %p111_p1  ;;  %s1698_s30 = sshll.u32 %s2032_s19, 8 }
   0xe   : > { %s1551_s5 = sshll.u32 %s185_s29, 10  ;;  %s195_s8 = scalar_lea.hbm %s2436_s3, %s1698_s30 }
   0xf   : > { %s189_s9 = scalar_lea.vmem [#allocation2], %s1551_s5  ;;  %p2129_p11 = pnand %p1714_p10, %p2103_p3 }
  0x10   : > { %s196_s10 = sshll.u32 %s189_s9, 4  ;;  %p1554_p12 = scmp.ge.s32.totalorder %s2036_s20, 1  ;;  %s197_s10 = int_to_ptr.vmem [resolvable:$true] %s196_s10 }
  0x11   : > { %s186_s12 = scalar_lea.sflag [#allocation3], %s185_s29  ;;  %p1960_p13 = pneg %p2129_p11 }
  0x12   : > { %s1971_s13 = scalar_lea.vmem %s197_s10, 16384  ;;  %s2038_s14 = smov [#allocation2]  }
  0x13   : > { %p1972_p0 = scmp.ne.s32.totalorder %s197_s10, %s1971_s13  ;;  %s1976_s15 = sshll.u32 %s2038_s14, 4  ;;  %s1977_s15 = int_to_ptr.vmem [resolvable:$false] %s1976_s15 }
  0x14   : > { %s1978_s21 = scalar_lea.vmem %s1977_s15, 32768  ;;  %p1979_p4 = scmp.lt.s32.totalorder %s197_s10, %s1977_s15 }
  0x15   : > { %p1974_p1 = pnand %p1972_p0, %p1960_p13  ;;  %p1980_p5 = scmp.lt.s32.totalorder %s1978_s21, %s1971_s13 }
  0x17   : > { %p1975_p2 = pneg %p1974_p1  ;;  %p1981_p3 = por %p1980_p5, %p1979_p4 }
  0x19   : > { %p1982_p6 = pnand %p1981_p3, %p1975_p2 }
  0x1b   : > { %1985 = shalt.err (!%p1982_p6)
}
  0x1c   : > { %s2039_s23 = smov 2048   ;;  %s2040_s24 = smov 256  }
  0x1d   : > { %s2041_s25 = smov 16   ;;  %p204_p7 = scmp.lt.s32.totalorder %s2036_s20, 9 }
  0x1e   : > { %1713 = dma.hbm_to_vmem [thread:$0]  (!%p2129_p11), %s195_s8, 16384, %s197_s10, %s186_s12, %s2039_s23, %s2040_s24, %s2041_s25  }
  0x1f   : > { %p205_p10 = pnand %p1554_p12, %p204_p7 }
  0x20   : > { %s2142_s29 = sand.u32 (!%p205_p10), 1, %s2020_s16  }
  0x21   : > { %208 = sbr.rel (%p205_p10) target bundleno = 389 (0x185), region = 36  ;;  %s1555_s30 = sshll.u32 (!%p205_p10), %s2142_s29, 10 }
  0x22   : > { %s211_s5 = scalar_lea.sflag (!%p205_p10), [#allocation3], %s2142_s29  ;;  %s2146_s6 = scalar_lea.vmem (!%p205_p10), [#allocation2], %s1555_s30 }
  0x26   : > { %2011 = dma.done.wait (%p2110_p8), %s211_s5, 16384  }
  0x27   : > { %2013 = vsyncadd (%p2110_p8), %s211_s5, 4294950912  ;;  %v1766_v0 = vld [vmem:[%s2146_s6 + $0xe4] ss:$16 sps:$4 sm:$0xff]   ;;  %v1770_v2 = vld [vmem:[%s2146_s6 + $0xe0] ss:$16 sps:$4 sm:$0xff]   ;;  %v280_v37 = vlaneseq }
  0x28   : > { %v1768_v1 = vld [vmem:[%s2146_s6 + $0x2e4] ss:$16 sps:$4 sm:$0xff]   ;;  %1146 = vmatprep.subr.bf16.mxu0 %v1766_v0  ;;  %v1771_v3 = vld [vmem:[%s2146_s6 + $0x2e0] ss:$16 sps:$4 sm:$0xff]   ;;  %v255_v62 = vld [vmem:[%s2435_s2 + $0x8] sm:$0xff] }
  0x29   : > { %1199 = vmatprep.subr.bf16.mxu1 %v1768_v1  ;;  %v1772_v4 = vld [vmem:[%s2146_s6 + $0xc4] ss:$16 sps:$4 sm:$0xff]   ;;  %1147 = vmatpush1.bf16.msra.mxu0 %v1770_v2  ;;  %v1776_v6 = vld [vmem:[%s2146_s6 + $0xc0] ss:$16 sps:$4 sm:$0xff]   ;;  %v281_v42 = vshrl.u32 %v280_v37, 7  ;;  %v257_v63 = vld [vmem:[%s2435_s2 + $0x18] sm:$0xff] }
  0x2a   : > { %1200 = vmatpush1.bf16.msra.mxu1 %v1771_v3  ;;  %v1774_v5 = vld [vmem:[%s2146_s6 + $0x2c4] ss:$16 sps:$4 sm:$0xff]   ;;  %1148 = vmatprep.subr.bf16.mxu0 %v1772_v4  ;;  %v1777_v7 = vld [vmem:[%s2146_s6 + $0x2c0] ss:$16 sps:$4 sm:$0xff]   ;;  %v265_v4 = vunpack.c.h.bf16 %v255_v62 }
  0x2b   : > { %1201 = vmatprep.subr.bf16.mxu1 %v1774_v5  ;;  %v1778_v8 = vld [vmem:[%s2146_s6 + $0xa4] ss:$16 sps:$4 sm:$0xff]   ;;  %v1782_v10 = vld [vmem:[%s2146_s6 + $0xa0] ss:$16 sps:$4 sm:$0xff]   ;;  %v286_v47 = vsub.s32 1, %v281_v42  ;;  %v294_v49 = vsub.s32 3, %v281_v42  ;;  %v269_v5 = vunpack.c.h.bf16 %v257_v63 }
  0x2c   : > { %v1780_v9 = vld [vmem:[%s2146_s6 + $0x2a4] ss:$16 sps:$4 sm:$0xff]   ;;  %v1783_v11 = vld [vmem:[%s2146_s6 + $0x2a0] ss:$16 sps:$4 sm:$0xff]   ;;  %v282_v53 = vsub.s32 0, %v281_v42  ;;  %v290_v58 = vsub.s32 2, %v281_v42 }
  0x2d   : > { %1149 = vmatpush1.bf16.msra.mxu0 %v1776_v6  ;;  %v1784_v12 = vld [vmem:[%s2146_s6 + $0x84] ss:$16 sps:$4 sm:$0xff]   ;;  %v1788_v14 = vld [vmem:[%s2146_s6 + $0x80] ss:$16 sps:$4 sm:$0xff]  }
  0x2e   : > { %1202 = vmatpush1.bf16.msra.mxu1 %v1777_v7  ;;  %1150 = vmatprep.subr.bf16.mxu0 %v1778_v8  ;;  %v1786_v13 = vld [vmem:[%s2146_s6 + $0x284] ss:$16 sps:$4 sm:$0xff]   ;;  %v1789_v15 = vld [vmem:[%s2146_s6 + $0x280] ss:$16 sps:$4 sm:$0xff]  }
  0x2f   : > { %1203 = vmatprep.subr.bf16.mxu1 %v1780_v9  ;;  %v1790_v16 = vld [vmem:[%s2146_s6 + $0x64] ss:$16 sps:$4 sm:$0xff]   ;;  %v1794_v18 = vld [vmem:[%s2146_s6 + $0x60] ss:$16 sps:$4 sm:$0xff]  }
  0x30   : > { %v1792_v17 = vld [vmem:[%s2146_s6 + $0x264] ss:$16 sps:$4 sm:$0xff]   ;;  %v1795_v19 = vld [vmem:[%s2146_s6 + $0x260] ss:$16 sps:$4 sm:$0xff]  }
  0x31   : > { %1151 = vmatpush1.bf16.msra.mxu0 %v1782_v10  ;;  %v1796_v20 = vld [vmem:[%s2146_s6 + $0x44] ss:$16 sps:$4 sm:$0xff]   ;;  %v1800_v22 = vld [vmem:[%s2146_s6 + $0x40] ss:$16 sps:$4 sm:$0xff]   ;;  %v264_v10 = vunpack.c.l.bf16 %v255_v62  ;;  %v1870_v62 = vld [vmem:[%s2146_s6 + $0xcc] ss:$16 sps:$4 sm:$0xff]  }
  0x32   : > { %1204 = vmatpush1.bf16.msra.mxu1 %v1783_v11  ;;  %1152 = vmatprep.subr.bf16.mxu0 %v1784_v12  ;;  %v1798_v21 = vld [vmem:[%s2146_s6 + $0x244] ss:$16 sps:$4 sm:$0xff]   ;;  %v1801_v23 = vld [vmem:[%s2146_s6 + $0x240] ss:$16 sps:$4 sm:$0xff]   ;;  %v268_v11 = vunpack.c.l.bf16 %v257_v63  ;;  %v1873_v63 = vld [vmem:[%s2146_s6 + $0x2cc] ss:$16 sps:$4 sm:$0xff]  }
  0x33   : > { %1205 = vmatprep.subr.bf16.mxu1 %v1786_v13  ;;  %v1802_v24 = vld [vmem:[%s2146_s6 + $0x24] ss:$16 sps:$4 sm:$0xff]   ;;  %v1806_v26 = vld [vmem:[%s2146_s6 + $0x20] ss:$16 sps:$4 sm:$0xff]  }
  0x34   : > { %v1804_v25 = vld [vmem:[%s2146_s6 + $0x224] ss:$16 sps:$4 sm:$0xff]   ;;  %v1807_v27 = vld [vmem:[%s2146_s6 + $0x220] ss:$16 sps:$4 sm:$0xff]  }
  0x35   : > { %1153 = vmatpush1.bf16.msra.mxu0 %v1788_v14  ;;  %v1808_v28 = vld [vmem:[%s2146_s6 + $0x4] ss:$16 sps:$4 sm:$0xff]   ;;  %v1812_v30 = vld [vmem:[%s2146_s6] ss:$16 sps:$4 sm:$0xff]  }
  0x36   : > { %1206 = vmatpush1.bf16.msra.mxu1 %v1789_v15  ;;  %1154 = vmatprep.subr.bf16.mxu0 %v1790_v16  ;;  %v1810_v29 = vld [vmem:[%s2146_s6 + $0x204] ss:$16 sps:$4 sm:$0xff]   ;;  %v1813_v31 = vld [vmem:[%s2146_s6 + $0x200] ss:$16 sps:$4 sm:$0xff]  }
  0x37   : > { %1207 = vmatprep.subr.bf16.mxu1 %v1792_v17  ;;  %v1814_v32 = vld [vmem:[%s2146_s6 + $0x1e4] ss:$16 sps:$4 sm:$0xff]   ;;  %v1818_v34 = vld [vmem:[%s2146_s6 + $0x1e0] ss:$16 sps:$4 sm:$0xff]  }
  0x38   : > { %v1816_v33 = vld [vmem:[%s2146_s6 + $0x3e4] ss:$16 sps:$4 sm:$0xff]   ;;  %v1819_v35 = vld [vmem:[%s2146_s6 + $0x3e0] ss:$16 sps:$4 sm:$0xff]  }
  0x39   : > { %1155 = vmatpush1.bf16.msra.mxu0 %v1794_v18  ;;  %v1820_v36 = vld [vmem:[%s2146_s6 + $0x1c4] ss:$16 sps:$4 sm:$0xff]   ;;  %v1824_v39 = vld [vmem:[%s2146_s6 + $0x1c0] ss:$16 sps:$4 sm:$0xff]  }
  0x3a   : > { %1208 = vmatpush1.bf16.msra.mxu1 %v1795_v19  ;;  %1156 = vmatprep.subr.bf16.mxu0 %v1796_v20  ;;  %v1822_v38 = vld [vmem:[%s2146_s6 + $0x3c4] ss:$16 sps:$4 sm:$0xff]   ;;  %v1825_v40 = vld [vmem:[%s2146_s6 + $0x3c0] ss:$16 sps:$4 sm:$0xff]  }
  0x3b   : > { %1209 = vmatprep.subr.bf16.mxu1 %v1798_v21  ;;  %v1826_v41 = vld [vmem:[%s2146_s6 + $0x1a4] ss:$16 sps:$4 sm:$0xff]   ;;  %v1830_v44 = vld [vmem:[%s2146_s6 + $0x1a0] ss:$16 sps:$4 sm:$0xff]  }
  0x3c   : > { %v1828_v43 = vld [vmem:[%s2146_s6 + $0x3a4] ss:$16 sps:$4 sm:$0xff]   ;;  %v1831_v45 = vld [vmem:[%s2146_s6 + $0x3a0] ss:$16 sps:$4 sm:$0xff]  }
  0x3d   : > { %1157 = vmatpush1.bf16.msra.mxu0 %v1800_v22  ;;  %v1832_v46 = vld [vmem:[%s2146_s6 + $0x184] ss:$16 sps:$4 sm:$0xff]   ;;  %v1836_v50 = vld [vmem:[%s2146_s6 + $0x180] ss:$16 sps:$4 sm:$0xff]  }
  0x3e   : > { %1210 = vmatpush1.bf16.msra.mxu1 %v1801_v23  ;;  %1158 = vmatprep.subr.bf16.mxu0 %v1802_v24  ;;  %v1834_v48 = vld [vmem:[%s2146_s6 + $0x384] ss:$16 sps:$4 sm:$0xff]   ;;  %v1837_v51 = vld [vmem:[%s2146_s6 + $0x380] ss:$16 sps:$4 sm:$0xff]  }
  0x3f   : > { %1211 = vmatprep.subr.bf16.mxu1 %v1804_v25  ;;  %v254_v52 = vld [vmem:[%s2435_s2] sm:$0xff]  ;;  %v256_v54 = vld [vmem:[%s2435_s2 + $0x10] sm:$0xff] }
  0x40   : > { %v263_v55 = vunpack.c.h.bf16 %v254_v52  ;;  %v278_v56 = vld [vmem:[%s2433_s0] sm:$0xf]  ;;  %v267_v59 = vunpack.c.h.bf16 %v256_v54  ;;  %v1838_v0 = vld [vmem:[%s2146_s6 + $0x164] ss:$16 sps:$4 sm:$0xff]   ;;  %v262_v2 = vunpack.c.l.bf16 %v254_v52  ;;  %v266_v3 = vunpack.c.l.bf16 %v256_v54  ;;  %v1864_v54 = vld [vmem:[%s2146_s6 + $0xec] ss:$16 sps:$4 sm:$0xff]  }
  0x41   : > { %1159 = vmatpush1.bf16.msra.mxu0 %v1806_v26  ;;  %v316_v57 = vld [vmem:[%s2434_s1] sm:$0xf]  ;;  %v2212_v60 = vrot.slane %v278_v56, %v286_v47  ;;  %v1840_v1 = vld [vmem:[%s2146_s6 + $0x364] ss:$16 sps:$4 sm:$0xff]   ;;  %v2226_v8 = vrot.slane %v278_v56, %v294_v49  ;;  %v2230_v12 = vrot.slane %v278_v56, %v282_v53  ;;  %v2232_v13 = vrot.slane %v278_v56, %v290_v58 }
  0x42   : > { %1212 = vmatpush1.bf16.msra.mxu1 %v1807_v27  ;;  %1160 = vmatprep.subr.bf16.mxu0 %v1808_v28  ;;  %v2214_v61 = vrot.slane %v316_v57, %v286_v47  ;;  %v2228_v9 = vrot.slane %v316_v57, %v294_v49  ;;  %v1842_v14 = vld [vmem:[%s2146_s6 + $0x160] ss:$16 sps:$4 sm:$0xff]   ;;  %v1844_v19 = vld [vmem:[%s2146_s6 + $0x144] ss:$16 sps:$4 sm:$0xff]   ;;  %v2242_v22 = vrot.slane %v316_v57, %v282_v53 }
  0x43   : > { %1213 = vmatprep.subr.bf16.mxu1 %v1810_v29  ;;  %v301_v6 = vmul.f32 %v2212_v60, %v263_v55  ;;  %v305_v7 = vmul.f32 %v2212_v60, %v267_v59  ;;  %v1843_v15 = vld [vmem:[%s2146_s6 + $0x360] ss:$16 sps:$4 sm:$0xff]   ;;  %v303_v18 = vmul.f32 %v2226_v8, %v265_v4  ;;  %v1846_v20 = vld [vmem:[%s2146_s6 + $0x344] ss:$16 sps:$4 sm:$0xff]   ;;  %v307_v21 = vmul.f32 %v2226_v8, %v269_v5  ;;  %v1867_v55 = vld [vmem:[%s2146_s6 + $0x2ec] ss:$16 sps:$4 sm:$0xff]  }
  0x44   : > { %v2244_v23 = vrot.slane %v316_v57, %v290_v58  ;;  %v300_v27 = vmul.f32 %v2230_v12, %v262_v2  ;;  %v304_v29 = vmul.f32 %v2230_v12, %v266_v3  ;;  %v1852_v37 = vld [vmem:[%s2146_s6 + $0x324] ss:$16 sps:$4 sm:$0xff]   ;;  %v1861_v53 = vld [vmem:[%s2146_s6 + $0x300] ss:$16 sps:$4 sm:$0xff]   ;;  %v1862_v58 = vld [vmem:[%s2146_s6 + $0xe8] ss:$16 sps:$4 sm:$0xff]  }
  0x45   : > { %1161 = vmatpush1.bf16.msra.mxu0 %v1812_v30  ;;  %v339_v16 = vadd.f32 %v2214_v61, %v301_v6  ;;  %v343_v17 = vadd.f32 %v2214_v61, %v305_v7  ;;  %v341_v26 = vadd.f32 %v2228_v9, %v303_v18  ;;  %v345_v28 = vadd.f32 %v2228_v9, %v307_v21  ;;  %v1858_v47 = vld [vmem:[%s2146_s6 + $0x304] ss:$16 sps:$4 sm:$0xff]   ;;  %v1865_v59 = vld [vmem:[%s2146_s6 + $0x2e8] ss:$16 sps:$4 sm:$0xff]   ;;  %v1876_v2 = vld [vmem:[%s2146_s6 + $0xac] ss:$16 sps:$4 sm:$0xff]  }
  0x46   : > { %1214 = vmatpush1.bf16.msra.mxu1 %v1813_v31  ;;  %1162 = vmatprep.subr.bf16.mxu0 %v1814_v32  ;;  %v302_v30 = vmul.f32 %v2232_v13, %v264_v10  ;;  %v306_v31 = vmul.f32 %v2232_v13, %v268_v11  ;;  %v1848_v32 = vld [vmem:[%s2146_s6 + $0x140] ss:$16 sps:$4 sm:$0xff]   ;;  %v342_v42 = vadd.f32 %v2242_v22, %v304_v29  ;;  %v1879_v3 = vld [vmem:[%s2146_s6 + $0x2ac] ss:$16 sps:$4 sm:$0xff]   ;;  %v1874_v4 = vld [vmem:[%s2146_s6 + $0xa8] ss:$16 sps:$4 sm:$0xff]  }
  0x47   : > { %1215 = vmatprep.subr.bf16.mxu1 %v1816_v33  ;;  %v355_v24 = vmax.f32 %v339_v16, 0.0  ;;  %v359_v25 = vmax.f32 %v343_v17, 0.0  ;;  %v1849_v33 = vld [vmem:[%s2146_s6 + $0x340] ss:$16 sps:$4 sm:$0xff]   ;;  %v1877_v5 = vld [vmem:[%s2146_s6 + $0x2a8] ss:$16 sps:$4 sm:$0xff]  }
  0x48   : > { %v1882_v6 = vld [vmem:[%s2146_s6 + $0x8c] ss:$16 sps:$4 sm:$0xff]   ;;  %v1880_v10 = vld [vmem:[%s2146_s6 + $0x88] ss:$16 sps:$4 sm:$0xff]  }
  0x49   : > { %1163 = vmatpush2.bf16.msra.mxu0 %v1818_v34  ;;  %v2254_v34 = vpack.c.bf16 %v359_v25, %v355_v24  ;;  %v1885_v7 = vld [vmem:[%s2146_s6 + $0x28c] ss:$16 sps:$4 sm:$0xff]   ;;  %v1883_v11 = vld [vmem:[%s2146_s6 + $0x288] ss:$16 sps:$4 sm:$0xff]  }
  0x4a   : > { %1216 = vmatpush2.bf16.msra.mxu1 %v1819_v35  ;;  %1164 = vmatprep.subr.bf16.mxu0 %v1820_v36  ;;  %v357_v35 = vmax.f32 %v341_v26, 0.0  ;;  %v1850_v36 = vld [vmem:[%s2146_s6 + $0x124] ss:$16 sps:$4 sm:$0xff]   ;;  %v1886_v16 = vld [vmem:[%s2146_s6 + $0x68] ss:$16 sps:$4 sm:$0xff]  }
  0x4b   : > { %1217 = vmatprep.subr.bf16.mxu1 %v1822_v38  ;;  %v361_v38 = vmax.f32 %v345_v28, 0.0  ;;  %1178 = vmatprep.mubr.bf16.mxu0 %v2254_v34  ;;  %v1889_v17 = vld [vmem:[%s2146_s6 + $0x268] ss:$16 sps:$4 sm:$0xff]   ;;  %v1894_v18 = vld [vmem:[%s2146_s6 + $0x4c] ss:$16 sps:$4 sm:$0xff]  }
  0x4c   : > { %v259_v24 = vld [vmem:[%s2435_s2 + $0x28] sm:$0xff]  ;;  %v261_v25 = vld [vmem:[%s2435_s2 + $0x38] sm:$0xff] }
  0x4d   : > { %1165 = vmatpush2.bf16.msra.mxu0 %v1824_v39  ;;  %v338_v39 = vadd.f32 %v2242_v22, %v300_v27  ;;  %v1897_v27 = vld [vmem:[%s2146_s6 + $0x24c] ss:$16 sps:$4 sm:$0xff]   ;;  %v273_v29 = vunpack.c.h.bf16 %v259_v24 }
  0x4e   : > { %1218 = vmatpush2.bf16.msra.mxu1 %v1825_v40  ;;  %1166 = vmatprep.subr.bf16.mxu0 %v1826_v41  ;;  %v1854_v40 = vld [vmem:[%s2146_s6 + $0x120] ss:$16 sps:$4 sm:$0xff]   ;;  %v2261_v41 = vpack.c.bf16 %v361_v38, %v357_v35  ;;  %v272_v35 = vunpack.c.l.bf16 %v259_v24  ;;  %v1928_v24 = vld [vmem:[%s2146_s6 + $0x188] ss:$16 sps:$4 sm:$0xff]  }
  0x4f   : > { %1219 = vmatprep.subr.bf16.mxu1 %v1828_v43  ;;  %v340_v43 = vadd.f32 %v2244_v23, %v302_v30  ;;  %v354_v49 = vmax.f32 %v338_v39, 0.0  ;;  %v277_v30 = vunpack.c.h.bf16 %v261_v25  ;;  %v311_v39 = vmul.f32 %v2226_v8, %v273_v29  ;;  %v1937_v29 = vld [vmem:[%s2146_s6 + $0x368] ss:$16 sps:$4 sm:$0xff]  }
  0x50   : > { %1231 = vmatprep.mubr.bf16.mxu1 %v2261_v41 }
  0x51   : > { %1167 = vmatpush2.bf16.msra.mxu0 %v1830_v44  ;;  %v344_v44 = vadd.f32 %v2244_v23, %v306_v31 }
  0x52   : > { %1220 = vmatpush2.bf16.msra.mxu1 %v1831_v45  ;;  %1168 = vmatprep.subr.bf16.mxu0 %v1832_v46  ;;  %v1855_v45 = vld [vmem:[%s2146_s6 + $0x320] ss:$16 sps:$4 sm:$0xff]   ;;  %v1856_v46 = vld [vmem:[%s2146_s6 + $0x104] ss:$16 sps:$4 sm:$0xff]  }
  0x53   : > { %1221 = vmatprep.subr.bf16.mxu1 %v1834_v48  ;;  %v1860_v48 = vld [vmem:[%s2146_s6 + $0x100] ss:$16 sps:$4 sm:$0xff]   ;;  %v360_v52 = vmax.f32 %v344_v44, 0.0  ;;  %v1900_v44 = vld [vmem:[%s2146_s6 + $0x2c] ss:$16 sps:$4 sm:$0xff]  }
  0x55   : > { %1169 = vmatpush2.bf16.msra.mxu0 %v1836_v50  ;;  %v358_v50 = vmax.f32 %v342_v42, 0.0 }
  0x56   : > { %1222 = vmatpush2.bf16.msra.mxu1 %v1837_v51  ;;  %1170 = vmatprep.subr.bf16.mxu0 %v1838_v0  ;;  %v356_v51 = vmax.f32 %v340_v43, 0.0  ;;  %v1868_v0 = vld [vmem:[%s2146_s6 + $0xc8] ss:$16 sps:$4 sm:$0xff]  }
  0x57   : > { %1223 = vmatprep.subr.bf16.mxu1 %v1840_v1  ;;  %v2274_v56 = vpack.c.bf16 %v358_v50, %v354_v49  ;;  %v1871_v1 = vld [vmem:[%s2146_s6 + $0x2c8] ss:$16 sps:$4 sm:$0xff]  }
  0x58   : > { %v2276_v57 = vpack.c.bf16 %v360_v52, %v356_v51  ;;  %v1895_v43 = vld [vmem:[%s2146_s6 + $0x248] ss:$16 sps:$4 sm:$0xff]  }
  0x59   : > { %1171 = vmatpush2.bf16.msra.mxu0 %v1842_v14  ;;  %v1888_v14 = vld [vmem:[%s2146_s6 + $0x6c] ss:$16 sps:$4 sm:$0xff]  }
  0x5a   : > { %1224 = vmatpush2.bf16.msra.mxu1 %v1843_v15  ;;  %1172 = vmatprep.subr.bf16.mxu0 %v1844_v19  ;;  %v1891_v15 = vld [vmem:[%s2146_s6 + $0x26c] ss:$16 sps:$4 sm:$0xff]   ;;  %v258_v19 = vld [vmem:[%s2435_s2 + $0x20] sm:$0xff] }
  0x5b   : > { %1225 = vmatprep.subr.bf16.mxu1 %v1846_v20  ;;  %v260_v20 = vld [vmem:[%s2435_s2 + $0x30] sm:$0xff]  ;;  %v271_v21 = vunpack.c.h.bf16 %v258_v19  ;;  %v270_v26 = vunpack.c.l.bf16 %v258_v19  ;;  %v1925_v19 = vld [vmem:[%s2146_s6 + $0x3a8] ss:$16 sps:$4 sm:$0xff]  }
  0x5c   : > { %v275_v28 = vunpack.c.h.bf16 %v260_v20  ;;  %v274_v31 = vunpack.c.l.bf16 %v260_v20  ;;  %v1930_v20 = vld [vmem:[%s2146_s6 + $0x18c] ss:$16 sps:$4 sm:$0xff]  }
  0x5d   : > { %1173 = vmatpush2.bf16.msra.mxu0 %v1848_v32  ;;  %v309_v32 = vmul.f32 %v2212_v60, %v271_v21  ;;  %v1933_v21 = vld [vmem:[%s2146_s6 + $0x38c] ss:$16 sps:$4 sm:$0xff]  }
  0x5e   : > { %1226 = vmatpush2.bf16.msra.mxu1 %v1849_v33  ;;  %1174 = vmatprep.subr.bf16.mxu0 %v1850_v36  ;;  %v308_v33 = vmul.f32 %v2230_v12, %v270_v26  ;;  %v276_v36 = vunpack.c.l.bf16 %v261_v25  ;;  %v313_v38 = vmul.f32 %v2212_v60, %v275_v28  ;;  %v312_v42 = vmul.f32 %v2230_v12, %v274_v31  ;;  %v1903_v60 = vld [vmem:[%s2146_s6 + $0x22c] ss:$16 sps:$4 sm:$0xff]   ;;  %v1931_v25 = vld [vmem:[%s2146_s6 + $0x388] ss:$16 sps:$4 sm:$0xff]  }
  0x5f   : > { %1227 = vmatprep.subr.bf16.mxu1 %v1852_v37  ;;  %v1892_v37 = vld [vmem:[%s2146_s6 + $0x48] ss:$16 sps:$4 sm:$0xff]   ;;  %v1936_v26 = vld [vmem:[%s2146_s6 + $0x16c] ss:$16 sps:$4 sm:$0xff]  }
  0x60   : > { %v350_v50 = vadd.f32 %v2242_v22, %v312_v42  ;;  %v314_v52 = vmul.f32 %v2232_v13, %v276_v36  ;;  %v1934_v28 = vld [vmem:[%s2146_s6 + $0x168] ss:$16 sps:$4 sm:$0xff]   ;;  %v1945_v31 = vld [vmem:[%s2146_s6 + $0x34c] ss:$16 sps:$4 sm:$0xff]  }
  0x61   : > { %1175 = vmatpush2.bf16.msra.mxu0 %v1854_v40  ;;  %v315_v40 = vmul.f32 %v2226_v8, %v277_v30  ;;  %v349_v8 = vadd.f32 %v2228_v9, %v311_v39  ;;  %v1942_v30 = vld [vmem:[%s2146_s6 + $0x14c] ss:$16 sps:$4 sm:$0xff]   ;;  %v1952_v42 = vld [vmem:[%s2146_s6 + $0x108] ss:$16 sps:$4 sm:$0xff]  }
  0x62   : > { %1228 = vmatpush2.bf16.msra.mxu1 %v1855_v45  ;;  %1176 = vmatprep.subr.bf16.mxu0 %v1856_v46  ;;  %v347_v45 = vadd.f32 %v2214_v61, %v309_v32  ;;  %v346_v46 = vadd.f32 %v2242_v22, %v308_v33  ;;  %v1906_v22 = vld [vmem:[%s2146_s6 + $0xc] ss:$16 sps:$4 sm:$0xff]   ;;  %v1940_v32 = vld [vmem:[%s2146_s6 + $0x148] ss:$16 sps:$4 sm:$0xff]  }
  0x63   : > { %1229 = vmatprep.subr.bf16.mxu1 %v1858_v47  ;;  %v310_v47 = vmul.f32 %v2232_v13, %v272_v35  ;;  %v353_v12 = vadd.f32 %v2228_v9, %v315_v40  ;;  %v352_v9 = vadd.f32 %v2244_v23, %v314_v52  ;;  %v1943_v33 = vld [vmem:[%s2146_s6 + $0x348] ss:$16 sps:$4 sm:$0xff]   ;;  %v1948_v35 = vld [vmem:[%s2146_s6 + $0x12c] ss:$16 sps:$4 sm:$0xff]  }
  0x64   : > { %v363_v49 = vmax.f32 %v347_v45, 0.0  ;;  %v362_v51 = vmax.f32 %v346_v46, 0.0  ;;  %v1951_v36 = vld [vmem:[%s2146_s6 + $0x32c] ss:$16 sps:$4 sm:$0xff]  }
  0x65   : > { %1177 = vmatpush2.bf16.msra.mxu0 %v1860_v48  ;;  %v351_v48 = vadd.f32 %v2214_v61, %v313_v38  ;;  %v1898_v61 = vld [vmem:[%s2146_s6 + $0x28] ss:$16 sps:$4 sm:$0xff]   ;;  %v1954_v39 = vld [vmem:[%s2146_s6 + $0x10c] ss:$16 sps:$4 sm:$0xff]  }
  0x66   : > { %1230 = vmatpush2.bf16.msra.mxu1 %v1861_v53  ;;  %1252 = vmatprep.subr.bf16.mxu0 %v1864_v54  ;;  %v365_v54 = vmax.f32 %v349_v8, 0.0  ;;  %v1949_v38 = vld [vmem:[%s2146_s6 + $0x328] ss:$16 sps:$4 sm:$0xff]   ;;  %v1957_v40 = vld [vmem:[%s2146_s6 + $0x30c] ss:$16 sps:$4 sm:$0xff]  }
  0x67   : > { %1305 = vmatprep.subr.bf16.mxu1 %v1867_v55  ;;  %v367_v53 = vmax.f32 %v351_v48, 0.0  ;;  %v369_v55 = vmax.f32 %v353_v12, 0.0 }
  0x68   : > { %1179 = vmatmul.mubr.bf16.vlgmr.msra.gmra.mxu0 %v2274_v56 }
  0x69   : > { %1232 = vmatmul.mubr.bf16.vlgmr.msra.gmra.mxu1 %v2276_v57  ;;  %1253 = vmatpush1.bf16.msra.mxu0 %v1862_v58  ;;  %v348_v58 = vadd.f32 %v2244_v23, %v310_v47  ;;  %v2336_v13 = vpack.c.bf16 %v367_v53, %v363_v49  ;;  %v1904_v23 = vld [vmem:[%s2146_s6 + $0x8] ss:$16 sps:$4 sm:$0xff]  }
  0x6a   : > { %1306 = vmatpush1.bf16.msra.mxu1 %v1865_v59  ;;  %1254 = vmatprep.subr.bf16.mxu0 %v1870_v62  ;;  %v1901_v59 = vld [vmem:[%s2146_s6 + $0x228] ss:$16 sps:$4 sm:$0xff]   ;;  %v366_v62 = vmax.f32 %v350_v50, 0.0 }
  0x6b   : > { %1307 = vmatprep.subr.bf16.mxu1 %v1873_v63  ;;  %v1909_v63 = vld [vmem:[%s2146_s6 + $0x20c] ss:$16 sps:$4 sm:$0xff]   ;;  %1188 = vmatprep.mubr.bf16.mxu0 %v2336_v13 }
  0x6d   : > { %1255 = vmatpush1.bf16.msra.mxu0 %v1868_v0  ;;  %v2338_v0 = vpack.c.bf16 %v369_v55, %v365_v54 }
  0x6e   : > { %1308 = vmatpush1.bf16.msra.mxu1 %v1871_v1  ;;  %1256 = vmatprep.subr.bf16.mxu0 %v1876_v2  ;;  %v364_v1 = vmax.f32 %v348_v58, 0.0  ;;  %v2340_v2 = vpack.c.bf16 %v366_v62, %v362_v51 }
  0x6f   : > { %1309 = vmatprep.subr.bf16.mxu1 %v1879_v3  ;;  %v368_v3 = vmax.f32 %v352_v9, 0.0  ;;  %1241 = vmatprep.mubr.bf16.mxu1 %v2338_v0 }
  0x70   : > { %1189 = vmatmul.mubr.bf16.gmra.mxu0 %v2340_v2 }
  0x71   : > { %1257 = vmatpush1.bf16.msra.mxu0 %v1874_v4  ;;  %v1907_v4 = vld [vmem:[%s2146_s6 + $0x208] ss:$16 sps:$4 sm:$0xff]   ;;  %1284 = vmatprep.mubr.bf16.mxu0 %v2254_v34 }
  0x72   : > { %1310 = vmatpush1.bf16.msra.mxu1 %v1877_v5  ;;  %1258 = vmatprep.subr.bf16.mxu0 %v1882_v6  ;;  %v2346_v5 = vpack.c.bf16 %v368_v3, %v364_v1  ;;  %v1912_v6 = vld [vmem:[%s2146_s6 + $0x1ec] ss:$16 sps:$4 sm:$0xff]   ;;  %v1919_v34 = vld [vmem:[%s2146_s6 + $0x3c8] ss:$16 sps:$4 sm:$0xff]  }
  0x73   : > { %1311 = vmatprep.subr.bf16.mxu1 %v1885_v7  ;;  %v1915_v7 = vld [vmem:[%s2146_s6 + $0x3ec] ss:$16 sps:$4 sm:$0xff]  }
  0x74   : > { %1242 = vmatmul.mubr.bf16.gmra.mxu1 %v2346_v5 }
  0x75   : > { %1259 = vmatpush1.bf16.msra.mxu0 %v1880_v10  ;;  %1337 = vmatprep.mubr.bf16.mxu1 %v2261_v41  ;;  %v1910_v10 = vld [vmem:[%s2146_s6 + $0x1e8] ss:$16 sps:$4 sm:$0xff]   ;;  %v1924_v41 = vld [vmem:[%s2146_s6 + $0x1ac] ss:$16 sps:$4 sm:$0xff]  }
  0x76   : > { %1312 = vmatpush1.bf16.msra.mxu1 %v1883_v11  ;;  %1260 = vmatprep.subr.bf16.mxu0 %v1888_v14  ;;  %v1913_v11 = vld [vmem:[%s2146_s6 + $0x3e8] ss:$16 sps:$4 sm:$0xff]   ;;  %v1918_v14 = vld [vmem:[%s2146_s6 + $0x1cc] ss:$16 sps:$4 sm:$0xff]  }
  0x77   : > { %1313 = vmatprep.subr.bf16.mxu1 %v1891_v15  ;;  %v1921_v15 = vld [vmem:[%s2146_s6 + $0x3cc] ss:$16 sps:$4 sm:$0xff]  }
  0x79   : > { %1261 = vmatpush1.bf16.msra.mxu0 %v1886_v16  ;;  %v1916_v16 = vld [vmem:[%s2146_s6 + $0x1c8] ss:$16 sps:$4 sm:$0xff]  }
  0x7a   : > { %1314 = vmatpush1.bf16.msra.mxu1 %v1889_v17  ;;  %1262 = vmatprep.subr.bf16.mxu0 %v1894_v18  ;;  %v1927_v17 = vld [vmem:[%s2146_s6 + $0x3ac] ss:$16 sps:$4 sm:$0xff]   ;;  %v1922_v18 = vld [vmem:[%s2146_s6 + $0x1a8] ss:$16 sps:$4 sm:$0xff]  }
  0x7b   : > { %1315 = vmatprep.subr.bf16.mxu1 %v1897_v27  ;;  %v1939_v27 = vld [vmem:[%s2146_s6 + $0x36c] ss:$16 sps:$4 sm:$0xff]  }
  0x7d   : > { %1263 = vmatpush1.bf16.msra.mxu0 %v1892_v37  ;;  %v1946_v37 = vld [vmem:[%s2146_s6 + $0x128] ss:$16 sps:$4 sm:$0xff]  }
  0x7e   : > { %1316 = vmatpush1.bf16.msra.mxu1 %v1895_v43  ;;  %1264 = vmatprep.subr.bf16.mxu0 %v1900_v44  ;;  %v1955_v43 = vld [vmem:[%s2146_s6 + $0x308] ss:$16 sps:$4 sm:$0xff]   ;;  %s1556_s6 = sshll.u32 %s2142_s29, 6  ;;  %s1707_s29 = sshll.u32 (%p2117_p9), %s2028_s18, 4 }
  0x7f   : > { %1317 = vmatprep.subr.bf16.mxu1 %v1903_v60  ;;  %s2391_s10 = scalar_lea.vmem [#allocation4], %s1556_s6  ;;  %s1426_s13 = scalar_lea.vmem (%p2117_p9), %s2437_s4, %s1707_s29 }
  0x81   : > { %1265 = vmatpush1.bf16.msra.mxu0 %v1898_v61 }
  0x82   : > { %1318 = vmatpush1.bf16.msra.mxu1 %v1901_v59  ;;  %1266 = vmatprep.subr.bf16.mxu0 %v1906_v22 }
  0x83   : > { %1319 = vmatprep.subr.bf16.mxu1 %v1909_v63 }
  0x85   : > { %1267 = vmatpush1.bf16.msra.mxu0 %v1904_v23 }
  0x86   : > { %1320 = vmatpush1.bf16.msra.mxu1 %v1907_v4  ;;  %1268 = vmatprep.subr.bf16.mxu0 %v1912_v6 }
  0x87   : > { %1321 = vmatprep.subr.bf16.mxu1 %v1915_v7 }
  0x89   : > { %1269 = vmatpush2.bf16.msra.mxu0 %v1910_v10 }
  0x8a   : > { %1322 = vmatpush2.bf16.msra.mxu1 %v1913_v11  ;;  %1270 = vmatprep.subr.bf16.mxu0 %v1918_v14 }
  0x8b   : > { %1323 = vmatprep.subr.bf16.mxu1 %v1921_v15 }
  0x8d   : > { %1271 = vmatpush2.bf16.msra.mxu0 %v1916_v16 }
  0x8e   : > { %1324 = vmatpush2.bf16.msra.mxu1 %v1919_v34  ;;  %1272 = vmatprep.subr.bf16.mxu0 %v1924_v41 }
  0x8f   : > { %1325 = vmatprep.subr.bf16.mxu1 %v1927_v17 }
  0x91   : > { %1273 = vmatpush2.bf16.msra.mxu0 %v1922_v18 }
  0x92   : > { %1326 = vmatpush2.bf16.msra.mxu1 %v1925_v19  ;;  %1274 = vmatprep.subr.bf16.mxu0 %v1930_v20 }
  0x93   : > { %1327 = vmatprep.subr.bf16.mxu1 %v1933_v21 }
  0x95   : > { %1275 = vmatpush2.bf16.msra.mxu0 %v1928_v24 }
  0x96   : > { %1328 = vmatpush2.bf16.msra.mxu1 %v1931_v25  ;;  %1276 = vmatprep.subr.bf16.mxu0 %v1936_v26 }
  0x97   : > { %1329 = vmatprep.subr.bf16.mxu1 %v1939_v27 }
  0x99   : > { %1277 = vmatpush2.bf16.msra.mxu0 %v1934_v28 }
  0x9a   : > { %1330 = vmatpush2.bf16.msra.mxu1 %v1937_v29  ;;  %1278 = vmatprep.subr.bf16.mxu0 %v1942_v30 }
  0x9b   : > { %1331 = vmatprep.subr.bf16.mxu1 %v1945_v31 }
  0x9d   : > { %1279 = vmatpush2.bf16.msra.mxu0 %v1940_v32 }
  0x9e   : > { %1332 = vmatpush2.bf16.msra.mxu1 %v1943_v33  ;;  %1280 = vmatprep.subr.bf16.mxu0 %v1948_v35 }
  0x9f   : > { %1333 = vmatprep.subr.bf16.mxu1 %v1951_v36 }
  0xa1   : > { %1281 = vmatpush2.bf16.msra.mxu0 %v1946_v37 }
  0xa2   : > { %1334 = vmatpush2.bf16.msra.mxu1 %v1949_v38  ;;  %1282 = vmatprep.subr.bf16.mxu0 %v1954_v39 }
  0xa3   : > { %1335 = vmatprep.subr.bf16.mxu1 %v1957_v40 }
  0xa5   : > { %1283 = vmatpush2.bf16.msra.mxu0 %v1952_v42 }
  0xa6   : > { %1336 = vmatpush2.bf16.msra.mxu1 %v1955_v43 }
  0xa8   : > { %1285 = vmatmul.mubr.bf16.vlgmr.msra.gmra.mxu0 %v2274_v56 }
  0xa9   : > { %1338 = vmatmul.mubr.bf16.vlgmr.msra.gmra.mxu1 %v2276_v57  ;;  %1294 = vmatprep.mubr.bf16.mxu0 %v2336_v13 }
  0xaa   : > { %1347 = vmatprep.mubr.bf16.mxu1 %v2338_v0 }
  0xb0   : > { %1295 = vmatmul.mubr.bf16.gmra.mxu0 %v2340_v2 }
  0xb1   : > { %1348 = vmatmul.mubr.bf16.gmra.mxu1 %v2346_v5 }
 0x128   : > { %v1180_v44 = vpop.f32.mrf.mxu0 }
 0x129   : > { %v1233_v45 = vpop.f32.mrf.mxu1 }
 0x12a   : > { %v1234_v46 = vadd.f32 %v1233_v45, %v1180_v44  ;;  %v1182_v47 = vpop.f32.mrf.mxu0 }
 0x12b   : > { %v1235_v60 = vpop.f32.mrf.mxu1 }
 0x12c   : > { %v1236_v48 = vadd.f32 %v1235_v60, %v1182_v47  ;;  %v1184_v8 = vpop.f32.mrf.mxu0 }
 0x12d   : > { %v1237_v12 = vpop.f32.mrf.mxu1 }
 0x12e   : > { %v1699_v56 = vpack.c.bf16 %v1236_v48, %v1234_v46  ;;  %v1186_v49 = vpop.f32.mrf.mxu0  ;;  %v1238_v50 = vadd.f32 %v1237_v12, %v1184_v8 }
 0x12f   : > { %v1239_v57 = vpop.f32.mrf.mxu1 }
 0x130   : > { %1406 = vst [vmem:[%s2391_s10] sm:$0xff] %v1699_v56  ;;  %v1240_v51 = vadd.f32 %v1239_v57, %v1186_v49  ;;  %v1190_v53 = vpop.f32.mrf.mxu0 }
 0x132   : > { %v1701_v52 = vpack.c.bf16 %v1240_v51, %v1238_v50  ;;  %v1192_v58 = vpop.f32.mrf.mxu0 }
 0x134   : > { %1408 = vst [vmem:[%s2391_s10 + $0x10] sm:$0xff] %v1701_v52  ;;  %v1243_v54 = vpop.f32.mrf.mxu1  ;;  %v1194_v62 = vpop.f32.mrf.mxu0 }
 0x135   : > { %v1244_v55 = vadd.f32 %v1243_v54, %v1190_v53 }
 0x136   : > { %v1245_v61 = vpop.f32.mrf.mxu1  ;;  %v1196_v13 = vpop.f32.mrf.mxu0 }
 0x137   : > { %v1246_v59 = vadd.f32 %v1245_v61, %v1192_v58  ;;  %v1439_v35 = vld [vmem:[%s2391_s10] sm:$0xff] (%p2117_p9) }
 0x138   : > { %v1247_v9 = vpop.f32.mrf.mxu1  ;;  %1440 = vst [vmem:[%s1426_s13] sm:$0xff] (%p2117_p9), %v1439_v35 }
 0x139   : > { %v1703_v22 = vpack.c.bf16 %v1246_v59, %v1244_v55  ;;  %v1248_v63 = vadd.f32 %v1247_v9, %v1194_v62 }
 0x13a   : > { %v1249_v0 = vpop.f32.mrf.mxu1 }
 0x13b   : > { %1410 = vst [vmem:[%s2391_s10 + $0x20] sm:$0xff] %v1703_v22  ;;  %v1250_v1 = vadd.f32 %v1249_v0, %v1196_v13  ;;  %v1443_v37 = vld [vmem:[%s2391_s10 + $0x10] sm:$0xff] (%p2117_p9) }
 0x13c   : > { %1444 = vst [vmem:[%s1426_s13 + $0x80] sm:$0xff] (%p2117_p9), %v1443_v37 }
 0x13d   : > { %v1705_v2 = vpack.c.bf16 %v1250_v1, %v1248_v63 }
 0x13f   : > { %1412 = vst [vmem:[%s2391_s10 + $0x30] sm:$0xff] %v1705_v2 }
 0x142   : > { %v1447_v39 = vld [vmem:[%s2391_s10 + $0x20] sm:$0xff] (%p2117_p9) }
 0x143   : > { %1448 = vst [vmem:[%s1426_s13 + $0x100] sm:$0xff] (%p2117_p9), %v1447_v39 }
 0x146   : > { %v1451_v42 = vld [vmem:[%s2391_s10 + $0x30] sm:$0xff] (%p2117_p9) }
 0x147   : > { %1452 = vst [vmem:[%s1426_s13 + $0x180] sm:$0xff] (%p2117_p9), %v1451_v42 }
 0x168   : > { %v1286_v3 = vpop.f32.mrf.mxu0 }
 0x169   : > { %v1339_v23 = vpop.f32.mrf.mxu1 }
 0x16a   : > { %v1288_v4 = vpop.f32.mrf.mxu0  ;;  %v1340_v6 = vadd.f32 %v1339_v23, %v1286_v3 }
 0x16b   : > { %v1341_v5 = vpop.f32.mrf.mxu1 }
 0x16c   : > { %v1342_v7 = vadd.f32 %v1341_v5, %v1288_v4  ;;  %v1290_v10 = vpop.f32.mrf.mxu0 }
 0x16d   : > { %v1343_v11 = vpop.f32.mrf.mxu1 }
 0x16e   : > { %v1700_v14 = vpack.c.bf16 %v1342_v7, %v1340_v6  ;;  %v1292_v15 = vpop.f32.mrf.mxu0  ;;  %v1344_v34 = vadd.f32 %v1343_v11, %v1290_v10 }
 0x16f   : > { %v1345_v16 = vpop.f32.mrf.mxu1 }
 0x170   : > { %1407 = vst [vmem:[%s2391_s10 + $0x8] sm:$0xff] %v1700_v14  ;;  %v1346_v41 = vadd.f32 %v1345_v16, %v1292_v15  ;;  %v1296_v17 = vpop.f32.mrf.mxu0 }
 0x171   : > { %v1349_v18 = vpop.f32.mrf.mxu1 }
 0x172   : > { %v1702_v19 = vpack.c.bf16 %v1346_v41, %v1344_v34  ;;  %v1298_v20 = vpop.f32.mrf.mxu0  ;;  %v1350_v24 = vadd.f32 %v1349_v18, %v1296_v17 }
 0x173   : > { %v1351_v21 = vpop.f32.mrf.mxu1 }
 0x174   : > { %1409 = vst [vmem:[%s2391_s10 + $0x18] sm:$0xff] %v1702_v19  ;;  %v1352_v25 = vadd.f32 %v1351_v21, %v1298_v20  ;;  %v1300_v26 = vpop.f32.mrf.mxu0 }
 0x175   : > { %v1353_v27 = vpop.f32.mrf.mxu1 }
 0x176   : > { %v1704_v28 = vpack.c.bf16 %v1352_v25, %v1350_v24  ;;  %v1302_v29 = vpop.f32.mrf.mxu0  ;;  %v1354_v31 = vadd.f32 %v1353_v27, %v1300_v26 }
 0x177   : > { %v1355_v30 = vpop.f32.mrf.mxu1  ;;  %v1441_v36 = vld [vmem:[%s2391_s10 + $0x8] sm:$0xff] (%p2117_p9) }
 0x178   : > { %1411 = vst [vmem:[%s2391_s10 + $0x28] sm:$0xff] %v1704_v28  ;;  %v1356_v32 = vadd.f32 %v1355_v30, %v1302_v29  ;;  %1420 = sbr.rel (!%p2117_p9) target bundleno = 389 (0x185), region = 44  ;;  %1442 = vst [vmem:[%s1426_s13 + $0x8] sm:$0xff] (%p2117_p9), %v1441_v36 }
 0x17a   : > { %v1706_v33 = vpack.c.bf16 %v1356_v32, %v1354_v31 }
 0x17b   : > { %v1445_v38 = vld [vmem:[%s2391_s10 + $0x18] sm:$0xff] (%p2117_p9) }
 0x17c   : > { %1413 = vst [vmem:[%s2391_s10 + $0x38] sm:$0xff] %v1706_v33  ;;  %1446 = vst [vmem:[%s1426_s13 + $0x88] sm:$0xff] (%p2117_p9), %v1445_v38 }
 0x17f   : > { %v1449_v40 = vld [vmem:[%s2391_s10 + $0x28] sm:$0xff] }
 0x180   : > { %1450 = vst [vmem:[%s1426_s13 + $0x108] sm:$0xff] %v1449_v40 }
 0x183   : > { %v1453_v43 = vld [vmem:[%s2391_s10 + $0x38] sm:$0xff] }
 0x184   : > { %1454 = vst [vmem:[%s1426_s13 + $0x188] sm:$0xff] %v1453_v43 }
 0x185 PF: > { %s17_s20 = sadd.s32 1, %s2036_s20   ;;  %s2442_s15 = smov %s2020_s16 }
 0x186   : > { %p14_p8 = scmp.ge.s32.totalorder %s17_s20, 10   ;;  %s2443_s16 = smov %s2024_s17 }
 0x187   : > { %s2444_s17 = smov %s2115_s27  ;;  %s2445_s18 = smov %s2032_s19 }
 0x188   : > { %s2446_s19 = smov %s2448_s22  ;;  %16 = sbr.rel (!%p14_p8) target bundleno = 4 (0x4), region = 102 }
 0x18d   :  { %1470 = vsyncpa [#allocation3], 1 }
 0x18e   :  { %1472 = vsyncpa [#allocation3 + $0x1], 1 }

// kernel: acgan_generator_forward.13
= control target key start
LH: loop header
LB: loop body
LE: loop exit
PB: predicated region body
PF: predicated region fallthrough
CT: control target
= control target key end

     0   :  { %v20_v0 = vlaneseq  ;;  %v299_v2 = vmov 0.0   ;;  %s405_s0 = inlined_call_operand.vmem [shape: bf16[128,256], index: 0, kind: input, shape index: {}]   ;;  %s406_s1 = inlined_call_operand.vmem [shape: f32[1,256], index: 1, kind: input, shape index: {}]   ;;  %s407_s2 = inlined_call_operand.vmem [shape: f32[1,256], index: 2, kind: input, shape index: {}]   ;;  %s408_s3 = inlined_call_operand.vmem [shape: f32[1,256], index: 3, kind: output, shape index: {0}]   ;;  %s409_s4 = inlined_call_operand.vmem [shape: f32[1,256], index: 4, kind: output, shape index: {1}]  }
   0x1   :  { %v26_v3 = vld [vmem:[%s405_s0] sm:$0xff]  ;;  %v27_v4 = vld [vmem:[%s405_s0 + $0x8] sm:$0xff]  ;;  %v28_v5 = vld [vmem:[%s405_s0 + $0x10] sm:$0xff] }
   0x2   :  { %vm328_vm0 = vcmp.lt.s32.totalorder %v20_v0, 256  ;;  %v42_v6 = vunpack.c.l.bf16 %v26_v3  ;;  %v43_v7 = vunpack.c.h.bf16 %v26_v3  ;;  %v44_v8 = vunpack.c.l.bf16 %v27_v4  ;;  %v29_v10 = vld [vmem:[%s405_s0 + $0x18] sm:$0xff]  ;;  %v30_v13 = vld [vmem:[%s405_s0 + $0x20] sm:$0xff]  ;;  %v31_v18 = vld [vmem:[%s405_s0 + $0x28] sm:$0xff] }
   0x3   :  { %24 = vst.msk [vmem:[#allocation2] sm:$0x3] %vm328_vm0, %v299_v2  ;;  %25 = vst.msk [vmem:[#allocation3] sm:$0x3] %vm328_vm0, %v299_v2  ;;  %v45_v9 = vunpack.c.h.bf16 %v27_v4  ;;  %v46_v11 = vunpack.c.l.bf16 %v28_v5  ;;  %v47_v12 = vunpack.c.h.bf16 %v28_v5  ;;  %v48_v14 = vunpack.c.l.bf16 %v29_v10  ;;  %v32_v23 = vld [vmem:[%s405_s0 + $0x30] sm:$0xff]  ;;  %v33_v24 = vld [vmem:[%s405_s0 + $0x38] sm:$0xff] }
   0x4   :  { %v49_v15 = vunpack.c.h.bf16 %v29_v10  ;;  %v75_v16 = vadd.f32 %v44_v8, %v42_v6  ;;  %v50_v19 = vunpack.c.l.bf16 %v30_v13  ;;  %v51_v20 = vunpack.c.h.bf16 %v30_v13  ;;  %v34_v29 = vld [vmem:[%s405_s0 + $0x40] sm:$0xff]  ;;  %v35_v36 = vld [vmem:[%s405_s0 + $0x48] sm:$0xff]  ;;  %v36_v41 = vld [vmem:[%s405_s0 + $0x50] sm:$0xff] }
   0x5   :  { %v96_v17 = vadd.f32 %v45_v9, %v43_v7  ;;  %v52_v25 = vunpack.c.l.bf16 %v31_v18  ;;  %v53_v26 = vunpack.c.h.bf16 %v31_v18  ;;  %v54_v30 = vunpack.c.l.bf16 %v32_v23  ;;  %v37_v46 = vld [vmem:[%s405_s0 + $0x58] sm:$0xff]  ;;  %v38_v51 = vld [vmem:[%s405_s0 + $0x60] sm:$0xff]  ;;  %v39_v56 = vld [vmem:[%s405_s0 + $0x68] sm:$0xff] }
   0x6   :  { %v76_v21 = vadd.f32 %v75_v16, %v46_v11  ;;  %v55_v31 = vunpack.c.h.bf16 %v32_v23  ;;  %v56_v34 = vunpack.c.l.bf16 %v33_v24  ;;  %v57_v35 = vunpack.c.h.bf16 %v33_v24  ;;  %v40_v61 = vld [vmem:[%s405_s0 + $0x70] sm:$0xff] }
   0x7   :  { %v97_v22 = vadd.f32 %v96_v17, %v47_v12  ;;  %v58_v39 = vunpack.c.l.bf16 %v34_v29  ;;  %v59_v40 = vunpack.c.h.bf16 %v34_v29  ;;  %v60_v44 = vunpack.c.l.bf16 %v35_v36 }
   0x8   :  { %v77_v27 = vadd.f32 %v76_v21, %v48_v14  ;;  %v61_v45 = vunpack.c.h.bf16 %v35_v36  ;;  %267 = vmul.bf16.f32.vacc0 %v26_v3, %v26_v3  ;;  %v62_v49 = vunpack.c.l.bf16 %v36_v41 }
   0x9   :  { %v98_v28 = vadd.f32 %v97_v22, %v49_v15  ;;  %268 = vmac.bf16.f32.vacc0 %v27_v4, %v27_v4  ;;  %v63_v50 = vunpack.c.h.bf16 %v36_v41  ;;  %v64_v54 = vunpack.c.l.bf16 %v37_v46  ;;  %v41_v4 = vld [vmem:[%s405_s0 + $0x78] sm:$0xff] }
   0xa   :  { %v78_v32 = vadd.f32 %v77_v27, %v50_v19  ;;  %269 = vmac.bf16.f32.vacc0 %v28_v5, %v28_v5  ;;  %v65_v55 = vunpack.c.h.bf16 %v37_v46  ;;  %v66_v59 = vunpack.c.l.bf16 %v38_v51 }
   0xb   :  { %v99_v33 = vadd.f32 %v98_v28, %v51_v20  ;;  %270 = vmac.bf16.f32.vacc0 %v29_v10, %v29_v10  ;;  %v67_v60 = vunpack.c.h.bf16 %v38_v51  ;;  %v68_v2 = vunpack.c.l.bf16 %v39_v56 }
   0xc   :  { %v79_v37 = vadd.f32 %v78_v32, %v52_v25  ;;  %271 = vmac.bf16.f32.vacc0 %v30_v13, %v30_v13  ;;  %v69_v3 = vunpack.c.h.bf16 %v39_v56  ;;  %v70_v7 = vunpack.c.l.bf16 %v40_v61 }
   0xd   :  { %v100_v38 = vadd.f32 %v99_v33, %v53_v26  ;;  %272 = vmac.bf16.f32.vacc0 %v31_v18, %v31_v18  ;;  %v71_v8 = vunpack.c.h.bf16 %v40_v61  ;;  %v72_v11 = vunpack.c.l.bf16 %v41_v4 }
   0xe   :  { %v80_v42 = vadd.f32 %v79_v37, %v54_v30  ;;  %273 = vmac.bf16.f32.vacc0 %v32_v23, %v32_v23  ;;  %v73_v12 = vunpack.c.h.bf16 %v41_v4  ;;  %v300_v18 = vmov 1966171168  }
   0xf   :  { %v101_v43 = vadd.f32 %v100_v38, %v55_v31  ;;  %274 = vmac.bf16.f32.vacc0 %v33_v24, %v33_v24  ;;  %v121_v22 = vunpack.c.l.s4 %v300_v18  ;;  %v124_v28 = vshrl.u32 %v20_v0, 7 }
  0x10   :  { %v81_v47 = vadd.f32 %v80_v42, %v56_v34  ;;  %275 = vmac.bf16.f32.vacc0 %v34_v29, %v34_v29 }
  0x11   :  { %v102_v48 = vadd.f32 %v101_v43, %v57_v35  ;;  %276 = vmac.bf16.f32.vacc0 %v35_v36, %v35_v36  ;;  %v122_v24 = vunpack.c.0.s8 %v121_v22 }
  0x12   :  { %v82_v52 = vadd.f32 %v81_v47, %v58_v39  ;;  %277 = vmac.bf16.f32.vacc0 %v36_v41, %v36_v41 }
  0x13   :  { %v103_v53 = vadd.f32 %v102_v48, %v59_v40  ;;  %278 = vmac.bf16.f32.vacc0 %v37_v46, %v37_v46  ;;  %v125_v33 = vsub.s32 %v122_v24, %v124_v28  ;;  %v301_v40 = vmov 1935823168  }
  0x14   :  { %v83_v57 = vadd.f32 %v82_v52, %v60_v44  ;;  %279 = vmac.bf16.f32.vacc0 %v38_v51, %v38_v51  ;;  %v287_v41 = vunpack.c.l.s4 %v301_v40  ;;  %v74_v51 = vld [vmem:[#allocation2] sm:$0x3] }
  0x15   :  { %v104_v58 = vadd.f32 %v103_v53, %v61_v45  ;;  %280 = vmac.bf16.f32.vacc0 %v39_v56, %v39_v56 }
  0x16   :  { %v84_v62 = vadd.f32 %v83_v57, %v62_v49  ;;  %281 = vmac.bf16.f32.vacc0 %v40_v61, %v40_v61  ;;  %v288_v42 = vunpack.c.0.s8 %v287_v41 }
  0x17   :  { %v105_v63 = vadd.f32 %v104_v58, %v63_v50  ;;  %282 = vmac.bf16.f32.vacc0 %v41_v4, %v41_v4 }
  0x18   :  { %v85_v5 = vadd.f32 %v84_v62, %v64_v54  ;;  %v291_v43 = vsub.s32 %v288_v42, %v124_v28 }
  0x19   :  { %v106_v6 = vadd.f32 %v105_v63, %v65_v55  ;;  %v283_v36 = vmovacc.add.low.vacc0 }
  0x1a   :  { %v86_v9 = vadd.f32 %v85_v5, %v66_v59  ;;  %v284_v37 = vmovacc.add.high.vacc0 }
  0x1b   :  { %v107_v10 = vadd.f32 %v106_v6, %v67_v60 }
  0x1c   :  { %v87_v14 = vadd.f32 %v86_v9, %v68_v2  ;;  %v285_v38 = vcombine.low %v283_v36, %v284_v37  ;;  %v286_v39 = vcombine.high %v283_v36, %v284_v37  ;;  %v141_v2 = vld [vmem:[#allocation3] sm:$0x3] }
  0x1d   :  { %v108_v15 = vadd.f32 %v107_v10, %v69_v3 }
  0x1e   :  { %v88_v13 = vadd.f32 %v87_v14, %v70_v7  ;;  %v292_v0 = vrot.slane %v285_v38, %v291_v43  ;;  %v298_v44 = vrot.slane %v286_v39, %v291_v43  ;;  %v246_v14 = vld [vmem:[%s406_s1] sm:$0x3] }
  0x1f   :  { %v109_v16 = vadd.f32 %v108_v15, %v71_v8 }
  0x20   :  { %v89_v17 = vadd.f32 %v88_v13, %v72_v11  ;;  %v189_v46 = vrot.slane %v292_v0, 4  ;;  %v210_v47 = vrot.slane %v298_v44, 4 }
  0x21   :  { %v110_v19 = vadd.f32 %v109_v16, %v73_v12  ;;  %v251_v16 = vld [vmem:[%s407_s2] sm:$0x3] }
  0x22   :  { %v90_v20 = vrot.slane %v89_v17, 4  ;;  %v190_v49 = vadd.f32 %v292_v0, %v189_v46  ;;  %v211_v50 = vadd.f32 %v298_v44, %v210_v47 }
  0x23   :  { %v111_v21 = vrot.slane %v110_v19, 4 }
  0x24   :  { %v91_v25 = vadd.f32 %v90_v20, %v89_v17  ;;  %v191_v53 = vrot.slane %v190_v49, 2  ;;  %v212_v54 = vrot.slane %v211_v50, 2 }
  0x25   :  { %v112_v26 = vadd.f32 %v111_v21, %v110_v19 }
  0x26   :  { %v92_v23 = vrot.slane %v91_v25, 2  ;;  %v192_v56 = vadd.f32 %v191_v53, %v190_v49  ;;  %v213_v57 = vadd.f32 %v212_v54, %v211_v50 }
  0x27   :  { %v113_v27 = vrot.slane %v112_v26, 2 }
  0x28   :  { %v93_v30 = vadd.f32 %v92_v23, %v91_v25  ;;  %v193_v58 = vrot.slane %v192_v56, 1  ;;  %v214_v59 = vrot.slane %v213_v57, 1 }
  0x29   :  { %v114_v31 = vadd.f32 %v113_v27, %v112_v26 }
  0x2a   :  { %v94_v29 = vrot.slane %v93_v30, 1  ;;  %v194_v60 = vadd.f32 %v193_v58, %v192_v56  ;;  %v215_v61 = vadd.f32 %v214_v59, %v213_v57 }
  0x2b   :  { %v115_v32 = vrot.slane %v114_v31, 1 }
  0x2c   :  { %v95_v34 = vadd.f32 %v94_v29, %v93_v30  ;;  %v218_v62 = vcombine.low %v194_v60, %v215_v61 }
  0x2d   :  { %v116_v35 = vadd.f32 %v115_v32, %v114_v31 }
  0x2e   :  { %v225_v63 = vrot.slane %v218_v62, %v125_v33 }
  0x2f   :  { %v119_v45 = vcombine.low %v95_v34, %v116_v35 }
  0x30   :  { %v232_v3 = vrot.slane %v225_v63, %v125_v33 }
  0x31   :  { %v126_v48 = vrot.slane %v119_v45, %v125_v33 }
  0x32   :  { %v234_v4 = vadd.f32 %v232_v3, %v141_v2 }
  0x33   :  { %v133_v52 = vrot.slane %v126_v48, %v125_v33 }
  0x34   :  { %235 = vst.msk [vmem:[#allocation3] sm:$0x3] %vm328_vm0, %v234_v4 }
  0x35   :  { %v135_v55 = vadd.f32 %v133_v52, %v74_v51 }
  0x37   :  { %140 = vst.msk [vmem:[#allocation2] sm:$0x3] %vm328_vm0, %v135_v55 }
  0x3b   :  { %v241_v8 = vld [vmem:[#allocation3] sm:$0x3] }
  0x3c   :  { %v242_v9 = vmul.f32 0.0078125, %v241_v8 }
  0x3e   :  { %v239_v5 = vld [vmem:[#allocation2] sm:$0x3] }
  0x3f   :  { %v240_v6 = vmul.f32 0.0078125, %v239_v5 }
  0x41   :  { %v243_v7 = vmul.f32 %v240_v6, %v240_v6 }
  0x43   :  { %v244_v10 = vsub.f32 %v242_v9, %v243_v7 }
  0x45   :  { %v245_v11 = vmax.f32 %v244_v10, 0.0 }
  0x47   :  { %v247_v12 = vadd.f32 1e-05, %v245_v11 }
  0x49   :  { %265 = vrsqrt.f32 %v247_v12 }
  0x56   :  { %v266_v15 = vpop.eup %265 }
  0x57   :  { %v249_v13 = vmul.f32 %v266_v15, %v246_v14 }
  0x59   :  { %250 = vst.msk [vmem:[%s408_s3] sm:$0x3] %vm328_vm0, %v249_v13  ;;  %v252_v17 = vmul.f32 %v249_v13, %v240_v6 }
  0x5b   :  { %v253_v19 = vsub.f32 %v251_v16, %v252_v17 }
  0x5d   :  { %254 = vst.msk [vmem:[%s409_s4] sm:$0x3] %vm328_vm0, %v253_v19 }

// kernel: acgan_generator_forward.14
= control target key start
LH: loop header
LB: loop body
LE: loop exit
PB: predicated region body
PF: predicated region fallthrough
CT: control target
= control target key end

     0   :  { %s1920_s15 = smov 0   ;;  %s1922_s16 = smov 0   ;;  %s2519_s0 = inlined_call_operand.vmem [shape: f32[1,256], index: 0, kind: input, shape index: {}]   ;;  %s2520_s1 = inlined_call_operand.vmem [shape: f32[1,256], index: 1, kind: input, shape index: {}]   ;;  %s2521_s2 = inlined_call_operand.vmem [shape: bf16[128,256], index: 2, kind: input, shape index: {}]   ;;  %s2522_s3 = inlined_call_operand.vmem [shape: bf16[256,2048], index: 3, kind: input, shape index: {}]   ;;  %s2523_s4 = inlined_call_operand.vmem [shape: bf16[128,2048], index: 4, kind: output, shape index: {}]  }
   0x1   :  { %s1924_s17 = smov 0   ;;  %s1926_s18 = smov 0  }
   0x2   :  { %s1928_s19 = smov 0  }
   0x3 LB: > { %s23_s20 = sadd.s32 1, %s1889_s18  ;;  %s1573_s21 = sadd.s32 4294967295, %s1893_s19   ;;  %s1893_s19 = sphi %s1928_s19, %s14_s19   ;;  %s1889_s18 = sphi %s1926_s18, %s2528_s18   ;;  %s1885_s17 = sphi %s1924_s17, %s2527_s17   ;;  %s1881_s16 = sphi %s1922_s16, %s2526_s16   ;;  %s1877_s15 = sphi %s1920_s15, %s2525_s15  }
   0x4   : > { %p24_p0 = scmp.ge.s32.totalorder %s23_s20, 4  ;;  %p108_p1 = scmp.ne.s32.totalorder %s1881_s16, %s1877_s15 }
   0x5   : > { %p109_p2 = scmp.eq.s32.totalorder %s1893_s19, 0  ;;  %p140_p4 = scmp.eq.s32.totalorder %s1573_s21, 3 }
   0x6   : > { %s2530_s20 = smov (%p24_p0, %s23_s20), 0  ;;  %s101_s23 = sadd.s32 1, %s1881_s16 }
   0x7   : > { %p110_p3 = por %p109_p2, %p108_p1  ;;  %s98_s22 = ssub.s32 %s1889_s18, %s2530_s20 }
   0x8   : > { %p99_p5 = scmp.eq.s32.totalorder %s98_s22, 0  ;;  %p1955_p6 = por %p140_p4, %p108_p1 }
   0x9   : > { %p1577_p7 = scmp.ge.s32.totalorder %s1893_s19, 4 }
   0xa   : > { %s1960_s25 = scalar_select %p99_p5, %s1881_s16, %s101_s23  }
   0xb   : > { %178 = sbr.rel (%p1577_p7) target bundleno = 52 (0x34), region = 28 }
  0x10   : > { %181 = sbr.rel (!%p110_p3) target bundleno = 52 (0x34), region = 32  ;;  %s183_s26 = sand.u32 (%p110_p3), 1, %s1881_s16  }
  0x11   : > { %s1685_s27 = sshll.u32 (%p110_p3), %s1889_s18, 4  ;;  %s1578_s28 = sshll.u32 (%p110_p3), %s183_s26, 9 }
  0x12   : > { %s1968_s5 = scalar_lea.vmem (%p110_p3), %s2522_s3, %s1685_s27  ;;  %s1973_s6 = scalar_lea.vmem (%p110_p3), [#allocation2], %s1578_s28 }
  0x13   : > { %v201_v0 = vld [vmem:[%s1968_s5] sm:$0xff] (%p110_p3)  ;;  %v203_v1 = vld [vmem:[%s1968_s5 + $0x8] sm:$0xff] (%p110_p3) }
  0x14   : > { %v205_v2 = vld [vmem:[%s1968_s5 + $0x40] sm:$0xff] (%p110_p3)  ;;  %202 = vst [vmem:[%s1973_s6] sm:$0xff] (%p110_p3), %v201_v0  ;;  %204 = vst [vmem:[%s1973_s6 + $0x8] sm:$0xff] (%p110_p3), %v203_v1  ;;  %v207_v3 = vld [vmem:[%s1968_s5 + $0x48] sm:$0xff] (%p110_p3) }
  0x15   : > { %206 = vst [vmem:[%s1973_s6 + $0x10] sm:$0xff] %v205_v2  ;;  %v209_v4 = vld [vmem:[%s1968_s5 + $0x80] sm:$0xff]  ;;  %v211_v5 = vld [vmem:[%s1968_s5 + $0x88] sm:$0xff]  ;;  %208 = vst [vmem:[%s1973_s6 + $0x18] sm:$0xff] %v207_v3 }
  0x16   : > { %210 = vst [vmem:[%s1973_s6 + $0x20] sm:$0xff] %v209_v4  ;;  %212 = vst [vmem:[%s1973_s6 + $0x28] sm:$0xff] %v211_v5  ;;  %v213_v6 = vld [vmem:[%s1968_s5 + $0xc0] sm:$0xff]  ;;  %v215_v7 = vld [vmem:[%s1968_s5 + $0xc8] sm:$0xff] }
  0x17   : > { %v217_v8 = vld [vmem:[%s1968_s5 + $0x100] sm:$0xff]  ;;  %214 = vst [vmem:[%s1973_s6 + $0x30] sm:$0xff] %v213_v6  ;;  %216 = vst [vmem:[%s1973_s6 + $0x38] sm:$0xff] %v215_v7  ;;  %v219_v9 = vld [vmem:[%s1968_s5 + $0x108] sm:$0xff] }
  0x18   : > { %218 = vst [vmem:[%s1973_s6 + $0x40] sm:$0xff] %v217_v8  ;;  %v221_v10 = vld [vmem:[%s1968_s5 + $0x140] sm:$0xff]  ;;  %v223_v11 = vld [vmem:[%s1968_s5 + $0x148] sm:$0xff]  ;;  %220 = vst [vmem:[%s1973_s6 + $0x48] sm:$0xff] %v219_v9 }
  0x19   : > { %222 = vst [vmem:[%s1973_s6 + $0x50] sm:$0xff] %v221_v10  ;;  %224 = vst [vmem:[%s1973_s6 + $0x58] sm:$0xff] %v223_v11  ;;  %v225_v12 = vld [vmem:[%s1968_s5 + $0x180] sm:$0xff]  ;;  %v227_v13 = vld [vmem:[%s1968_s5 + $0x188] sm:$0xff] }
  0x1a   : > { %v229_v14 = vld [vmem:[%s1968_s5 + $0x1c0] sm:$0xff]  ;;  %226 = vst [vmem:[%s1973_s6 + $0x60] sm:$0xff] %v225_v12  ;;  %228 = vst [vmem:[%s1973_s6 + $0x68] sm:$0xff] %v227_v13  ;;  %v231_v15 = vld [vmem:[%s1968_s5 + $0x1c8] sm:$0xff] }
  0x1b   : > { %230 = vst [vmem:[%s1973_s6 + $0x70] sm:$0xff] %v229_v14  ;;  %v233_v16 = vld [vmem:[%s1968_s5 + $0x200] sm:$0xff]  ;;  %v235_v17 = vld [vmem:[%s1968_s5 + $0x208] sm:$0xff]  ;;  %232 = vst [vmem:[%s1973_s6 + $0x78] sm:$0xff] %v231_v15 }
  0x1c   : > { %234 = vst [vmem:[%s1973_s6 + $0x80] sm:$0xff] %v233_v16  ;;  %236 = vst [vmem:[%s1973_s6 + $0x88] sm:$0xff] %v235_v17  ;;  %v237_v18 = vld [vmem:[%s1968_s5 + $0x240] sm:$0xff]  ;;  %v239_v19 = vld [vmem:[%s1968_s5 + $0x248] sm:$0xff] }
  0x1d   : > { %v241_v20 = vld [vmem:[%s1968_s5 + $0x280] sm:$0xff]  ;;  %238 = vst [vmem:[%s1973_s6 + $0x90] sm:$0xff] %v237_v18  ;;  %240 = vst [vmem:[%s1973_s6 + $0x98] sm:$0xff] %v239_v19  ;;  %v243_v21 = vld [vmem:[%s1968_s5 + $0x288] sm:$0xff] }
  0x1e   : > { %242 = vst [vmem:[%s1973_s6 + $0xa0] sm:$0xff] %v241_v20  ;;  %v245_v22 = vld [vmem:[%s1968_s5 + $0x2c0] sm:$0xff]  ;;  %v247_v23 = vld [vmem:[%s1968_s5 + $0x2c8] sm:$0xff]  ;;  %244 = vst [vmem:[%s1973_s6 + $0xa8] sm:$0xff] %v243_v21 }
  0x1f   : > { %246 = vst [vmem:[%s1973_s6 + $0xb0] sm:$0xff] %v245_v22  ;;  %248 = vst [vmem:[%s1973_s6 + $0xb8] sm:$0xff] %v247_v23  ;;  %v249_v24 = vld [vmem:[%s1968_s5 + $0x300] sm:$0xff]  ;;  %v251_v25 = vld [vmem:[%s1968_s5 + $0x308] sm:$0xff] }
  0x20   : > { %v253_v26 = vld [vmem:[%s1968_s5 + $0x340] sm:$0xff]  ;;  %250 = vst [vmem:[%s1973_s6 + $0xc0] sm:$0xff] %v249_v24  ;;  %252 = vst [vmem:[%s1973_s6 + $0xc8] sm:$0xff] %v251_v25  ;;  %v255_v27 = vld [vmem:[%s1968_s5 + $0x348] sm:$0xff] }
  0x21   : > { %254 = vst [vmem:[%s1973_s6 + $0xd0] sm:$0xff] %v253_v26  ;;  %v257_v28 = vld [vmem:[%s1968_s5 + $0x380] sm:$0xff]  ;;  %v259_v29 = vld [vmem:[%s1968_s5 + $0x388] sm:$0xff]  ;;  %256 = vst [vmem:[%s1973_s6 + $0xd8] sm:$0xff] %v255_v27 }
  0x22   : > { %258 = vst [vmem:[%s1973_s6 + $0xe0] sm:$0xff] %v257_v28  ;;  %260 = vst [vmem:[%s1973_s6 + $0xe8] sm:$0xff] %v259_v29  ;;  %v261_v30 = vld [vmem:[%s1968_s5 + $0x3c0] sm:$0xff]  ;;  %v263_v31 = vld [vmem:[%s1968_s5 + $0x3c8] sm:$0xff] }
  0x23   : > { %v265_v32 = vld [vmem:[%s1968_s5 + $0x400] sm:$0xff]  ;;  %262 = vst [vmem:[%s1973_s6 + $0xf0] sm:$0xff] %v261_v30  ;;  %264 = vst [vmem:[%s1973_s6 + $0xf8] sm:$0xff] %v263_v31  ;;  %v267_v33 = vld [vmem:[%s1968_s5 + $0x408] sm:$0xff] }
  0x24   : > { %266 = vst [vmem:[%s1973_s6 + $0x100] sm:$0xff] %v265_v32  ;;  %v269_v34 = vld [vmem:[%s1968_s5 + $0x440] sm:$0xff]  ;;  %v271_v35 = vld [vmem:[%s1968_s5 + $0x448] sm:$0xff]  ;;  %268 = vst [vmem:[%s1973_s6 + $0x108] sm:$0xff] %v267_v33 }
  0x25   : > { %270 = vst [vmem:[%s1973_s6 + $0x110] sm:$0xff] %v269_v34  ;;  %272 = vst [vmem:[%s1973_s6 + $0x118] sm:$0xff] %v271_v35  ;;  %v273_v36 = vld [vmem:[%s1968_s5 + $0x480] sm:$0xff]  ;;  %v275_v37 = vld [vmem:[%s1968_s5 + $0x488] sm:$0xff] }
  0x26   : > { %v277_v38 = vld [vmem:[%s1968_s5 + $0x4c0] sm:$0xff]  ;;  %274 = vst [vmem:[%s1973_s6 + $0x120] sm:$0xff] %v273_v36  ;;  %276 = vst [vmem:[%s1973_s6 + $0x128] sm:$0xff] %v275_v37  ;;  %v279_v39 = vld [vmem:[%s1968_s5 + $0x4c8] sm:$0xff] }
  0x27   : > { %278 = vst [vmem:[%s1973_s6 + $0x130] sm:$0xff] %v277_v38  ;;  %v281_v40 = vld [vmem:[%s1968_s5 + $0x500] sm:$0xff]  ;;  %v283_v41 = vld [vmem:[%s1968_s5 + $0x508] sm:$0xff]  ;;  %280 = vst [vmem:[%s1973_s6 + $0x138] sm:$0xff] %v279_v39 }
  0x28   : > { %282 = vst [vmem:[%s1973_s6 + $0x140] sm:$0xff] %v281_v40  ;;  %284 = vst [vmem:[%s1973_s6 + $0x148] sm:$0xff] %v283_v41  ;;  %v285_v42 = vld [vmem:[%s1968_s5 + $0x540] sm:$0xff]  ;;  %v287_v43 = vld [vmem:[%s1968_s5 + $0x548] sm:$0xff] }
  0x29   : > { %v289_v44 = vld [vmem:[%s1968_s5 + $0x580] sm:$0xff]  ;;  %286 = vst [vmem:[%s1973_s6 + $0x150] sm:$0xff] %v285_v42  ;;  %288 = vst [vmem:[%s1973_s6 + $0x158] sm:$0xff] %v287_v43  ;;  %v291_v45 = vld [vmem:[%s1968_s5 + $0x588] sm:$0xff] }
  0x2a   : > { %290 = vst [vmem:[%s1973_s6 + $0x160] sm:$0xff] %v289_v44  ;;  %v293_v46 = vld [vmem:[%s1968_s5 + $0x5c0] sm:$0xff]  ;;  %v295_v47 = vld [vmem:[%s1968_s5 + $0x5c8] sm:$0xff]  ;;  %292 = vst [vmem:[%s1973_s6 + $0x168] sm:$0xff] %v291_v45 }
  0x2b   : > { %294 = vst [vmem:[%s1973_s6 + $0x170] sm:$0xff] %v293_v46  ;;  %296 = vst [vmem:[%s1973_s6 + $0x178] sm:$0xff] %v295_v47  ;;  %v297_v48 = vld [vmem:[%s1968_s5 + $0x600] sm:$0xff]  ;;  %v299_v49 = vld [vmem:[%s1968_s5 + $0x608] sm:$0xff] }
  0x2c   : > { %v301_v50 = vld [vmem:[%s1968_s5 + $0x640] sm:$0xff]  ;;  %298 = vst [vmem:[%s1973_s6 + $0x180] sm:$0xff] %v297_v48  ;;  %300 = vst [vmem:[%s1973_s6 + $0x188] sm:$0xff] %v299_v49  ;;  %v303_v51 = vld [vmem:[%s1968_s5 + $0x648] sm:$0xff] }
  0x2d   : > { %302 = vst [vmem:[%s1973_s6 + $0x190] sm:$0xff] %v301_v50  ;;  %v305_v52 = vld [vmem:[%s1968_s5 + $0x680] sm:$0xff]  ;;  %v307_v53 = vld [vmem:[%s1968_s5 + $0x688] sm:$0xff]  ;;  %304 = vst [vmem:[%s1973_s6 + $0x198] sm:$0xff] %v303_v51 }
  0x2e   : > { %306 = vst [vmem:[%s1973_s6 + $0x1a0] sm:$0xff] %v305_v52  ;;  %308 = vst [vmem:[%s1973_s6 + $0x1a8] sm:$0xff] %v307_v53  ;;  %v309_v54 = vld [vmem:[%s1968_s5 + $0x6c0] sm:$0xff]  ;;  %v311_v55 = vld [vmem:[%s1968_s5 + $0x6c8] sm:$0xff] }
  0x2f   : > { %v313_v56 = vld [vmem:[%s1968_s5 + $0x700] sm:$0xff]  ;;  %310 = vst [vmem:[%s1973_s6 + $0x1b0] sm:$0xff] %v309_v54  ;;  %312 = vst [vmem:[%s1973_s6 + $0x1b8] sm:$0xff] %v311_v55  ;;  %v315_v57 = vld [vmem:[%s1968_s5 + $0x708] sm:$0xff] }
  0x30   : > { %314 = vst [vmem:[%s1973_s6 + $0x1c0] sm:$0xff] %v313_v56  ;;  %v317_v58 = vld [vmem:[%s1968_s5 + $0x740] sm:$0xff]  ;;  %v319_v59 = vld [vmem:[%s1968_s5 + $0x748] sm:$0xff]  ;;  %316 = vst [vmem:[%s1973_s6 + $0x1c8] sm:$0xff] %v315_v57 }
  0x31   : > { %318 = vst [vmem:[%s1973_s6 + $0x1d0] sm:$0xff] %v317_v58  ;;  %320 = vst [vmem:[%s1973_s6 + $0x1d8] sm:$0xff] %v319_v59  ;;  %v321_v60 = vld [vmem:[%s1968_s5 + $0x780] sm:$0xff]  ;;  %v323_v61 = vld [vmem:[%s1968_s5 + $0x788] sm:$0xff] }
  0x32   : > { %v325_v62 = vld [vmem:[%s1968_s5 + $0x7c0] sm:$0xff]  ;;  %322 = vst [vmem:[%s1973_s6 + $0x1e0] sm:$0xff] %v321_v60  ;;  %324 = vst [vmem:[%s1973_s6 + $0x1e8] sm:$0xff] %v323_v61  ;;  %v327_v63 = vld [vmem:[%s1968_s5 + $0x7c8] sm:$0xff] }
  0x33   : > { %326 = vst [vmem:[%s1973_s6 + $0x1f0] sm:$0xff] %v325_v62  ;;  %328 = vst [vmem:[%s1973_s6 + $0x1f8] sm:$0xff] %v327_v63 }
  0x34 PF: > { %p1581_p8 = scmp.ge.s32.totalorder %s1893_s19, 1  ;;  %p333_p9 = scmp.lt.s32.totalorder %s1893_s19, 5 }
  0x36   : > { %p334_p10 = pnand %p1581_p8, %p333_p9 }
  0x37   : > { %s340_s7 = sand.u32 (!%p334_p10), 1, %s1877_s15  }
  0x38   : > { %337 = sbr.rel (%p334_p10) target bundleno = 395 (0x18b), region = 55  ;;  %s1582_s8 = sshll.u32 (!%p334_p10), %s340_s7, 9 }
  0x39   : > { %s2127_s23 = scalar_lea.vmem (!%p334_p10), [#allocation2], %s1582_s8 }
  0x3d   : > { %v430_v0 = vlaneseq  ;;  %v2108_v1 = vld [vmem:[%s2521_s2] sm:$0xff]  ;;  %v2113_v2 = vld [vmem:[%s2521_s2 + $0x8] sm:$0xff]  ;;  %v2148_v18 = vld [vmem:[%s2521_s2 + $0x30] sm:$0xff]  ;;  %s1718_s15 = sshll.u32 (%p1955_p6), %s1885_s17, 4 }
  0x3e   : > { %v2118_v3 = vld [vmem:[%s2519_s0] sm:$0x3]  ;;  %v1759_v6 = vld [vmem:[%s2127_s23 + $0xe4] ss:$16 sps:$4 sm:$0xff]   ;;  %v1761_v7 = vld [vmem:[%s2127_s23 + $0xec] ss:$16 sps:$4 sm:$0xff]   ;;  %v397_v8 = vunpack.c.h.bf16 %v2108_v1  ;;  %v399_v9 = vunpack.c.h.bf16 %v2113_v2  ;;  %v409_v32 = vunpack.c.h.bf16 %v2148_v18  ;;  %s2441_s21 = scalar_lea.vmem (%p1955_p6), %s2523_s4, %s1718_s15 }
  0x3f   : > { %v2120_v4 = vshrl.u32 %v430_v0, 7  ;;  %v2125_v5 = vld [vmem:[%s2520_s1] sm:$0x3]  ;;  %948 = vmatprep.subr.bf16.mxu0 %v1759_v6  ;;  %v1764_v12 = vld [vmem:[%s2127_s23 + $0xe8] ss:$16 sps:$4 sm:$0xff]   ;;  %1061 = vmatprep.subr.bf16.mxu1 %v1761_v7 }
  0x40   : > { %v1763_v11 = vld [vmem:[%s2127_s23 + $0xe0] ss:$16 sps:$4 sm:$0xff]   ;;  %v1765_v13 = vld [vmem:[%s2127_s23 + $0xc4] ss:$16 sps:$4 sm:$0xff]   ;;  %1062 = vmatpush1.bf16.msra.mxu1 %v1764_v12  ;;  %v1767_v16 = vld [vmem:[%s2127_s23 + $0xcc] ss:$16 sps:$4 sm:$0xff]  }
  0x41   : > { %v436_v10 = vsub.s32 1, %v2120_v4  ;;  %949 = vmatpush1.bf16.msra.mxu0 %v1763_v11  ;;  %v1769_v17 = vld [vmem:[%s2127_s23 + $0xc0] ss:$16 sps:$4 sm:$0xff]   ;;  %v1770_v19 = vld [vmem:[%s2127_s23 + $0xc8] ss:$16 sps:$4 sm:$0xff]   ;;  %1063 = vmatprep.subr.bf16.mxu1 %v1767_v16 }
  0x42   : > { %950 = vmatprep.subr.bf16.mxu0 %v1765_v13  ;;  %v1771_v22 = vld [vmem:[%s2127_s23 + $0xa4] ss:$16 sps:$4 sm:$0xff]   ;;  %v1773_v23 = vld [vmem:[%s2127_s23 + $0xac] ss:$16 sps:$4 sm:$0xff]   ;;  %v1775_v24 = vld [vmem:[%s2127_s23 + $0xa0] ss:$16 sps:$4 sm:$0xff]  }
  0x43   : > { %v2138_v14 = vrot.slane %v2118_v3, %v436_v10  ;;  %v2141_v15 = vrot.slane %v2125_v5, %v436_v10  ;;  %v1776_v25 = vld [vmem:[%s2127_s23 + $0xa8] ss:$16 sps:$4 sm:$0xff]   ;;  %v1777_v28 = vld [vmem:[%s2127_s23 + $0x84] ss:$16 sps:$4 sm:$0xff]   ;;  %v1779_v29 = vld [vmem:[%s2127_s23 + $0x8c] ss:$16 sps:$4 sm:$0xff]  }
  0x44   : > { %1064 = vmatpush1.bf16.msra.mxu1 %v1770_v19  ;;  %v1781_v33 = vld [vmem:[%s2127_s23 + $0x80] ss:$16 sps:$4 sm:$0xff]   ;;  %v1782_v35 = vld [vmem:[%s2127_s23 + $0x88] ss:$16 sps:$4 sm:$0xff]   ;;  %v1783_v36 = vld [vmem:[%s2127_s23 + $0x64] ss:$16 sps:$4 sm:$0xff]  }
  0x45   : > { %v441_v20 = vmul.f32 %v2138_v14, %v397_v8  ;;  %v443_v21 = vmul.f32 %v2138_v14, %v399_v9  ;;  %951 = vmatpush1.bf16.msra.mxu0 %v1769_v17  ;;  %1065 = vmatprep.subr.bf16.mxu1 %v1773_v23  ;;  %v1785_v37 = vld [vmem:[%s2127_s23 + $0x6c] ss:$16 sps:$4 sm:$0xff]   ;;  %v453_v38 = vmul.f32 %v2138_v14, %v409_v32  ;;  %v1787_v39 = vld [vmem:[%s2127_s23 + $0x60] ss:$16 sps:$4 sm:$0xff]   ;;  %v1788_v40 = vld [vmem:[%s2127_s23 + $0x68] ss:$16 sps:$4 sm:$0xff]  }
  0x46   : > { %952 = vmatprep.subr.bf16.mxu0 %v1771_v22  ;;  %v1789_v42 = vld [vmem:[%s2127_s23 + $0x44] ss:$16 sps:$4 sm:$0xff]   ;;  %v1791_v43 = vld [vmem:[%s2127_s23 + $0x4c] ss:$16 sps:$4 sm:$0xff]   ;;  %v1793_v44 = vld [vmem:[%s2127_s23 + $0x40] ss:$16 sps:$4 sm:$0xff]  }
  0x47   : > { %v485_v26 = vadd.f32 %v2141_v15, %v441_v20  ;;  %v487_v27 = vadd.f32 %v2141_v15, %v443_v21  ;;  %v2170_v41 = vadd.f32 %v2141_v15, %v453_v38  ;;  %v1794_v45 = vld [vmem:[%s2127_s23 + $0x48] ss:$16 sps:$4 sm:$0xff]   ;;  %v1795_v46 = vld [vmem:[%s2127_s23 + $0x24] ss:$16 sps:$4 sm:$0xff]   ;;  %v1797_v47 = vld [vmem:[%s2127_s23 + $0x2c] ss:$16 sps:$4 sm:$0xff]  }
  0x48   : > { %1066 = vmatpush1.bf16.msra.mxu1 %v1776_v25  ;;  %v1799_v48 = vld [vmem:[%s2127_s23 + $0x20] ss:$16 sps:$4 sm:$0xff]   ;;  %v1800_v49 = vld [vmem:[%s2127_s23 + $0x28] ss:$16 sps:$4 sm:$0xff]   ;;  %v1801_v50 = vld [vmem:[%s2127_s23 + $0x4] ss:$16 sps:$4 sm:$0xff]   ;;  %v396_v25 = vunpack.c.l.bf16 %v2108_v1 }
  0x49   : > { %v517_v30 = vmax.f32 %v485_v26, 0.0  ;;  %v519_v31 = vmax.f32 %v487_v27, 0.0  ;;  %953 = vmatpush1.bf16.msra.mxu0 %v1775_v24  ;;  %1067 = vmatprep.subr.bf16.mxu1 %v1779_v29  ;;  %v1803_v51 = vld [vmem:[%s2127_s23 + $0xc] ss:$16 sps:$4 sm:$0xff]   ;;  %v1805_v52 = vld [vmem:[%s2127_s23] ss:$16 sps:$4 sm:$0xff]  }
  0x4a   : > { %954 = vmatprep.subr.bf16.mxu0 %v1777_v28  ;;  %v1806_v53 = vld [vmem:[%s2127_s23 + $0x8] ss:$16 sps:$4 sm:$0xff]   ;;  %v1807_v54 = vld [vmem:[%s2127_s23 + $0x1e4] ss:$16 sps:$4 sm:$0xff]   ;;  %v1809_v55 = vld [vmem:[%s2127_s23 + $0x1ec] ss:$16 sps:$4 sm:$0xff]  }
  0x4b   : > { %v549_v34 = vpack.c.bf16 %v519_v31, %v517_v30  ;;  %v1811_v56 = vld [vmem:[%s2127_s23 + $0x1e0] ss:$16 sps:$4 sm:$0xff]   ;;  %v1812_v57 = vld [vmem:[%s2127_s23 + $0x1e8] ss:$16 sps:$4 sm:$0xff]   ;;  %v1813_v58 = vld [vmem:[%s2127_s23 + $0x1c4] ss:$16 sps:$4 sm:$0xff]   ;;  %v398_v30 = vunpack.c.l.bf16 %v2113_v2 }
  0x4c   : > { %1068 = vmatpush1.bf16.msra.mxu1 %v1782_v35  ;;  %v1815_v59 = vld [vmem:[%s2127_s23 + $0x1cc] ss:$16 sps:$4 sm:$0xff]   ;;  %v1817_v60 = vld [vmem:[%s2127_s23 + $0x1c0] ss:$16 sps:$4 sm:$0xff]   ;;  %v1818_v61 = vld [vmem:[%s2127_s23 + $0x1c8] ss:$16 sps:$4 sm:$0xff]  }
  0x4d   : > { %980 = vmatprep.mubr.bf16.mxu0 %v549_v34  ;;  %1093 = vmatprep.mubr.bf16.mxu1 %v549_v34  ;;  %v1819_v62 = vld [vmem:[%s2127_s23 + $0x1a4] ss:$16 sps:$4 sm:$0xff]   ;;  %v1821_v63 = vld [vmem:[%s2127_s23 + $0x1ac] ss:$16 sps:$4 sm:$0xff]   ;;  %v1823_v0 = vld [vmem:[%s2127_s23 + $0x1a0] ss:$16 sps:$4 sm:$0xff]  }
  0x4e   : > { %955 = vmatpush1.bf16.msra.mxu0 %v1781_v33  ;;  %1069 = vmatprep.subr.bf16.mxu1 %v1785_v37  ;;  %v1824_v6 = vld [vmem:[%s2127_s23 + $0x1a8] ss:$16 sps:$4 sm:$0xff]   ;;  %v1825_v7 = vld [vmem:[%s2127_s23 + $0x184] ss:$16 sps:$4 sm:$0xff]   ;;  %v1827_v8 = vld [vmem:[%s2127_s23 + $0x18c] ss:$16 sps:$4 sm:$0xff]  }
  0x4f   : > { %956 = vmatprep.subr.bf16.mxu0 %v1783_v36  ;;  %v432_v9 = vsub.s32 0, %v2120_v4  ;;  %v2202_v10 = vld [vmem:[%s2521_s2 + $0x38] sm:$0xff]  ;;  %v2207_v11 = vld [vmem:[%s2521_s2 + $0x10] sm:$0xff]  ;;  %v2213_v13 = vld [vmem:[%s2521_s2 + $0x40] sm:$0xff]  ;;  %v529_v34 = vmax.f32 %v2170_v41, 0.0 }
  0x50   : > { %1070 = vmatpush1.bf16.msra.mxu1 %v1788_v40  ;;  %v411_v12 = vunpack.c.h.bf16 %v2202_v10  ;;  %v2218_v4 = vld [vmem:[%s2521_s2 + $0x48] sm:$0xff]  ;;  %v2223_v16 = vld [vmem:[%s2521_s2 + $0x50] sm:$0xff]  ;;  %v413_v20 = vunpack.c.h.bf16 %v2213_v13  ;;  %v2232_v22 = vld [vmem:[%s2521_s2 + $0x58] sm:$0xff] }
  0x51   : > { %1071 = vmatprep.subr.bf16.mxu1 %v1791_v43  ;;  %v1829_v17 = vld [vmem:[%s2127_s23 + $0x180] ss:$16 sps:$4 sm:$0xff]   ;;  %v1830_v19 = vld [vmem:[%s2127_s23 + $0x188] ss:$16 sps:$4 sm:$0xff]   ;;  %v415_v21 = vunpack.c.h.bf16 %v2218_v4  ;;  %v1831_v23 = vld [vmem:[%s2127_s23 + $0x164] ss:$16 sps:$4 sm:$0xff]   ;;  %v417_v28 = vunpack.c.h.bf16 %v2223_v16  ;;  %v419_v29 = vunpack.c.h.bf16 %v2232_v22  ;;  %v2247_v31 = vrot.slane %v2118_v3, %v432_v9 }
  0x52   : > { %957 = vmatpush1.bf16.msra.mxu0 %v1787_v39  ;;  %v1833_v24 = vld [vmem:[%s2127_s23 + $0x16c] ss:$16 sps:$4 sm:$0xff]   ;;  %v455_v27 = vmul.f32 %v2138_v14, %v411_v12  ;;  %v457_v32 = vmul.f32 %v2138_v14, %v413_v20  ;;  %v1835_v2 = vld [vmem:[%s2127_s23 + $0x160] ss:$16 sps:$4 sm:$0xff]   ;;  %v1836_v37 = vld [vmem:[%s2127_s23 + $0x168] ss:$16 sps:$4 sm:$0xff]   ;;  %v401_v3 = vunpack.c.h.bf16 %v2207_v11  ;;  %v2264_v43 = vrot.slane %v2125_v5, %v432_v9 }
  0x53   : > { %958 = vmatprep.subr.bf16.mxu0 %v1789_v42  ;;  %v2240_v26 = vld [vmem:[%s2521_s2 + $0x18] sm:$0xff]  ;;  %v459_v1 = vmul.f32 %v2138_v14, %v415_v21  ;;  %v461_v35 = vmul.f32 %v2138_v14, %v417_v28  ;;  %v463_v36 = vmul.f32 %v2138_v14, %v419_v29  ;;  %v1837_v42 = vld [vmem:[%s2127_s23 + $0x144] ss:$16 sps:$4 sm:$0xff]   ;;  %v2277_v5 = vld [vmem:[%s2521_s2 + $0x68] sm:$0xff] }
  0x54   : > { %1072 = vmatpush1.bf16.msra.mxu1 %v1794_v45  ;;  %v499_v33 = vadd.f32 %v2141_v15, %v455_v27  ;;  %v403_v38 = vunpack.c.h.bf16 %v2240_v26  ;;  %v501_v39 = vadd.f32 %v2141_v15, %v457_v32  ;;  %v1839_v41 = vld [vmem:[%s2127_s23 + $0x14c] ss:$16 sps:$4 sm:$0xff]   ;;  %v423_v9 = vunpack.c.h.bf16 %v2277_v5  ;;  %v1848_v27 = vld [vmem:[%s2127_s23 + $0x128] ss:$16 sps:$4 sm:$0xff]  }
  0x55   : > { %1073 = vmatprep.subr.bf16.mxu1 %v1797_v47  ;;  %v503_v40 = vadd.f32 %v2141_v15, %v459_v1  ;;  %v505_v45 = vadd.f32 %v2141_v15, %v461_v35  ;;  %v1849_v1 = vld [vmem:[%s2127_s23 + $0x104] ss:$16 sps:$4 sm:$0xff]  }
  0x56   : > { %959 = vmatpush1.bf16.msra.mxu0 %v1793_v44  ;;  %v531_v44 = vmax.f32 %v499_v33, 0.0  ;;  %v533_v47 = vmax.f32 %v501_v39, 0.0  ;;  %v1851_v33 = vld [vmem:[%s2127_s23 + $0x10c] ss:$16 sps:$4 sm:$0xff]  }
  0x57   : > { %960 = vmatprep.subr.bf16.mxu0 %v1795_v46  ;;  %v440_v46 = vmul.f32 %v2247_v31, %v396_v25 }
  0x58   : > { %1074 = vmatpush1.bf16.msra.mxu1 %v1800_v49  ;;  %v507_v49 = vadd.f32 %v2141_v15, %v463_v36 }
  0x59   : > { %1075 = vmatprep.subr.bf16.mxu1 %v1803_v51  ;;  %v442_v51 = vmul.f32 %v2247_v31, %v398_v30  ;;  %v484_v12 = vadd.f32 %v2264_v43, %v440_v46 }
  0x5a   : > { %961 = vmatpush1.bf16.msra.mxu0 %v1799_v48  ;;  %v535_v48 = vmax.f32 %v503_v40, 0.0 }
  0x5b   : > { %962 = vmatprep.subr.bf16.mxu0 %v1801_v50  ;;  %v2272_v50 = vld [vmem:[%s2521_s2 + $0x60] sm:$0xff]  ;;  %v486_v21 = vadd.f32 %v2264_v43, %v442_v51 }
  0x5c   : > { %1076 = vmatpush1.bf16.msra.mxu1 %v1806_v53  ;;  %v2284_v53 = vld [vmem:[%s2521_s2 + $0x20] sm:$0xff] }
  0x5d   : > { %1077 = vmatprep.subr.bf16.mxu1 %v1809_v55  ;;  %v2291_v55 = vpack.c.bf16 %v531_v44, %v529_v34  ;;  %v518_v39 = vmax.f32 %v486_v21, 0.0  ;;  %v1853_v44 = vld [vmem:[%s2127_s23 + $0x100] ss:$16 sps:$4 sm:$0xff]  }
  0x5e   : > { %963 = vmatpush1.bf16.msra.mxu0 %v1805_v52  ;;  %v400_v52 = vunpack.c.l.bf16 %v2207_v11  ;;  %v2312_v11 = vld [vmem:[%s2521_s2 + $0x78] sm:$0xff] }
  0x5f   : > { %964 = vmatprep.subr.bf16.mxu0 %v1807_v54  ;;  %v2289_v54 = vld [vmem:[%s2521_s2 + $0x28] sm:$0xff]  ;;  %v427_v32 = vunpack.c.h.bf16 %v2312_v11 }
  0x60   : > { %1078 = vmatpush2.bf16.msra.mxu1 %v1812_v57  ;;  %v1841_v57 = vld [vmem:[%s2127_s23 + $0x140] ss:$16 sps:$4 sm:$0xff]   ;;  %v444_v30 = vmul.f32 %v2247_v31, %v400_v52  ;;  %v404_v52 = vunpack.c.l.bf16 %v2284_v53 }
  0x61   : > { %1079 = vmatprep.subr.bf16.mxu1 %v1815_v59  ;;  %v445_v59 = vmul.f32 %v2138_v14, %v401_v3 }
  0x62   : > { %965 = vmatpush2.bf16.msra.mxu0 %v1811_v56  ;;  %v537_v56 = vmax.f32 %v505_v45, 0.0  ;;  %v1854_v45 = vld [vmem:[%s2127_s23 + $0x108] ss:$16 sps:$4 sm:$0xff]  }
  0x63   : > { %966 = vmatprep.subr.bf16.mxu0 %v1813_v58  ;;  %v1842_v58 = vld [vmem:[%s2127_s23 + $0x148] ss:$16 sps:$4 sm:$0xff]   ;;  %v489_v28 = vadd.f32 %v2141_v15, %v445_v59  ;;  %v488_v59 = vadd.f32 %v2264_v43, %v444_v30 }
  0x64   : > { %1080 = vmatpush2.bf16.msra.mxu1 %v1818_v61  ;;  %v2297_v61 = vpack.c.bf16 %v535_v48, %v533_v47 }
  0x65   : > { %1081 = vmatprep.subr.bf16.mxu1 %v1821_v63  ;;  %v2302_v63 = vld [vmem:[%s2521_s2 + $0x70] sm:$0xff]  ;;  %v521_v46 = vmax.f32 %v489_v28, 0.0 }
  0x66   : > { %967 = vmatpush2.bf16.msra.mxu0 %v1817_v60  ;;  %v447_v60 = vmul.f32 %v2138_v14, %v403_v38  ;;  %v425_v25 = vunpack.c.h.bf16 %v2302_v63  ;;  %v471_v38 = vmul.f32 %v2138_v14, %v427_v32 }
  0x67   : > { %968 = vmatprep.subr.bf16.mxu0 %v1819_v62  ;;  %v539_v62 = vmax.f32 %v507_v49, 0.0 }
  0x68   : > { %1082 = vmatpush2.bf16.msra.mxu1 %v1824_v6  ;;  %v1845_v6 = vld [vmem:[%s2127_s23 + $0x12c] ss:$16 sps:$4 sm:$0xff]   ;;  %v491_v29 = vadd.f32 %v2141_v15, %v447_v60  ;;  %v469_v3 = vmul.f32 %v2138_v14, %v425_v25  ;;  %v515_v49 = vadd.f32 %v2141_v15, %v471_v38 }
  0x69   : > { %1083 = vmatprep.subr.bf16.mxu1 %v1827_v8  ;;  %v421_v8 = vunpack.c.h.bf16 %v2272_v50  ;;  %v2317_v20 = vpack.c.bf16 %v539_v62, %v537_v56 }
  0x6a   : > { %969 = vmatpush2.bf16.msra.mxu0 %v1823_v0  ;;  %v1843_v0 = vld [vmem:[%s2127_s23 + $0x124] ss:$16 sps:$4 sm:$0xff]   ;;  %v523_v47 = vmax.f32 %v491_v29, 0.0  ;;  %v513_v48 = vadd.f32 %v2141_v15, %v469_v3  ;;  %v416_v3 = vunpack.c.l.bf16 %v2223_v16 }
  0x6b   : > { %970 = vmatprep.subr.bf16.mxu0 %v1825_v7  ;;  %v402_v7 = vunpack.c.l.bf16 %v2240_v26  ;;  %v1847_v26 = vld [vmem:[%s2127_s23 + $0x120] ss:$16 sps:$4 sm:$0xff]   ;;  %s1583_s23 = sshll.u32 %s340_s7, 8 }
  0x6c   : > { %1084 = vmatpush2.bf16.msra.mxu1 %v1830_v19  ;;  %v407_v19 = vunpack.c.h.bf16 %v2289_v54  ;;  %v545_v56 = vmax.f32 %v513_v48, 0.0  ;;  %s2398_s13 = scalar_lea.vmem [#allocation3], %s1583_s23 }
  0x6d   : > { %1085 = vmatprep.subr.bf16.mxu1 %v1833_v24  ;;  %v467_v24 = vmul.f32 %v2138_v14, %v423_v9  ;;  %v446_v34 = vmul.f32 %v2247_v31, %v402_v7 }
  0x6e   : > { %971 = vmatpush2.bf16.msra.mxu0 %v1829_v17  ;;  %v405_v17 = vunpack.c.h.bf16 %v2284_v53  ;;  %v451_v40 = vmul.f32 %v2138_v14, %v407_v19  ;;  %v520_v53 = vmax.f32 %v488_v59, 0.0  ;;  %v408_v19 = vunpack.c.l.bf16 %v2148_v18 }
  0x6f   : > { %972 = vmatprep.subr.bf16.mxu0 %v1831_v23  ;;  %v465_v23 = vmul.f32 %v2138_v14, %v421_v8  ;;  %v511_v36 = vadd.f32 %v2141_v15, %v467_v24  ;;  %v490_v60 = vadd.f32 %v2264_v43, %v446_v34  ;;  %v448_v8 = vmul.f32 %v2247_v31, %v404_v52 }
  0x70   : > { %1086 = vmatpush2.bf16.msra.mxu1 %v1836_v37  ;;  %v449_v37 = vmul.f32 %v2138_v14, %v405_v17  ;;  %v406_v14 = vunpack.c.l.bf16 %v2289_v54  ;;  %v410_v24 = vunpack.c.l.bf16 %v2202_v10  ;;  %v452_v28 = vmul.f32 %v2247_v31, %v408_v19 }
  0x71   : > { %1087 = vmatprep.subr.bf16.mxu1 %v1839_v41  ;;  %v509_v35 = vadd.f32 %v2141_v15, %v465_v23  ;;  %v543_v41 = vmax.f32 %v511_v36, 0.0  ;;  %v522_v54 = vmax.f32 %v490_v60, 0.0  ;;  %v492_v23 = vadd.f32 %v2264_v43, %v448_v8 }
  0x72   : > { %973 = vmatpush2.bf16.msra.mxu0 %v1835_v2  ;;  %v516_v2 = vmax.f32 %v484_v12, 0.0  ;;  %v493_v62 = vadd.f32 %v2141_v15, %v449_v37  ;;  %v450_v9 = vmul.f32 %v2247_v31, %v406_v14  ;;  %v454_v29 = vmul.f32 %v2247_v31, %v410_v24 }
  0x73   : > { %974 = vmatprep.subr.bf16.mxu0 %v1837_v42  ;;  %v541_v42 = vmax.f32 %v509_v35, 0.0  ;;  %v550_v21 = vpack.c.bf16 %v522_v54, %v520_v53  ;;  %v412_v18 = vunpack.c.l.bf16 %v2213_v13  ;;  %v496_v32 = vadd.f32 %v2264_v43, %v452_v28 }
  0x74   : > { %1088 = vmatpush2.bf16.msra.mxu1 %v1842_v58  ;;  %v548_v58 = vpack.c.bf16 %v518_v39, %v516_v2  ;;  %v525_v12 = vmax.f32 %v493_v62, 0.0  ;;  %v414_v10 = vunpack.c.l.bf16 %v2218_v4  ;;  %v418_v4 = vunpack.c.l.bf16 %v2232_v22 }
  0x75   : > { %1089 = vmatprep.subr.bf16.mxu1 %v1845_v6  ;;  %v2342_v51 = vpack.c.bf16 %v543_v41, %v541_v42  ;;  %v495_v6 = vadd.f32 %v2141_v15, %v451_v40  ;;  %v494_v15 = vadd.f32 %v2264_v43, %v450_v9  ;;  %v528_v34 = vmax.f32 %v496_v32, 0.0 }
  0x76   : > { %975 = vmatpush2.bf16.msra.mxu0 %v1841_v57  ;;  %v547_v57 = vmax.f32 %v515_v49, 0.0  ;;  %v458_v36 = vmul.f32 %v2247_v31, %v414_v10  ;;  %v460_v40 = vmul.f32 %v2247_v31, %v416_v3  ;;  %v462_v42 = vmul.f32 %v2247_v31, %v418_v4 }
  0x77   : > { %976 = vmatprep.subr.bf16.mxu0 %v1843_v0  ;;  %v551_v0 = vpack.c.bf16 %v523_v47, %v521_v46  ;;  %v527_v17 = vmax.f32 %v495_v6, 0.0  ;;  %v422_v22 = vunpack.c.l.bf16 %v2277_v5  ;;  %v424_v52 = vunpack.c.l.bf16 %v2302_v63 }
  0x78   : > { %1090 = vmatpush2.bf16.msra.mxu1 %v1848_v27  ;;  %v2350_v7 = vpack.c.bf16 %v547_v57, %v545_v56  ;;  %v526_v27 = vmax.f32 %v494_v15, 0.0  ;;  %v502_v37 = vadd.f32 %v2264_v43, %v458_v36  ;;  %v506_v16 = vadd.f32 %v2264_v43, %v462_v42 }
  0x79   : > { %1091 = vmatprep.subr.bf16.mxu1 %v1851_v33  ;;  %v553_v25 = vpack.c.bf16 %v527_v17, %v525_v12  ;;  %v456_v33 = vmul.f32 %v2247_v31, %v412_v18  ;;  %v466_v48 = vmul.f32 %v2247_v31, %v422_v22  ;;  %v426_v5 = vunpack.c.l.bf16 %v2312_v11 }
  0x7a   : > { %977 = vmatpush2.bf16.msra.mxu0 %v1847_v26  ;;  %v524_v26 = vmax.f32 %v492_v23, 0.0  ;;  %v534_v39 = vmax.f32 %v502_v37, 0.0  ;;  %v538_v47 = vmax.f32 %v506_v16, 0.0  ;;  %v468_v57 = vmul.f32 %v2247_v31, %v424_v52 }
  0x7b   : > { %978 = vmatprep.subr.bf16.mxu0 %v1849_v1  ;;  %v498_v1 = vadd.f32 %v2264_v43, %v454_v29  ;;  %v500_v13 = vadd.f32 %v2264_v43, %v456_v33  ;;  %v510_v49 = vadd.f32 %v2264_v43, %v466_v48 }
  0x7c   : > { %1092 = vmatpush2.bf16.msra.mxu1 %v1854_v45  ;;  %v552_v30 = vpack.c.bf16 %v526_v27, %v524_v26  ;;  %v512_v59 = vadd.f32 %v2264_v43, %v468_v57 }
  0x7d   : > { %v530_v35 = vmax.f32 %v498_v1, 0.0  ;;  %v532_v38 = vmax.f32 %v500_v13, 0.0  ;;  %v542_v56 = vmax.f32 %v510_v49, 0.0 }
  0x7e   : > { %979 = vmatpush2.bf16.msra.mxu0 %v1853_v44  ;;  %v504_v44 = vadd.f32 %v2264_v43, %v460_v40  ;;  %v544_v11 = vmax.f32 %v512_v59, 0.0 }
  0x7f   : > { %1094 = vmatmul.mubr.bf16.vlgmr.msra.gmra.mxu1 %v548_v58  ;;  %v554_v2 = vpack.c.bf16 %v530_v35, %v528_v34  ;;  %v556_v41 = vpack.c.bf16 %v534_v39, %v532_v38 }
  0x80   : > { %1103 = vmatprep.mubr.bf16.mxu1 %v551_v0  ;;  %v536_v46 = vmax.f32 %v504_v44, 0.0 }
  0x81   : > { %981 = vmatmul.mubr.bf16.vlgmr.msra.gmra.mxu0 %v548_v58  ;;  %v470_v58 = vmul.f32 %v2247_v31, %v426_v5 }
  0x82   : > { %990 = vmatprep.mubr.bf16.mxu0 %v551_v0 }
  0x83   : > { %v514_v63 = vadd.f32 %v2264_v43, %v470_v58 }
  0x85   : > { %v546_v60 = vmax.f32 %v514_v63, 0.0 }
  0x87   : > { %1104 = vmatmul.mubr.bf16.gmra.mxu1 %v550_v21  ;;  %v562_v62 = vpack.c.bf16 %v546_v60, %v544_v11 }
  0x88   : > { %1113 = vmatprep.mubr.bf16.mxu1 %v553_v25 }
  0x89   : > { %991 = vmatmul.mubr.bf16.gmra.mxu0 %v550_v21 }
  0x8a   : > { %1000 = vmatprep.mubr.bf16.mxu0 %v553_v25 }
  0x8f   : > { %1114 = vmatmul.mubr.bf16.gmra.mxu1 %v552_v30 }
  0x90   : > { %1123 = vmatprep.mubr.bf16.mxu1 %v2291_v55 }
  0x91   : > { %1001 = vmatmul.mubr.bf16.gmra.mxu0 %v552_v30 }
  0x92   : > { %1010 = vmatprep.mubr.bf16.mxu0 %v2291_v55  ;;  %v420_v55 = vunpack.c.l.bf16 %v2272_v50 }
  0x94   : > { %v464_v45 = vmul.f32 %v2247_v31, %v420_v55 }
  0x96   : > { %v508_v50 = vadd.f32 %v2264_v43, %v464_v45 }
  0x97   : > { %1124 = vmatmul.mubr.bf16.gmra.mxu1 %v554_v2 }
  0x98   : > { %1133 = vmatprep.mubr.bf16.mxu1 %v2297_v61  ;;  %v540_v14 = vmax.f32 %v508_v50, 0.0 }
  0x99   : > { %1011 = vmatmul.mubr.bf16.gmra.mxu0 %v554_v2 }
  0x9a   : > { %1020 = vmatprep.mubr.bf16.mxu0 %v2297_v61  ;;  %v558_v61 = vpack.c.bf16 %v538_v47, %v536_v46 }
  0x9f   : > { %1134 = vmatmul.mubr.bf16.gmra.mxu1 %v556_v41 }
  0xa0   : > { %1143 = vmatprep.mubr.bf16.mxu1 %v2317_v20 }
  0xa1   : > { %1021 = vmatmul.mubr.bf16.gmra.mxu0 %v556_v41 }
  0xa2   : > { %1030 = vmatprep.mubr.bf16.mxu0 %v2317_v20  ;;  %v560_v20 = vpack.c.bf16 %v542_v56, %v540_v14 }
  0xa7   : > { %1144 = vmatmul.mubr.bf16.gmra.mxu1 %v558_v61 }
  0xa8   : > { %1153 = vmatprep.mubr.bf16.mxu1 %v2342_v51 }
  0xa9   : > { %1031 = vmatmul.mubr.bf16.gmra.mxu0 %v558_v61 }
  0xaa   : > { %1040 = vmatprep.mubr.bf16.mxu0 %v2342_v51 }
  0xaf   : > { %1154 = vmatmul.mubr.bf16.gmra.mxu1 %v560_v20 }
  0xb0   : > { %1163 = vmatprep.mubr.bf16.mxu1 %v2350_v7 }
  0xb1   : > { %1041 = vmatmul.mubr.bf16.gmra.mxu0 %v560_v20 }
  0xb2   : > { %1050 = vmatprep.mubr.bf16.mxu0 %v2350_v7 }
  0xb7   : > { %1164 = vmatmul.mubr.bf16.gmra.mxu1 %v562_v62 }
  0xb9   : > { %1051 = vmatmul.mubr.bf16.gmra.mxu0 %v562_v62 }
 0x13f   : > { %v1095_v51 = vpop.f32.mrf.mxu1 }
 0x141   : > { %v982_v31 = vpop.f32.mrf.mxu0  ;;  %v1097_v6 = vpop.f32.mrf.mxu1 }
 0x142   : > { %v1687_v54 = vpack.c.bf16 %v1097_v6, %v1095_v51 }
 0x143   : > { %v984_v0 = vpop.f32.mrf.mxu0  ;;  %v1099_v8 = vpop.f32.mrf.mxu1 }
 0x144   : > { %v1686_v53 = vpack.c.bf16 %v984_v0, %v982_v31  ;;  %1367 = vst [vmem:[%s2398_s13 + $0x8] sm:$0xff] %v1687_v54 }
 0x145   : > { %v986_v43 = vpop.f32.mrf.mxu0  ;;  %v1101_v9 = vpop.f32.mrf.mxu1 }
 0x146   : > { %1366 = vst [vmem:[%s2398_s13] sm:$0xff] %v1686_v53  ;;  %v1689_v17 = vpack.c.bf16 %v1101_v9, %v1099_v8 }
 0x147   : > { %v988_v7 = vpop.f32.mrf.mxu0  ;;  %v1105_v21 = vpop.f32.mrf.mxu1 }
 0x148   : > { %v1688_v12 = vpack.c.bf16 %v988_v7, %v986_v43  ;;  %1369 = vst [vmem:[%s2398_s13 + $0x18] sm:$0xff] %v1689_v17 }
 0x149   : > { %v992_v19 = vpop.f32.mrf.mxu0  ;;  %v1107_v15 = vpop.f32.mrf.mxu1 }
 0x14a   : > { %1368 = vst [vmem:[%s2398_s13 + $0x10] sm:$0xff] %v1688_v12  ;;  %v1691_v25 = vpack.c.bf16 %v1107_v15, %v1105_v21 }
 0x14b   : > { %v994_v23 = vpop.f32.mrf.mxu0  ;;  %v1109_v27 = vpop.f32.mrf.mxu1 }
 0x14c   : > { %v1690_v24 = vpack.c.bf16 %v994_v23, %v992_v19  ;;  %1371 = vst [vmem:[%s2398_s13 + $0x28] sm:$0xff] %v1691_v25 }
 0x14d   : > { %v996_v26 = vpop.f32.mrf.mxu0  ;;  %v1111_v29 = vpop.f32.mrf.mxu1 }
 0x14e   : > { %1370 = vst [vmem:[%s2398_s13 + $0x20] sm:$0xff] %v1690_v24  ;;  %v1693_v30 = vpack.c.bf16 %v1111_v29, %v1109_v27 }
 0x14f   : > { %v998_v28 = vpop.f32.mrf.mxu0  ;;  %v1115_v1 = vpop.f32.mrf.mxu1 }
 0x150   : > { %v1692_v18 = vpack.c.bf16 %v998_v28, %v996_v26  ;;  %1373 = vst [vmem:[%s2398_s13 + $0x38] sm:$0xff] %v1693_v30 }
 0x151   : > { %v1002_v32 = vpop.f32.mrf.mxu0  ;;  %v1117_v33 = vpop.f32.mrf.mxu1 }
 0x152   : > { %1372 = vst [vmem:[%s2398_s13 + $0x30] sm:$0xff] %v1692_v18  ;;  %v1695_v35 = vpack.c.bf16 %v1117_v33, %v1115_v1 }
 0x153   : > { %v1004_v10 = vpop.f32.mrf.mxu0  ;;  %v1119_v13 = vpop.f32.mrf.mxu1 }
 0x154   : > { %v1694_v34 = vpack.c.bf16 %v1004_v10, %v1002_v32  ;;  %1375 = vst [vmem:[%s2398_s13 + $0x48] sm:$0xff] %v1695_v35 }
 0x155   : > { %v1006_v36 = vpop.f32.mrf.mxu0  ;;  %v1121_v37 = vpop.f32.mrf.mxu1 }
 0x156   : > { %1374 = vst [vmem:[%s2398_s13 + $0x40] sm:$0xff] %v1694_v34  ;;  %v1697_v4 = vpack.c.bf16 %v1121_v37, %v1119_v13  ;;  %v1425_v37 = vld [vmem:[%s2398_s13 + $0x8] sm:$0xff] (%p1955_p6) }
 0x157   : > { %v1008_v2 = vpop.f32.mrf.mxu0  ;;  %v1125_v39 = vpop.f32.mrf.mxu1  ;;  %1426 = vst [vmem:[%s2441_s21 + $0x8] sm:$0xff] (%p1955_p6), %v1425_v37 }
 0x158   : > { %v1696_v3 = vpack.c.bf16 %v1008_v2, %v1006_v36  ;;  %1377 = vst [vmem:[%s2398_s13 + $0x58] sm:$0xff] %v1697_v4  ;;  %v1423_v2 = vld [vmem:[%s2398_s13] sm:$0xff] (%p1955_p6)  ;;  %v1429_v4 = vld [vmem:[%s2398_s13 + $0x18] sm:$0xff] (%p1955_p6) }
 0x159   : > { %v1012_v38 = vpop.f32.mrf.mxu0  ;;  %v1127_v42 = vpop.f32.mrf.mxu1  ;;  %1424 = vst [vmem:[%s2441_s21] sm:$0xff] (%p1955_p6), %v1423_v2  ;;  %1430 = vst [vmem:[%s2441_s21 + $0x48] sm:$0xff] (%p1955_p6), %v1429_v4 }
 0x15a   : > { %1376 = vst [vmem:[%s2398_s13 + $0x50] sm:$0xff] %v1696_v3  ;;  %v1699_v41 = vpack.c.bf16 %v1127_v42, %v1125_v39  ;;  %v1427_v3 = vld [vmem:[%s2398_s13 + $0x10] sm:$0xff] (%p1955_p6)  ;;  %v1433_v39 = vld [vmem:[%s2398_s13 + $0x28] sm:$0xff] (%p1955_p6)  ;;  %v1437_v42 = vld [vmem:[%s2398_s13 + $0x38] sm:$0xff] (%p1955_p6) }
 0x15b   : > { %v1014_v40 = vpop.f32.mrf.mxu0  ;;  %v1129_v16 = vpop.f32.mrf.mxu1  ;;  %1428 = vst [vmem:[%s2441_s21 + $0x40] sm:$0xff] (%p1955_p6), %v1427_v3  ;;  %1434 = vst [vmem:[%s2441_s21 + $0x88] sm:$0xff] (%p1955_p6), %v1433_v39 }
 0x15c   : > { %v1698_v55 = vpack.c.bf16 %v1014_v40, %v1012_v38  ;;  %1379 = vst [vmem:[%s2398_s13 + $0x68] sm:$0xff] %v1699_v41  ;;  %v1431_v38 = vld [vmem:[%s2398_s13 + $0x20] sm:$0xff] (%p1955_p6)  ;;  %v1435_v40 = vld [vmem:[%s2398_s13 + $0x30] sm:$0xff] (%p1955_p6)  ;;  %1438 = vst [vmem:[%s2441_s21 + $0xc8] sm:$0xff] (%p1955_p6), %v1437_v42 }
 0x15d   : > { %v1016_v44 = vpop.f32.mrf.mxu0  ;;  %v1131_v45 = vpop.f32.mrf.mxu1  ;;  %1432 = vst [vmem:[%s2441_s21 + $0x80] sm:$0xff] (%p1955_p6), %v1431_v38  ;;  %1436 = vst [vmem:[%s2441_s21 + $0xc0] sm:$0xff] (%p1955_p6), %v1435_v40  ;;  %v1441_v41 = vld [vmem:[%s2398_s13 + $0x48] sm:$0xff] (%p1955_p6) }
 0x15e   : > { %1378 = vst [vmem:[%s2398_s13 + $0x60] sm:$0xff] %v1698_v55  ;;  %v1701_v47 = vpack.c.bf16 %v1131_v45, %v1129_v16  ;;  %v1439_v55 = vld [vmem:[%s2398_s13 + $0x40] sm:$0xff] (%p1955_p6)  ;;  %1442 = vst [vmem:[%s2441_s21 + $0x108] sm:$0xff] (%p1955_p6), %v1441_v41 }
 0x15f   : > { %v1018_v22 = vpop.f32.mrf.mxu0  ;;  %v1135_v50 = vpop.f32.mrf.mxu1  ;;  %1440 = vst [vmem:[%s2441_s21 + $0x100] sm:$0xff] (%p1955_p6), %v1439_v55  ;;  %v1445_v16 = vld [vmem:[%s2398_s13 + $0x58] sm:$0xff] (%p1955_p6) }
 0x160   : > { %v1700_v46 = vpack.c.bf16 %v1018_v22, %v1016_v44  ;;  %1381 = vst [vmem:[%s2398_s13 + $0x78] sm:$0xff] %v1701_v47  ;;  %1446 = vst [vmem:[%s2441_s21 + $0x148] sm:$0xff] (%p1955_p6), %v1445_v16 }
 0x161   : > { %v1022_v48 = vpop.f32.mrf.mxu0  ;;  %v1137_v49 = vpop.f32.mrf.mxu1  ;;  %v1443_v44 = vld [vmem:[%s2398_s13 + $0x50] sm:$0xff] (%p1955_p6) }
 0x162   : > { %1380 = vst [vmem:[%s2398_s13 + $0x70] sm:$0xff] %v1700_v46  ;;  %v1703_v5 = vpack.c.bf16 %v1137_v49, %v1135_v50  ;;  %1444 = vst [vmem:[%s2441_s21 + $0x140] sm:$0xff] (%p1955_p6), %v1443_v44 }
 0x163   : > { %v1024_v61 = vpop.f32.mrf.mxu0  ;;  %v1139_v56 = vpop.f32.mrf.mxu1  ;;  %v1449_v45 = vld [vmem:[%s2398_s13 + $0x68] sm:$0xff] (%p1955_p6) }
 0x164   : > { %v1702_v52 = vpack.c.bf16 %v1024_v61, %v1022_v48  ;;  %1383 = vst [vmem:[%s2398_s13 + $0x88] sm:$0xff] %v1703_v5  ;;  %1450 = vst [vmem:[%s2441_s21 + $0x188] sm:$0xff] (%p1955_p6), %v1449_v45 }
 0x165   : > { %v1026_v14 = vpop.f32.mrf.mxu0  ;;  %v1141_v58 = vpop.f32.mrf.mxu1  ;;  %v1447_v22 = vld [vmem:[%s2398_s13 + $0x60] sm:$0xff] (%p1955_p6) }
 0x166   : > { %1382 = vst [vmem:[%s2398_s13 + $0x80] sm:$0xff] %v1702_v52  ;;  %v1705_v59 = vpack.c.bf16 %v1141_v58, %v1139_v56  ;;  %1448 = vst [vmem:[%s2441_s21 + $0x180] sm:$0xff] (%p1955_p6), %v1447_v22 }
 0x167   : > { %v1028_v57 = vpop.f32.mrf.mxu0  ;;  %v1145_v11 = vpop.f32.mrf.mxu1  ;;  %v1453_v47 = vld [vmem:[%s2398_s13 + $0x78] sm:$0xff] (%p1955_p6) }
 0x168   : > { %v1704_v20 = vpack.c.bf16 %v1028_v57, %v1026_v14  ;;  %1385 = vst [vmem:[%s2398_s13 + $0x98] sm:$0xff] %v1705_v59  ;;  %1454 = vst [vmem:[%s2441_s21 + $0x1c8] sm:$0xff] (%p1955_p6), %v1453_v47 }
 0x169   : > { %v1032_v63 = vpop.f32.mrf.mxu0  ;;  %v1147_v62 = vpop.f32.mrf.mxu1  ;;  %v1451_v46 = vld [vmem:[%s2398_s13 + $0x70] sm:$0xff] (%p1955_p6) }
 0x16a   : > { %1384 = vst [vmem:[%s2398_s13 + $0x90] sm:$0xff] %v1704_v20  ;;  %v1707_v51 = vpack.c.bf16 %v1147_v62, %v1145_v11  ;;  %1452 = vst [vmem:[%s2441_s21 + $0x1c0] sm:$0xff] (%p1955_p6), %v1451_v46 }
 0x16b   : > { %v1034_v60 = vpop.f32.mrf.mxu0  ;;  %v1149_v6 = vpop.f32.mrf.mxu1  ;;  %v1457_v50 = vld [vmem:[%s2398_s13 + $0x88] sm:$0xff] (%p1955_p6) }
 0x16c   : > { %v1706_v31 = vpack.c.bf16 %v1034_v60, %v1032_v63  ;;  %1387 = vst [vmem:[%s2398_s13 + $0xa8] sm:$0xff] %v1707_v51  ;;  %1458 = vst [vmem:[%s2441_s21 + $0x208] sm:$0xff] (%p1955_p6), %v1457_v50 }
 0x16d   : > { %v1036_v0 = vpop.f32.mrf.mxu0  ;;  %v1151_v54 = vpop.f32.mrf.mxu1  ;;  %v1455_v48 = vld [vmem:[%s2398_s13 + $0x80] sm:$0xff] (%p1955_p6) }
 0x16e   : > { %1386 = vst [vmem:[%s2398_s13 + $0xa0] sm:$0xff] %v1706_v31  ;;  %v1709_v8 = vpack.c.bf16 %v1151_v54, %v1149_v6  ;;  %1456 = vst [vmem:[%s2441_s21 + $0x200] sm:$0xff] (%p1955_p6), %v1455_v48 }
 0x16f   : > { %v1038_v53 = vpop.f32.mrf.mxu0  ;;  %v1155_v9 = vpop.f32.mrf.mxu1  ;;  %v1461_v49 = vld [vmem:[%s2398_s13 + $0x98] sm:$0xff] (%p1955_p6) }
 0x170   : > { %v1708_v43 = vpack.c.bf16 %v1038_v53, %v1036_v0  ;;  %1389 = vst [vmem:[%s2398_s13 + $0xb8] sm:$0xff] %v1709_v8  ;;  %1462 = vst [vmem:[%s2441_s21 + $0x248] sm:$0xff] (%p1955_p6), %v1461_v49 }
 0x171   : > { %v1042_v7 = vpop.f32.mrf.mxu0  ;;  %v1157_v17 = vpop.f32.mrf.mxu1  ;;  %v1459_v61 = vld [vmem:[%s2398_s13 + $0x90] sm:$0xff] (%p1955_p6) }
 0x172   : > { %1388 = vst [vmem:[%s2398_s13 + $0xb0] sm:$0xff] %v1708_v43  ;;  %v1711_v21 = vpack.c.bf16 %v1157_v17, %v1155_v9  ;;  %1460 = vst [vmem:[%s2441_s21 + $0x240] sm:$0xff] (%p1955_p6), %v1459_v61 }
 0x173   : > { %v1044_v12 = vpop.f32.mrf.mxu0  ;;  %v1159_v15 = vpop.f32.mrf.mxu1  ;;  %v1465_v5 = vld [vmem:[%s2398_s13 + $0xa8] sm:$0xff] (%p1955_p6) }
 0x174   : > { %v1710_v19 = vpack.c.bf16 %v1044_v12, %v1042_v7  ;;  %1391 = vst [vmem:[%s2398_s13 + $0xc8] sm:$0xff] %v1711_v21  ;;  %1466 = vst [vmem:[%s2441_s21 + $0x288] sm:$0xff] (%p1955_p6), %v1465_v5 }
 0x175   : > { %v1046_v23 = vpop.f32.mrf.mxu0  ;;  %v1161_v25 = vpop.f32.mrf.mxu1  ;;  %v1463_v52 = vld [vmem:[%s2398_s13 + $0xa0] sm:$0xff] (%p1955_p6) }
 0x176   : > { %1390 = vst [vmem:[%s2398_s13 + $0xc0] sm:$0xff] %v1710_v19  ;;  %v1713_v27 = vpack.c.bf16 %v1161_v25, %v1159_v15  ;;  %1464 = vst [vmem:[%s2441_s21 + $0x280] sm:$0xff] (%p1955_p6), %v1463_v52 }
 0x177   : > { %v1048_v24 = vpop.f32.mrf.mxu0  ;;  %v1165_v29 = vpop.f32.mrf.mxu1  ;;  %v1469_v56 = vld [vmem:[%s2398_s13 + $0xb8] sm:$0xff] (%p1955_p6) }
 0x178   : > { %v1712_v26 = vpack.c.bf16 %v1048_v24, %v1046_v23  ;;  %1393 = vst [vmem:[%s2398_s13 + $0xd8] sm:$0xff] %v1713_v27  ;;  %1470 = vst [vmem:[%s2441_s21 + $0x2c8] sm:$0xff] (%p1955_p6), %v1469_v56 }
 0x179   : > { %v1052_v28 = vpop.f32.mrf.mxu0  ;;  %v1167_v30 = vpop.f32.mrf.mxu1  ;;  %v1467_v14 = vld [vmem:[%s2398_s13 + $0xb0] sm:$0xff] (%p1955_p6) }
 0x17a   : > { %1392 = vst [vmem:[%s2398_s13 + $0xd0] sm:$0xff] %v1712_v26  ;;  %v1715_v1 = vpack.c.bf16 %v1167_v30, %v1165_v29  ;;  %1468 = vst [vmem:[%s2441_s21 + $0x2c0] sm:$0xff] (%p1955_p6), %v1467_v14 }
 0x17b   : > { %v1054_v18 = vpop.f32.mrf.mxu0  ;;  %v1169_v33 = vpop.f32.mrf.mxu1  ;;  %v1473_v58 = vld [vmem:[%s2398_s13 + $0xc8] sm:$0xff] (%p1955_p6) }
 0x17c   : > { %v1714_v32 = vpack.c.bf16 %v1054_v18, %v1052_v28  ;;  %1395 = vst [vmem:[%s2398_s13 + $0xe8] sm:$0xff] %v1715_v1  ;;  %1474 = vst [vmem:[%s2441_s21 + $0x308] sm:$0xff] (%p1955_p6), %v1473_v58 }
 0x17d   : > { %v1056_v10 = vpop.f32.mrf.mxu0  ;;  %v1171_v35 = vpop.f32.mrf.mxu1  ;;  %v1471_v57 = vld [vmem:[%s2398_s13 + $0xc0] sm:$0xff] (%p1955_p6) }
 0x17e   : > { %1394 = vst [vmem:[%s2398_s13 + $0xe0] sm:$0xff] %v1714_v32  ;;  %v1717_v13 = vpack.c.bf16 %v1171_v35, %v1169_v33  ;;  %1404 = sbr.rel (!%p1955_p6) target bundleno = 395 (0x18b), region = 63  ;;  %1472 = vst [vmem:[%s2441_s21 + $0x300] sm:$0xff] (%p1955_p6), %v1471_v57 }
 0x17f   : > { %v1058_v34 = vpop.f32.mrf.mxu0  ;;  %v1477_v59 = vld [vmem:[%s2398_s13 + $0xd8] sm:$0xff] (%p1955_p6) }
 0x180   : > { %v1716_v36 = vpack.c.bf16 %v1058_v34, %v1056_v10  ;;  %1397 = vst [vmem:[%s2398_s13 + $0xf8] sm:$0xff] %v1717_v13  ;;  %1478 = vst [vmem:[%s2441_s21 + $0x348] sm:$0xff] (%p1955_p6), %v1477_v59 }
 0x181   : > { %v1475_v20 = vld [vmem:[%s2398_s13 + $0xd0] sm:$0xff] (%p1955_p6) }
 0x182   : > { %1396 = vst [vmem:[%s2398_s13 + $0xf0] sm:$0xff] %v1716_v36  ;;  %1476 = vst [vmem:[%s2441_s21 + $0x340] sm:$0xff] (%p1955_p6), %v1475_v20 }
 0x183   : > { %v1481_v11 = vld [vmem:[%s2398_s13 + $0xe8] sm:$0xff] }
 0x184   : > { %1482 = vst [vmem:[%s2441_s21 + $0x388] sm:$0xff] %v1481_v11 }
 0x185   : > { %v1479_v63 = vld [vmem:[%s2398_s13 + $0xe0] sm:$0xff] }
 0x186   : > { %1480 = vst [vmem:[%s2441_s21 + $0x380] sm:$0xff] %v1479_v63 }
 0x187   : > { %v1485_v62 = vld [vmem:[%s2398_s13 + $0xf8] sm:$0xff] }
 0x188   : > { %1486 = vst [vmem:[%s2441_s21 + $0x3c8] sm:$0xff] %v1485_v62 }
 0x189   : > { %v1483_v60 = vld [vmem:[%s2398_s13 + $0xf0] sm:$0xff] }
 0x18a   : > { %1484 = vst [vmem:[%s2441_s21 + $0x3c0] sm:$0xff] %v1483_v60 }
 0x18b PF: > { %s14_s19 = sadd.s32 1, %s1893_s19   ;;  %s2525_s15 = smov %s1881_s16 }
 0x18c   : > { %p11_p11 = scmp.ge.s32.totalorder %s14_s19, 6   ;;  %s2526_s16 = smov %s1960_s25 }
 0x18d   : > { %s2527_s17 = smov %s1889_s18  ;;  %s2528_s18 = smov %s2530_s20 }
 0x18e   :  { %13 = sbr.rel (!%p11_p11) target bundleno = 3 (0x3), region = 120 }

// kernel: acgan_generator_forward.15
= control target key start
LH: loop header
LB: loop body
LE: loop exit
PB: predicated region body
PF: predicated region fallthrough
CT: control target
= control target key end

     0   :  { %v547_v0 = vmov 0.0   ;;  %s681_s0 = inlined_call_operand.vmem [shape: bf16[512,128], index: 0, kind: input, shape index: {}]   ;;  %s682_s1 = inlined_call_operand.vmem [shape: f32[1,128], index: 1, kind: input, shape index: {}]   ;;  %s683_s2 = inlined_call_operand.vmem [shape: f32[1,128], index: 2, kind: input, shape index: {}]   ;;  %s684_s3 = inlined_call_operand.vmem [shape: f32[1,128], index: 3, kind: output, shape index: {0}]   ;;  %s685_s4 = inlined_call_operand.vmem [shape: f32[1,128], index: 4, kind: output, shape index: {1}]  }
   0x1   :  { %20 = vst [vmem:[#allocation2] sm:$0x1] %v547_v0  ;;  %21 = vst [vmem:[#allocation3] sm:$0x1] %v547_v0  ;;  %v386_v1 = vld [vmem:[%s681_s0] sm:$0xff]   ;;  %v513_v2 = vld [vmem:[%s681_s0 + $0x8] sm:$0xff]  }
   0x2   :  { %v387_v3 = vunpack.c.l.bf16 %v386_v1  ;;  %v388_v4 = vunpack.c.h.bf16 %v386_v1  ;;  %v391_v5 = vunpack.c.l.bf16 %v513_v2  ;;  %v514_v6 = vld [vmem:[%s681_s0 + $0x10] sm:$0xff]   ;;  %v392_v7 = vunpack.c.h.bf16 %v513_v2  ;;  %v515_v11 = vld [vmem:[%s681_s0 + $0x18] sm:$0xff]   ;;  %v516_v16 = vld [vmem:[%s681_s0 + $0x20] sm:$0xff]  }
   0x3   :  { %v395_v9 = vunpack.c.l.bf16 %v514_v6  ;;  %v396_v12 = vunpack.c.h.bf16 %v514_v6  ;;  %v399_v14 = vunpack.c.l.bf16 %v515_v11  ;;  %v400_v17 = vunpack.c.h.bf16 %v515_v11  ;;  %v517_v21 = vld [vmem:[%s681_s0 + $0x28] sm:$0xff]   ;;  %v518_v28 = vld [vmem:[%s681_s0 + $0x30] sm:$0xff]   ;;  %v519_v36 = vld [vmem:[%s681_s0 + $0x38] sm:$0xff]  }
   0x4   :  { %v151_v8 = vadd.f32 %v388_v4, %v387_v3  ;;  %v403_v19 = vunpack.c.l.bf16 %v516_v16  ;;  %v404_v22 = vunpack.c.h.bf16 %v516_v16  ;;  %v407_v24 = vunpack.c.l.bf16 %v517_v21  ;;  %v520_v45 = vld [vmem:[%s681_s0 + $0x40] sm:$0xff]   ;;  %v521_v54 = vld [vmem:[%s681_s0 + $0x48] sm:$0xff]   ;;  %v522_v63 = vld [vmem:[%s681_s0 + $0x50] sm:$0xff]  }
   0x5   :  { %v223_v26 = vmul.f32 %v387_v3, %v387_v3  ;;  %v224_v27 = vmul.f32 %v388_v4, %v388_v4  ;;  %v408_v29 = vunpack.c.h.bf16 %v517_v21  ;;  %v225_v31 = vmul.f32 %v391_v5, %v391_v5 }
   0x6   :  { %v152_v10 = vadd.f32 %v391_v5, %v151_v8  ;;  %v411_v32 = vunpack.c.l.bf16 %v518_v28  ;;  %v226_v34 = vmul.f32 %v392_v7, %v392_v7  ;;  %v412_v37 = vunpack.c.h.bf16 %v518_v28  ;;  %v523_v8 = vld [vmem:[%s681_s0 + $0x58] sm:$0xff]  }
   0x7   :  { %v287_v35 = vadd.f32 %v224_v27, %v223_v26  ;;  %v227_v39 = vmul.f32 %v395_v9, %v395_v9  ;;  %v415_v41 = vunpack.c.l.bf16 %v519_v36  ;;  %v228_v43 = vmul.f32 %v396_v12, %v396_v12  ;;  %v525_v26 = vld [vmem:[%s681_s0 + $0x68] sm:$0xff]  }
   0x8   :  { %v153_v13 = vadd.f32 %v392_v7, %v152_v10  ;;  %v416_v46 = vunpack.c.h.bf16 %v519_v36  ;;  %v229_v48 = vmul.f32 %v399_v14, %v399_v14  ;;  %v419_v50 = vunpack.c.l.bf16 %v520_v45 }
   0x9   :  { %v288_v40 = vadd.f32 %v287_v35, %v225_v31  ;;  %v230_v52 = vmul.f32 %v400_v17, %v400_v17  ;;  %v420_v55 = vunpack.c.h.bf16 %v520_v45  ;;  %v231_v57 = vmul.f32 %v403_v19, %v403_v19  ;;  %v526_v35 = vld [vmem:[%s681_s0 + $0x70] sm:$0xff]  }
   0xa   :  { %v154_v15 = vadd.f32 %v395_v9, %v153_v13  ;;  %v423_v59 = vunpack.c.l.bf16 %v521_v54  ;;  %v232_v61 = vmul.f32 %v404_v22, %v404_v22  ;;  %v424_v0 = vunpack.c.h.bf16 %v521_v54 }
   0xb   :  { %v289_v44 = vadd.f32 %v288_v40, %v226_v34  ;;  %v233_v2 = vmul.f32 %v407_v24, %v407_v24  ;;  %v427_v4 = vunpack.c.l.bf16 %v522_v63  ;;  %v234_v6 = vmul.f32 %v408_v29, %v408_v29 }
   0xc   :  { %v155_v18 = vadd.f32 %v396_v12, %v154_v15  ;;  %v428_v9 = vunpack.c.h.bf16 %v522_v63  ;;  %v235_v11 = vmul.f32 %v411_v32, %v411_v32  ;;  %v431_v13 = vunpack.c.l.bf16 %v523_v8 }
   0xd   :  { %v290_v49 = vadd.f32 %v289_v44, %v227_v39  ;;  %v236_v15 = vmul.f32 %v412_v37, %v412_v37  ;;  %v439_v31 = vunpack.c.l.bf16 %v525_v26  ;;  %v440_v36 = vunpack.c.h.bf16 %v525_v26  ;;  %v527_v44 = vld [vmem:[%s681_s0 + $0x78] sm:$0xff]  }
   0xe   :  { %v156_v20 = vadd.f32 %v399_v14, %v155_v18  ;;  %v432_v18 = vunpack.c.h.bf16 %v523_v8  ;;  %v443_v40 = vunpack.c.l.bf16 %v526_v35  ;;  %v444_v45 = vunpack.c.h.bf16 %v526_v35 }
   0xf   :  { %v291_v53 = vadd.f32 %v290_v49, %v228_v43  ;;  %v447_v49 = vunpack.c.l.bf16 %v527_v44  ;;  %v448_v54 = vunpack.c.h.bf16 %v527_v44 }
  0x10   :  { %v157_v23 = vadd.f32 %v400_v17, %v156_v20  ;;  %v524_v17 = vld [vmem:[%s681_s0 + $0x60] sm:$0xff]   ;;  %v237_v20 = vmul.f32 %v415_v41, %v415_v41 }
  0x11   :  { %v292_v58 = vadd.f32 %v291_v53, %v229_v48  ;;  %v436_v27 = vunpack.c.h.bf16 %v524_v17  ;;  %v528_v53 = vld [vmem:[%s681_s0 + $0x80] sm:$0xff]  }
  0x12   :  { %v158_v25 = vadd.f32 %v403_v19, %v157_v23  ;;  %v452_v63 = vunpack.c.h.bf16 %v528_v53 }
  0x13   :  { %v293_v62 = vadd.f32 %v292_v58, %v230_v52  ;;  %v451_v58 = vunpack.c.l.bf16 %v528_v53 }
  0x14   :  { %v159_v30 = vadd.f32 %v404_v22, %v158_v25  ;;  %v435_v22 = vunpack.c.l.bf16 %v524_v17 }
  0x15   :  { %v294_v3 = vadd.f32 %v293_v62, %v231_v57  ;;  %v529_v62 = vld [vmem:[%s681_s0 + $0x88] sm:$0xff]  }
  0x16   :  { %v160_v33 = vadd.f32 %v407_v24, %v159_v30  ;;  %v238_v24 = vmul.f32 %v416_v46, %v416_v46  ;;  %v456_v8 = vunpack.c.h.bf16 %v529_v62 }
  0x17   :  { %v295_v7 = vadd.f32 %v294_v3, %v232_v61  ;;  %v455_v3 = vunpack.c.l.bf16 %v529_v62 }
  0x18   :  { %v161_v38 = vadd.f32 %v408_v29, %v160_v33  ;;  %v239_v29 = vmul.f32 %v419_v50, %v419_v50  ;;  %v240_v33 = vmul.f32 %v420_v55, %v420_v55 }
  0x19   :  { %v296_v12 = vadd.f32 %v295_v7, %v233_v2  ;;  %v530_v7 = vld [vmem:[%s681_s0 + $0x90] sm:$0xff]  }
  0x1a   :  { %v162_v42 = vadd.f32 %v411_v32, %v161_v38  ;;  %v241_v38 = vmul.f32 %v423_v59, %v423_v59  ;;  %v460_v17 = vunpack.c.h.bf16 %v530_v7 }
  0x1b   :  { %v297_v16 = vadd.f32 %v296_v12, %v234_v6  ;;  %v459_v12 = vunpack.c.l.bf16 %v530_v7 }
  0x1c   :  { %v163_v47 = vadd.f32 %v412_v37, %v162_v42  ;;  %v242_v42 = vmul.f32 %v424_v0, %v424_v0 }
  0x1d   :  { %v298_v21 = vadd.f32 %v297_v16, %v235_v11  ;;  %v531_v16 = vld [vmem:[%s681_s0 + $0x98] sm:$0xff]  }
  0x1e   :  { %v164_v51 = vadd.f32 %v415_v41, %v163_v47  ;;  %v243_v47 = vmul.f32 %v427_v4, %v427_v4  ;;  %v464_v26 = vunpack.c.h.bf16 %v531_v16 }
  0x1f   :  { %v299_v25 = vadd.f32 %v298_v21, %v236_v15  ;;  %v463_v21 = vunpack.c.l.bf16 %v531_v16 }
  0x20   :  { %v165_v56 = vadd.f32 %v416_v46, %v164_v51  ;;  %v244_v51 = vmul.f32 %v428_v9, %v428_v9 }
  0x21   :  { %v300_v30 = vadd.f32 %v299_v25, %v237_v20  ;;  %v532_v25 = vld [vmem:[%s681_s0 + $0xa0] sm:$0xff]  }
  0x22   :  { %v166_v60 = vadd.f32 %v419_v50, %v165_v56  ;;  %v245_v56 = vmul.f32 %v431_v13, %v431_v13  ;;  %v468_v35 = vunpack.c.h.bf16 %v532_v25 }
  0x23   :  { %v301_v34 = vadd.f32 %v300_v30, %v238_v24  ;;  %v467_v30 = vunpack.c.l.bf16 %v532_v25 }
  0x24   :  { %v167_v1 = vadd.f32 %v420_v55, %v166_v60  ;;  %v246_v60 = vmul.f32 %v432_v18, %v432_v18 }
  0x25   :  { %v302_v39 = vadd.f32 %v301_v34, %v239_v29  ;;  %v533_v34 = vld [vmem:[%s681_s0 + $0xa8] sm:$0xff]  }
  0x26   :  { %v168_v5 = vadd.f32 %v423_v59, %v167_v1  ;;  %v247_v1 = vmul.f32 %v435_v22, %v435_v22  ;;  %v472_v44 = vunpack.c.h.bf16 %v533_v34 }
  0x27   :  { %v303_v43 = vadd.f32 %v302_v39, %v240_v33  ;;  %v471_v39 = vunpack.c.l.bf16 %v533_v34 }
  0x28   :  { %v169_v10 = vadd.f32 %v424_v0, %v168_v5  ;;  %v248_v5 = vmul.f32 %v436_v27, %v436_v27 }
  0x29   :  { %v304_v48 = vadd.f32 %v303_v43, %v241_v38  ;;  %v534_v43 = vld [vmem:[%s681_s0 + $0xb0] sm:$0xff]  }
  0x2a   :  { %v170_v14 = vadd.f32 %v427_v4, %v169_v10  ;;  %v249_v10 = vmul.f32 %v439_v31, %v439_v31  ;;  %v476_v53 = vunpack.c.h.bf16 %v534_v43 }
  0x2b   :  { %v305_v52 = vadd.f32 %v304_v48, %v242_v42  ;;  %v475_v48 = vunpack.c.l.bf16 %v534_v43 }
  0x2c   :  { %v171_v19 = vadd.f32 %v428_v9, %v170_v14  ;;  %v250_v14 = vmul.f32 %v440_v36, %v440_v36 }
  0x2d   :  { %v306_v57 = vadd.f32 %v305_v52, %v243_v47  ;;  %v535_v52 = vld [vmem:[%s681_s0 + $0xb8] sm:$0xff]  }
  0x2e   :  { %v172_v23 = vadd.f32 %v431_v13, %v171_v19  ;;  %v251_v19 = vmul.f32 %v443_v40, %v443_v40  ;;  %v480_v62 = vunpack.c.h.bf16 %v535_v52 }
  0x2f   :  { %v307_v61 = vadd.f32 %v306_v57, %v244_v51  ;;  %v479_v57 = vunpack.c.l.bf16 %v535_v52 }
  0x30   :  { %v173_v28 = vadd.f32 %v432_v18, %v172_v23  ;;  %v252_v23 = vmul.f32 %v444_v45, %v444_v45 }
  0x31   :  { %v308_v2 = vadd.f32 %v307_v61, %v245_v56  ;;  %v536_v61 = vld [vmem:[%s681_s0 + $0xc0] sm:$0xff]  }
  0x32   :  { %v174_v32 = vadd.f32 %v435_v22, %v173_v28  ;;  %v253_v28 = vmul.f32 %v447_v49, %v447_v49  ;;  %v484_v7 = vunpack.c.h.bf16 %v536_v61 }
  0x33   :  { %v309_v6 = vadd.f32 %v308_v2, %v246_v60  ;;  %v483_v2 = vunpack.c.l.bf16 %v536_v61 }
  0x34   :  { %v175_v37 = vadd.f32 %v436_v27, %v174_v32  ;;  %v254_v32 = vmul.f32 %v448_v54, %v448_v54 }
  0x35   :  { %v310_v11 = vadd.f32 %v309_v6, %v247_v1  ;;  %v537_v6 = vld [vmem:[%s681_s0 + $0xc8] sm:$0xff]  }
  0x36   :  { %v176_v41 = vadd.f32 %v439_v31, %v175_v37  ;;  %v255_v37 = vmul.f32 %v451_v58, %v451_v58  ;;  %v488_v16 = vunpack.c.h.bf16 %v537_v6 }
  0x37   :  { %v311_v15 = vadd.f32 %v310_v11, %v248_v5  ;;  %v487_v11 = vunpack.c.l.bf16 %v537_v6 }
  0x38   :  { %v177_v46 = vadd.f32 %v440_v36, %v176_v41  ;;  %v256_v41 = vmul.f32 %v452_v63, %v452_v63 }
  0x39   :  { %v312_v20 = vadd.f32 %v311_v15, %v249_v10  ;;  %v538_v15 = vld [vmem:[%s681_s0 + $0xd0] sm:$0xff]  }
  0x3a   :  { %v178_v50 = vadd.f32 %v443_v40, %v177_v46  ;;  %v257_v46 = vmul.f32 %v455_v3, %v455_v3  ;;  %v492_v25 = vunpack.c.h.bf16 %v538_v15 }
  0x3b   :  { %v313_v24 = vadd.f32 %v312_v20, %v250_v14  ;;  %v491_v20 = vunpack.c.l.bf16 %v538_v15 }
  0x3c   :  { %v179_v55 = vadd.f32 %v444_v45, %v178_v50  ;;  %v258_v50 = vmul.f32 %v456_v8, %v456_v8 }
  0x3d   :  { %v314_v29 = vadd.f32 %v313_v24, %v251_v19  ;;  %v539_v24 = vld [vmem:[%s681_s0 + $0xd8] sm:$0xff]  }
  0x3e   :  { %v180_v59 = vadd.f32 %v447_v49, %v179_v55  ;;  %v259_v55 = vmul.f32 %v459_v12, %v459_v12  ;;  %v496_v34 = vunpack.c.h.bf16 %v539_v24 }
  0x3f   :  { %v315_v33 = vadd.f32 %v314_v29, %v252_v23  ;;  %v495_v29 = vunpack.c.l.bf16 %v539_v24 }
  0x40   :  { %v181_v0 = vadd.f32 %v448_v54, %v180_v59  ;;  %v260_v59 = vmul.f32 %v460_v17, %v460_v17 }
  0x41   :  { %v316_v38 = vadd.f32 %v315_v33, %v253_v28  ;;  %v540_v33 = vld [vmem:[%s681_s0 + $0xe0] sm:$0xff]  }
  0x42   :  { %v182_v4 = vadd.f32 %v451_v58, %v181_v0  ;;  %v261_v0 = vmul.f32 %v463_v21, %v463_v21  ;;  %v500_v43 = vunpack.c.h.bf16 %v540_v33 }
  0x43   :  { %v317_v42 = vadd.f32 %v316_v38, %v254_v32  ;;  %v499_v38 = vunpack.c.l.bf16 %v540_v33 }
  0x44   :  { %v183_v9 = vadd.f32 %v452_v63, %v182_v4  ;;  %v262_v4 = vmul.f32 %v464_v26, %v464_v26 }
  0x45   :  { %v318_v47 = vadd.f32 %v317_v42, %v255_v37  ;;  %v541_v42 = vld [vmem:[%s681_s0 + $0xe8] sm:$0xff]  }
  0x46   :  { %v184_v13 = vadd.f32 %v455_v3, %v183_v9  ;;  %v263_v9 = vmul.f32 %v467_v30, %v467_v30  ;;  %v504_v52 = vunpack.c.h.bf16 %v541_v42 }
  0x47   :  { %v319_v51 = vadd.f32 %v318_v47, %v256_v41  ;;  %v503_v47 = vunpack.c.l.bf16 %v541_v42 }
  0x48   :  { %v185_v18 = vadd.f32 %v456_v8, %v184_v13  ;;  %v264_v13 = vmul.f32 %v468_v35, %v468_v35 }
  0x49   :  { %v320_v56 = vadd.f32 %v319_v51, %v257_v46  ;;  %v542_v51 = vld [vmem:[%s681_s0 + $0xf0] sm:$0xff]  }
  0x4a   :  { %v186_v22 = vadd.f32 %v459_v12, %v185_v18  ;;  %v265_v18 = vmul.f32 %v471_v39, %v471_v39  ;;  %v508_v61 = vunpack.c.h.bf16 %v542_v51 }
  0x4b   :  { %v321_v60 = vadd.f32 %v320_v56, %v258_v50  ;;  %v507_v56 = vunpack.c.l.bf16 %v542_v51 }
  0x4c   :  { %v187_v27 = vadd.f32 %v460_v17, %v186_v22  ;;  %v266_v22 = vmul.f32 %v472_v44, %v472_v44 }
  0x4d   :  { %v322_v1 = vadd.f32 %v321_v60, %v259_v55  ;;  %v543_v60 = vld [vmem:[%s681_s0 + $0xf8] sm:$0xff]  }
  0x4e   :  { %v188_v31 = vadd.f32 %v463_v21, %v187_v27  ;;  %v267_v27 = vmul.f32 %v475_v48, %v475_v48 }
  0x4f   :  { %v323_v5 = vadd.f32 %v322_v1, %v260_v59  ;;  %v511_v1 = vunpack.c.l.bf16 %v543_v60 }
  0x50   :  { %v189_v36 = vadd.f32 %v464_v26, %v188_v31  ;;  %v268_v31 = vmul.f32 %v476_v53, %v476_v53 }
  0x51   :  { %v324_v10 = vadd.f32 %v323_v5, %v261_v0  ;;  %v512_v5 = vunpack.c.h.bf16 %v543_v60 }
  0x52   :  { %v190_v40 = vadd.f32 %v467_v30, %v189_v36  ;;  %v269_v36 = vmul.f32 %v479_v57, %v479_v57 }
  0x53   :  { %v325_v14 = vadd.f32 %v324_v10, %v262_v4  ;;  %v278_v10 = vmul.f32 %v496_v34, %v496_v34 }
  0x54   :  { %v191_v45 = vadd.f32 %v468_v35, %v190_v40  ;;  %v270_v40 = vmul.f32 %v480_v62, %v480_v62 }
  0x55   :  { %v326_v19 = vadd.f32 %v325_v14, %v263_v9 }
  0x56   :  { %v192_v49 = vadd.f32 %v471_v39, %v191_v45  ;;  %v271_v45 = vmul.f32 %v483_v2, %v483_v2 }
  0x57   :  { %v327_v23 = vadd.f32 %v326_v19, %v264_v13  ;;  %v279_v13 = vmul.f32 %v499_v38, %v499_v38  ;;  %v281_v19 = vmul.f32 %v503_v47, %v503_v47 }
  0x58   :  { %v193_v54 = vadd.f32 %v472_v44, %v192_v49  ;;  %v272_v49 = vmul.f32 %v484_v7, %v484_v7 }
  0x59   :  { %v328_v28 = vadd.f32 %v327_v23, %v265_v18 }
  0x5a   :  { %v194_v58 = vadd.f32 %v475_v48, %v193_v54  ;;  %v273_v54 = vmul.f32 %v487_v11, %v487_v11 }
  0x5b   :  { %v329_v32 = vadd.f32 %v328_v28, %v266_v22  ;;  %v282_v22 = vmul.f32 %v504_v52, %v504_v52  ;;  %v284_v28 = vmul.f32 %v508_v61, %v508_v61 }
  0x5c   :  { %v195_v63 = vadd.f32 %v476_v53, %v194_v58  ;;  %v274_v58 = vmul.f32 %v488_v16, %v488_v16 }
  0x5d   :  { %v330_v37 = vadd.f32 %v329_v32, %v267_v27  ;;  %v285_v32 = vmul.f32 %v511_v1, %v511_v1 }
  0x5e   :  { %v196_v3 = vadd.f32 %v479_v57, %v195_v63  ;;  %v275_v63 = vmul.f32 %v491_v20, %v491_v20 }
  0x5f   :  { %v331_v41 = vadd.f32 %v330_v37, %v268_v31 }
  0x60   :  { %v197_v8 = vadd.f32 %v480_v62, %v196_v3  ;;  %v276_v3 = vmul.f32 %v492_v25, %v492_v25 }
  0x61   :  { %v332_v46 = vadd.f32 %v331_v41, %v269_v36 }
  0x62   :  { %v198_v12 = vadd.f32 %v483_v2, %v197_v8 }
  0x63   :  { %v333_v50 = vadd.f32 %v332_v46, %v270_v40 }
  0x64   :  { %v199_v17 = vadd.f32 %v484_v7, %v198_v12  ;;  %v277_v7 = vmul.f32 %v495_v29, %v495_v29 }
  0x65   :  { %v334_v55 = vadd.f32 %v333_v50, %v271_v45 }
  0x66   :  { %v200_v21 = vadd.f32 %v487_v11, %v199_v17 }
  0x67   :  { %v335_v59 = vadd.f32 %v334_v55, %v272_v49  ;;  %v368_v55 = vld [vmem:[%s682_s1] sm:$0x1] }
  0x68   :  { %v201_v26 = vadd.f32 %v488_v16, %v200_v21  ;;  %v280_v16 = vmul.f32 %v500_v43, %v500_v43 }
  0x69   :  { %v336_v0 = vadd.f32 %v335_v59, %v273_v54 }
  0x6a   :  { %v202_v30 = vadd.f32 %v491_v20, %v201_v26 }
  0x6b   :  { %v337_v4 = vadd.f32 %v336_v0, %v274_v58  ;;  %v373_v58 = vld [vmem:[%s683_s2] sm:$0x1] }
  0x6c   :  { %v203_v35 = vadd.f32 %v492_v25, %v202_v30  ;;  %v283_v25 = vmul.f32 %v507_v56, %v507_v56  ;;  %v150_v30 = vld [vmem:[#allocation2] sm:$0x1] }
  0x6d   :  { %v338_v8 = vadd.f32 %v337_v4, %v275_v63 }
  0x6e   :  { %v204_v39 = vadd.f32 %v495_v29, %v203_v35  ;;  %v286_v35 = vmul.f32 %v512_v5, %v512_v5 }
  0x6f   :  { %v339_v11 = vadd.f32 %v338_v8, %v276_v3 }
  0x70   :  { %v205_v44 = vadd.f32 %v496_v34, %v204_v39 }
  0x71   :  { %v340_v14 = vadd.f32 %v339_v11, %v277_v7 }
  0x72   :  { %v206_v48 = vadd.f32 %v499_v38, %v205_v44  ;;  %v222_v44 = vld [vmem:[#allocation3] sm:$0x1] }
  0x73   :  { %v341_v17 = vadd.f32 %v340_v14, %v278_v10 }
  0x74   :  { %v207_v53 = vadd.f32 %v500_v43, %v206_v48 }
  0x75   :  { %v342_v20 = vadd.f32 %v341_v17, %v279_v13 }
  0x76   :  { %v208_v57 = vadd.f32 %v503_v47, %v207_v53 }
  0x77   :  { %v343_v23 = vadd.f32 %v342_v20, %v280_v16 }
  0x78   :  { %v209_v62 = vadd.f32 %v504_v52, %v208_v57 }
  0x79   :  { %v344_v26 = vadd.f32 %v343_v23, %v281_v19 }
  0x7a   :  { %v210_v2 = vadd.f32 %v507_v56, %v209_v62 }
  0x7b   :  { %v345_v29 = vadd.f32 %v344_v26, %v282_v22 }
  0x7c   :  { %v211_v6 = vadd.f32 %v508_v61, %v210_v2 }
  0x7d   :  { %v346_v33 = vadd.f32 %v345_v29, %v283_v25 }
  0x7e   :  { %v212_v9 = vadd.f32 %v511_v1, %v211_v6 }
  0x7f   :  { %v347_v36 = vadd.f32 %v346_v33, %v284_v28 }
  0x80   :  { %v213_v12 = vadd.f32 %v512_v5, %v212_v9 }
  0x81   :  { %v348_v37 = vadd.f32 %v347_v36, %v285_v32 }
  0x82   :  { %v214_v15 = vrot.slane %v213_v12, 4 }
  0x83   :  { %v349_v38 = vadd.f32 %v348_v37, %v286_v35 }
  0x84   :  { %v215_v18 = vadd.f32 %v214_v15, %v213_v12 }
  0x85   :  { %v350_v39 = vrot.slane %v349_v38, 4 }
  0x86   :  { %v216_v21 = vrot.slane %v215_v18, 2 }
  0x87   :  { %v351_v40 = vadd.f32 %v350_v39, %v349_v38 }
  0x88   :  { %v217_v24 = vadd.f32 %v216_v21, %v215_v18 }
  0x89   :  { %v352_v41 = vrot.slane %v351_v40, 2 }
  0x8a   :  { %v218_v27 = vrot.slane %v217_v24, 1 }
  0x8b   :  { %v353_v42 = vadd.f32 %v352_v41, %v351_v40 }
  0x8c   :  { %v219_v31 = vadd.f32 %v218_v27, %v217_v24 }
  0x8d   :  { %v354_v43 = vrot.slane %v353_v42, 1 }
  0x8e   :  { %v220_v34 = vadd.f32 %v219_v31, %v150_v30 }
  0x8f   :  { %v355_v45 = vadd.f32 %v354_v43, %v353_v42 }
  0x90   :  { %221 = vst [vmem:[#allocation2] sm:$0x1] %v220_v34 }
  0x91   :  { %v356_v46 = vadd.f32 %v355_v45, %v222_v44 }
  0x93   :  { %357 = vst [vmem:[#allocation3] sm:$0x1] %v356_v46 }
  0x97   :  { %v361_v47 = vld [vmem:[#allocation2] sm:$0x1] }
  0x98   :  { %v362_v48 = vmul.f32 0.001953125, %v361_v47 }
  0x9a   :  { %v365_v49 = vmul.f32 %v362_v48, %v362_v48  ;;  %v363_v50 = vld [vmem:[#allocation3] sm:$0x1] }
  0x9b   :  { %v364_v51 = vmul.f32 0.001953125, %v363_v50 }
  0x9d   :  { %v366_v52 = vsub.f32 %v364_v51, %v365_v49 }
  0x9f   :  { %v367_v53 = vmax.f32 %v366_v52, 0.0 }
  0xa1   :  { %v369_v54 = vadd.f32 1e-05, %v367_v53 }
  0xa3   :  { %545 = vrsqrt.f32 %v369_v54 }
  0xb0   :  { %v546_v56 = vpop.eup %545 }
  0xb1   :  { %v371_v57 = vmul.f32 %v546_v56, %v368_v55 }
  0xb3   :  { %372 = vst [vmem:[%s684_s3] sm:$0x1] %v371_v57  ;;  %v374_v59 = vmul.f32 %v371_v57, %v362_v48 }
  0xb5   :  { %v375_v60 = vsub.f32 %v373_v58, %v374_v59 }
  0xb7   :  { %376 = vst [vmem:[%s685_s4] sm:$0x1] %v375_v60 }

// kernel: acgan_generator_forward.16
= control target key start
LH: loop header
LB: loop body
LE: loop exit
PB: predicated region body
PF: predicated region fallthrough
CT: control target
= control target key end

     0   :  { %s3465_s15 = smov 0   ;;  %s3467_s16 = smov 0   ;;  %s4327_s0 = inlined_call_operand.vmem [shape: f32[1,128], index: 0, kind: input, shape index: {}]   ;;  %s4328_s1 = inlined_call_operand.vmem [shape: f32[1,128], index: 1, kind: input, shape index: {}]   ;;  %s4329_s2 = inlined_call_operand.vmem [shape: bf16[512,128], index: 2, kind: input, shape index: {}]   ;;  %s4330_s3 = inlined_call_operand.vmem [shape: bf16[128,1024], index: 3, kind: input, shape index: {}]   ;;  %s4331_s4 = inlined_call_operand.vmem [shape: bf16[512,1024], index: 4, kind: output, shape index: {}]  }
   0x1   :  { %s3469_s17 = smov 0   ;;  %s3471_s18 = smov 0  }
   0x2   :  { %s3473_s19 = smov 0  }
   0x3 LB: > { %s23_s20 = sadd.s32 1, %s3433_s18  ;;  %s2841_s21 = sadd.s32 4294967295, %s3437_s19   ;;  %s3437_s19 = sphi %s3473_s19, %s14_s19   ;;  %s3433_s18 = sphi %s3471_s18, %s4336_s18   ;;  %s3429_s17 = sphi %s3469_s17, %s4335_s17   ;;  %s3425_s16 = sphi %s3467_s16, %s4334_s16   ;;  %s3421_s15 = sphi %s3465_s15, %s4333_s15  }
   0x4   : > { %p24_p0 = scmp.ge.s32.totalorder %s23_s20, 2  ;;  %p108_p1 = scmp.ne.s32.totalorder %s3425_s16, %s3421_s15 }
   0x5   : > { %p109_p2 = scmp.eq.s32.totalorder %s3437_s19, 0  ;;  %p140_p4 = scmp.eq.s32.totalorder %s2841_s21, 1 }
   0x6   : > { %s4338_s20 = smov (%p24_p0, %s23_s20), 0  ;;  %s101_s23 = sadd.s32 1, %s3425_s16 }
   0x7   : > { %p110_p3 = por %p109_p2, %p108_p1  ;;  %s98_s22 = ssub.s32 %s3433_s18, %s4338_s20 }
   0x8   : > { %p99_p5 = scmp.eq.s32.totalorder %s98_s22, 0  ;;  %p3500_p6 = por %p140_p4, %p108_p1 }
   0x9   : > { %p2845_p7 = scmp.ge.s32.totalorder %s3437_s19, 2 }
   0xa   : > { %s3505_s25 = scalar_select %p99_p5, %s3425_s16, %s101_s23  }
   0xb   : > { %177 = sbr.rel (%p2845_p7) target bundleno = 36 (0x24), region = 28 }
  0x10   : > { %180 = sbr.rel (!%p110_p3) target bundleno = 36 (0x24), region = 32  ;;  %s182_s26 = sand.u32 (%p110_p3), 1, %s3425_s16  }
  0x11   : > { %s3019_s27 = sshll.u32 (%p110_p3), %s3433_s18, 4  ;;  %s2846_s28 = sshll.u32 (%p110_p3), %s182_s26, 8 }
  0x12   : > { %s3513_s5 = scalar_lea.vmem (%p110_p3), %s4330_s3, %s3019_s27  ;;  %s3518_s6 = scalar_lea.vmem (%p110_p3), [#allocation2], %s2846_s28 }
  0x13   : > { %v200_v0 = vld [vmem:[%s3513_s5] sm:$0xff] (%p110_p3)  ;;  %v202_v1 = vld [vmem:[%s3513_s5 + $0x8] sm:$0xff] (%p110_p3) }
  0x14   : > { %v204_v2 = vld [vmem:[%s3513_s5 + $0x20] sm:$0xff] (%p110_p3)  ;;  %201 = vst [vmem:[%s3518_s6] sm:$0xff] (%p110_p3), %v200_v0  ;;  %203 = vst [vmem:[%s3518_s6 + $0x8] sm:$0xff] (%p110_p3), %v202_v1  ;;  %v206_v3 = vld [vmem:[%s3513_s5 + $0x28] sm:$0xff] (%p110_p3) }
  0x15   : > { %205 = vst [vmem:[%s3518_s6 + $0x10] sm:$0xff] %v204_v2  ;;  %v208_v4 = vld [vmem:[%s3513_s5 + $0x40] sm:$0xff]  ;;  %v210_v5 = vld [vmem:[%s3513_s5 + $0x48] sm:$0xff]  ;;  %207 = vst [vmem:[%s3518_s6 + $0x18] sm:$0xff] %v206_v3 }
  0x16   : > { %209 = vst [vmem:[%s3518_s6 + $0x20] sm:$0xff] %v208_v4  ;;  %211 = vst [vmem:[%s3518_s6 + $0x28] sm:$0xff] %v210_v5  ;;  %v212_v6 = vld [vmem:[%s3513_s5 + $0x60] sm:$0xff]  ;;  %v214_v7 = vld [vmem:[%s3513_s5 + $0x68] sm:$0xff] }
  0x17   : > { %v216_v8 = vld [vmem:[%s3513_s5 + $0x80] sm:$0xff]  ;;  %213 = vst [vmem:[%s3518_s6 + $0x30] sm:$0xff] %v212_v6  ;;  %215 = vst [vmem:[%s3518_s6 + $0x38] sm:$0xff] %v214_v7  ;;  %v218_v9 = vld [vmem:[%s3513_s5 + $0x88] sm:$0xff] }
  0x18   : > { %217 = vst [vmem:[%s3518_s6 + $0x40] sm:$0xff] %v216_v8  ;;  %v220_v10 = vld [vmem:[%s3513_s5 + $0xa0] sm:$0xff]  ;;  %v222_v11 = vld [vmem:[%s3513_s5 + $0xa8] sm:$0xff]  ;;  %219 = vst [vmem:[%s3518_s6 + $0x48] sm:$0xff] %v218_v9 }
  0x19   : > { %221 = vst [vmem:[%s3518_s6 + $0x50] sm:$0xff] %v220_v10  ;;  %223 = vst [vmem:[%s3518_s6 + $0x58] sm:$0xff] %v222_v11  ;;  %v224_v12 = vld [vmem:[%s3513_s5 + $0xc0] sm:$0xff]  ;;  %v226_v13 = vld [vmem:[%s3513_s5 + $0xc8] sm:$0xff] }
  0x1a   : > { %v228_v14 = vld [vmem:[%s3513_s5 + $0xe0] sm:$0xff]  ;;  %225 = vst [vmem:[%s3518_s6 + $0x60] sm:$0xff] %v224_v12  ;;  %227 = vst [vmem:[%s3518_s6 + $0x68] sm:$0xff] %v226_v13  ;;  %v230_v15 = vld [vmem:[%s3513_s5 + $0xe8] sm:$0xff] }
  0x1b   : > { %229 = vst [vmem:[%s3518_s6 + $0x70] sm:$0xff] %v228_v14  ;;  %v232_v16 = vld [vmem:[%s3513_s5 + $0x100] sm:$0xff]  ;;  %v234_v17 = vld [vmem:[%s3513_s5 + $0x108] sm:$0xff]  ;;  %231 = vst [vmem:[%s3518_s6 + $0x78] sm:$0xff] %v230_v15 }
  0x1c   : > { %233 = vst [vmem:[%s3518_s6 + $0x80] sm:$0xff] %v232_v16  ;;  %235 = vst [vmem:[%s3518_s6 + $0x88] sm:$0xff] %v234_v17  ;;  %v236_v18 = vld [vmem:[%s3513_s5 + $0x120] sm:$0xff]  ;;  %v238_v19 = vld [vmem:[%s3513_s5 + $0x128] sm:$0xff] }
  0x1d   : > { %v240_v20 = vld [vmem:[%s3513_s5 + $0x140] sm:$0xff]  ;;  %237 = vst [vmem:[%s3518_s6 + $0x90] sm:$0xff] %v236_v18  ;;  %239 = vst [vmem:[%s3518_s6 + $0x98] sm:$0xff] %v238_v19  ;;  %v242_v21 = vld [vmem:[%s3513_s5 + $0x148] sm:$0xff] }
  0x1e   : > { %241 = vst [vmem:[%s3518_s6 + $0xa0] sm:$0xff] %v240_v20  ;;  %v244_v22 = vld [vmem:[%s3513_s5 + $0x160] sm:$0xff]  ;;  %v246_v23 = vld [vmem:[%s3513_s5 + $0x168] sm:$0xff]  ;;  %243 = vst [vmem:[%s3518_s6 + $0xa8] sm:$0xff] %v242_v21 }
  0x1f   : > { %245 = vst [vmem:[%s3518_s6 + $0xb0] sm:$0xff] %v244_v22  ;;  %247 = vst [vmem:[%s3518_s6 + $0xb8] sm:$0xff] %v246_v23  ;;  %v248_v24 = vld [vmem:[%s3513_s5 + $0x180] sm:$0xff]  ;;  %v250_v25 = vld [vmem:[%s3513_s5 + $0x188] sm:$0xff] }
  0x20   : > { %v252_v26 = vld [vmem:[%s3513_s5 + $0x1a0] sm:$0xff]  ;;  %249 = vst [vmem:[%s3518_s6 + $0xc0] sm:$0xff] %v248_v24  ;;  %251 = vst [vmem:[%s3518_s6 + $0xc8] sm:$0xff] %v250_v25  ;;  %v254_v27 = vld [vmem:[%s3513_s5 + $0x1a8] sm:$0xff] }
  0x21   : > { %253 = vst [vmem:[%s3518_s6 + $0xd0] sm:$0xff] %v252_v26  ;;  %v256_v28 = vld [vmem:[%s3513_s5 + $0x1c0] sm:$0xff]  ;;  %v258_v29 = vld [vmem:[%s3513_s5 + $0x1c8] sm:$0xff]  ;;  %255 = vst [vmem:[%s3518_s6 + $0xd8] sm:$0xff] %v254_v27 }
  0x22   : > { %257 = vst [vmem:[%s3518_s6 + $0xe0] sm:$0xff] %v256_v28  ;;  %259 = vst [vmem:[%s3518_s6 + $0xe8] sm:$0xff] %v258_v29  ;;  %v260_v30 = vld [vmem:[%s3513_s5 + $0x1e0] sm:$0xff]  ;;  %v262_v31 = vld [vmem:[%s3513_s5 + $0x1e8] sm:$0xff] }
  0x23   : > { %261 = vst [vmem:[%s3518_s6 + $0xf0] sm:$0xff] %v260_v30  ;;  %263 = vst [vmem:[%s3518_s6 + $0xf8] sm:$0xff] %v262_v31 }
  0x24 PF: > { %p2849_p8 = scmp.ge.s32.totalorder %s3437_s19, 1  ;;  %p268_p9 = scmp.lt.s32.totalorder %s3437_s19, 3 }
  0x26   : > { %p269_p10 = pnand %p2849_p8, %p268_p9 }
  0x27   : > { %s275_s7 = sand.u32 (!%p269_p10), 1, %s3421_s15  }
  0x28   : > { %272 = sbr.rel (%p269_p10) target bundleno = 563 (0x233), region = 55  ;;  %s2850_s8 = sshll.u32 (!%p269_p10), %s275_s7, 8 }
  0x29   : > { %s3588_s9 = scalar_lea.vmem (!%p269_p10), [#allocation2], %s2850_s8  ;;  %s2851_s23 = sshll.u32 (!%p269_p10), %s275_s7, 10 }
  0x2a   : > { %s3876_s15 = scalar_lea.vmem (!%p269_p10), [#allocation3], %s2851_s23 }
  0x2d   : > { %v3439_v32 = vmov 0   ;;  %v3349_v33 = vld [vmem:[%s3588_s9 + $0xe4] ss:$16 sps:$4 sm:$0xff]   ;;  %v3351_v34 = vld [vmem:[%s3588_s9 + $0xec] ss:$16 sps:$4 sm:$0xff]   ;;  %s3148_s14 = sshll.u32 (%p3500_p6), %s3429_s17, 4 }
  0x2e   : > { %904 = vmatprep.mubr.bf16.mxu0 %v3439_v32  ;;  %1257 = vmatprep.mubr.bf16.mxu1 %v3439_v32  ;;  %v3353_v35 = vld [vmem:[%s3588_s9 + $0xe0] ss:$16 sps:$4 sm:$0xff]   ;;  %v3354_v36 = vld [vmem:[%s3588_s9 + $0xe8] ss:$16 sps:$4 sm:$0xff]   ;;  %v3355_v37 = vld [vmem:[%s3588_s9 + $0xc4] ss:$16 sps:$4 sm:$0xff]   ;;  %s4057_s23 = scalar_lea.vmem (%p3500_p6), %s4331_s4, %s3148_s14 }
  0x2f   : > { %872 = vmatprep.subr.bf16.mxu0 %v3349_v33  ;;  %1225 = vmatprep.subr.bf16.mxu1 %v3351_v34  ;;  %v3357_v38 = vld [vmem:[%s3588_s9 + $0xcc] ss:$16 sps:$4 sm:$0xff]   ;;  %v3359_v39 = vld [vmem:[%s3588_s9 + $0xc0] ss:$16 sps:$4 sm:$0xff]   ;;  %v3360_v40 = vld [vmem:[%s3588_s9 + $0xc8] ss:$16 sps:$4 sm:$0xff]  }
  0x30   : > { %873 = vmatpush1.bf16.msra.mxu0 %v3353_v35  ;;  %1226 = vmatpush1.bf16.msra.mxu1 %v3354_v36  ;;  %v3361_v41 = vld [vmem:[%s3588_s9 + $0xa4] ss:$16 sps:$4 sm:$0xff]   ;;  %v3363_v42 = vld [vmem:[%s3588_s9 + $0xac] ss:$16 sps:$4 sm:$0xff]   ;;  %v3365_v43 = vld [vmem:[%s3588_s9 + $0xa0] ss:$16 sps:$4 sm:$0xff]  }
  0x31   : > { %874 = vmatprep.subr.bf16.mxu0 %v3355_v37  ;;  %1227 = vmatprep.subr.bf16.mxu1 %v3357_v38  ;;  %v3366_v44 = vld [vmem:[%s3588_s9 + $0xa8] ss:$16 sps:$4 sm:$0xff]   ;;  %v3367_v45 = vld [vmem:[%s3588_s9 + $0x84] ss:$16 sps:$4 sm:$0xff]   ;;  %v3369_v46 = vld [vmem:[%s3588_s9 + $0x8c] ss:$16 sps:$4 sm:$0xff]  }
  0x32   : > { %v3150_v47 = vld [vmem:[%s4329_s2] sm:$0xff]   ;;  %v3372_v49 = vld [vmem:[%s3588_s9 + $0x88] ss:$16 sps:$4 sm:$0xff]   ;;  %v3375_v51 = vld [vmem:[%s3588_s9 + $0x6c] ss:$16 sps:$4 sm:$0xff]  }
  0x33   : > { %v3371_v48 = vld [vmem:[%s3588_s9 + $0x80] ss:$16 sps:$4 sm:$0xff]   ;;  %v3373_v50 = vld [vmem:[%s3588_s9 + $0x64] ss:$16 sps:$4 sm:$0xff]   ;;  %v3378_v53 = vld [vmem:[%s3588_s9 + $0x68] ss:$16 sps:$4 sm:$0xff]   ;;  %v3151_v54 = vunpack.c.l.bf16 %v3150_v47  ;;  %v3152_v55 = vunpack.c.h.bf16 %v3150_v47 }
  0x34   : > { %875 = vmatpush1.bf16.msra.mxu0 %v3359_v39  ;;  %1228 = vmatpush1.bf16.msra.mxu1 %v3360_v40  ;;  %v3377_v52 = vld [vmem:[%s3588_s9 + $0x60] ss:$16 sps:$4 sm:$0xff]   ;;  %v3379_v57 = vld [vmem:[%s3588_s9 + $0x44] ss:$16 sps:$4 sm:$0xff]   ;;  %v3381_v58 = vld [vmem:[%s3588_s9 + $0x4c] ss:$16 sps:$4 sm:$0xff]  }
  0x35   : > { %876 = vmatprep.subr.bf16.mxu0 %v3361_v41  ;;  %1229 = vmatprep.subr.bf16.mxu1 %v3363_v42  ;;  %v3616_v56 = vld [vmem:[%s4327_s0] ss:$0 sm:$0xff]  ;;  %v3277_v59 = vld [vmem:[%s4329_s2 + $0x8] sm:$0xff]   ;;  %v3385_v1 = vld [vmem:[%s3588_s9 + $0x24] ss:$16 sps:$4 sm:$0xff]  }
  0x36   : > { %v449_v60 = vmul.f32 %v3151_v54, %v3616_v56  ;;  %v450_v61 = vmul.f32 %v3152_v55, %v3616_v56  ;;  %v3628_v62 = vld [vmem:[%s4328_s1] ss:$0 sm:$0xff]  ;;  %v3384_v0 = vld [vmem:[%s3588_s9 + $0x48] ss:$16 sps:$4 sm:$0xff]   ;;  %v3387_v2 = vld [vmem:[%s3588_s9 + $0x2c] ss:$16 sps:$4 sm:$0xff]   ;;  %v3155_v5 = vunpack.c.l.bf16 %v3277_v59  ;;  %v3156_v6 = vunpack.c.h.bf16 %v3277_v59 }
  0x37   : > { %v3383_v63 = vld [vmem:[%s3588_s9 + $0x40] ss:$16 sps:$4 sm:$0xff]   ;;  %v3390_v8 = vld [vmem:[%s3588_s9 + $0x28] ss:$16 sps:$4 sm:$0xff]   ;;  %v3391_v9 = vld [vmem:[%s3588_s9 + $0x4] ss:$16 sps:$4 sm:$0xff]  }
  0x38   : > { %877 = vmatpush1.bf16.msra.mxu0 %v3365_v43  ;;  %1230 = vmatpush1.bf16.msra.mxu1 %v3366_v44  ;;  %v520_v3 = vadd.f32 %v3628_v62, %v449_v60  ;;  %v521_v4 = vadd.f32 %v3628_v62, %v450_v61  ;;  %v3389_v7 = vld [vmem:[%s3588_s9 + $0x20] ss:$16 sps:$4 sm:$0xff]   ;;  %v3393_v10 = vld [vmem:[%s3588_s9 + $0xc] ss:$16 sps:$4 sm:$0xff]   ;;  %v451_v13 = vmul.f32 %v3155_v5, %v3616_v56  ;;  %v3396_v17 = vld [vmem:[%s3588_s9 + $0x8] ss:$16 sps:$4 sm:$0xff]  }
  0x39   : > { %878 = vmatprep.subr.bf16.mxu0 %v3367_v45  ;;  %1231 = vmatprep.subr.bf16.mxu1 %v3369_v46  ;;  %v452_v14 = vmul.f32 %v3156_v6, %v3616_v56  ;;  %v3278_v15 = vld [vmem:[%s4329_s2 + $0x10] sm:$0xff]   ;;  %v3279_v27 = vld [vmem:[%s4329_s2 + $0x18] sm:$0xff]   ;;  %v3280_v38 = vld [vmem:[%s4329_s2 + $0x20] sm:$0xff]  }
  0x3a   : > { %v584_v11 = vmax.f32 %v520_v3, 0.0  ;;  %v585_v12 = vmax.f32 %v521_v4, 0.0  ;;  %v3395_v16 = vld [vmem:[%s3588_s9] ss:$16 sps:$4 sm:$0xff]   ;;  %v3159_v18 = vunpack.c.l.bf16 %v3278_v15  ;;  %v522_v20 = vadd.f32 %v3628_v62, %v451_v13  ;;  %v3283_v6 = vld [vmem:[%s4329_s2 + $0x38] sm:$0xff]  }
  0x3b   : > { %v523_v21 = vadd.f32 %v3628_v62, %v452_v14  ;;  %v3160_v22 = vunpack.c.h.bf16 %v3278_v15  ;;  %v3163_v28 = vunpack.c.l.bf16 %v3279_v27  ;;  %v3164_v33 = vunpack.c.h.bf16 %v3279_v27  ;;  %v3282_v59 = vld [vmem:[%s4329_s2 + $0x30] sm:$0xff]  }
  0x3c   : > { %879 = vmatpush1.bf16.msra.mxu0 %v3371_v48  ;;  %1232 = vmatpush1.bf16.msra.mxu1 %v3372_v49  ;;  %v648_v19 = vpack.c.bf16 %v585_v12, %v584_v11  ;;  %v586_v23 = vmax.f32 %v522_v20, 0.0  ;;  %v453_v25 = vmul.f32 %v3159_v18, %v3616_v56  ;;  %v3167_v42 = vunpack.c.l.bf16 %v3280_v38  ;;  %v3281_v48 = vld [vmem:[%s4329_s2 + $0x28] sm:$0xff]  }
  0x3d   : > { %880 = vmatprep.subr.bf16.mxu0 %v3373_v50  ;;  %1233 = vmatprep.subr.bf16.mxu1 %v3375_v51  ;;  %v587_v24 = vmax.f32 %v523_v21, 0.0  ;;  %v454_v26 = vmul.f32 %v3160_v22, %v3616_v56  ;;  %v455_v34 = vmul.f32 %v3163_v28, %v3616_v56  ;;  %v456_v37 = vmul.f32 %v3164_v33, %v3616_v56 }
  0x3e   : > { %v524_v30 = vadd.f32 %v3628_v62, %v453_v25  ;;  %v3168_v43 = vunpack.c.h.bf16 %v3280_v38  ;;  %v457_v46 = vmul.f32 %v3167_v42, %v3616_v56  ;;  %v3171_v49 = vunpack.c.l.bf16 %v3281_v48 }
  0x3f   : > { %v649_v29 = vpack.c.bf16 %v587_v24, %v586_v23  ;;  %v525_v31 = vadd.f32 %v3628_v62, %v454_v26  ;;  %v526_v39 = vadd.f32 %v3628_v62, %v455_v34  ;;  %v527_v41 = vadd.f32 %v3628_v62, %v456_v37  ;;  %v3285_v26 = vld [vmem:[%s4329_s2 + $0x48] sm:$0xff]   ;;  %v3286_v37 = vld [vmem:[%s4329_s2 + $0x50] sm:$0xff]  }
  0x40   : > { %881 = vmatpush1.bf16.msra.mxu0 %v3377_v52  ;;  %1234 = vmatpush1.bf16.msra.mxu1 %v3378_v53  ;;  %v588_v35 = vmax.f32 %v524_v30, 0.0  ;;  %v458_v47 = vmul.f32 %v3168_v43, %v3616_v56  ;;  %v528_v51 = vadd.f32 %v3628_v62, %v457_v46  ;;  %v3172_v53 = vunpack.c.h.bf16 %v3281_v48 }
  0x41   : > { %882 = vmatprep.subr.bf16.mxu0 %v3379_v57  ;;  %1235 = vmatprep.subr.bf16.mxu1 %v3381_v58  ;;  %v589_v36 = vmax.f32 %v525_v31, 0.0  ;;  %v590_v44 = vmax.f32 %v526_v39, 0.0  ;;  %v591_v45 = vmax.f32 %v527_v41, 0.0  ;;  %v459_v57 = vmul.f32 %v3171_v49, %v3616_v56 }
  0x42   : > { %v529_v52 = vadd.f32 %v3628_v62, %v458_v47  ;;  %v592_v54 = vmax.f32 %v528_v51, 0.0  ;;  %v460_v58 = vmul.f32 %v3172_v53, %v3616_v56  ;;  %v3175_v60 = vunpack.c.l.bf16 %v3282_v59  ;;  %v3287_v47 = vld [vmem:[%s4329_s2 + $0x58] sm:$0xff]  }
  0x43   : > { %v650_v40 = vpack.c.bf16 %v589_v36, %v588_v35  ;;  %v651_v50 = vpack.c.bf16 %v591_v45, %v590_v44  ;;  %v3176_v61 = vunpack.c.h.bf16 %v3282_v59  ;;  %v3180_v11 = vunpack.c.h.bf16 %v3283_v6 }
  0x44   : > { %883 = vmatpush1.bf16.msra.mxu0 %v3383_v63  ;;  %1236 = vmatpush1.bf16.msra.mxu1 %v3384_v0  ;;  %v593_v55 = vmax.f32 %v529_v52, 0.0  ;;  %v530_v0 = vadd.f32 %v3628_v62, %v459_v57  ;;  %v3187_v27 = vunpack.c.l.bf16 %v3285_v26  ;;  %v3188_v31 = vunpack.c.h.bf16 %v3285_v26 }
  0x45   : > { %884 = vmatprep.subr.bf16.mxu0 %v3385_v1  ;;  %1237 = vmatprep.subr.bf16.mxu1 %v3387_v2  ;;  %v531_v1 = vadd.f32 %v3628_v62, %v460_v58  ;;  %v461_v2 = vmul.f32 %v3175_v60, %v3616_v56  ;;  %v462_v3 = vmul.f32 %v3176_v61, %v3616_v56  ;;  %v3191_v38 = vunpack.c.l.bf16 %v3286_v37  ;;  %v3288_v58 = vld [vmem:[%s4329_s2 + $0x60] sm:$0xff]  }
  0x46   : > { %v652_v63 = vpack.c.bf16 %v593_v55, %v592_v54  ;;  %v594_v4 = vmax.f32 %v530_v0, 0.0  ;;  %v464_v15 = vmul.f32 %v3180_v11, %v3616_v56  ;;  %v467_v35 = vmul.f32 %v3187_v27, %v3616_v56 }
  0x47   : > { %v595_v5 = vmax.f32 %v531_v1, 0.0  ;;  %v468_v36 = vmul.f32 %v3188_v31, %v3616_v56  ;;  %v3192_v42 = vunpack.c.h.bf16 %v3286_v37  ;;  %v469_v45 = vmul.f32 %v3191_v38, %v3616_v56 }
  0x48   : > { %885 = vmatpush1.bf16.msra.mxu0 %v3389_v7  ;;  %1238 = vmatpush1.bf16.msra.mxu1 %v3390_v8  ;;  %v532_v7 = vadd.f32 %v3628_v62, %v461_v2  ;;  %v533_v8 = vadd.f32 %v3628_v62, %v462_v3  ;;  %v3195_v48 = vunpack.c.l.bf16 %v3287_v47  ;;  %v3196_v52 = vunpack.c.h.bf16 %v3287_v47 }
  0x49   : > { %886 = vmatprep.subr.bf16.mxu0 %v3391_v9  ;;  %1239 = vmatprep.subr.bf16.mxu1 %v3393_v10  ;;  %v653_v9 = vpack.c.bf16 %v595_v5, %v594_v4  ;;  %v3179_v10 = vunpack.c.l.bf16 %v3283_v6  ;;  %v539_v41 = vadd.f32 %v3628_v62, %v468_v36  ;;  %v470_v46 = vmul.f32 %v3192_v42, %v3616_v56  ;;  %v3289_v5 = vld [vmem:[%s4329_s2 + $0x68] sm:$0xff]   ;;  %v3292_v36 = vld [vmem:[%s4329_s2 + $0x80] sm:$0xff]  }
  0x4a   : > { %v596_v12 = vmax.f32 %v532_v7, 0.0  ;;  %v597_v13 = vmax.f32 %v533_v8, 0.0  ;;  %v471_v55 = vmul.f32 %v3195_v48, %v3616_v56  ;;  %v472_v57 = vmul.f32 %v3196_v52, %v3616_v56 }
  0x4b   : > { %v463_v14 = vmul.f32 %v3179_v10, %v3616_v56  ;;  %v603_v44 = vmax.f32 %v539_v41, 0.0  ;;  %v541_v51 = vadd.f32 %v3628_v62, %v470_v46  ;;  %v3199_v59 = vunpack.c.l.bf16 %v3288_v58  ;;  %v3293_v46 = vld [vmem:[%s4329_s2 + $0x88] sm:$0xff]  }
  0x4c   : > { %887 = vmatpush1.bf16.msra.mxu0 %v3395_v16  ;;  %1240 = vmatpush1.bf16.msra.mxu1 %v3396_v17  ;;  %v3284_v16 = vld [vmem:[%s4329_s2 + $0x40] sm:$0xff]   ;;  %v654_v17 = vpack.c.bf16 %v597_v13, %v596_v12  ;;  %v542_v61 = vadd.f32 %v3628_v62, %v471_v55  ;;  %v3200_v0 = vunpack.c.h.bf16 %v3288_v58  ;;  %v3203_v6 = vunpack.c.l.bf16 %v3289_v5 }
  0x4d   : > { %v534_v18 = vadd.f32 %v3628_v62, %v463_v14  ;;  %v3183_v20 = vunpack.c.l.bf16 %v3284_v16  ;;  %v3184_v21 = vunpack.c.h.bf16 %v3284_v16  ;;  %v605_v54 = vmax.f32 %v541_v51, 0.0 }
  0x4e   : > { %v606_v1 = vmax.f32 %v542_v61, 0.0  ;;  %v473_v3 = vmul.f32 %v3199_v59, %v3616_v56  ;;  %v474_v4 = vmul.f32 %v3200_v0, %v3616_v56  ;;  %v3204_v10 = vunpack.c.h.bf16 %v3289_v5 }
  0x4f   : > { %905 = vmatmul.mubr.bf16.vlgmr.msra.gmra.mxu0 %v648_v19  ;;  %1258 = vmatmul.mubr.bf16.vlgmr.msra.gmra.mxu1 %v648_v19  ;;  %v535_v19 = vadd.f32 %v3628_v62, %v464_v15  ;;  %v598_v22 = vmax.f32 %v534_v18, 0.0  ;;  %v465_v24 = vmul.f32 %v3183_v20, %v3616_v56  ;;  %v466_v25 = vmul.f32 %v3184_v21, %v3616_v56  ;;  %v3290_v15 = vld [vmem:[%s4329_s2 + $0x70] sm:$0xff]  }
  0x50   : > { %914 = vmatprep.mubr.bf16.mxu0 %v3439_v32  ;;  %1267 = vmatprep.mubr.bf16.mxu1 %v3439_v32  ;;  %v544_v8 = vadd.f32 %v3628_v62, %v473_v3  ;;  %v475_v13 = vmul.f32 %v3203_v6, %v3616_v56  ;;  %v476_v14 = vmul.f32 %v3204_v10, %v3616_v56  ;;  %v3207_v16 = vunpack.c.l.bf16 %v3290_v15 }
  0x51   : > { %v599_v23 = vmax.f32 %v535_v19, 0.0  ;;  %v537_v30 = vadd.f32 %v3628_v62, %v466_v25  ;;  %v3208_v20 = vunpack.c.h.bf16 %v3290_v15  ;;  %v3291_v25 = vld [vmem:[%s4329_s2 + $0x78] sm:$0xff]   ;;  %v3215_v37 = vunpack.c.l.bf16 %v3292_v36 }
  0x52   : > { %v608_v11 = vmax.f32 %v544_v8, 0.0  ;;  %v546_v18 = vadd.f32 %v3628_v62, %v475_v13  ;;  %v547_v19 = vadd.f32 %v3628_v62, %v476_v14  ;;  %v3211_v26 = vunpack.c.l.bf16 %v3291_v25  ;;  %v3296_v14 = vld [vmem:[%s4329_s2 + $0xa0] sm:$0xff]  }
  0x53   : > { %v655_v28 = vpack.c.bf16 %v599_v23, %v598_v22  ;;  %v601_v34 = vmax.f32 %v537_v30, 0.0  ;;  %v477_v23 = vmul.f32 %v3207_v16, %v3616_v56  ;;  %v3212_v30 = vunpack.c.h.bf16 %v3291_v25 }
  0x54   : > { %v610_v21 = vmax.f32 %v546_v18, 0.0  ;;  %v611_v22 = vmax.f32 %v547_v19, 0.0  ;;  %v3216_v41 = vunpack.c.h.bf16 %v3292_v36  ;;  %v3219_v47 = vunpack.c.l.bf16 %v3293_v46 }
  0x55   : > { %v3220_v51 = vunpack.c.h.bf16 %v3293_v46  ;;  %v3231_v15 = vunpack.c.l.bf16 %v3296_v14  ;;  %v3232_v16 = vunpack.c.h.bf16 %v3296_v14 }
  0x56   : > { %v661_v27 = vpack.c.bf16 %v611_v22, %v610_v21 }
  0x57   : > { %915 = vmatmul.mubr.bf16.gmra.mxu0 %v649_v29  ;;  %1268 = vmatmul.mubr.bf16.gmra.mxu1 %v649_v29  ;;  %v536_v29 = vadd.f32 %v3628_v62, %v465_v24  ;;  %v478_v24 = vmul.f32 %v3208_v20, %v3616_v56  ;;  %v484_v55 = vmul.f32 %v3220_v51, %v3616_v56 }
  0x58   : > { %924 = vmatprep.mubr.bf16.mxu0 %v3439_v32  ;;  %1277 = vmatprep.mubr.bf16.mxu1 %v3439_v32  ;;  %v489_v20 = vmul.f32 %v3231_v15, %v3616_v56  ;;  %v490_v21 = vmul.f32 %v3232_v16, %v3616_v56 }
  0x59   : > { %v600_v33 = vmax.f32 %v536_v29, 0.0  ;;  %v549_v29 = vadd.f32 %v3628_v62, %v478_v24  ;;  %v555_v61 = vadd.f32 %v3628_v62, %v484_v55  ;;  %v3297_v24 = vld [vmem:[%s4329_s2 + $0xa8] sm:$0xff]   ;;  %v3300_v55 = vld [vmem:[%s4329_s2 + $0xc0] sm:$0xff]  }
  0x5a   : > { %v560_v25 = vadd.f32 %v3628_v62, %v489_v20 }
  0x5b   : > { %v656_v39 = vpack.c.bf16 %v601_v34, %v600_v33  ;;  %v613_v33 = vmax.f32 %v549_v29, 0.0  ;;  %v479_v34 = vmul.f32 %v3211_v26, %v3616_v56  ;;  %v561_v26 = vadd.f32 %v3628_v62, %v490_v21 }
  0x5c   : > { %v3236_v29 = vunpack.c.h.bf16 %v3297_v24 }
  0x5f   : > { %925 = vmatmul.mubr.bf16.gmra.mxu0 %v650_v40  ;;  %1278 = vmatmul.mubr.bf16.gmra.mxu1 %v650_v40  ;;  %v538_v40 = vadd.f32 %v3628_v62, %v467_v35  ;;  %v480_v35 = vmul.f32 %v3212_v30, %v3616_v56  ;;  %v624_v30 = vmax.f32 %v560_v25, 0.0  ;;  %v3303_v25 = vld [vmem:[%s4329_s2 + $0xd8] sm:$0xff]  }
  0x60   : > { %934 = vmatprep.mubr.bf16.mxu0 %v3439_v32  ;;  %1287 = vmatprep.mubr.bf16.mxu1 %v3439_v32 }
  0x61   : > { %v602_v43 = vmax.f32 %v538_v40, 0.0  ;;  %v551_v40 = vadd.f32 %v3628_v62, %v480_v35  ;;  %v3298_v35 = vld [vmem:[%s4329_s2 + $0xb0] sm:$0xff]  }
  0x63   : > { %v657_v49 = vpack.c.bf16 %v603_v44, %v602_v43  ;;  %v615_v43 = vmax.f32 %v551_v40, 0.0  ;;  %v481_v44 = vmul.f32 %v3215_v37, %v3616_v56  ;;  %v3240_v40 = vunpack.c.h.bf16 %v3298_v35 }
  0x67   : > { %935 = vmatmul.mubr.bf16.gmra.mxu0 %v651_v50  ;;  %1288 = vmatmul.mubr.bf16.gmra.mxu1 %v651_v50  ;;  %v540_v50 = vadd.f32 %v3628_v62, %v469_v45  ;;  %v482_v45 = vmul.f32 %v3216_v41, %v3616_v56 }
  0x68   : > { %944 = vmatprep.mubr.bf16.mxu0 %v3439_v32  ;;  %1297 = vmatprep.mubr.bf16.mxu1 %v3439_v32 }
  0x69   : > { %v604_v53 = vmax.f32 %v540_v50, 0.0  ;;  %v553_v50 = vadd.f32 %v3628_v62, %v482_v45  ;;  %v3299_v45 = vld [vmem:[%s4329_s2 + $0xb8] sm:$0xff]  }
  0x6a   : > { %v3243_v46 = vunpack.c.l.bf16 %v3299_v45 }
  0x6b   : > { %v658_v60 = vpack.c.bf16 %v605_v54, %v604_v53  ;;  %v617_v53 = vmax.f32 %v553_v50, 0.0  ;;  %v483_v54 = vmul.f32 %v3219_v47, %v3616_v56  ;;  %v3244_v47 = vunpack.c.h.bf16 %v3299_v45 }
  0x6c   : > { %v495_v51 = vmul.f32 %v3243_v46, %v3616_v56 }
  0x6f   : > { %945 = vmatmul.mubr.bf16.gmra.mxu0 %v652_v63  ;;  %1298 = vmatmul.mubr.bf16.gmra.mxu1 %v652_v63  ;;  %v543_v63 = vadd.f32 %v3628_v62, %v472_v57  ;;  %v3294_v57 = vld [vmem:[%s4329_s2 + $0x90] sm:$0xff]  }
  0x70   : > { %954 = vmatprep.mubr.bf16.mxu0 %v3439_v32  ;;  %1307 = vmatprep.mubr.bf16.mxu1 %v3439_v32  ;;  %v3223_v58 = vunpack.c.l.bf16 %v3294_v57 }
  0x71   : > { %v607_v2 = vmax.f32 %v543_v63, 0.0  ;;  %v3224_v63 = vunpack.c.h.bf16 %v3294_v57  ;;  %v566_v57 = vadd.f32 %v3628_v62, %v495_v51 }
  0x72   : > { %v485_v0 = vmul.f32 %v3223_v58, %v3616_v56 }
  0x73   : > { %v659_v7 = vpack.c.bf16 %v607_v2, %v606_v1  ;;  %v619_v2 = vmax.f32 %v555_v61, 0.0  ;;  %v486_v3 = vmul.f32 %v3224_v63, %v3616_v56  ;;  %v3248_v61 = vunpack.c.h.bf16 %v3300_v55 }
  0x74   : > { %v556_v5 = vadd.f32 %v3628_v62, %v485_v0  ;;  %v630_v63 = vmax.f32 %v566_v57, 0.0 }
  0x76   : > { %v620_v10 = vmax.f32 %v556_v5, 0.0 }
  0x77   : > { %955 = vmatmul.mubr.bf16.gmra.mxu0 %v653_v9  ;;  %1308 = vmatmul.mubr.bf16.gmra.mxu1 %v653_v9  ;;  %v545_v9 = vadd.f32 %v3628_v62, %v474_v4  ;;  %v3295_v4 = vld [vmem:[%s4329_s2 + $0x98] sm:$0xff]  }
  0x78   : > { %964 = vmatprep.mubr.bf16.mxu0 %v3439_v32  ;;  %1317 = vmatprep.mubr.bf16.mxu1 %v3439_v32  ;;  %v3227_v8 = vunpack.c.l.bf16 %v3295_v4 }
  0x79   : > { %v609_v12 = vmax.f32 %v545_v9, 0.0  ;;  %v3228_v9 = vunpack.c.h.bf16 %v3295_v4 }
  0x7b   : > { %v488_v13 = vmul.f32 %v3228_v9, %v3616_v56 }
  0x7d   : > { %v559_v19 = vadd.f32 %v3628_v62, %v488_v13  ;;  %v3302_v13 = vld [vmem:[%s4329_s2 + $0xd0] sm:$0xff]  }
  0x7e   : > { %v3255_v14 = vunpack.c.l.bf16 %v3302_v13  ;;  %v3256_v15 = vunpack.c.h.bf16 %v3302_v13 }
  0x7f   : > { %965 = vmatmul.mubr.bf16.gmra.mxu0 %v654_v17  ;;  %1318 = vmatmul.mubr.bf16.gmra.mxu1 %v654_v17  ;;  %v660_v17 = vpack.c.bf16 %v609_v12, %v608_v11  ;;  %v487_v12 = vmul.f32 %v3227_v8, %v3616_v56 }
  0x80   : > { %974 = vmatprep.mubr.bf16.mxu0 %v3439_v32  ;;  %1327 = vmatprep.mubr.bf16.mxu1 %v3439_v32  ;;  %v502_v20 = vmul.f32 %v3256_v15, %v3616_v56 }
  0x81   : > { %v558_v18 = vadd.f32 %v3628_v62, %v487_v12 }
  0x83   : > { %v622_v22 = vmax.f32 %v558_v18, 0.0 }
  0x87   : > { %975 = vmatmul.mubr.bf16.gmra.mxu0 %v655_v28  ;;  %1328 = vmatmul.mubr.bf16.gmra.mxu1 %v655_v28  ;;  %v548_v28 = vadd.f32 %v3628_v62, %v477_v23  ;;  %v623_v23 = vmax.f32 %v559_v19, 0.0  ;;  %v501_v19 = vmul.f32 %v3255_v14, %v3616_v56 }
  0x88   : > { %984 = vmatprep.mubr.bf16.mxu0 %v3439_v32  ;;  %1337 = vmatprep.mubr.bf16.mxu1 %v3439_v32 }
  0x89   : > { %v612_v31 = vmax.f32 %v548_v28, 0.0  ;;  %v3235_v28 = vunpack.c.l.bf16 %v3297_v24 }
  0x8b   : > { %v662_v38 = vpack.c.bf16 %v613_v33, %v612_v31  ;;  %v625_v31 = vmax.f32 %v561_v26, 0.0  ;;  %v491_v33 = vmul.f32 %v3235_v28, %v3616_v56 }
  0x8d   : > { %v668_v36 = vpack.c.bf16 %v625_v31, %v624_v30  ;;  %v562_v37 = vadd.f32 %v3628_v62, %v491_v33  ;;  %v572_v30 = vadd.f32 %v3628_v62, %v501_v19  ;;  %v573_v31 = vadd.f32 %v3628_v62, %v502_v20 }
  0x8f   : > { %985 = vmatmul.mubr.bf16.gmra.mxu0 %v656_v39  ;;  %1338 = vmatmul.mubr.bf16.gmra.mxu1 %v656_v39  ;;  %v550_v39 = vadd.f32 %v3628_v62, %v479_v34  ;;  %v492_v34 = vmul.f32 %v3236_v29, %v3616_v56  ;;  %v626_v41 = vmax.f32 %v562_v37, 0.0  ;;  %v3260_v37 = vunpack.c.h.bf16 %v3303_v25 }
  0x90   : > { %994 = vmatprep.mubr.bf16.mxu0 %v3439_v32  ;;  %1347 = vmatprep.mubr.bf16.mxu1 %v3439_v32 }
  0x91   : > { %v614_v42 = vmax.f32 %v550_v39, 0.0  ;;  %v3239_v39 = vunpack.c.l.bf16 %v3298_v35 }
  0x93   : > { %v663_v48 = vpack.c.bf16 %v615_v43, %v614_v42  ;;  %v493_v43 = vmul.f32 %v3239_v39, %v3616_v56 }
  0x97   : > { %995 = vmatmul.mubr.bf16.gmra.mxu0 %v657_v49  ;;  %1348 = vmatmul.mubr.bf16.gmra.mxu1 %v657_v49  ;;  %v552_v49 = vadd.f32 %v3628_v62, %v481_v44  ;;  %v494_v44 = vmul.f32 %v3240_v40, %v3616_v56 }
  0x98   : > { %1004 = vmatprep.mubr.bf16.mxu0 %v3439_v32  ;;  %1357 = vmatprep.mubr.bf16.mxu1 %v3439_v32 }
  0x99   : > { %v616_v52 = vmax.f32 %v552_v49, 0.0  ;;  %v564_v49 = vadd.f32 %v3628_v62, %v493_v43  ;;  %v565_v50 = vadd.f32 %v3628_v62, %v494_v44  ;;  %v637_v43 = vmax.f32 %v573_v31, 0.0 }
  0x9b   : > { %v664_v59 = vpack.c.bf16 %v617_v53, %v616_v52  ;;  %v496_v52 = vmul.f32 %v3244_v47, %v3616_v56  ;;  %v628_v53 = vmax.f32 %v564_v49, 0.0  ;;  %v504_v47 = vmul.f32 %v3260_v37, %v3616_v56 }
  0x9d   : > { %v567_v58 = vadd.f32 %v3628_v62, %v496_v52 }
  0x9f   : > { %1005 = vmatmul.mubr.bf16.gmra.mxu0 %v658_v60  ;;  %1358 = vmatmul.mubr.bf16.gmra.mxu1 %v658_v60  ;;  %v554_v60 = vadd.f32 %v3628_v62, %v483_v54  ;;  %v629_v54 = vmax.f32 %v565_v50, 0.0  ;;  %v631_v0 = vmax.f32 %v567_v58, 0.0  ;;  %v575_v58 = vadd.f32 %v3628_v62, %v504_v47 }
  0xa0   : > { %1014 = vmatprep.mubr.bf16.mxu0 %v3439_v32  ;;  %1367 = vmatprep.mubr.bf16.mxu1 %v3439_v32 }
  0xa1   : > { %v618_v1 = vmax.f32 %v554_v60, 0.0  ;;  %v3247_v60 = vunpack.c.l.bf16 %v3300_v55  ;;  %v671_v4 = vpack.c.bf16 %v631_v0, %v630_v63 }
  0xa3   : > { %v665_v6 = vpack.c.bf16 %v619_v2, %v618_v1  ;;  %v497_v1 = vmul.f32 %v3247_v60, %v3616_v56  ;;  %v498_v2 = vmul.f32 %v3248_v61, %v3616_v56 }
  0xa5   : > { %v568_v5 = vadd.f32 %v3628_v62, %v497_v1 }
  0xa7   : > { %1015 = vmatmul.mubr.bf16.gmra.mxu0 %v659_v7  ;;  %1368 = vmatmul.mubr.bf16.gmra.mxu1 %v659_v7  ;;  %v557_v7 = vadd.f32 %v3628_v62, %v486_v3  ;;  %v3301_v3 = vld [vmem:[%s4329_s2 + $0xc8] sm:$0xff]   ;;  %v632_v9 = vmax.f32 %v568_v5, 0.0  ;;  %v639_v5 = vmax.f32 %v575_v58, 0.0 }
  0xa8   : > { %1024 = vmatprep.mubr.bf16.mxu0 %v3439_v32  ;;  %1377 = vmatprep.mubr.bf16.mxu1 %v3439_v32  ;;  %v3252_v8 = vunpack.c.h.bf16 %v3301_v3 }
  0xa9   : > { %v621_v11 = vmax.f32 %v557_v7, 0.0  ;;  %v3251_v7 = vunpack.c.l.bf16 %v3301_v3 }
  0xaa   : > { %v500_v12 = vmul.f32 %v3252_v8, %v3616_v56  ;;  %v3305_v8 = vld [vmem:[%s4329_s2 + $0xe8] sm:$0xff]  }
  0xab   : > { %v3267_v13 = vunpack.c.l.bf16 %v3305_v8  ;;  %v3268_v14 = vunpack.c.h.bf16 %v3305_v8 }
  0xac   : > { %v571_v18 = vadd.f32 %v3628_v62, %v500_v12 }
  0xae   : > { %v635_v24 = vmax.f32 %v571_v18, 0.0 }
  0xaf   : > { %1025 = vmatmul.mubr.bf16.gmra.mxu0 %v660_v17  ;;  %1378 = vmatmul.mubr.bf16.gmra.mxu1 %v660_v17  ;;  %v666_v17 = vpack.c.bf16 %v621_v11, %v620_v10  ;;  %v499_v11 = vmul.f32 %v3251_v7, %v3616_v56 }
  0xb0   : > { %1034 = vmatprep.mubr.bf16.mxu0 %v3439_v32  ;;  %1387 = vmatprep.mubr.bf16.mxu1 %v3439_v32 }
  0xb7   : > { %1035 = vmatmul.mubr.bf16.gmra.mxu0 %v661_v27  ;;  %1388 = vmatmul.mubr.bf16.gmra.mxu1 %v661_v27  ;;  %v667_v27 = vpack.c.bf16 %v623_v23, %v622_v22 }
  0xb8   : > { %1044 = vmatprep.mubr.bf16.mxu0 %v3439_v32  ;;  %1397 = vmatprep.mubr.bf16.mxu1 %v3439_v32 }
  0xbf   : > { %1045 = vmatmul.mubr.bf16.gmra.mxu0 %v662_v38  ;;  %1398 = vmatmul.mubr.bf16.gmra.mxu1 %v662_v38  ;;  %v563_v38 = vadd.f32 %v3628_v62, %v492_v34 }
  0xc0   : > { %1054 = vmatprep.mubr.bf16.mxu0 %v3439_v32  ;;  %1407 = vmatprep.mubr.bf16.mxu1 %v3439_v32 }
  0xc1   : > { %v627_v42 = vmax.f32 %v563_v38, 0.0 }
  0xc7   : > { %1055 = vmatmul.mubr.bf16.gmra.mxu0 %v663_v48  ;;  %1408 = vmatmul.mubr.bf16.gmra.mxu1 %v663_v48  ;;  %v669_v48 = vpack.c.bf16 %v627_v42, %v626_v41  ;;  %v636_v42 = vmax.f32 %v572_v30, 0.0  ;;  %v3306_v30 = vld [vmem:[%s4329_s2 + $0xf0] sm:$0xff]  }
  0xc8   : > { %1064 = vmatprep.mubr.bf16.mxu0 %v3439_v32  ;;  %1417 = vmatprep.mubr.bf16.mxu1 %v3439_v32 }
  0xcf   : > { %1065 = vmatmul.mubr.bf16.gmra.mxu0 %v664_v59  ;;  %1418 = vmatmul.mubr.bf16.gmra.mxu1 %v664_v59  ;;  %v670_v59 = vpack.c.bf16 %v629_v54, %v628_v53  ;;  %v674_v53 = vpack.c.bf16 %v637_v43, %v636_v42 }
  0xd0   : > { %1074 = vmatprep.mubr.bf16.mxu0 %v3439_v32  ;;  %1427 = vmatprep.mubr.bf16.mxu1 %v3439_v32 }
  0xd7   : > { %1075 = vmatmul.mubr.bf16.gmra.mxu0 %v665_v6  ;;  %1428 = vmatmul.mubr.bf16.gmra.mxu1 %v665_v6  ;;  %v569_v6 = vadd.f32 %v3628_v62, %v498_v2 }
  0xd8   : > { %1084 = vmatprep.mubr.bf16.mxu0 %v3439_v32  ;;  %1437 = vmatprep.mubr.bf16.mxu1 %v3439_v32 }
  0xd9   : > { %v633_v10 = vmax.f32 %v569_v6, 0.0 }
  0xdb   : > { %v672_v16 = vpack.c.bf16 %v633_v10, %v632_v9 }
  0xdf   : > { %1085 = vmatmul.mubr.bf16.gmra.mxu0 %v666_v17  ;;  %1438 = vmatmul.mubr.bf16.gmra.mxu1 %v666_v17  ;;  %v570_v17 = vadd.f32 %v3628_v62, %v499_v11 }
  0xe0   : > { %1094 = vmatprep.mubr.bf16.mxu0 %v3439_v32  ;;  %1447 = vmatprep.mubr.bf16.mxu1 %v3439_v32 }
  0xe1   : > { %v634_v23 = vmax.f32 %v570_v17, 0.0 }
  0xe3   : > { %v673_v35 = vpack.c.bf16 %v635_v24, %v634_v23  ;;  %v507_v24 = vmul.f32 %v3267_v13, %v3616_v56 }
  0xe7   : > { %1095 = vmatmul.mubr.bf16.gmra.mxu0 %v667_v27  ;;  %1448 = vmatmul.mubr.bf16.gmra.mxu1 %v667_v27 }
  0xe8   : > { %1104 = vmatprep.mubr.bf16.mxu0 %v3439_v32  ;;  %1457 = vmatprep.mubr.bf16.mxu1 %v3439_v32 }
  0xef   : > { %1105 = vmatmul.mubr.bf16.gmra.mxu0 %v668_v36  ;;  %1458 = vmatmul.mubr.bf16.gmra.mxu1 %v668_v36  ;;  %v3259_v36 = vunpack.c.l.bf16 %v3303_v25  ;;  %v508_v25 = vmul.f32 %v3268_v14, %v3616_v56 }
  0xf0   : > { %1114 = vmatprep.mubr.bf16.mxu0 %v3439_v32  ;;  %1467 = vmatprep.mubr.bf16.mxu1 %v3439_v32 }
  0xf1   : > { %v503_v46 = vmul.f32 %v3259_v36, %v3616_v56  ;;  %v579_v36 = vadd.f32 %v3628_v62, %v508_v25 }
  0xf3   : > { %v574_v57 = vadd.f32 %v3628_v62, %v503_v46  ;;  %v643_v47 = vmax.f32 %v579_v36, 0.0 }
  0xf7   : > { %1115 = vmatmul.mubr.bf16.gmra.mxu0 %v669_v48  ;;  %1468 = vmatmul.mubr.bf16.gmra.mxu1 %v669_v48  ;;  %v3304_v48 = vld [vmem:[%s4329_s2 + $0xe0] sm:$0xff]  }
  0xf8   : > { %1124 = vmatprep.mubr.bf16.mxu0 %v3439_v32  ;;  %1477 = vmatprep.mubr.bf16.mxu1 %v3439_v32  ;;  %v3264_v60 = vunpack.c.h.bf16 %v3304_v48 }
  0xfa   : > { %v506_v7 = vmul.f32 %v3264_v60, %v3616_v56 }
  0xfc   : > { %v577_v19 = vadd.f32 %v3628_v62, %v506_v7 }
  0xff   : > { %1125 = vmatmul.mubr.bf16.gmra.mxu0 %v670_v59  ;;  %1478 = vmatmul.mubr.bf16.gmra.mxu1 %v670_v59  ;;  %v3263_v59 = vunpack.c.l.bf16 %v3304_v48 }
 0x100   : > { %1134 = vmatprep.mubr.bf16.mxu0 %v3439_v32  ;;  %1487 = vmatprep.mubr.bf16.mxu1 %v3439_v32 }
 0x101   : > { %v505_v6 = vmul.f32 %v3263_v59, %v3616_v56 }
 0x103   : > { %v576_v18 = vadd.f32 %v3628_v62, %v505_v6 }
 0x107   : > { %1135 = vmatmul.mubr.bf16.gmra.mxu0 %v671_v4  ;;  %1488 = vmatmul.mubr.bf16.gmra.mxu1 %v671_v4  ;;  %v638_v4 = vmax.f32 %v574_v57, 0.0 }
 0x108   : > { %1144 = vmatprep.mubr.bf16.mxu0 %v3439_v32  ;;  %1497 = vmatprep.mubr.bf16.mxu1 %v3439_v32 }
 0x109   : > { %v675_v17 = vpack.c.bf16 %v639_v5, %v638_v4 }
 0x10f   : > { %v906_v21 = vpop.f32.mrf.mxu0  ;;  %1145 = vmatmul.mubr.bf16.gmra.mxu0 %v672_v16  ;;  %v1259_v22 = vpop.f32.mrf.mxu1  ;;  %1498 = vmatmul.mubr.bf16.gmra.mxu1 %v672_v16 }
 0x110   : > { %1154 = vmatprep.mubr.bf16.mxu0 %v3439_v32  ;;  %1507 = vmatprep.mubr.bf16.mxu1 %v3439_v32 }
 0x111   : > { %v908_v26 = vpop.f32.mrf.mxu0  ;;  %v1261_v27 = vpop.f32.mrf.mxu1 }
 0x112   : > { %v3020_v28 = vpack.c.bf16 %v908_v26, %v906_v21  ;;  %v3021_v29 = vpack.c.bf16 %v1261_v27, %v1259_v22 }
 0x113   : > { %v910_v33 = vpop.f32.mrf.mxu0  ;;  %v1263_v34 = vpop.f32.mrf.mxu1 }
 0x114   : > { %2346 = vst [vmem:[%s3876_s15] sm:$0xff] %v3020_v28  ;;  %2347 = vst [vmem:[%s3876_s15 + $0x8] sm:$0xff] %v3021_v29  ;;  %v640_v28 = vmax.f32 %v576_v18, 0.0  ;;  %v641_v29 = vmax.f32 %v577_v19, 0.0 }
 0x115   : > { %v912_v38 = vpop.f32.mrf.mxu0  ;;  %v1265_v39 = vpop.f32.mrf.mxu1 }
 0x116   : > { %v3022_v40 = vpack.c.bf16 %v912_v38, %v910_v33  ;;  %v3023_v41 = vpack.c.bf16 %v1265_v39, %v1263_v34  ;;  %v676_v39 = vpack.c.bf16 %v641_v29, %v640_v28 }
 0x117   : > { %v916_v44 = vpop.f32.mrf.mxu0  ;;  %1155 = vmatmul.mubr.bf16.gmra.mxu0 %v673_v35  ;;  %v1269_v45 = vpop.f32.mrf.mxu1  ;;  %1508 = vmatmul.mubr.bf16.gmra.mxu1 %v673_v35  ;;  %v578_v35 = vadd.f32 %v3628_v62, %v507_v24  ;;  %v3397_v62 = vld [vmem:[%s4327_s0] ss:$0 sm:$0xff] }
 0x118   : > { %2348 = vst [vmem:[%s3876_s15 + $0x10] sm:$0xff] %v3022_v40  ;;  %2349 = vst [vmem:[%s3876_s15 + $0x18] sm:$0xff] %v3023_v41  ;;  %1164 = vmatprep.mubr.bf16.mxu0 %v3439_v32  ;;  %1517 = vmatprep.mubr.bf16.mxu1 %v3439_v32  ;;  %v3271_v40 = vunpack.c.l.bf16 %v3306_v30  ;;  %v3272_v41 = vunpack.c.h.bf16 %v3306_v30 }
 0x119   : > { %v918_v49 = vpop.f32.mrf.mxu0  ;;  %v1271_v50 = vpop.f32.mrf.mxu1  ;;  %v642_v46 = vmax.f32 %v578_v35, 0.0 }
 0x11a   : > { %v3024_v51 = vpack.c.bf16 %v918_v49, %v916_v44  ;;  %v3025_v52 = vpack.c.bf16 %v1271_v50, %v1269_v45  ;;  %v509_v50 = vmul.f32 %v3397_v62, %v3271_v40 }
 0x11b   : > { %v920_v54 = vpop.f32.mrf.mxu0  ;;  %v1273_v55 = vpop.f32.mrf.mxu1  ;;  %v677_v58 = vpack.c.bf16 %v643_v47, %v642_v46 }
 0x11c   : > { %2350 = vst [vmem:[%s3876_s15 + $0x20] sm:$0xff] %v3024_v51  ;;  %2351 = vst [vmem:[%s3876_s15 + $0x28] sm:$0xff] %v3025_v52  ;;  %v510_v51 = vmul.f32 %v3397_v62, %v3272_v41  ;;  %v3307_v52 = vld [vmem:[%s4329_s2 + $0xf8] sm:$0xff]  }
 0x11d   : > { %v922_v61 = vpop.f32.mrf.mxu0  ;;  %v1275_v63 = vpop.f32.mrf.mxu1 }
 0x11e   : > { %v3026_v0 = vpack.c.bf16 %v922_v61, %v920_v54  ;;  %v3027_v1 = vpack.c.bf16 %v1275_v63, %v1273_v55  ;;  %v3398_v61 = vld [vmem:[%s4328_s1] ss:$0 sm:$0xff] }
 0x11f   : > { %v926_v2 = vpop.f32.mrf.mxu0  ;;  %1165 = vmatmul.mubr.bf16.gmra.mxu0 %v674_v53  ;;  %v1279_v3 = vpop.f32.mrf.mxu1  ;;  %1518 = vmatmul.mubr.bf16.gmra.mxu1 %v674_v53  ;;  %v580_v63 = vadd.f32 %v3398_v61, %v509_v50 }
 0x120   : > { %2352 = vst [vmem:[%s3876_s15 + $0x30] sm:$0xff] %v3026_v0  ;;  %2353 = vst [vmem:[%s3876_s15 + $0x38] sm:$0xff] %v3027_v1  ;;  %1174 = vmatprep.mubr.bf16.mxu0 %v3439_v32  ;;  %1527 = vmatprep.mubr.bf16.mxu1 %v3439_v32  ;;  %v581_v0 = vadd.f32 %v3398_v61, %v510_v51  ;;  %v3275_v1 = vunpack.c.l.bf16 %v3307_v52 }
 0x121   : > { %v928_v9 = vpop.f32.mrf.mxu0  ;;  %v1281_v10 = vpop.f32.mrf.mxu1 }
 0x122   : > { %v3028_v11 = vpack.c.bf16 %v928_v9, %v926_v2  ;;  %v3029_v12 = vpack.c.bf16 %v1281_v10, %v1279_v3  ;;  %v3276_v2 = vunpack.c.h.bf16 %v3307_v52  ;;  %v644_v9 = vmax.f32 %v580_v63, 0.0 }
 0x123   : > { %v930_v15 = vpop.f32.mrf.mxu0  ;;  %v1283_v16 = vpop.f32.mrf.mxu1  ;;  %v645_v10 = vmax.f32 %v581_v0, 0.0 }
 0x124   : > { %2354 = vst [vmem:[%s3876_s15 + $0x40] sm:$0xff] %v3028_v11  ;;  %2355 = vst [vmem:[%s3876_s15 + $0x48] sm:$0xff] %v3029_v12  ;;  %v511_v11 = vmul.f32 %v3397_v62, %v3275_v1  ;;  %v512_v12 = vmul.f32 %v3397_v62, %v3276_v2 }
 0x125   : > { %v932_v20 = vpop.f32.mrf.mxu0  ;;  %v1285_v21 = vpop.f32.mrf.mxu1  ;;  %v678_v19 = vpack.c.bf16 %v645_v10, %v644_v9 }
 0x126   : > { %v3030_v22 = vpack.c.bf16 %v932_v20, %v930_v15  ;;  %v3031_v23 = vpack.c.bf16 %v1285_v21, %v1283_v16  ;;  %v582_v20 = vadd.f32 %v3398_v61, %v511_v11  ;;  %v583_v21 = vadd.f32 %v3398_v61, %v512_v12 }
 0x127   : > { %v936_v26 = vpop.f32.mrf.mxu0  ;;  %1175 = vmatmul.mubr.bf16.gmra.mxu0 %v675_v17  ;;  %v1289_v27 = vpop.f32.mrf.mxu1  ;;  %1528 = vmatmul.mubr.bf16.gmra.mxu1 %v675_v17 }
 0x128   : > { %2356 = vst [vmem:[%s3876_s15 + $0x50] sm:$0xff] %v3030_v22  ;;  %2357 = vst [vmem:[%s3876_s15 + $0x58] sm:$0xff] %v3031_v23  ;;  %1184 = vmatprep.mubr.bf16.mxu0 %v3439_v32  ;;  %1537 = vmatprep.mubr.bf16.mxu1 %v3439_v32  ;;  %v646_v28 = vmax.f32 %v582_v20, 0.0  ;;  %v647_v29 = vmax.f32 %v583_v21, 0.0 }
 0x129   : > { %v938_v31 = vpop.f32.mrf.mxu0  ;;  %v1291_v56 = vpop.f32.mrf.mxu1 }
 0x12a   : > { %v3032_v33 = vpack.c.bf16 %v938_v31, %v936_v26  ;;  %v3033_v34 = vpack.c.bf16 %v1291_v56, %v1289_v27  ;;  %v679_v36 = vpack.c.bf16 %v647_v29, %v646_v28 }
 0x12b   : > { %v940_v37 = vpop.f32.mrf.mxu0  ;;  %v1293_v38 = vpop.f32.mrf.mxu1 }
 0x12c   : > { %2358 = vst [vmem:[%s3876_s15 + $0x60] sm:$0xff] %v3032_v33  ;;  %2359 = vst [vmem:[%s3876_s15 + $0x68] sm:$0xff] %v3033_v34 }
 0x12d   : > { %v942_v42 = vpop.f32.mrf.mxu0  ;;  %v1295_v43 = vpop.f32.mrf.mxu1 }
 0x12e   : > { %v3034_v44 = vpack.c.bf16 %v942_v42, %v940_v37  ;;  %v3035_v45 = vpack.c.bf16 %v1295_v43, %v1293_v38 }
 0x12f   : > { %v946_v48 = vpop.f32.mrf.mxu0  ;;  %1185 = vmatmul.mubr.bf16.gmra.mxu0 %v676_v39  ;;  %v1299_v49 = vpop.f32.mrf.mxu1  ;;  %1538 = vmatmul.mubr.bf16.gmra.mxu1 %v676_v39 }
 0x130   : > { %2360 = vst [vmem:[%s3876_s15 + $0x70] sm:$0xff] %v3034_v44  ;;  %2361 = vst [vmem:[%s3876_s15 + $0x78] sm:$0xff] %v3035_v45  ;;  %1194 = vmatprep.mubr.bf16.mxu0 %v3439_v32  ;;  %1547 = vmatprep.mubr.bf16.mxu1 %v3439_v32 }
 0x131   : > { %v948_v53 = vpop.f32.mrf.mxu0  ;;  %v1301_v54 = vpop.f32.mrf.mxu1 }
 0x132   : > { %v3036_v55 = vpack.c.bf16 %v948_v53, %v946_v48  ;;  %v3037_v57 = vpack.c.bf16 %v1301_v54, %v1299_v49 }
 0x133   : > { %v950_v59 = vpop.f32.mrf.mxu0  ;;  %v1303_v60 = vpop.f32.mrf.mxu1 }
 0x134   : > { %2362 = vst [vmem:[%s3876_s15 + $0x80] sm:$0xff] %v3036_v55  ;;  %2363 = vst [vmem:[%s3876_s15 + $0x88] sm:$0xff] %v3037_v57 }
 0x135   : > { %v952_v3 = vpop.f32.mrf.mxu0  ;;  %v1305_v4 = vpop.f32.mrf.mxu1 }
 0x136   : > { %v3038_v5 = vpack.c.bf16 %v952_v3, %v950_v59  ;;  %v3039_v6 = vpack.c.bf16 %v1305_v4, %v1303_v60 }
 0x137   : > { %v956_v7 = vpop.f32.mrf.mxu0  ;;  %1195 = vmatmul.mubr.bf16.gmra.mxu0 %v677_v58  ;;  %v1309_v8 = vpop.f32.mrf.mxu1  ;;  %1548 = vmatmul.mubr.bf16.gmra.mxu1 %v677_v58 }
 0x138   : > { %2364 = vst [vmem:[%s3876_s15 + $0x90] sm:$0xff] %v3038_v5  ;;  %2365 = vst [vmem:[%s3876_s15 + $0x98] sm:$0xff] %v3039_v6  ;;  %1204 = vmatprep.mubr.bf16.mxu0 %v3439_v32  ;;  %1557 = vmatprep.mubr.bf16.mxu1 %v3439_v32 }
 0x139   : > { %v958_v13 = vpop.f32.mrf.mxu0  ;;  %v1311_v14 = vpop.f32.mrf.mxu1 }
 0x13a   : > { %v3040_v15 = vpack.c.bf16 %v958_v13, %v956_v7  ;;  %v3041_v16 = vpack.c.bf16 %v1311_v14, %v1309_v8 }
 0x13b   : > { %v960_v17 = vpop.f32.mrf.mxu0  ;;  %v1313_v18 = vpop.f32.mrf.mxu1 }
 0x13c   : > { %2366 = vst [vmem:[%s3876_s15 + $0xa0] sm:$0xff] %v3040_v15  ;;  %2367 = vst [vmem:[%s3876_s15 + $0xa8] sm:$0xff] %v3041_v16 }
 0x13d   : > { %v962_v22 = vpop.f32.mrf.mxu0  ;;  %v1315_v23 = vpop.f32.mrf.mxu1 }
 0x13e   : > { %v3042_v24 = vpack.c.bf16 %v962_v22, %v960_v17  ;;  %v3043_v25 = vpack.c.bf16 %v1315_v23, %v1313_v18 }
 0x13f   : > { %v966_v26 = vpop.f32.mrf.mxu0  ;;  %1205 = vmatmul.mubr.bf16.gmra.mxu0 %v678_v19  ;;  %v1319_v27 = vpop.f32.mrf.mxu1  ;;  %1558 = vmatmul.mubr.bf16.gmra.mxu1 %v678_v19 }
 0x140   : > { %2368 = vst [vmem:[%s3876_s15 + $0xb0] sm:$0xff] %v3042_v24  ;;  %2369 = vst [vmem:[%s3876_s15 + $0xb8] sm:$0xff] %v3043_v25  ;;  %1214 = vmatprep.mubr.bf16.mxu0 %v3439_v32  ;;  %1567 = vmatprep.mubr.bf16.mxu1 %v3439_v32 }
 0x141   : > { %v968_v30 = vpop.f32.mrf.mxu0  ;;  %v1321_v31 = vpop.f32.mrf.mxu1 }
 0x142   : > { %v3044_v56 = vpack.c.bf16 %v968_v30, %v966_v26  ;;  %v3045_v33 = vpack.c.bf16 %v1321_v31, %v1319_v27 }
 0x143   : > { %v970_v34 = vpop.f32.mrf.mxu0  ;;  %v1323_v35 = vpop.f32.mrf.mxu1 }
 0x144   : > { %2370 = vst [vmem:[%s3876_s15 + $0xc0] sm:$0xff] %v3044_v56  ;;  %2371 = vst [vmem:[%s3876_s15 + $0xc8] sm:$0xff] %v3045_v33 }
 0x145   : > { %v972_v37 = vpop.f32.mrf.mxu0  ;;  %v1325_v38 = vpop.f32.mrf.mxu1 }
 0x146   : > { %v3046_v39 = vpack.c.bf16 %v972_v37, %v970_v34  ;;  %v3047_v40 = vpack.c.bf16 %v1325_v38, %v1323_v35 }
 0x147   : > { %v976_v41 = vpop.f32.mrf.mxu0  ;;  %1215 = vmatmul.mubr.bf16.gmra.mxu0 %v679_v36  ;;  %v1329_v32 = vpop.f32.mrf.mxu1  ;;  %1568 = vmatmul.mubr.bf16.gmra.mxu1 %v679_v36 }
 0x148   : > { %2372 = vst [vmem:[%s3876_s15 + $0xd0] sm:$0xff] %v3046_v39  ;;  %2373 = vst [vmem:[%s3876_s15 + $0xd8] sm:$0xff] %v3047_v40 }
 0x149   : > { %v978_v42 = vpop.f32.mrf.mxu0  ;;  %v1331_v43 = vpop.f32.mrf.mxu1 }
 0x14a   : > { %v3048_v44 = vpack.c.bf16 %v978_v42, %v976_v41  ;;  %v3049_v45 = vpack.c.bf16 %v1331_v43, %v1329_v32 }
 0x14b   : > { %v980_v46 = vpop.f32.mrf.mxu0  ;;  %v1333_v47 = vpop.f32.mrf.mxu1 }
 0x14c   : > { %2374 = vst [vmem:[%s3876_s15 + $0xe0] sm:$0xff] %v3048_v44  ;;  %2375 = vst [vmem:[%s3876_s15 + $0xe8] sm:$0xff] %v3049_v45 }
 0x14d   : > { %v982_v48 = vpop.f32.mrf.mxu0  ;;  %v1335_v49 = vpop.f32.mrf.mxu1 }
 0x14e   : > { %v3050_v62 = vpack.c.bf16 %v982_v48, %v980_v46  ;;  %v3051_v50 = vpack.c.bf16 %v1335_v49, %v1333_v47 }
 0x14f   : > { %v986_v51 = vpop.f32.mrf.mxu0  ;;  %v1339_v52 = vpop.f32.mrf.mxu1 }
 0x150   : > { %2376 = vst [vmem:[%s3876_s15 + $0xf0] sm:$0xff] %v3050_v62  ;;  %2377 = vst [vmem:[%s3876_s15 + $0xf8] sm:$0xff] %v3051_v50 }
 0x151   : > { %v988_v53 = vpop.f32.mrf.mxu0  ;;  %v1341_v54 = vpop.f32.mrf.mxu1 }
 0x152   : > { %v3052_v55 = vpack.c.bf16 %v988_v53, %v986_v51  ;;  %v3053_v57 = vpack.c.bf16 %v1341_v54, %v1339_v52 }
 0x153   : > { %v990_v58 = vpop.f32.mrf.mxu0  ;;  %v1343_v59 = vpop.f32.mrf.mxu1 }
 0x154   : > { %2378 = vst [vmem:[%s3876_s15 + $0x100] sm:$0xff] %v3052_v55  ;;  %2379 = vst [vmem:[%s3876_s15 + $0x108] sm:$0xff] %v3053_v57 }
 0x155   : > { %v992_v60 = vpop.f32.mrf.mxu0  ;;  %v1345_v61 = vpop.f32.mrf.mxu1 }
 0x156   : > { %v3054_v63 = vpack.c.bf16 %v992_v60, %v990_v58  ;;  %v3055_v0 = vpack.c.bf16 %v1345_v61, %v1343_v59 }
 0x157   : > { %v996_v1 = vpop.f32.mrf.mxu0  ;;  %v1349_v2 = vpop.f32.mrf.mxu1 }
 0x158   : > { %2380 = vst [vmem:[%s3876_s15 + $0x110] sm:$0xff] %v3054_v63  ;;  %2381 = vst [vmem:[%s3876_s15 + $0x118] sm:$0xff] %v3055_v0 }
 0x159   : > { %v998_v3 = vpop.f32.mrf.mxu0  ;;  %v1351_v4 = vpop.f32.mrf.mxu1 }
 0x15a   : > { %v3056_v5 = vpack.c.bf16 %v998_v3, %v996_v1  ;;  %v3057_v6 = vpack.c.bf16 %v1351_v4, %v1349_v2 }
 0x15b   : > { %v1000_v7 = vpop.f32.mrf.mxu0  ;;  %v1353_v8 = vpop.f32.mrf.mxu1 }
 0x15c   : > { %2382 = vst [vmem:[%s3876_s15 + $0x120] sm:$0xff] %v3056_v5  ;;  %2383 = vst [vmem:[%s3876_s15 + $0x128] sm:$0xff] %v3057_v6 }
 0x15d   : > { %v1002_v9 = vpop.f32.mrf.mxu0  ;;  %v1355_v10 = vpop.f32.mrf.mxu1 }
 0x15e   : > { %v3058_v11 = vpack.c.bf16 %v1002_v9, %v1000_v7  ;;  %v3059_v12 = vpack.c.bf16 %v1355_v10, %v1353_v8 }
 0x15f   : > { %v1006_v13 = vpop.f32.mrf.mxu0  ;;  %v1359_v14 = vpop.f32.mrf.mxu1 }
 0x160   : > { %2384 = vst [vmem:[%s3876_s15 + $0x130] sm:$0xff] %v3058_v11  ;;  %2385 = vst [vmem:[%s3876_s15 + $0x138] sm:$0xff] %v3059_v12 }
 0x161   : > { %v1008_v15 = vpop.f32.mrf.mxu0  ;;  %v1361_v16 = vpop.f32.mrf.mxu1 }
 0x162   : > { %v3060_v17 = vpack.c.bf16 %v1008_v15, %v1006_v13  ;;  %v3061_v18 = vpack.c.bf16 %v1361_v16, %v1359_v14 }
 0x163   : > { %v1010_v19 = vpop.f32.mrf.mxu0  ;;  %v1363_v20 = vpop.f32.mrf.mxu1 }
 0x164   : > { %2386 = vst [vmem:[%s3876_s15 + $0x140] sm:$0xff] %v3060_v17  ;;  %2387 = vst [vmem:[%s3876_s15 + $0x148] sm:$0xff] %v3061_v18 }
 0x165   : > { %v1012_v21 = vpop.f32.mrf.mxu0  ;;  %v1365_v22 = vpop.f32.mrf.mxu1 }
 0x166   : > { %v3062_v23 = vpack.c.bf16 %v1012_v21, %v1010_v19  ;;  %v3063_v24 = vpack.c.bf16 %v1365_v22, %v1363_v20 }
 0x167   : > { %v1016_v25 = vpop.f32.mrf.mxu0  ;;  %v1369_v26 = vpop.f32.mrf.mxu1 }
 0x168   : > { %2388 = vst [vmem:[%s3876_s15 + $0x150] sm:$0xff] %v3062_v23  ;;  %2389 = vst [vmem:[%s3876_s15 + $0x158] sm:$0xff] %v3063_v24 }
 0x169   : > { %v1018_v27 = vpop.f32.mrf.mxu0  ;;  %v1371_v28 = vpop.f32.mrf.mxu1 }
 0x16a   : > { %v3064_v29 = vpack.c.bf16 %v1018_v27, %v1016_v25  ;;  %v3065_v30 = vpack.c.bf16 %v1371_v28, %v1369_v26 }
 0x16b   : > { %v1020_v31 = vpop.f32.mrf.mxu0  ;;  %v1373_v56 = vpop.f32.mrf.mxu1 }
 0x16c   : > { %2390 = vst [vmem:[%s3876_s15 + $0x160] sm:$0xff] %v3064_v29  ;;  %2391 = vst [vmem:[%s3876_s15 + $0x168] sm:$0xff] %v3065_v30 }
 0x16d   : > { %v1022_v33 = vpop.f32.mrf.mxu0  ;;  %v1375_v34 = vpop.f32.mrf.mxu1 }
 0x16e   : > { %v3066_v35 = vpack.c.bf16 %v1022_v33, %v1020_v31  ;;  %v3067_v36 = vpack.c.bf16 %v1375_v34, %v1373_v56 }
 0x16f   : > { %v1026_v37 = vpop.f32.mrf.mxu0  ;;  %v1379_v38 = vpop.f32.mrf.mxu1 }
 0x170   : > { %2392 = vst [vmem:[%s3876_s15 + $0x170] sm:$0xff] %v3066_v35  ;;  %2393 = vst [vmem:[%s3876_s15 + $0x178] sm:$0xff] %v3067_v36 }
 0x171   : > { %v1028_v39 = vpop.f32.mrf.mxu0  ;;  %v1381_v40 = vpop.f32.mrf.mxu1 }
 0x172   : > { %v3068_v41 = vpack.c.bf16 %v1028_v39, %v1026_v37  ;;  %v3069_v32 = vpack.c.bf16 %v1381_v40, %v1379_v38 }
 0x173   : > { %v1030_v42 = vpop.f32.mrf.mxu0  ;;  %v1383_v43 = vpop.f32.mrf.mxu1 }
 0x174   : > { %2394 = vst [vmem:[%s3876_s15 + $0x180] sm:$0xff] %v3068_v41  ;;  %2395 = vst [vmem:[%s3876_s15 + $0x188] sm:$0xff] %v3069_v32 }
 0x175   : > { %v1032_v44 = vpop.f32.mrf.mxu0  ;;  %v1385_v45 = vpop.f32.mrf.mxu1 }
 0x176   : > { %v3070_v46 = vpack.c.bf16 %v1032_v44, %v1030_v42  ;;  %v3071_v47 = vpack.c.bf16 %v1385_v45, %v1383_v43 }
 0x177   : > { %v1036_v48 = vpop.f32.mrf.mxu0  ;;  %v1389_v49 = vpop.f32.mrf.mxu1 }
 0x178   : > { %2396 = vst [vmem:[%s3876_s15 + $0x190] sm:$0xff] %v3070_v46  ;;  %2397 = vst [vmem:[%s3876_s15 + $0x198] sm:$0xff] %v3071_v47 }
 0x179   : > { %v1038_v62 = vpop.f32.mrf.mxu0  ;;  %v1391_v50 = vpop.f32.mrf.mxu1 }
 0x17a   : > { %v3072_v51 = vpack.c.bf16 %v1038_v62, %v1036_v48  ;;  %v3073_v52 = vpack.c.bf16 %v1391_v50, %v1389_v49 }
 0x17b   : > { %v1040_v53 = vpop.f32.mrf.mxu0  ;;  %v1393_v54 = vpop.f32.mrf.mxu1 }
 0x17c   : > { %2398 = vst [vmem:[%s3876_s15 + $0x1a0] sm:$0xff] %v3072_v51  ;;  %2399 = vst [vmem:[%s3876_s15 + $0x1a8] sm:$0xff] %v3073_v52 }
 0x17d   : > { %v1042_v55 = vpop.f32.mrf.mxu0  ;;  %v1395_v57 = vpop.f32.mrf.mxu1 }
 0x17e   : > { %v3074_v58 = vpack.c.bf16 %v1042_v55, %v1040_v53  ;;  %v3075_v59 = vpack.c.bf16 %v1395_v57, %v1393_v54 }
 0x17f   : > { %v1046_v60 = vpop.f32.mrf.mxu0  ;;  %v1399_v61 = vpop.f32.mrf.mxu1 }
 0x180   : > { %2400 = vst [vmem:[%s3876_s15 + $0x1b0] sm:$0xff] %v3074_v58  ;;  %2401 = vst [vmem:[%s3876_s15 + $0x1b8] sm:$0xff] %v3075_v59 }
 0x181   : > { %v1048_v63 = vpop.f32.mrf.mxu0  ;;  %v1401_v0 = vpop.f32.mrf.mxu1 }
 0x182   : > { %v3076_v1 = vpack.c.bf16 %v1048_v63, %v1046_v60  ;;  %v3077_v2 = vpack.c.bf16 %v1401_v0, %v1399_v61 }
 0x183   : > { %v1050_v3 = vpop.f32.mrf.mxu0  ;;  %v1403_v4 = vpop.f32.mrf.mxu1 }
 0x184   : > { %2402 = vst [vmem:[%s3876_s15 + $0x1c0] sm:$0xff] %v3076_v1  ;;  %2403 = vst [vmem:[%s3876_s15 + $0x1c8] sm:$0xff] %v3077_v2 }
 0x185   : > { %v1052_v5 = vpop.f32.mrf.mxu0  ;;  %v1405_v6 = vpop.f32.mrf.mxu1 }
 0x186   : > { %v3078_v7 = vpack.c.bf16 %v1052_v5, %v1050_v3  ;;  %v3079_v8 = vpack.c.bf16 %v1405_v6, %v1403_v4 }
 0x187   : > { %v1056_v9 = vpop.f32.mrf.mxu0  ;;  %v1409_v10 = vpop.f32.mrf.mxu1 }
 0x188   : > { %2404 = vst [vmem:[%s3876_s15 + $0x1d0] sm:$0xff] %v3078_v7  ;;  %2405 = vst [vmem:[%s3876_s15 + $0x1d8] sm:$0xff] %v3079_v8 }
 0x189   : > { %v1058_v11 = vpop.f32.mrf.mxu0  ;;  %v1411_v12 = vpop.f32.mrf.mxu1 }
 0x18a   : > { %v3080_v13 = vpack.c.bf16 %v1058_v11, %v1056_v9  ;;  %v3081_v14 = vpack.c.bf16 %v1411_v12, %v1409_v10 }
 0x18b   : > { %v1060_v15 = vpop.f32.mrf.mxu0  ;;  %v1413_v16 = vpop.f32.mrf.mxu1 }
 0x18c   : > { %2406 = vst [vmem:[%s3876_s15 + $0x1e0] sm:$0xff] %v3080_v13  ;;  %2407 = vst [vmem:[%s3876_s15 + $0x1e8] sm:$0xff] %v3081_v14 }
 0x18d   : > { %v1062_v17 = vpop.f32.mrf.mxu0  ;;  %v1415_v18 = vpop.f32.mrf.mxu1 }
 0x18e   : > { %v3082_v19 = vpack.c.bf16 %v1062_v17, %v1060_v15  ;;  %v3083_v20 = vpack.c.bf16 %v1415_v18, %v1413_v16 }
 0x18f   : > { %v1066_v21 = vpop.f32.mrf.mxu0  ;;  %v1419_v22 = vpop.f32.mrf.mxu1 }
 0x190   : > { %2408 = vst [vmem:[%s3876_s15 + $0x1f0] sm:$0xff] %v3082_v19  ;;  %2409 = vst [vmem:[%s3876_s15 + $0x1f8] sm:$0xff] %v3083_v20 }
 0x191   : > { %v1068_v23 = vpop.f32.mrf.mxu0  ;;  %v1421_v24 = vpop.f32.mrf.mxu1 }
 0x192   : > { %v3084_v25 = vpack.c.bf16 %v1068_v23, %v1066_v21  ;;  %v3085_v26 = vpack.c.bf16 %v1421_v24, %v1419_v22 }
 0x193   : > { %v1070_v27 = vpop.f32.mrf.mxu0  ;;  %v1423_v28 = vpop.f32.mrf.mxu1 }
 0x194   : > { %2410 = vst [vmem:[%s3876_s15 + $0x200] sm:$0xff] %v3084_v25  ;;  %2411 = vst [vmem:[%s3876_s15 + $0x208] sm:$0xff] %v3085_v26 }
 0x195   : > { %v1072_v29 = vpop.f32.mrf.mxu0  ;;  %v1425_v30 = vpop.f32.mrf.mxu1 }
 0x196   : > { %v3086_v31 = vpack.c.bf16 %v1072_v29, %v1070_v27  ;;  %v3087_v56 = vpack.c.bf16 %v1425_v30, %v1423_v28 }
 0x197   : > { %v1076_v33 = vpop.f32.mrf.mxu0  ;;  %v1429_v34 = vpop.f32.mrf.mxu1 }
 0x198   : > { %2412 = vst [vmem:[%s3876_s15 + $0x210] sm:$0xff] %v3086_v31  ;;  %2413 = vst [vmem:[%s3876_s15 + $0x218] sm:$0xff] %v3087_v56 }
 0x199   : > { %v1078_v35 = vpop.f32.mrf.mxu0  ;;  %v1431_v36 = vpop.f32.mrf.mxu1 }
 0x19a   : > { %v3088_v37 = vpack.c.bf16 %v1078_v35, %v1076_v33  ;;  %v3089_v38 = vpack.c.bf16 %v1431_v36, %v1429_v34 }
 0x19b   : > { %v1080_v39 = vpop.f32.mrf.mxu0  ;;  %v1433_v40 = vpop.f32.mrf.mxu1 }
 0x19c   : > { %2414 = vst [vmem:[%s3876_s15 + $0x220] sm:$0xff] %v3088_v37  ;;  %2415 = vst [vmem:[%s3876_s15 + $0x228] sm:$0xff] %v3089_v38 }
 0x19d   : > { %v1082_v41 = vpop.f32.mrf.mxu0  ;;  %v1435_v32 = vpop.f32.mrf.mxu1 }
 0x19e   : > { %v3090_v42 = vpack.c.bf16 %v1082_v41, %v1080_v39  ;;  %v3091_v43 = vpack.c.bf16 %v1435_v32, %v1433_v40 }
 0x19f   : > { %v1086_v44 = vpop.f32.mrf.mxu0  ;;  %v1439_v45 = vpop.f32.mrf.mxu1 }
 0x1a0   : > { %2416 = vst [vmem:[%s3876_s15 + $0x230] sm:$0xff] %v3090_v42  ;;  %2417 = vst [vmem:[%s3876_s15 + $0x238] sm:$0xff] %v3091_v43 }
 0x1a1   : > { %v1088_v46 = vpop.f32.mrf.mxu0  ;;  %v1441_v47 = vpop.f32.mrf.mxu1 }
 0x1a2   : > { %v3092_v48 = vpack.c.bf16 %v1088_v46, %v1086_v44  ;;  %v3093_v49 = vpack.c.bf16 %v1441_v47, %v1439_v45 }
 0x1a3   : > { %v1090_v62 = vpop.f32.mrf.mxu0  ;;  %v1443_v50 = vpop.f32.mrf.mxu1 }
 0x1a4   : > { %2418 = vst [vmem:[%s3876_s15 + $0x240] sm:$0xff] %v3092_v48  ;;  %2419 = vst [vmem:[%s3876_s15 + $0x248] sm:$0xff] %v3093_v49 }
 0x1a5   : > { %v1092_v51 = vpop.f32.mrf.mxu0  ;;  %v1445_v52 = vpop.f32.mrf.mxu1 }
 0x1a6   : > { %v3094_v53 = vpack.c.bf16 %v1092_v51, %v1090_v62  ;;  %v3095_v54 = vpack.c.bf16 %v1445_v52, %v1443_v50 }
 0x1a7   : > { %v1096_v55 = vpop.f32.mrf.mxu0  ;;  %v1449_v57 = vpop.f32.mrf.mxu1 }
 0x1a8   : > { %2420 = vst [vmem:[%s3876_s15 + $0x250] sm:$0xff] %v3094_v53  ;;  %2421 = vst [vmem:[%s3876_s15 + $0x258] sm:$0xff] %v3095_v54 }
 0x1a9   : > { %v1098_v58 = vpop.f32.mrf.mxu0  ;;  %v1451_v59 = vpop.f32.mrf.mxu1 }
 0x1aa   : > { %v3096_v60 = vpack.c.bf16 %v1098_v58, %v1096_v55  ;;  %v3097_v61 = vpack.c.bf16 %v1451_v59, %v1449_v57 }
 0x1ab   : > { %v1100_v63 = vpop.f32.mrf.mxu0  ;;  %v1453_v0 = vpop.f32.mrf.mxu1 }
 0x1ac   : > { %2422 = vst [vmem:[%s3876_s15 + $0x260] sm:$0xff] %v3096_v60  ;;  %2423 = vst [vmem:[%s3876_s15 + $0x268] sm:$0xff] %v3097_v61 }
 0x1ad   : > { %v1102_v1 = vpop.f32.mrf.mxu0  ;;  %v1455_v2 = vpop.f32.mrf.mxu1 }
 0x1ae   : > { %v3098_v3 = vpack.c.bf16 %v1102_v1, %v1100_v63  ;;  %v3099_v4 = vpack.c.bf16 %v1455_v2, %v1453_v0 }
 0x1af   : > { %v1106_v5 = vpop.f32.mrf.mxu0  ;;  %v1459_v6 = vpop.f32.mrf.mxu1 }
 0x1b0   : > { %2424 = vst [vmem:[%s3876_s15 + $0x270] sm:$0xff] %v3098_v3  ;;  %2425 = vst [vmem:[%s3876_s15 + $0x278] sm:$0xff] %v3099_v4 }
 0x1b1   : > { %v1108_v7 = vpop.f32.mrf.mxu0  ;;  %v1461_v8 = vpop.f32.mrf.mxu1 }
 0x1b2   : > { %v3100_v9 = vpack.c.bf16 %v1108_v7, %v1106_v5  ;;  %v3101_v10 = vpack.c.bf16 %v1461_v8, %v1459_v6 }
 0x1b3   : > { %v1110_v11 = vpop.f32.mrf.mxu0  ;;  %v1463_v12 = vpop.f32.mrf.mxu1 }
 0x1b4   : > { %2426 = vst [vmem:[%s3876_s15 + $0x280] sm:$0xff] %v3100_v9  ;;  %2427 = vst [vmem:[%s3876_s15 + $0x288] sm:$0xff] %v3101_v10 }
 0x1b5   : > { %v1112_v13 = vpop.f32.mrf.mxu0  ;;  %v1465_v14 = vpop.f32.mrf.mxu1 }
 0x1b6   : > { %v3102_v15 = vpack.c.bf16 %v1112_v13, %v1110_v11  ;;  %v3103_v16 = vpack.c.bf16 %v1465_v14, %v1463_v12 }
 0x1b7   : > { %v1116_v17 = vpop.f32.mrf.mxu0  ;;  %v1469_v18 = vpop.f32.mrf.mxu1 }
 0x1b8   : > { %2428 = vst [vmem:[%s3876_s15 + $0x290] sm:$0xff] %v3102_v15  ;;  %2429 = vst [vmem:[%s3876_s15 + $0x298] sm:$0xff] %v3103_v16 }
 0x1b9   : > { %v1118_v19 = vpop.f32.mrf.mxu0  ;;  %v1471_v20 = vpop.f32.mrf.mxu1 }
 0x1ba   : > { %v3104_v21 = vpack.c.bf16 %v1118_v19, %v1116_v17  ;;  %v3105_v22 = vpack.c.bf16 %v1471_v20, %v1469_v18 }
 0x1bb   : > { %v1120_v23 = vpop.f32.mrf.mxu0  ;;  %v1473_v24 = vpop.f32.mrf.mxu1 }
 0x1bc   : > { %2430 = vst [vmem:[%s3876_s15 + $0x2a0] sm:$0xff] %v3104_v21  ;;  %2431 = vst [vmem:[%s3876_s15 + $0x2a8] sm:$0xff] %v3105_v22 }
 0x1bd   : > { %v1122_v25 = vpop.f32.mrf.mxu0  ;;  %v1475_v26 = vpop.f32.mrf.mxu1 }
 0x1be   : > { %v3106_v27 = vpack.c.bf16 %v1122_v25, %v1120_v23  ;;  %v3107_v28 = vpack.c.bf16 %v1475_v26, %v1473_v24 }
 0x1bf   : > { %v1126_v29 = vpop.f32.mrf.mxu0  ;;  %v1479_v30 = vpop.f32.mrf.mxu1 }
 0x1c0   : > { %2432 = vst [vmem:[%s3876_s15 + $0x2b0] sm:$0xff] %v3106_v27  ;;  %2433 = vst [vmem:[%s3876_s15 + $0x2b8] sm:$0xff] %v3107_v28 }
 0x1c1   : > { %v1128_v31 = vpop.f32.mrf.mxu0  ;;  %v1481_v56 = vpop.f32.mrf.mxu1 }
 0x1c2   : > { %v3108_v33 = vpack.c.bf16 %v1128_v31, %v1126_v29  ;;  %v3109_v34 = vpack.c.bf16 %v1481_v56, %v1479_v30 }
 0x1c3   : > { %v1130_v35 = vpop.f32.mrf.mxu0  ;;  %v1483_v36 = vpop.f32.mrf.mxu1 }
 0x1c4   : > { %2434 = vst [vmem:[%s3876_s15 + $0x2c0] sm:$0xff] %v3108_v33  ;;  %2435 = vst [vmem:[%s3876_s15 + $0x2c8] sm:$0xff] %v3109_v34 }
 0x1c5   : > { %v1132_v37 = vpop.f32.mrf.mxu0  ;;  %v1485_v38 = vpop.f32.mrf.mxu1 }
 0x1c6   : > { %v3110_v39 = vpack.c.bf16 %v1132_v37, %v1130_v35  ;;  %v3111_v40 = vpack.c.bf16 %v1485_v38, %v1483_v36 }
 0x1c7   : > { %v1136_v41 = vpop.f32.mrf.mxu0  ;;  %v1489_v32 = vpop.f32.mrf.mxu1 }
 0x1c8   : > { %2436 = vst [vmem:[%s3876_s15 + $0x2d0] sm:$0xff] %v3110_v39  ;;  %2437 = vst [vmem:[%s3876_s15 + $0x2d8] sm:$0xff] %v3111_v40 }
 0x1c9   : > { %v1138_v42 = vpop.f32.mrf.mxu0  ;;  %v1491_v43 = vpop.f32.mrf.mxu1 }
 0x1ca   : > { %v3112_v44 = vpack.c.bf16 %v1138_v42, %v1136_v41  ;;  %v3113_v45 = vpack.c.bf16 %v1491_v43, %v1489_v32 }
 0x1cb   : > { %v1140_v46 = vpop.f32.mrf.mxu0  ;;  %v1493_v47 = vpop.f32.mrf.mxu1 }
 0x1cc   : > { %2438 = vst [vmem:[%s3876_s15 + $0x2e0] sm:$0xff] %v3112_v44  ;;  %2439 = vst [vmem:[%s3876_s15 + $0x2e8] sm:$0xff] %v3113_v45 }
 0x1cd   : > { %v1142_v48 = vpop.f32.mrf.mxu0  ;;  %v1495_v49 = vpop.f32.mrf.mxu1 }
 0x1ce   : > { %v3114_v62 = vpack.c.bf16 %v1142_v48, %v1140_v46  ;;  %v3115_v50 = vpack.c.bf16 %v1495_v49, %v1493_v47 }
 0x1cf   : > { %v1146_v51 = vpop.f32.mrf.mxu0  ;;  %v1499_v52 = vpop.f32.mrf.mxu1 }
 0x1d0   : > { %2440 = vst [vmem:[%s3876_s15 + $0x2f0] sm:$0xff] %v3114_v62  ;;  %2441 = vst [vmem:[%s3876_s15 + $0x2f8] sm:$0xff] %v3115_v50 }
 0x1d1   : > { %v1148_v53 = vpop.f32.mrf.mxu0  ;;  %v1501_v54 = vpop.f32.mrf.mxu1 }
 0x1d2   : > { %v3116_v55 = vpack.c.bf16 %v1148_v53, %v1146_v51  ;;  %v3117_v57 = vpack.c.bf16 %v1501_v54, %v1499_v52 }
 0x1d3   : > { %v1150_v58 = vpop.f32.mrf.mxu0  ;;  %v1503_v59 = vpop.f32.mrf.mxu1 }
 0x1d4   : > { %2442 = vst [vmem:[%s3876_s15 + $0x300] sm:$0xff] %v3116_v55  ;;  %2443 = vst [vmem:[%s3876_s15 + $0x308] sm:$0xff] %v3117_v57 }
 0x1d5   : > { %v1152_v60 = vpop.f32.mrf.mxu0  ;;  %v1505_v61 = vpop.f32.mrf.mxu1 }
 0x1d6   : > { %v3118_v63 = vpack.c.bf16 %v1152_v60, %v1150_v58  ;;  %v3119_v0 = vpack.c.bf16 %v1505_v61, %v1503_v59 }
 0x1d7   : > { %v1156_v1 = vpop.f32.mrf.mxu0  ;;  %v1509_v2 = vpop.f32.mrf.mxu1 }
 0x1d8   : > { %2444 = vst [vmem:[%s3876_s15 + $0x310] sm:$0xff] %v3118_v63  ;;  %2445 = vst [vmem:[%s3876_s15 + $0x318] sm:$0xff] %v3119_v0 }
 0x1d9   : > { %v1158_v3 = vpop.f32.mrf.mxu0  ;;  %v1511_v4 = vpop.f32.mrf.mxu1 }
 0x1da   : > { %v3120_v5 = vpack.c.bf16 %v1158_v3, %v1156_v1  ;;  %v3121_v6 = vpack.c.bf16 %v1511_v4, %v1509_v2 }
 0x1db   : > { %v1160_v7 = vpop.f32.mrf.mxu0  ;;  %v1513_v8 = vpop.f32.mrf.mxu1 }
 0x1dc   : > { %2446 = vst [vmem:[%s3876_s15 + $0x320] sm:$0xff] %v3120_v5  ;;  %2447 = vst [vmem:[%s3876_s15 + $0x328] sm:$0xff] %v3121_v6 }
 0x1dd   : > { %v1162_v9 = vpop.f32.mrf.mxu0  ;;  %v1515_v10 = vpop.f32.mrf.mxu1 }
 0x1de   : > { %v3122_v11 = vpack.c.bf16 %v1162_v9, %v1160_v7  ;;  %v3123_v12 = vpack.c.bf16 %v1515_v10, %v1513_v8 }
 0x1df   : > { %v1166_v13 = vpop.f32.mrf.mxu0  ;;  %v1519_v14 = vpop.f32.mrf.mxu1 }
 0x1e0   : > { %2448 = vst [vmem:[%s3876_s15 + $0x330] sm:$0xff] %v3122_v11  ;;  %2449 = vst [vmem:[%s3876_s15 + $0x338] sm:$0xff] %v3123_v12 }
 0x1e1   : > { %v1168_v15 = vpop.f32.mrf.mxu0  ;;  %v1521_v16 = vpop.f32.mrf.mxu1 }
 0x1e2   : > { %v3124_v17 = vpack.c.bf16 %v1168_v15, %v1166_v13  ;;  %v3125_v18 = vpack.c.bf16 %v1521_v16, %v1519_v14 }
 0x1e3   : > { %v1170_v19 = vpop.f32.mrf.mxu0  ;;  %v1523_v20 = vpop.f32.mrf.mxu1 }
 0x1e4   : > { %2450 = vst [vmem:[%s3876_s15 + $0x340] sm:$0xff] %v3124_v17  ;;  %2451 = vst [vmem:[%s3876_s15 + $0x348] sm:$0xff] %v3125_v18 }
 0x1e5   : > { %v1172_v21 = vpop.f32.mrf.mxu0  ;;  %v1525_v22 = vpop.f32.mrf.mxu1 }
 0x1e6   : > { %v3126_v23 = vpack.c.bf16 %v1172_v21, %v1170_v19  ;;  %v3127_v24 = vpack.c.bf16 %v1525_v22, %v1523_v20  ;;  %v2499_v21 = vld [vmem:[%s3876_s15] sm:$0xff] (%p3500_p6)  ;;  %v2501_v22 = vld [vmem:[%s3876_s15 + $0x8] sm:$0xff] (%p3500_p6) }
 0x1e7   : > { %v1176_v25 = vpop.f32.mrf.mxu0  ;;  %v1529_v26 = vpop.f32.mrf.mxu1  ;;  %2500 = vst [vmem:[%s4057_s23] sm:$0xff] (%p3500_p6), %v2499_v21  ;;  %2502 = vst [vmem:[%s4057_s23 + $0x8] sm:$0xff] (%p3500_p6), %v2501_v22  ;;  %v2627_v21 = vld [vmem:[%s3876_s15 + $0x200] sm:$0xff] (%p3500_p6)  ;;  %v2629_v22 = vld [vmem:[%s3876_s15 + $0x208] sm:$0xff] (%p3500_p6) }
 0x1e8   : > { %2452 = vst [vmem:[%s3876_s15 + $0x350] sm:$0xff] %v3126_v23  ;;  %2453 = vst [vmem:[%s3876_s15 + $0x358] sm:$0xff] %v3127_v24  ;;  %v2503_v23 = vld [vmem:[%s3876_s15 + $0x10] sm:$0xff] (%p3500_p6)  ;;  %v2505_v24 = vld [vmem:[%s3876_s15 + $0x18] sm:$0xff] (%p3500_p6) }
 0x1e9   : > { %v1178_v27 = vpop.f32.mrf.mxu0  ;;  %v1531_v28 = vpop.f32.mrf.mxu1  ;;  %2504 = vst [vmem:[%s4057_s23 + $0x20] sm:$0xff] (%p3500_p6), %v2503_v23  ;;  %2506 = vst [vmem:[%s4057_s23 + $0x28] sm:$0xff] (%p3500_p6), %v2505_v24  ;;  %v2631_v23 = vld [vmem:[%s3876_s15 + $0x210] sm:$0xff] (%p3500_p6)  ;;  %v2633_v24 = vld [vmem:[%s3876_s15 + $0x218] sm:$0xff] (%p3500_p6) }
 0x1ea   : > { %v3128_v29 = vpack.c.bf16 %v1178_v27, %v1176_v25  ;;  %v3129_v30 = vpack.c.bf16 %v1531_v28, %v1529_v26  ;;  %v2507_v25 = vld [vmem:[%s3876_s15 + $0x20] sm:$0xff] (%p3500_p6)  ;;  %v2509_v26 = vld [vmem:[%s3876_s15 + $0x28] sm:$0xff] (%p3500_p6)  ;;  %v2511_v27 = vld [vmem:[%s3876_s15 + $0x30] sm:$0xff] (%p3500_p6)  ;;  %2628 = vst [vmem:[%s4057_s23 + $0x400] sm:$0xff] (%p3500_p6), %v2627_v21 }
 0x1eb   : > { %v1180_v31 = vpop.f32.mrf.mxu0  ;;  %v1533_v56 = vpop.f32.mrf.mxu1  ;;  %2508 = vst [vmem:[%s4057_s23 + $0x40] sm:$0xff] (%p3500_p6), %v2507_v25  ;;  %2510 = vst [vmem:[%s4057_s23 + $0x48] sm:$0xff] (%p3500_p6), %v2509_v26  ;;  %v2513_v28 = vld [vmem:[%s3876_s15 + $0x38] sm:$0xff] (%p3500_p6)  ;;  %v2635_v25 = vld [vmem:[%s3876_s15 + $0x220] sm:$0xff] (%p3500_p6) }
 0x1ec   : > { %2454 = vst [vmem:[%s3876_s15 + $0x360] sm:$0xff] %v3128_v29  ;;  %2455 = vst [vmem:[%s3876_s15 + $0x368] sm:$0xff] %v3129_v30  ;;  %v2515_v29 = vld [vmem:[%s3876_s15 + $0x40] sm:$0xff] (%p3500_p6)  ;;  %v2517_v30 = vld [vmem:[%s3876_s15 + $0x48] sm:$0xff] (%p3500_p6) }
 0x1ed   : > { %v1182_v33 = vpop.f32.mrf.mxu0  ;;  %v1535_v34 = vpop.f32.mrf.mxu1  ;;  %2512 = vst [vmem:[%s4057_s23 + $0x60] sm:$0xff] (%p3500_p6), %v2511_v27  ;;  %2514 = vst [vmem:[%s4057_s23 + $0x68] sm:$0xff] (%p3500_p6), %v2513_v28  ;;  %v2637_v26 = vld [vmem:[%s3876_s15 + $0x228] sm:$0xff] (%p3500_p6)  ;;  %v2639_v27 = vld [vmem:[%s3876_s15 + $0x230] sm:$0xff] (%p3500_p6) }
 0x1ee   : > { %v3130_v35 = vpack.c.bf16 %v1182_v33, %v1180_v31  ;;  %v3131_v36 = vpack.c.bf16 %v1535_v34, %v1533_v56  ;;  %2516 = vst [vmem:[%s4057_s23 + $0x80] sm:$0xff] (%p3500_p6), %v2515_v29  ;;  %v2519_v31 = vld [vmem:[%s3876_s15 + $0x50] sm:$0xff] (%p3500_p6)  ;;  %v2521_v56 = vld [vmem:[%s3876_s15 + $0x58] sm:$0xff] (%p3500_p6)  ;;  %2518 = vst [vmem:[%s4057_s23 + $0x88] sm:$0xff] (%p3500_p6), %v2517_v30 }
 0x1ef   : > { %v1186_v37 = vpop.f32.mrf.mxu0  ;;  %v1539_v38 = vpop.f32.mrf.mxu1  ;;  %2520 = vst [vmem:[%s4057_s23 + $0xa0] sm:$0xff] (%p3500_p6), %v2519_v31  ;;  %2522 = vst [vmem:[%s4057_s23 + $0xa8] sm:$0xff] (%p3500_p6), %v2521_v56  ;;  %v2523_v33 = vld [vmem:[%s3876_s15 + $0x60] sm:$0xff] (%p3500_p6)  ;;  %v2525_v34 = vld [vmem:[%s3876_s15 + $0x68] sm:$0xff] (%p3500_p6) }
 0x1f0   : > { %2456 = vst [vmem:[%s3876_s15 + $0x370] sm:$0xff] %v3130_v35  ;;  %2457 = vst [vmem:[%s3876_s15 + $0x378] sm:$0xff] %v3131_v36  ;;  %v2527_v35 = vld [vmem:[%s3876_s15 + $0x70] sm:$0xff] (%p3500_p6)  ;;  %v2529_v36 = vld [vmem:[%s3876_s15 + $0x78] sm:$0xff] (%p3500_p6) }
 0x1f1   : > { %v1188_v39 = vpop.f32.mrf.mxu0  ;;  %v1541_v40 = vpop.f32.mrf.mxu1  ;;  %2524 = vst [vmem:[%s4057_s23 + $0xc0] sm:$0xff] (%p3500_p6), %v2523_v33  ;;  %2526 = vst [vmem:[%s4057_s23 + $0xc8] sm:$0xff] (%p3500_p6), %v2525_v34  ;;  %v2641_v28 = vld [vmem:[%s3876_s15 + $0x238] sm:$0xff] (%p3500_p6)  ;;  %v2643_v29 = vld [vmem:[%s3876_s15 + $0x240] sm:$0xff] (%p3500_p6) }
 0x1f2   : > { %v3132_v41 = vpack.c.bf16 %v1188_v39, %v1186_v37  ;;  %v3133_v32 = vpack.c.bf16 %v1541_v40, %v1539_v38  ;;  %2528 = vst [vmem:[%s4057_s23 + $0xe0] sm:$0xff] (%p3500_p6), %v2527_v35  ;;  %v2531_v37 = vld [vmem:[%s3876_s15 + $0x80] sm:$0xff] (%p3500_p6)  ;;  %v2533_v38 = vld [vmem:[%s3876_s15 + $0x88] sm:$0xff] (%p3500_p6)  ;;  %2530 = vst [vmem:[%s4057_s23 + $0xe8] sm:$0xff] (%p3500_p6), %v2529_v36 }
 0x1f3   : > { %v1190_v42 = vpop.f32.mrf.mxu0  ;;  %v1543_v43 = vpop.f32.mrf.mxu1  ;;  %2532 = vst [vmem:[%s4057_s23 + $0x100] sm:$0xff] (%p3500_p6), %v2531_v37  ;;  %2534 = vst [vmem:[%s4057_s23 + $0x108] sm:$0xff] (%p3500_p6), %v2533_v38  ;;  %v2535_v39 = vld [vmem:[%s3876_s15 + $0x90] sm:$0xff] (%p3500_p6)  ;;  %v2537_v40 = vld [vmem:[%s3876_s15 + $0x98] sm:$0xff] (%p3500_p6) }
 0x1f4   : > { %2458 = vst [vmem:[%s3876_s15 + $0x380] sm:$0xff] %v3132_v41  ;;  %2459 = vst [vmem:[%s3876_s15 + $0x388] sm:$0xff] %v3133_v32  ;;  %v2539_v41 = vld [vmem:[%s3876_s15 + $0xa0] sm:$0xff] (%p3500_p6)  ;;  %v2541_v32 = vld [vmem:[%s3876_s15 + $0xa8] sm:$0xff] (%p3500_p6) }
 0x1f5   : > { %v1192_v44 = vpop.f32.mrf.mxu0  ;;  %v1545_v45 = vpop.f32.mrf.mxu1  ;;  %2536 = vst [vmem:[%s4057_s23 + $0x120] sm:$0xff] (%p3500_p6), %v2535_v39  ;;  %2538 = vst [vmem:[%s4057_s23 + $0x128] sm:$0xff] (%p3500_p6), %v2537_v40  ;;  %v2645_v30 = vld [vmem:[%s3876_s15 + $0x248] sm:$0xff] (%p3500_p6)  ;;  %v2647_v31 = vld [vmem:[%s3876_s15 + $0x250] sm:$0xff] (%p3500_p6) }
 0x1f6   : > { %v3134_v46 = vpack.c.bf16 %v1192_v44, %v1190_v42  ;;  %v3135_v47 = vpack.c.bf16 %v1545_v45, %v1543_v43  ;;  %2540 = vst [vmem:[%s4057_s23 + $0x140] sm:$0xff] (%p3500_p6), %v2539_v41  ;;  %v2543_v42 = vld [vmem:[%s3876_s15 + $0xb0] sm:$0xff] (%p3500_p6)  ;;  %v2545_v43 = vld [vmem:[%s3876_s15 + $0xb8] sm:$0xff] (%p3500_p6)  ;;  %2542 = vst [vmem:[%s4057_s23 + $0x148] sm:$0xff] (%p3500_p6), %v2541_v32 }
 0x1f7   : > { %v1196_v48 = vpop.f32.mrf.mxu0  ;;  %v1549_v49 = vpop.f32.mrf.mxu1  ;;  %2544 = vst [vmem:[%s4057_s23 + $0x160] sm:$0xff] (%p3500_p6), %v2543_v42  ;;  %2546 = vst [vmem:[%s4057_s23 + $0x168] sm:$0xff] (%p3500_p6), %v2545_v43  ;;  %v2547_v44 = vld [vmem:[%s3876_s15 + $0xc0] sm:$0xff] (%p3500_p6)  ;;  %v2549_v45 = vld [vmem:[%s3876_s15 + $0xc8] sm:$0xff] (%p3500_p6) }
 0x1f8   : > { %2460 = vst [vmem:[%s3876_s15 + $0x390] sm:$0xff] %v3134_v46  ;;  %2461 = vst [vmem:[%s3876_s15 + $0x398] sm:$0xff] %v3135_v47  ;;  %v2551_v46 = vld [vmem:[%s3876_s15 + $0xd0] sm:$0xff] (%p3500_p6)  ;;  %v2553_v47 = vld [vmem:[%s3876_s15 + $0xd8] sm:$0xff] (%p3500_p6) }
 0x1f9   : > { %v1198_v62 = vpop.f32.mrf.mxu0  ;;  %v1551_v50 = vpop.f32.mrf.mxu1  ;;  %2548 = vst [vmem:[%s4057_s23 + $0x180] sm:$0xff] (%p3500_p6), %v2547_v44  ;;  %2550 = vst [vmem:[%s4057_s23 + $0x188] sm:$0xff] (%p3500_p6), %v2549_v45  ;;  %v2649_v56 = vld [vmem:[%s3876_s15 + $0x258] sm:$0xff] (%p3500_p6)  ;;  %v2651_v33 = vld [vmem:[%s3876_s15 + $0x260] sm:$0xff] (%p3500_p6) }
 0x1fa   : > { %v3136_v51 = vpack.c.bf16 %v1198_v62, %v1196_v48  ;;  %v3137_v52 = vpack.c.bf16 %v1551_v50, %v1549_v49  ;;  %2552 = vst [vmem:[%s4057_s23 + $0x1a0] sm:$0xff] (%p3500_p6), %v2551_v46  ;;  %v2555_v48 = vld [vmem:[%s3876_s15 + $0xe0] sm:$0xff] (%p3500_p6)  ;;  %v2557_v49 = vld [vmem:[%s3876_s15 + $0xe8] sm:$0xff] (%p3500_p6)  ;;  %2554 = vst [vmem:[%s4057_s23 + $0x1a8] sm:$0xff] (%p3500_p6), %v2553_v47 }
 0x1fb   : > { %v1200_v53 = vpop.f32.mrf.mxu0  ;;  %v1553_v54 = vpop.f32.mrf.mxu1  ;;  %2556 = vst [vmem:[%s4057_s23 + $0x1c0] sm:$0xff] (%p3500_p6), %v2555_v48  ;;  %2558 = vst [vmem:[%s4057_s23 + $0x1c8] sm:$0xff] (%p3500_p6), %v2557_v49  ;;  %v2559_v62 = vld [vmem:[%s3876_s15 + $0xf0] sm:$0xff] (%p3500_p6)  ;;  %v2561_v50 = vld [vmem:[%s3876_s15 + $0xf8] sm:$0xff] (%p3500_p6) }
 0x1fc   : > { %2462 = vst [vmem:[%s3876_s15 + $0x3a0] sm:$0xff] %v3136_v51  ;;  %2463 = vst [vmem:[%s3876_s15 + $0x3a8] sm:$0xff] %v3137_v52  ;;  %v2563_v51 = vld [vmem:[%s3876_s15 + $0x100] sm:$0xff] (%p3500_p6)  ;;  %v2565_v52 = vld [vmem:[%s3876_s15 + $0x108] sm:$0xff] (%p3500_p6) }
 0x1fd   : > { %v1202_v55 = vpop.f32.mrf.mxu0  ;;  %v1555_v57 = vpop.f32.mrf.mxu1  ;;  %2560 = vst [vmem:[%s4057_s23 + $0x1e0] sm:$0xff] (%p3500_p6), %v2559_v62  ;;  %2562 = vst [vmem:[%s4057_s23 + $0x1e8] sm:$0xff] (%p3500_p6), %v2561_v50  ;;  %v2653_v34 = vld [vmem:[%s3876_s15 + $0x268] sm:$0xff] (%p3500_p6)  ;;  %v2655_v35 = vld [vmem:[%s3876_s15 + $0x270] sm:$0xff] (%p3500_p6) }
 0x1fe   : > { %v3138_v58 = vpack.c.bf16 %v1202_v55, %v1200_v53  ;;  %v3139_v59 = vpack.c.bf16 %v1555_v57, %v1553_v54  ;;  %2564 = vst [vmem:[%s4057_s23 + $0x200] sm:$0xff] (%p3500_p6), %v2563_v51  ;;  %v2567_v53 = vld [vmem:[%s3876_s15 + $0x110] sm:$0xff] (%p3500_p6)  ;;  %v2569_v54 = vld [vmem:[%s3876_s15 + $0x118] sm:$0xff] (%p3500_p6)  ;;  %2566 = vst [vmem:[%s4057_s23 + $0x208] sm:$0xff] (%p3500_p6), %v2565_v52 }
 0x1ff   : > { %v1206_v60 = vpop.f32.mrf.mxu0  ;;  %v1559_v61 = vpop.f32.mrf.mxu1  ;;  %2568 = vst [vmem:[%s4057_s23 + $0x220] sm:$0xff] (%p3500_p6), %v2567_v53  ;;  %2570 = vst [vmem:[%s4057_s23 + $0x228] sm:$0xff] (%p3500_p6), %v2569_v54  ;;  %v2571_v55 = vld [vmem:[%s3876_s15 + $0x120] sm:$0xff] (%p3500_p6)  ;;  %v2573_v57 = vld [vmem:[%s3876_s15 + $0x128] sm:$0xff] (%p3500_p6) }
 0x200   : > { %2464 = vst [vmem:[%s3876_s15 + $0x3b0] sm:$0xff] %v3138_v58  ;;  %2465 = vst [vmem:[%s3876_s15 + $0x3b8] sm:$0xff] %v3139_v59  ;;  %v2575_v58 = vld [vmem:[%s3876_s15 + $0x130] sm:$0xff] (%p3500_p6)  ;;  %v2577_v59 = vld [vmem:[%s3876_s15 + $0x138] sm:$0xff] (%p3500_p6) }
 0x201   : > { %v1208_v63 = vpop.f32.mrf.mxu0  ;;  %v1561_v0 = vpop.f32.mrf.mxu1  ;;  %2572 = vst [vmem:[%s4057_s23 + $0x240] sm:$0xff] (%p3500_p6), %v2571_v55  ;;  %2574 = vst [vmem:[%s4057_s23 + $0x248] sm:$0xff] (%p3500_p6), %v2573_v57  ;;  %v2657_v36 = vld [vmem:[%s3876_s15 + $0x278] sm:$0xff] (%p3500_p6)  ;;  %v2659_v37 = vld [vmem:[%s3876_s15 + $0x280] sm:$0xff] (%p3500_p6) }
 0x202   : > { %v3140_v1 = vpack.c.bf16 %v1208_v63, %v1206_v60  ;;  %v3141_v2 = vpack.c.bf16 %v1561_v0, %v1559_v61  ;;  %2576 = vst [vmem:[%s4057_s23 + $0x260] sm:$0xff] (%p3500_p6), %v2575_v58  ;;  %v2579_v60 = vld [vmem:[%s3876_s15 + $0x140] sm:$0xff] (%p3500_p6)  ;;  %v2581_v61 = vld [vmem:[%s3876_s15 + $0x148] sm:$0xff] (%p3500_p6)  ;;  %2578 = vst [vmem:[%s4057_s23 + $0x268] sm:$0xff] (%p3500_p6), %v2577_v59 }
 0x203   : > { %v1210_v3 = vpop.f32.mrf.mxu0  ;;  %v1563_v4 = vpop.f32.mrf.mxu1  ;;  %2580 = vst [vmem:[%s4057_s23 + $0x280] sm:$0xff] (%p3500_p6), %v2579_v60  ;;  %2582 = vst [vmem:[%s4057_s23 + $0x288] sm:$0xff] (%p3500_p6), %v2581_v61  ;;  %v2583_v63 = vld [vmem:[%s3876_s15 + $0x150] sm:$0xff] (%p3500_p6)  ;;  %v2585_v0 = vld [vmem:[%s3876_s15 + $0x158] sm:$0xff] (%p3500_p6) }
 0x204   : > { %2466 = vst [vmem:[%s3876_s15 + $0x3c0] sm:$0xff] %v3140_v1  ;;  %2467 = vst [vmem:[%s3876_s15 + $0x3c8] sm:$0xff] %v3141_v2  ;;  %v2587_v1 = vld [vmem:[%s3876_s15 + $0x160] sm:$0xff] (%p3500_p6)  ;;  %v2589_v2 = vld [vmem:[%s3876_s15 + $0x168] sm:$0xff] (%p3500_p6) }
 0x205   : > { %v1212_v5 = vpop.f32.mrf.mxu0  ;;  %v1565_v6 = vpop.f32.mrf.mxu1  ;;  %2584 = vst [vmem:[%s4057_s23 + $0x2a0] sm:$0xff] (%p3500_p6), %v2583_v63  ;;  %2586 = vst [vmem:[%s4057_s23 + $0x2a8] sm:$0xff] (%p3500_p6), %v2585_v0  ;;  %v2661_v38 = vld [vmem:[%s3876_s15 + $0x288] sm:$0xff] (%p3500_p6)  ;;  %v2663_v39 = vld [vmem:[%s3876_s15 + $0x290] sm:$0xff] (%p3500_p6) }
 0x206   : > { %v3142_v7 = vpack.c.bf16 %v1212_v5, %v1210_v3  ;;  %v3143_v8 = vpack.c.bf16 %v1565_v6, %v1563_v4  ;;  %2588 = vst [vmem:[%s4057_s23 + $0x2c0] sm:$0xff] (%p3500_p6), %v2587_v1  ;;  %v2591_v3 = vld [vmem:[%s3876_s15 + $0x170] sm:$0xff] (%p3500_p6)  ;;  %v2593_v4 = vld [vmem:[%s3876_s15 + $0x178] sm:$0xff] (%p3500_p6)  ;;  %2590 = vst [vmem:[%s4057_s23 + $0x2c8] sm:$0xff] (%p3500_p6), %v2589_v2 }
 0x207   : > { %v1216_v9 = vpop.f32.mrf.mxu0  ;;  %v1569_v10 = vpop.f32.mrf.mxu1  ;;  %2592 = vst [vmem:[%s4057_s23 + $0x2e0] sm:$0xff] (%p3500_p6), %v2591_v3  ;;  %2594 = vst [vmem:[%s4057_s23 + $0x2e8] sm:$0xff] (%p3500_p6), %v2593_v4  ;;  %v2595_v5 = vld [vmem:[%s3876_s15 + $0x180] sm:$0xff] (%p3500_p6)  ;;  %v2597_v6 = vld [vmem:[%s3876_s15 + $0x188] sm:$0xff] (%p3500_p6) }
 0x208   : > { %2468 = vst [vmem:[%s3876_s15 + $0x3d0] sm:$0xff] %v3142_v7  ;;  %2469 = vst [vmem:[%s3876_s15 + $0x3d8] sm:$0xff] %v3143_v8  ;;  %v2599_v7 = vld [vmem:[%s3876_s15 + $0x190] sm:$0xff] (%p3500_p6)  ;;  %v2601_v8 = vld [vmem:[%s3876_s15 + $0x198] sm:$0xff] (%p3500_p6) }
 0x209   : > { %v1218_v11 = vpop.f32.mrf.mxu0  ;;  %v1571_v12 = vpop.f32.mrf.mxu1  ;;  %2596 = vst [vmem:[%s4057_s23 + $0x300] sm:$0xff] (%p3500_p6), %v2595_v5  ;;  %2598 = vst [vmem:[%s4057_s23 + $0x308] sm:$0xff] (%p3500_p6), %v2597_v6  ;;  %v2665_v40 = vld [vmem:[%s3876_s15 + $0x298] sm:$0xff] (%p3500_p6)  ;;  %v2667_v41 = vld [vmem:[%s3876_s15 + $0x2a0] sm:$0xff] (%p3500_p6) }
 0x20a   : > { %v3144_v13 = vpack.c.bf16 %v1218_v11, %v1216_v9  ;;  %v3145_v14 = vpack.c.bf16 %v1571_v12, %v1569_v10  ;;  %2600 = vst [vmem:[%s4057_s23 + $0x320] sm:$0xff] (%p3500_p6), %v2599_v7  ;;  %v2603_v9 = vld [vmem:[%s3876_s15 + $0x1a0] sm:$0xff] (%p3500_p6)  ;;  %v2605_v10 = vld [vmem:[%s3876_s15 + $0x1a8] sm:$0xff] (%p3500_p6)  ;;  %2602 = vst [vmem:[%s4057_s23 + $0x328] sm:$0xff] (%p3500_p6), %v2601_v8 }
 0x20b   : > { %v1220_v15 = vpop.f32.mrf.mxu0  ;;  %v1573_v16 = vpop.f32.mrf.mxu1  ;;  %2604 = vst [vmem:[%s4057_s23 + $0x340] sm:$0xff] (%p3500_p6), %v2603_v9  ;;  %2606 = vst [vmem:[%s4057_s23 + $0x348] sm:$0xff] (%p3500_p6), %v2605_v10  ;;  %v2607_v11 = vld [vmem:[%s3876_s15 + $0x1b0] sm:$0xff] (%p3500_p6)  ;;  %v2609_v12 = vld [vmem:[%s3876_s15 + $0x1b8] sm:$0xff] (%p3500_p6) }
 0x20c   : > { %2470 = vst [vmem:[%s3876_s15 + $0x3e0] sm:$0xff] %v3144_v13  ;;  %2471 = vst [vmem:[%s3876_s15 + $0x3e8] sm:$0xff] %v3145_v14  ;;  %2480 = sbr.rel (!%p3500_p6) target bundleno = 563 (0x233), region = 63  ;;  %v2611_v13 = vld [vmem:[%s3876_s15 + $0x1c0] sm:$0xff] (%p3500_p6)  ;;  %v2613_v14 = vld [vmem:[%s3876_s15 + $0x1c8] sm:$0xff] (%p3500_p6) }
 0x20d   : > { %v1222_v17 = vpop.f32.mrf.mxu0  ;;  %v1575_v18 = vpop.f32.mrf.mxu1  ;;  %2608 = vst [vmem:[%s4057_s23 + $0x360] sm:$0xff] (%p3500_p6), %v2607_v11  ;;  %2610 = vst [vmem:[%s4057_s23 + $0x368] sm:$0xff] (%p3500_p6), %v2609_v12  ;;  %v2669_v32 = vld [vmem:[%s3876_s15 + $0x2a8] sm:$0xff] (%p3500_p6)  ;;  %v2671_v42 = vld [vmem:[%s3876_s15 + $0x2b0] sm:$0xff] (%p3500_p6) }
 0x20e   : > { %v3146_v19 = vpack.c.bf16 %v1222_v17, %v1220_v15  ;;  %v3147_v20 = vpack.c.bf16 %v1575_v18, %v1573_v16  ;;  %2612 = vst [vmem:[%s4057_s23 + $0x380] sm:$0xff] (%p3500_p6), %v2611_v13  ;;  %v2615_v15 = vld [vmem:[%s3876_s15 + $0x1d0] sm:$0xff] (%p3500_p6)  ;;  %v2617_v16 = vld [vmem:[%s3876_s15 + $0x1d8] sm:$0xff] (%p3500_p6)  ;;  %2614 = vst [vmem:[%s4057_s23 + $0x388] sm:$0xff] (%p3500_p6), %v2613_v14 }
 0x20f   : > { %2616 = vst [vmem:[%s4057_s23 + $0x3a0] sm:$0xff] (%p3500_p6), %v2615_v15  ;;  %2618 = vst [vmem:[%s4057_s23 + $0x3a8] sm:$0xff] (%p3500_p6), %v2617_v16  ;;  %v2619_v17 = vld [vmem:[%s3876_s15 + $0x1e0] sm:$0xff] (%p3500_p6)  ;;  %v2621_v18 = vld [vmem:[%s3876_s15 + $0x1e8] sm:$0xff] (%p3500_p6) }
 0x210   : > { %2472 = vst [vmem:[%s3876_s15 + $0x3f0] sm:$0xff] %v3146_v19  ;;  %2473 = vst [vmem:[%s3876_s15 + $0x3f8] sm:$0xff] %v3147_v20  ;;  %v2623_v19 = vld [vmem:[%s3876_s15 + $0x1f0] sm:$0xff] (%p3500_p6)  ;;  %v2625_v20 = vld [vmem:[%s3876_s15 + $0x1f8] sm:$0xff] (%p3500_p6) }
 0x211   : > { %2620 = vst [vmem:[%s4057_s23 + $0x3c0] sm:$0xff] %v2619_v17  ;;  %2622 = vst [vmem:[%s4057_s23 + $0x3c8] sm:$0xff] %v2621_v18  ;;  %v2673_v43 = vld [vmem:[%s3876_s15 + $0x2b8] sm:$0xff]  ;;  %v2675_v44 = vld [vmem:[%s3876_s15 + $0x2c0] sm:$0xff] }
 0x212   : > { %2624 = vst [vmem:[%s4057_s23 + $0x3e0] sm:$0xff] %v2623_v19  ;;  %2626 = vst [vmem:[%s4057_s23 + $0x3e8] sm:$0xff] %v2625_v20  ;;  %v2677_v45 = vld [vmem:[%s3876_s15 + $0x2c8] sm:$0xff]  ;;  %v2679_v46 = vld [vmem:[%s3876_s15 + $0x2d0] sm:$0xff] }
 0x213   : > { %2630 = vst [vmem:[%s4057_s23 + $0x408] sm:$0xff] %v2629_v22  ;;  %2632 = vst [vmem:[%s4057_s23 + $0x420] sm:$0xff] %v2631_v23  ;;  %v2681_v47 = vld [vmem:[%s3876_s15 + $0x2d8] sm:$0xff]  ;;  %v2683_v48 = vld [vmem:[%s3876_s15 + $0x2e0] sm:$0xff] }
 0x214   : > { %2634 = vst [vmem:[%s4057_s23 + $0x428] sm:$0xff] %v2633_v24  ;;  %2636 = vst [vmem:[%s4057_s23 + $0x440] sm:$0xff] %v2635_v25  ;;  %v2685_v49 = vld [vmem:[%s3876_s15 + $0x2e8] sm:$0xff]  ;;  %v2687_v62 = vld [vmem:[%s3876_s15 + $0x2f0] sm:$0xff] }
 0x215   : > { %2638 = vst [vmem:[%s4057_s23 + $0x448] sm:$0xff] %v2637_v26  ;;  %2640 = vst [vmem:[%s4057_s23 + $0x460] sm:$0xff] %v2639_v27  ;;  %v2689_v50 = vld [vmem:[%s3876_s15 + $0x2f8] sm:$0xff]  ;;  %v2691_v51 = vld [vmem:[%s3876_s15 + $0x300] sm:$0xff] }
 0x216   : > { %2642 = vst [vmem:[%s4057_s23 + $0x468] sm:$0xff] %v2641_v28  ;;  %2644 = vst [vmem:[%s4057_s23 + $0x480] sm:$0xff] %v2643_v29  ;;  %v2693_v52 = vld [vmem:[%s3876_s15 + $0x308] sm:$0xff]  ;;  %v2695_v53 = vld [vmem:[%s3876_s15 + $0x310] sm:$0xff] }
 0x217   : > { %2646 = vst [vmem:[%s4057_s23 + $0x488] sm:$0xff] %v2645_v30  ;;  %2648 = vst [vmem:[%s4057_s23 + $0x4a0] sm:$0xff] %v2647_v31  ;;  %v2697_v54 = vld [vmem:[%s3876_s15 + $0x318] sm:$0xff]  ;;  %v2699_v55 = vld [vmem:[%s3876_s15 + $0x320] sm:$0xff] }
 0x218   : > { %2650 = vst [vmem:[%s4057_s23 + $0x4a8] sm:$0xff] %v2649_v56  ;;  %2652 = vst [vmem:[%s4057_s23 + $0x4c0] sm:$0xff] %v2651_v33  ;;  %v2701_v57 = vld [vmem:[%s3876_s15 + $0x328] sm:$0xff]  ;;  %v2703_v58 = vld [vmem:[%s3876_s15 + $0x330] sm:$0xff] }
 0x219   : > { %2654 = vst [vmem:[%s4057_s23 + $0x4c8] sm:$0xff] %v2653_v34  ;;  %2656 = vst [vmem:[%s4057_s23 + $0x4e0] sm:$0xff] %v2655_v35  ;;  %v2705_v59 = vld [vmem:[%s3876_s15 + $0x338] sm:$0xff]  ;;  %v2707_v60 = vld [vmem:[%s3876_s15 + $0x340] sm:$0xff] }
 0x21a   : > { %2658 = vst [vmem:[%s4057_s23 + $0x4e8] sm:$0xff] %v2657_v36  ;;  %2660 = vst [vmem:[%s4057_s23 + $0x500] sm:$0xff] %v2659_v37  ;;  %v2709_v61 = vld [vmem:[%s3876_s15 + $0x348] sm:$0xff]  ;;  %v2711_v63 = vld [vmem:[%s3876_s15 + $0x350] sm:$0xff] }
 0x21b   : > { %2662 = vst [vmem:[%s4057_s23 + $0x508] sm:$0xff] %v2661_v38  ;;  %2664 = vst [vmem:[%s4057_s23 + $0x520] sm:$0xff] %v2663_v39  ;;  %v2713_v0 = vld [vmem:[%s3876_s15 + $0x358] sm:$0xff]  ;;  %v2715_v1 = vld [vmem:[%s3876_s15 + $0x360] sm:$0xff] }
 0x21c   : > { %2666 = vst [vmem:[%s4057_s23 + $0x528] sm:$0xff] %v2665_v40  ;;  %2668 = vst [vmem:[%s4057_s23 + $0x540] sm:$0xff] %v2667_v41  ;;  %v2717_v2 = vld [vmem:[%s3876_s15 + $0x368] sm:$0xff]  ;;  %v2719_v3 = vld [vmem:[%s3876_s15 + $0x370] sm:$0xff] }
 0x21d   : > { %2670 = vst [vmem:[%s4057_s23 + $0x548] sm:$0xff] %v2669_v32  ;;  %2672 = vst [vmem:[%s4057_s23 + $0x560] sm:$0xff] %v2671_v42  ;;  %v2721_v4 = vld [vmem:[%s3876_s15 + $0x378] sm:$0xff]  ;;  %v2723_v5 = vld [vmem:[%s3876_s15 + $0x380] sm:$0xff] }
 0x21e   : > { %2674 = vst [vmem:[%s4057_s23 + $0x568] sm:$0xff] %v2673_v43  ;;  %2676 = vst [vmem:[%s4057_s23 + $0x580] sm:$0xff] %v2675_v44  ;;  %v2725_v6 = vld [vmem:[%s3876_s15 + $0x388] sm:$0xff]  ;;  %v2727_v7 = vld [vmem:[%s3876_s15 + $0x390] sm:$0xff] }
 0x21f   : > { %2678 = vst [vmem:[%s4057_s23 + $0x588] sm:$0xff] %v2677_v45  ;;  %2680 = vst [vmem:[%s4057_s23 + $0x5a0] sm:$0xff] %v2679_v46  ;;  %v2729_v8 = vld [vmem:[%s3876_s15 + $0x398] sm:$0xff]  ;;  %v2731_v9 = vld [vmem:[%s3876_s15 + $0x3a0] sm:$0xff] }
 0x220   : > { %2682 = vst [vmem:[%s4057_s23 + $0x5a8] sm:$0xff] %v2681_v47  ;;  %2684 = vst [vmem:[%s4057_s23 + $0x5c0] sm:$0xff] %v2683_v48  ;;  %v2733_v10 = vld [vmem:[%s3876_s15 + $0x3a8] sm:$0xff]  ;;  %v2735_v11 = vld [vmem:[%s3876_s15 + $0x3b0] sm:$0xff] }
 0x221   : > { %2686 = vst [vmem:[%s4057_s23 + $0x5c8] sm:$0xff] %v2685_v49  ;;  %2688 = vst [vmem:[%s4057_s23 + $0x5e0] sm:$0xff] %v2687_v62  ;;  %v2737_v12 = vld [vmem:[%s3876_s15 + $0x3b8] sm:$0xff]  ;;  %v2739_v13 = vld [vmem:[%s3876_s15 + $0x3c0] sm:$0xff] }
 0x222   : > { %2690 = vst [vmem:[%s4057_s23 + $0x5e8] sm:$0xff] %v2689_v50  ;;  %2692 = vst [vmem:[%s4057_s23 + $0x600] sm:$0xff] %v2691_v51  ;;  %v2741_v14 = vld [vmem:[%s3876_s15 + $0x3c8] sm:$0xff]  ;;  %v2743_v15 = vld [vmem:[%s3876_s15 + $0x3d0] sm:$0xff] }
 0x223   : > { %2694 = vst [vmem:[%s4057_s23 + $0x608] sm:$0xff] %v2693_v52  ;;  %2696 = vst [vmem:[%s4057_s23 + $0x620] sm:$0xff] %v2695_v53  ;;  %v2745_v16 = vld [vmem:[%s3876_s15 + $0x3d8] sm:$0xff]  ;;  %v2747_v17 = vld [vmem:[%s3876_s15 + $0x3e0] sm:$0xff] }
 0x224   : > { %2698 = vst [vmem:[%s4057_s23 + $0x628] sm:$0xff] %v2697_v54  ;;  %2700 = vst [vmem:[%s4057_s23 + $0x640] sm:$0xff] %v2699_v55  ;;  %v2749_v18 = vld [vmem:[%s3876_s15 + $0x3e8] sm:$0xff]  ;;  %v2751_v19 = vld [vmem:[%s3876_s15 + $0x3f0] sm:$0xff] }
 0x225   : > { %2702 = vst [vmem:[%s4057_s23 + $0x648] sm:$0xff] %v2701_v57  ;;  %2704 = vst [vmem:[%s4057_s23 + $0x660] sm:$0xff] %v2703_v58  ;;  %v2753_v20 = vld [vmem:[%s3876_s15 + $0x3f8] sm:$0xff] }
 0x226   : > { %2706 = vst [vmem:[%s4057_s23 + $0x668] sm:$0xff] %v2705_v59  ;;  %2708 = vst [vmem:[%s4057_s23 + $0x680] sm:$0xff] %v2707_v60 }
 0x227   : > { %2710 = vst [vmem:[%s4057_s23 + $0x688] sm:$0xff] %v2709_v61  ;;  %2712 = vst [vmem:[%s4057_s23 + $0x6a0] sm:$0xff] %v2711_v63 }
 0x228   : > { %2714 = vst [vmem:[%s4057_s23 + $0x6a8] sm:$0xff] %v2713_v0  ;;  %2716 = vst [vmem:[%s4057_s23 + $0x6c0] sm:$0xff] %v2715_v1 }
 0x229   : > { %2718 = vst [vmem:[%s4057_s23 + $0x6c8] sm:$0xff] %v2717_v2  ;;  %2720 = vst [vmem:[%s4057_s23 + $0x6e0] sm:$0xff] %v2719_v3 }
 0x22a   : > { %2722 = vst [vmem:[%s4057_s23 + $0x6e8] sm:$0xff] %v2721_v4  ;;  %2724 = vst [vmem:[%s4057_s23 + $0x700] sm:$0xff] %v2723_v5 }
 0x22b   : > { %2726 = vst [vmem:[%s4057_s23 + $0x708] sm:$0xff] %v2725_v6  ;;  %2728 = vst [vmem:[%s4057_s23 + $0x720] sm:$0xff] %v2727_v7 }
 0x22c   : > { %2730 = vst [vmem:[%s4057_s23 + $0x728] sm:$0xff] %v2729_v8  ;;  %2732 = vst [vmem:[%s4057_s23 + $0x740] sm:$0xff] %v2731_v9 }
 0x22d   : > { %2734 = vst [vmem:[%s4057_s23 + $0x748] sm:$0xff] %v2733_v10  ;;  %2736 = vst [vmem:[%s4057_s23 + $0x760] sm:$0xff] %v2735_v11 }
 0x22e   : > { %2738 = vst [vmem:[%s4057_s23 + $0x768] sm:$0xff] %v2737_v12  ;;  %2740 = vst [vmem:[%s4057_s23 + $0x780] sm:$0xff] %v2739_v13 }
 0x22f   : > { %2742 = vst [vmem:[%s4057_s23 + $0x788] sm:$0xff] %v2741_v14  ;;  %2744 = vst [vmem:[%s4057_s23 + $0x7a0] sm:$0xff] %v2743_v15 }
 0x230   : > { %2746 = vst [vmem:[%s4057_s23 + $0x7a8] sm:$0xff] %v2745_v16  ;;  %2748 = vst [vmem:[%s4057_s23 + $0x7c0] sm:$0xff] %v2747_v17 }
 0x231   : > { %2750 = vst [vmem:[%s4057_s23 + $0x7c8] sm:$0xff] %v2749_v18  ;;  %2752 = vst [vmem:[%s4057_s23 + $0x7e0] sm:$0xff] %v2751_v19 }
 0x232   : > { %2754 = vst [vmem:[%s4057_s23 + $0x7e8] sm:$0xff] %v2753_v20 }
 0x233 PF: > { %s14_s19 = sadd.s32 1, %s3437_s19   ;;  %s4333_s15 = smov %s3425_s16 }
 0x234   : > { %p11_p11 = scmp.ge.s32.totalorder %s14_s19, 4   ;;  %s4334_s16 = smov %s3505_s25 }
 0x235   : > { %s4335_s17 = smov %s3433_s18  ;;  %s4336_s18 = smov %s4338_s20 }
 0x236   :  { %13 = sbr.rel (!%p11_p11) target bundleno = 3 (0x3), region = 120 }

// kernel: acgan_generator_forward.17
= control target key start
LH: loop header
LB: loop body
LE: loop exit
PB: predicated region body
PF: predicated region fallthrough
CT: control target
= control target key end

     0   :  { %s1532_s15 = smov 0   ;;  %s2529_s0 = inlined_call_operand.vmem [shape: bf16[2048,64], index: 0, kind: input, shape index: {}]   ;;  %s2530_s1 = inlined_call_operand.vmem [shape: f32[1,64], index: 1, kind: input, shape index: {}]   ;;  %s2531_s2 = inlined_call_operand.vmem [shape: f32[1,64], index: 2, kind: input, shape index: {}]   ;;  %s2532_s3 = inlined_call_operand.vmem [shape: f32[1,64], index: 3, kind: output, shape index: {0}]   ;;  %s2533_s4 = inlined_call_operand.vmem [shape: f32[1,64], index: 4, kind: output, shape index: {1}]  }
   0x1 LB: > { %s1538_s16 = sadd.s32 4294967295, %s1504_s15   ;;  %p1161_p0 = scmp.ge.s32.totalorder %s1504_s15, 1  ;;  %s1504_s15 = sphi %s1532_s15, %s15_s15  }
   0x2   : > { %p156_p1 = scmp.lt.s32.totalorder %s1504_s15, 3 }
   0x4   : > { %p157_p2 = pnand %p1161_p0, %p156_p1 }
   0x5   : > { %s1162_s17 = sshll.u32 (!%p157_p2), %s1538_s16, 7  ;;  %p1164_p4 = scmp.ne.s32.totalorder (!%p157_p2), %s1538_s16, 0 }
   0x6   : > { %160 = sbr.rel (%p157_p2) target bundleno = 365 (0x16d), region = 32  ;;  %p178_p3 = scmp.lt.s32.totalorder (!%p157_p2), %s1162_s17, 255 }
   0xb   : > { %s2535_s17 = smov (!%p178_p3, %s1162_s17), 255  ;;  %186 = sbr.rel (%p1164_p4) target bundleno = 18 (0x12), region = 36 }
   0xc   : > { %s1163_s18 = sshll.u32 %s2535_s17, 2 }
   0xd   : > { %s1546_s21 = scalar_lea.vmem %s2529_s0, %s1163_s18 }
  0x10   : > { %vm187_vm0 = vcmask 516096   ;;  %v1506_v0 = vmov 0.0  }
  0x11   : > { %188 = vst.msk [vmem:[#allocation2] sm:$0x1] %vm187_vm0, %v1506_v0  ;;  %189 = vst.msk [vmem:[#allocation3] sm:$0x1] %vm187_vm0, %v1506_v0 }
  0x12 PF: > { %v1169_v1 = vld [vmem:[%s1546_s21] sm:$0xff]   ;;  %v1424_v2 = vld [vmem:[%s1546_s21 + $0x8] sm:$0xff]   ;;  %vm447_vm1 = vcmask 523264   ;;  %v1425_v6 = vld [vmem:[%s1546_s21 + $0x10] sm:$0xff]   ;;  %vm710_vm2 = vcmask 516096   ;;  %p1165_p5 = scmp.ne.s32.totalorder %s1538_s16, 1 }
  0x13   : > { %v1551_v3 = vunpack.c.l.bf16 %v1169_v1  ;;  %v1553_v4 = vunpack.c.h.bf16 %v1169_v1  ;;  %v1555_v5 = vunpack.c.l.bf16 %v1424_v2  ;;  %v1558_v7 = vunpack.c.h.bf16 %v1424_v2  ;;  %v1426_v14 = vld [vmem:[%s1546_s21 + $0x18] sm:$0xff]   ;;  %v1427_v21 = vld [vmem:[%s1546_s21 + $0x20] sm:$0xff]   ;;  %v1428_v28 = vld [vmem:[%s1546_s21 + $0x28] sm:$0xff]  }
  0x14   : > { %v1566_v12 = vunpack.c.l.bf16 %v1425_v6  ;;  %v1571_v16 = vunpack.c.h.bf16 %v1425_v6  ;;  %v1575_v19 = vunpack.c.l.bf16 %v1426_v14  ;;  %v1580_v23 = vunpack.c.h.bf16 %v1426_v14  ;;  %v1429_v35 = vld [vmem:[%s1546_s21 + $0x30] sm:$0xff]   ;;  %v1430_v42 = vld [vmem:[%s1546_s21 + $0x38] sm:$0xff]   ;;  %v1431_v49 = vld [vmem:[%s1546_s21 + $0x40] sm:$0xff]  }
  0x15   : > { %v448_v8 = vsel %vm447_vm1, %v1551_v3, 0.0  ;;  %v449_v9 = vsel %vm447_vm1, %v1553_v4, 0.0  ;;  %v451_v10 = vsel %vm447_vm1, %v1555_v5, 0.0  ;;  %v453_v13 = vsel %vm447_vm1, %v1558_v7, 0.0  ;;  %v1432_v56 = vld [vmem:[%s1546_s21 + $0x48] sm:$0xff]   ;;  %v1433_v63 = vld [vmem:[%s1546_s21 + $0x50] sm:$0xff]  }
  0x16   : > { %v450_v11 = vadd.f32 %v449_v9, %v448_v8  ;;  %v455_v17 = vsel %vm447_vm1, %v1566_v12, 0.0  ;;  %v457_v20 = vsel %vm447_vm1, %v1571_v16, 0.0  ;;  %v459_v24 = vsel %vm447_vm1, %v1575_v19, 0.0 }
  0x17   : > { %v1584_v26 = vunpack.c.l.bf16 %v1427_v21  ;;  %v461_v27 = vsel %vm447_vm1, %v1580_v23, 0.0  ;;  %v1589_v30 = vunpack.c.h.bf16 %v1427_v21  ;;  %v1593_v33 = vunpack.c.l.bf16 %v1428_v28 }
  0x18   : > { %v452_v15 = vadd.f32 %v451_v10, %v450_v11  ;;  %v1598_v37 = vunpack.c.h.bf16 %v1428_v28  ;;  %v1602_v40 = vunpack.c.l.bf16 %v1429_v35  ;;  %v1607_v44 = vunpack.c.h.bf16 %v1429_v35  ;;  %v1434_v10 = vld [vmem:[%s1546_s21 + $0x58] sm:$0xff]   ;;  %v1436_v28 = vld [vmem:[%s1546_s21 + $0x68] sm:$0xff]  }
  0x19   : > { %v463_v31 = vsel %vm447_vm1, %v1584_v26, 0.0  ;;  %v465_v34 = vsel %vm447_vm1, %v1589_v30, 0.0  ;;  %v467_v38 = vsel %vm447_vm1, %v1593_v33, 0.0  ;;  %v1611_v47 = vunpack.c.l.bf16 %v1430_v42 }
  0x1a   : > { %v454_v18 = vadd.f32 %v453_v13, %v452_v15  ;;  %v469_v41 = vsel %vm447_vm1, %v1598_v37, 0.0  ;;  %v471_v45 = vsel %vm447_vm1, %v1602_v40, 0.0  ;;  %v473_v48 = vsel %vm447_vm1, %v1607_v44, 0.0 }
  0x1b   : > { %v1616_v51 = vunpack.c.h.bf16 %v1430_v42  ;;  %v475_v52 = vsel %vm447_vm1, %v1611_v47, 0.0  ;;  %v1620_v54 = vunpack.c.l.bf16 %v1431_v49  ;;  %v1625_v58 = vunpack.c.h.bf16 %v1431_v49 }
  0x1c   : > { %v456_v22 = vadd.f32 %v455_v17, %v454_v18  ;;  %v1629_v61 = vunpack.c.l.bf16 %v1432_v56  ;;  %v1634_v1 = vunpack.c.h.bf16 %v1432_v56  ;;  %v1638_v8 = vunpack.c.l.bf16 %v1433_v63 }
  0x1d   : > { %v477_v55 = vsel %vm447_vm1, %v1616_v51, 0.0  ;;  %v479_v59 = vsel %vm447_vm1, %v1620_v54, 0.0  ;;  %v481_v62 = vsel %vm447_vm1, %v1625_v58, 0.0  ;;  %v1643_v13 = vunpack.c.h.bf16 %v1433_v63 }
  0x1e   : > { %v458_v25 = vadd.f32 %v457_v20, %v456_v22  ;;  %v483_v2 = vsel %vm447_vm1, %v1629_v61, 0.0  ;;  %v485_v9 = vsel %vm447_vm1, %v1634_v1, 0.0  ;;  %v487_v14 = vsel %vm447_vm1, %v1638_v8, 0.0  ;;  %v1435_v20 = vld [vmem:[%s1546_s21 + $0x60] sm:$0xff]  }
  0x1f   : > { %v1647_v17 = vunpack.c.l.bf16 %v1434_v10  ;;  %v489_v18 = vsel %vm447_vm1, %v1643_v13, 0.0  ;;  %v1652_v22 = vunpack.c.h.bf16 %v1434_v10  ;;  %v713_v35 = vmul.f32 %v1551_v3, %v1551_v3 }
  0x20   : > { %v460_v29 = vadd.f32 %v459_v24, %v458_v25  ;;  %v718_v56 = vmul.f32 %v1571_v16, %v1571_v16 }
  0x21   : > { %v491_v24 = vsel %vm447_vm1, %v1647_v17, 0.0 }
  0x22   : > { %v462_v32 = vadd.f32 %v461_v27, %v460_v29  ;;  %v1656_v27 = vunpack.c.l.bf16 %v1435_v20  ;;  %v493_v29 = vsel %vm447_vm1, %v1652_v22, 0.0 }
  0x24   : > { %v464_v36 = vadd.f32 %v463_v31, %v462_v32  ;;  %v1661_v31 = vunpack.c.h.bf16 %v1435_v20 }
  0x26   : > { %v466_v39 = vadd.f32 %v465_v34, %v464_v36  ;;  %v495_v34 = vsel %vm447_vm1, %v1656_v27, 0.0  ;;  %v714_v36 = vmul.f32 %v1553_v4, %v1553_v4  ;;  %v497_v42 = vsel %vm447_vm1, %v1661_v31, 0.0 }
  0x28   : > { %v468_v43 = vadd.f32 %v467_v38, %v466_v39  ;;  %v715_v38 = vmul.f32 %v1555_v5, %v1555_v5  ;;  %v1671_v39 = vunpack.c.l.bf16 %v1436_v28  ;;  %v717_v5 = vmul.f32 %v1566_v12, %v1566_v12  ;;  %v1438_v12 = vld [vmem:[%s1546_s21 + $0x78] sm:$0xff]  }
  0x29   : > { %v842_v49 = vsel %vm447_vm1, %v714_v36, 0.0  ;;  %v1702_v10 = vunpack.c.l.bf16 %v1438_v12  ;;  %v1440_v36 = vld [vmem:[%s1546_s21 + $0x88] sm:$0xff]  }
  0x2a   : > { %v470_v46 = vadd.f32 %v469_v41, %v468_v43  ;;  %v716_v43 = vmul.f32 %v1558_v7, %v1558_v7  ;;  %v499_v4 = vsel %vm447_vm1, %v1671_v39, 0.0 }
  0x2c   : > { %v472_v50 = vadd.f32 %v471_v45, %v470_v46  ;;  %v1677_v45 = vunpack.c.h.bf16 %v1436_v28  ;;  %v1437_v46 = vld [vmem:[%s1546_s21 + $0x70] sm:$0xff]  }
  0x2e   : > { %v474_v53 = vadd.f32 %v473_v48, %v472_v50  ;;  %v841_v48 = vsel %vm447_vm1, %v713_v35, 0.0  ;;  %v844_v50 = vsel %vm447_vm1, %v715_v38, 0.0  ;;  %v501_v7 = vsel %vm447_vm1, %v1677_v45, 0.0 }
  0x30   : > { %v476_v57 = vadd.f32 %v475_v52, %v474_v53  ;;  %v843_v53 = vadd.f32 %v842_v49, %v841_v48  ;;  %v724_v48 = vmul.f32 %v1598_v37, %v1598_v37 }
  0x32   : > { %v478_v60 = vadd.f32 %v477_v55, %v476_v57  ;;  %v1687_v55 = vunpack.c.l.bf16 %v1437_v46  ;;  %v846_v57 = vsel %vm447_vm1, %v716_v43, 0.0  ;;  %v723_v43 = vmul.f32 %v1593_v33, %v1593_v33 }
  0x34   : > { %v480_v0 = vadd.f32 %v479_v59, %v478_v60  ;;  %v845_v60 = vadd.f32 %v844_v50, %v843_v53  ;;  %v503_v63 = vsel %vm447_vm1, %v1687_v55, 0.0  ;;  %v1441_v50 = vld [vmem:[%s1546_s21 + $0x90] sm:$0xff]  }
  0x36   : > { %v482_v6 = vadd.f32 %v481_v62, %v480_v0  ;;  %v1695_v62 = vunpack.c.h.bf16 %v1437_v46  ;;  %v719_v0 = vmul.f32 %v1575_v19, %v1575_v19  ;;  %v507_v19 = vsel %vm447_vm1, %v1702_v10, 0.0 }
  0x38   : > { %v484_v11 = vadd.f32 %v483_v2, %v482_v6  ;;  %v848_v2 = vsel %vm447_vm1, %v717_v5, 0.0  ;;  %v505_v16 = vsel %vm447_vm1, %v1695_v62, 0.0  ;;  %v1732_v5 = vunpack.c.l.bf16 %v1440_v36 }
  0x3a   : > { %v486_v15 = vadd.f32 %v485_v9, %v484_v11  ;;  %v847_v9 = vadd.f32 %v846_v57, %v845_v60  ;;  %v720_v11 = vmul.f32 %v1580_v23, %v1580_v23  ;;  %v515_v33 = vsel %vm447_vm1, %v1732_v5, 0.0 }
  0x3b   : > { %v860_v57 = vsel %vm447_vm1, %v723_v43, 0.0  ;;  %v1747_v60 = vunpack.c.l.bf16 %v1441_v50 }
  0x3c   : > { %v488_v21 = vadd.f32 %v487_v14, %v486_v15  ;;  %v850_v14 = vsel %vm447_vm1, %v718_v56, 0.0  ;;  %v1439_v15 = vld [vmem:[%s1546_s21 + $0x80] sm:$0xff]   ;;  %v849_v20 = vadd.f32 %v848_v2, %v847_v9  ;;  %v854_v35 = vsel %vm447_vm1, %v720_v11, 0.0  ;;  %v1442_v2 = vld [vmem:[%s1546_s21 + $0x98] sm:$0xff]  }
  0x3d   : > { %v725_v56 = vmul.f32 %v1602_v40, %v1602_v40  ;;  %v519_v40 = vsel %vm447_vm1, %v1747_v60, 0.0  ;;  %v727_v11 = vmul.f32 %v1611_v47, %v1611_v47 }
  0x3e   : > { %v490_v25 = vadd.f32 %v489_v18, %v488_v21  ;;  %v1710_v21 = vunpack.c.h.bf16 %v1438_v12 }
  0x40   : > { %v492_v32 = vadd.f32 %v491_v24, %v490_v25  ;;  %v721_v24 = vmul.f32 %v1584_v26, %v1584_v26  ;;  %v852_v25 = vsel %vm447_vm1, %v719_v0, 0.0  ;;  %v509_v23 = vsel %vm447_vm1, %v1710_v21, 0.0 }
  0x41   : > { %v862_v0 = vsel %vm447_vm1, %v724_v48, 0.0  ;;  %v731_v48 = vmul.f32 %v1629_v61, %v1629_v61 }
  0x42   : > { %v494_v41 = vadd.f32 %v493_v29, %v492_v32  ;;  %v851_v29 = vadd.f32 %v850_v14, %v849_v20  ;;  %v1717_v32 = vunpack.c.l.bf16 %v1439_v15  ;;  %v856_v46 = vsel %vm447_vm1, %v721_v24, 0.0 }
  0x43   : > { %v864_v14 = vsel %vm447_vm1, %v725_v56, 0.0  ;;  %v1762_v20 = vunpack.c.l.bf16 %v1442_v2 }
  0x44   : > { %v496_v3 = vadd.f32 %v495_v34, %v494_v41  ;;  %v722_v34 = vmul.f32 %v1589_v30, %v1589_v30  ;;  %v853_v41 = vadd.f32 %v852_v25, %v851_v29  ;;  %v511_v26 = vsel %vm447_vm1, %v1717_v32, 0.0  ;;  %v1443_v25 = vld [vmem:[%s1546_s21 + $0xa0] sm:$0xff]  }
  0x45   : > { %v523_v47 = vsel %vm447_vm1, %v1762_v20, 0.0 }
  0x46   : > { %v498_v52 = vadd.f32 %v497_v42, %v496_v3  ;;  %v1725_v42 = vunpack.c.h.bf16 %v1439_v15  ;;  %v858_v49 = vsel %vm447_vm1, %v722_v34, 0.0  ;;  %v729_v34 = vmul.f32 %v1620_v54, %v1620_v54 }
  0x48   : > { %v500_v59 = vadd.f32 %v499_v4, %v498_v52  ;;  %v855_v4 = vadd.f32 %v854_v35, %v853_v41  ;;  %v513_v30 = vsel %vm447_vm1, %v1725_v42, 0.0  ;;  %v868_v35 = vsel %vm447_vm1, %v727_v11, 0.0 }
  0x49   : > { %v1777_v41 = vunpack.c.l.bf16 %v1443_v25 }
  0x4a   : > { %v502_v6 = vadd.f32 %v501_v7, %v500_v59  ;;  %v857_v53 = vadd.f32 %v856_v46, %v855_v4  ;;  %v1740_v7 = vunpack.c.h.bf16 %v1440_v36  ;;  %v1444_v46 = vld [vmem:[%s1546_s21 + $0xa8] sm:$0xff]  }
  0x4b   : > { %v527_v54 = vsel %vm447_vm1, %v1777_v41, 0.0 }
  0x4c   : > { %v504_v18 = vadd.f32 %v503_v63, %v502_v6  ;;  %v859_v59 = vadd.f32 %v858_v49, %v857_v53  ;;  %v517_v37 = vsel %vm447_vm1, %v1740_v7, 0.0  ;;  %v726_v63 = vmul.f32 %v1607_v44, %v1607_v44 }
  0x4d   : > { %v872_v49 = vsel %vm447_vm1, %v729_v34, 0.0  ;;  %v1792_v53 = vunpack.c.l.bf16 %v1444_v46 }
  0x4e   : > { %v506_v28 = vadd.f32 %v505_v16, %v504_v18  ;;  %v861_v9 = vadd.f32 %v860_v57, %v859_v59  ;;  %v1755_v16 = vunpack.c.h.bf16 %v1441_v50  ;;  %v866_v24 = vsel %vm447_vm1, %v726_v63, 0.0  ;;  %v1445_v57 = vld [vmem:[%s1546_s21 + $0xb0] sm:$0xff]  }
  0x4f   : > { %v531_v61 = vsel %vm447_vm1, %v1792_v53, 0.0  ;;  %v733_v63 = vmul.f32 %v1638_v8, %v1638_v8 }
  0x50   : > { %v508_v38 = vadd.f32 %v507_v19, %v506_v28  ;;  %v863_v18 = vadd.f32 %v862_v0, %v861_v9  ;;  %v521_v44 = vsel %vm447_vm1, %v1755_v16, 0.0  ;;  %v728_v19 = vmul.f32 %v1616_v51, %v1616_v51 }
  0x51   : > { %v876_v0 = vsel %vm447_vm1, %v731_v48, 0.0  ;;  %v1807_v9 = vunpack.c.l.bf16 %v1445_v57 }
  0x52   : > { %v510_v3 = vadd.f32 %v509_v23, %v508_v38  ;;  %v865_v29 = vadd.f32 %v864_v14, %v863_v18  ;;  %v1770_v23 = vunpack.c.h.bf16 %v1442_v2  ;;  %v870_v43 = vsel %vm447_vm1, %v728_v19, 0.0  ;;  %v1446_v14 = vld [vmem:[%s1546_s21 + $0xb8] sm:$0xff]  }
  0x53   : > { %v535_v8 = vsel %vm447_vm1, %v1807_v9, 0.0  ;;  %v735_v19 = vmul.f32 %v1647_v17, %v1647_v17 }
  0x54   : > { %v512_v52 = vadd.f32 %v511_v26, %v510_v3  ;;  %v867_v38 = vadd.f32 %v866_v24, %v865_v29  ;;  %v525_v51 = vsel %vm447_vm1, %v1770_v23, 0.0  ;;  %v730_v26 = vmul.f32 %v1625_v58, %v1625_v58 }
  0x55   : > { %v880_v24 = vsel %vm447_vm1, %v733_v63, 0.0  ;;  %v1822_v29 = vunpack.c.l.bf16 %v1446_v14 }
  0x56   : > { %v514_v12 = vadd.f32 %v513_v30, %v512_v52  ;;  %v869_v4 = vadd.f32 %v868_v35, %v867_v38  ;;  %v1785_v30 = vunpack.c.h.bf16 %v1443_v25  ;;  %v874_v56 = vsel %vm447_vm1, %v730_v26, 0.0  ;;  %v1447_v35 = vld [vmem:[%s1546_s21 + $0xc0] sm:$0xff]  }
  0x57   : > { %v539_v17 = vsel %vm447_vm1, %v1822_v29, 0.0  ;;  %v737_v26 = vmul.f32 %v1656_v27, %v1656_v27 }
  0x58   : > { %v516_v6 = vadd.f32 %v515_v33, %v514_v12  ;;  %v871_v52 = vadd.f32 %v870_v43, %v869_v4  ;;  %v529_v58 = vsel %vm447_vm1, %v1785_v30, 0.0  ;;  %v732_v33 = vmul.f32 %v1634_v1, %v1634_v1 }
  0x59   : > { %v884_v43 = vsel %vm447_vm1, %v735_v19, 0.0  ;;  %v1837_v4 = vunpack.c.l.bf16 %v1447_v35 }
  0x5a   : > { %v518_v15 = vadd.f32 %v517_v37, %v516_v6  ;;  %v873_v59 = vadd.f32 %v872_v49, %v871_v52  ;;  %v1800_v37 = vunpack.c.h.bf16 %v1444_v46  ;;  %v878_v11 = vsel %vm447_vm1, %v732_v33, 0.0  ;;  %v1448_v49 = vld [vmem:[%s1546_s21 + $0xc8] sm:$0xff]  }
  0x5b   : > { %v543_v27 = vsel %vm447_vm1, %v1837_v4, 0.0  ;;  %v739_v33 = vmul.f32 %v1671_v39, %v1671_v39 }
  0x5c   : > { %v520_v28 = vadd.f32 %v519_v40, %v518_v15  ;;  %v875_v6 = vadd.f32 %v874_v56, %v873_v59  ;;  %v533_v1 = vsel %vm447_vm1, %v1800_v37, 0.0  ;;  %v734_v40 = vmul.f32 %v1643_v13, %v1643_v13 }
  0x5d   : > { %v888_v56 = vsel %vm447_vm1, %v737_v26, 0.0  ;;  %v1852_v59 = vunpack.c.l.bf16 %v1448_v49 }
  0x5e   : > { %v522_v36 = vadd.f32 %v521_v44, %v520_v28  ;;  %v877_v18 = vadd.f32 %v876_v0, %v875_v6  ;;  %v1815_v44 = vunpack.c.h.bf16 %v1445_v57  ;;  %v882_v34 = vsel %vm447_vm1, %v734_v40, 0.0  ;;  %v1449_v0 = vld [vmem:[%s1546_s21 + $0xd0] sm:$0xff]  }
  0x5f   : > { %v547_v39 = vsel %vm447_vm1, %v1852_v59, 0.0  ;;  %v741_v40 = vmul.f32 %v1687_v55, %v1687_v55 }
  0x60   : > { %v524_v3 = vadd.f32 %v523_v47, %v522_v36  ;;  %v879_v28 = vadd.f32 %v878_v11, %v877_v18  ;;  %v537_v13 = vsel %vm447_vm1, %v1815_v44, 0.0  ;;  %v736_v47 = vmul.f32 %v1652_v22, %v1652_v22 }
  0x61   : > { %v892_v11 = vsel %vm447_vm1, %v739_v33, 0.0  ;;  %v1867_v18 = vunpack.c.l.bf16 %v1449_v0 }
  0x62   : > { %v526_v50 = vadd.f32 %v525_v51, %v524_v3  ;;  %v881_v38 = vadd.f32 %v880_v24, %v879_v28  ;;  %v1830_v51 = vunpack.c.h.bf16 %v1446_v14  ;;  %v886_v48 = vsel %vm447_vm1, %v736_v47, 0.0  ;;  %v1450_v24 = vld [vmem:[%s1546_s21 + $0xd8] sm:$0xff]  }
  0x63   : > { %v551_v55 = vsel %vm447_vm1, %v1867_v18, 0.0  ;;  %v743_v47 = vmul.f32 %v1702_v10, %v1702_v10 }
  0x64   : > { %v528_v12 = vadd.f32 %v527_v54, %v526_v50  ;;  %v883_v3 = vadd.f32 %v882_v34, %v881_v38  ;;  %v541_v22 = vsel %vm447_vm1, %v1830_v51, 0.0  ;;  %v738_v54 = vmul.f32 %v1661_v31, %v1661_v31 }
  0x65   : > { %v896_v34 = vsel %vm447_vm1, %v741_v40, 0.0  ;;  %v1882_v38 = vunpack.c.l.bf16 %v1450_v24 }
  0x66   : > { %v530_v2 = vadd.f32 %v529_v58, %v528_v12  ;;  %v885_v52 = vadd.f32 %v884_v43, %v883_v3  ;;  %v1845_v58 = vunpack.c.h.bf16 %v1447_v35  ;;  %v890_v63 = vsel %vm447_vm1, %v738_v54, 0.0  ;;  %v1451_v43 = vld [vmem:[%s1546_s21 + $0xe0] sm:$0xff]  }
  0x67   : > { %v555_v10 = vsel %vm447_vm1, %v1882_v38, 0.0  ;;  %v745_v54 = vmul.f32 %v1717_v32, %v1717_v32 }
  0x68   : > { %v532_v15 = vadd.f32 %v531_v61, %v530_v2  ;;  %v887_v12 = vadd.f32 %v886_v48, %v885_v52  ;;  %v545_v31 = vsel %vm447_vm1, %v1845_v58, 0.0  ;;  %v740_v61 = vmul.f32 %v1677_v45, %v1677_v45 }
  0x69   : > { %v900_v48 = vsel %vm447_vm1, %v743_v47, 0.0  ;;  %v1897_v52 = vunpack.c.l.bf16 %v1451_v43 }
  0x6a   : > { %v534_v25 = vadd.f32 %v533_v1, %v532_v15  ;;  %v889_v6 = vadd.f32 %v888_v56, %v887_v12  ;;  %v1860_v1 = vunpack.c.h.bf16 %v1448_v49  ;;  %v894_v19 = vsel %vm447_vm1, %v740_v61, 0.0  ;;  %v1452_v56 = vld [vmem:[%s1546_s21 + $0xe8] sm:$0xff]  }
  0x6b   : > { %v559_v32 = vsel %vm447_vm1, %v1897_v52, 0.0  ;;  %v747_v61 = vmul.f32 %v1732_v5, %v1732_v5 }
  0x6c   : > { %v536_v36 = vadd.f32 %v535_v8, %v534_v25  ;;  %v891_v15 = vadd.f32 %v890_v63, %v889_v6  ;;  %v549_v45 = vsel %vm447_vm1, %v1860_v1, 0.0  ;;  %v742_v8 = vmul.f32 %v1695_v62, %v1695_v62 }
  0x6d   : > { %v904_v63 = vsel %vm447_vm1, %v745_v54, 0.0  ;;  %v1912_v6 = vunpack.c.l.bf16 %v1452_v56 }
  0x6e   : > { %v538_v46 = vadd.f32 %v537_v13, %v536_v36  ;;  %v893_v28 = vadd.f32 %v892_v11, %v891_v15  ;;  %v1875_v13 = vunpack.c.h.bf16 %v1449_v0  ;;  %v898_v26 = vsel %vm447_vm1, %v742_v8, 0.0  ;;  %v1453_v11 = vld [vmem:[%s1546_s21 + $0xf0] sm:$0xff]  }
  0x6f   : > { %v563_v5 = vsel %vm447_vm1, %v1912_v6, 0.0  ;;  %v749_v8 = vmul.f32 %v1747_v60, %v1747_v60 }
  0x70   : > { %v540_v50 = vadd.f32 %v539_v17, %v538_v46  ;;  %v895_v36 = vadd.f32 %v894_v19, %v893_v28  ;;  %v553_v62 = vsel %vm447_vm1, %v1875_v13, 0.0  ;;  %v744_v17 = vmul.f32 %v1710_v21, %v1710_v21 }
  0x71   : > { %v908_v19 = vsel %vm447_vm1, %v747_v61, 0.0  ;;  %v1927_v28 = vunpack.c.l.bf16 %v1453_v11 }
  0x72   : > { %v542_v57 = vadd.f32 %v541_v22, %v540_v50  ;;  %v897_v3 = vadd.f32 %v896_v34, %v895_v36  ;;  %v1890_v22 = vunpack.c.h.bf16 %v1450_v24  ;;  %v902_v33 = vsel %vm447_vm1, %v744_v17, 0.0  ;;  %v1454_v34 = vld [vmem:[%s1546_s21 + $0xf8] sm:$0xff]  }
  0x73   : > { %v567_v60 = vsel %vm447_vm1, %v1927_v28, 0.0  ;;  %v751_v17 = vmul.f32 %v1762_v20, %v1762_v20 }
  0x74   : > { %v544_v2 = vadd.f32 %v543_v27, %v542_v57  ;;  %v899_v50 = vadd.f32 %v898_v26, %v897_v3  ;;  %v557_v21 = vsel %vm447_vm1, %v1890_v22, 0.0  ;;  %v746_v27 = vmul.f32 %v1725_v42, %v1725_v42 }
  0x75   : > { %v912_v26 = vsel %vm447_vm1, %v749_v8, 0.0  ;;  %v1942_v3 = vunpack.c.l.bf16 %v1454_v34 }
  0x76   : > { %v546_v14 = vadd.f32 %v545_v31, %v544_v2  ;;  %v901_v12 = vadd.f32 %v900_v48, %v899_v50  ;;  %v1905_v31 = vunpack.c.h.bf16 %v1451_v43  ;;  %v906_v40 = vsel %vm447_vm1, %v746_v27, 0.0  ;;  %v1455_v48 = vld [vmem:[%s1546_s21 + $0x100] sm:$0xff]  }
  0x77   : > { %v571_v20 = vsel %vm447_vm1, %v1942_v3, 0.0  ;;  %v753_v27 = vmul.f32 %v1777_v41, %v1777_v41 }
  0x78   : > { %v548_v25 = vadd.f32 %v547_v39, %v546_v14  ;;  %v903_v2 = vadd.f32 %v902_v33, %v901_v12  ;;  %v561_v42 = vsel %vm447_vm1, %v1905_v31, 0.0  ;;  %v748_v39 = vmul.f32 %v1740_v7, %v1740_v7 }
  0x79   : > { %v916_v33 = vsel %vm447_vm1, %v751_v17, 0.0  ;;  %v1957_v12 = vunpack.c.l.bf16 %v1455_v48 }
  0x7a   : > { %v550_v35 = vadd.f32 %v549_v45, %v548_v25  ;;  %v905_v15 = vadd.f32 %v904_v63, %v903_v2  ;;  %v1920_v45 = vunpack.c.h.bf16 %v1452_v56  ;;  %v910_v47 = vsel %vm447_vm1, %v748_v39, 0.0  ;;  %v1456_v63 = vld [vmem:[%s1546_s21 + $0x108] sm:$0xff]  }
  0x7b   : > { %v575_v41 = vsel %vm447_vm1, %v1957_v12, 0.0  ;;  %v755_v39 = vmul.f32 %v1792_v53, %v1792_v53 }
  0x7c   : > { %v552_v46 = vadd.f32 %v551_v55, %v550_v35  ;;  %v907_v25 = vadd.f32 %v906_v40, %v905_v15  ;;  %v565_v7 = vsel %vm447_vm1, %v1920_v45, 0.0  ;;  %v750_v55 = vmul.f32 %v1755_v16, %v1755_v16 }
  0x7d   : > { %v920_v40 = vsel %vm447_vm1, %v753_v27, 0.0  ;;  %v1972_v15 = vunpack.c.l.bf16 %v1456_v63  ;;  %v1459_v27 = vld [vmem:[%s1546_s21 + $0x120] sm:$0xff]  }
  0x7e   : > { %v554_v49 = vadd.f32 %v553_v62, %v552_v46  ;;  %v909_v36 = vadd.f32 %v908_v19, %v907_v25  ;;  %v1935_v62 = vunpack.c.h.bf16 %v1453_v11  ;;  %v914_v54 = vsel %vm447_vm1, %v750_v55, 0.0  ;;  %v1457_v19 = vld [vmem:[%s1546_s21 + $0x110] sm:$0xff]  }
  0x7f   : > { %v579_v53 = vsel %vm447_vm1, %v1972_v15, 0.0  ;;  %v757_v55 = vmul.f32 %v1807_v9, %v1807_v9 }
  0x80   : > { %v556_v57 = vadd.f32 %v555_v10, %v554_v49  ;;  %v911_v46 = vadd.f32 %v910_v47, %v909_v36  ;;  %v569_v16 = vsel %vm447_vm1, %v1935_v62, 0.0  ;;  %v752_v10 = vmul.f32 %v1770_v23, %v1770_v23 }
  0x81   : > { %v924_v47 = vsel %vm447_vm1, %v755_v39, 0.0  ;;  %v1987_v36 = vunpack.c.l.bf16 %v1457_v19 }
  0x82   : > { %v558_v0 = vadd.f32 %v557_v21, %v556_v57  ;;  %v913_v50 = vadd.f32 %v912_v26, %v911_v46  ;;  %v1950_v21 = vunpack.c.h.bf16 %v1454_v34  ;;  %v918_v61 = vsel %vm447_vm1, %v752_v10, 0.0  ;;  %v1458_v26 = vld [vmem:[%s1546_s21 + $0x118] sm:$0xff]  }
  0x83   : > { %v583_v9 = vsel %vm447_vm1, %v1987_v36, 0.0  ;;  %v759_v10 = vmul.f32 %v1822_v29, %v1822_v29 }
  0x84   : > { %v560_v14 = vadd.f32 %v559_v32, %v558_v0  ;;  %v915_v57 = vadd.f32 %v914_v54, %v913_v50  ;;  %v573_v23 = vsel %vm447_vm1, %v1950_v21, 0.0  ;;  %v754_v32 = vmul.f32 %v1785_v30, %v1785_v30 }
  0x85   : > { %v928_v54 = vsel %vm447_vm1, %v757_v55, 0.0  ;;  %v2002_v50 = vunpack.c.l.bf16 %v1458_v26 }
  0x86   : > { %v562_v24 = vadd.f32 %v561_v42, %v560_v14  ;;  %v917_v2 = vadd.f32 %v916_v33, %v915_v57  ;;  %v1965_v42 = vunpack.c.h.bf16 %v1455_v48  ;;  %v922_v8 = vsel %vm447_vm1, %v754_v32, 0.0 }
  0x87   : > { %v587_v29 = vsel %vm447_vm1, %v2002_v50, 0.0  ;;  %v932_v32 = vsel %vm447_vm1, %v759_v10, 0.0 }
  0x88   : > { %v564_v35 = vadd.f32 %v563_v5, %v562_v24  ;;  %v919_v14 = vadd.f32 %v918_v61, %v917_v2  ;;  %v577_v30 = vsel %vm447_vm1, %v1965_v42, 0.0  ;;  %v756_v5 = vmul.f32 %v1800_v37, %v1800_v37 }
  0x89   : > { %v2017_v2 = vunpack.c.l.bf16 %v1459_v27 }
  0x8a   : > { %v566_v43 = vadd.f32 %v565_v7, %v564_v35  ;;  %v921_v25 = vadd.f32 %v920_v40, %v919_v14  ;;  %v1980_v7 = vunpack.c.h.bf16 %v1456_v63  ;;  %v926_v17 = vsel %vm447_vm1, %v756_v5, 0.0 }
  0x8b   : > { %v761_v63 = vmul.f32 %v1837_v4, %v1837_v4  ;;  %v762_v40 = vmul.f32 %v1845_v58, %v1845_v58  ;;  %v591_v4 = vsel %vm447_vm1, %v2017_v2, 0.0 }
  0x8c   : > { %v568_v49 = vadd.f32 %v567_v60, %v566_v43  ;;  %v923_v35 = vadd.f32 %v922_v8, %v921_v25  ;;  %v581_v37 = vsel %vm447_vm1, %v1980_v7, 0.0  ;;  %v758_v60 = vmul.f32 %v1815_v44, %v1815_v44 }
  0x8d   : > { %v763_v8 = vmul.f32 %v1852_v59, %v1852_v59 }
  0x8e   : > { %v570_v56 = vadd.f32 %v569_v16, %v568_v49  ;;  %v925_v46 = vadd.f32 %v924_v47, %v923_v35  ;;  %v1995_v16 = vunpack.c.h.bf16 %v1457_v19  ;;  %v936_v19 = vsel %vm447_vm1, %v761_v63, 0.0 }
  0x8f   : > { %v764_v47 = vmul.f32 %v1860_v1, %v1860_v1 }
  0x90   : > { %v572_v0 = vadd.f32 %v571_v20, %v570_v56  ;;  %v927_v49 = vadd.f32 %v926_v17, %v925_v46  ;;  %v585_v44 = vsel %vm447_vm1, %v1995_v16, 0.0  ;;  %v930_v20 = vsel %vm447_vm1, %v758_v60, 0.0 }
  0x91   : > { %v760_v56 = vmul.f32 %v1830_v51, %v1830_v51  ;;  %v1460_v51 = vld [vmem:[%s1546_s21 + $0x128] sm:$0xff]   ;;  %v765_v17 = vmul.f32 %v1867_v18, %v1867_v18 }
  0x92   : > { %v574_v11 = vadd.f32 %v573_v23, %v572_v0  ;;  %v929_v57 = vadd.f32 %v928_v54, %v927_v49  ;;  %v2010_v23 = vunpack.c.h.bf16 %v1458_v26  ;;  %v2040_v35 = vunpack.c.h.bf16 %v1460_v51 }
  0x93   : > { %v934_v14 = vsel %vm447_vm1, %v760_v56, 0.0  ;;  %v940_v26 = vsel %vm447_vm1, %v763_v8, 0.0  ;;  %v766_v54 = vmul.f32 %v1875_v13, %v1875_v13  ;;  %v770_v8 = vmul.f32 %v1905_v31, %v1905_v31 }
  0x94   : > { %v576_v24 = vadd.f32 %v575_v41, %v574_v11  ;;  %v931_v0 = vadd.f32 %v930_v20, %v929_v57  ;;  %v589_v41 = vsel %vm447_vm1, %v2010_v23, 0.0  ;;  %v597_v1 = vsel %vm447_vm1, %v2040_v35, 0.0 }
  0x95   : > { %v946_v63 = vsel %vm447_vm1, %v766_v54, 0.0 }
  0x96   : > { %v578_v34 = vadd.f32 %v577_v30, %v576_v24  ;;  %v933_v11 = vadd.f32 %v932_v32, %v931_v0  ;;  %v2025_v30 = vunpack.c.h.bf16 %v1459_v27  ;;  %v2032_v24 = vunpack.c.l.bf16 %v1460_v51 }
  0x97   : > { %v767_v27 = vmul.f32 %v1882_v38, %v1882_v38 }
  0x98   : > { %v580_v43 = vadd.f32 %v579_v53, %v578_v34  ;;  %v593_v58 = vsel %vm447_vm1, %v2025_v30, 0.0  ;;  %v935_v25 = vadd.f32 %v934_v14, %v933_v11  ;;  %v1461_v53 = vld [vmem:[%s1546_s21 + $0x130] sm:$0xff]   ;;  %v938_v34 = vsel %vm447_vm1, %v762_v40, 0.0 }
  0x99   : > { %v595_v59 = vsel %vm447_vm1, %v2032_v24, 0.0  ;;  %v2055_v49 = vunpack.c.h.bf16 %v1461_v53  ;;  %v948_v40 = vsel %vm447_vm1, %v767_v27, 0.0  ;;  %v774_v27 = vmul.f32 %v1935_v62, %v1935_v62 }
  0x9a   : > { %v582_v48 = vadd.f32 %v581_v37, %v580_v43  ;;  %v937_v37 = vadd.f32 %v936_v19, %v935_v25  ;;  %v2047_v43 = vunpack.c.l.bf16 %v1461_v53 }
  0x9b   : > { %v601_v13 = vsel %vm447_vm1, %v2055_v49, 0.0 }
  0x9c   : > { %v584_v33 = vadd.f32 %v583_v9, %v582_v48  ;;  %v939_v46 = vadd.f32 %v938_v34, %v937_v37  ;;  %v1462_v9 = vld [vmem:[%s1546_s21 + $0x138] sm:$0xff]   ;;  %v942_v48 = vsel %vm447_vm1, %v764_v47, 0.0  ;;  %v599_v18 = vsel %vm447_vm1, %v2047_v43, 0.0  ;;  %v1465_v37 = vld [vmem:[%s1546_s21 + $0x150] sm:$0xff]  }
  0x9d   : > { %v2062_v56 = vunpack.c.l.bf16 %v1462_v9  ;;  %v2070_v0 = vunpack.c.h.bf16 %v1462_v9 }
  0x9e   : > { %v586_v61 = vadd.f32 %v585_v44, %v584_v33  ;;  %v941_v44 = vadd.f32 %v940_v26, %v939_v46  ;;  %v944_v33 = vsel %vm447_vm1, %v765_v17, 0.0  ;;  %v772_v17 = vmul.f32 %v1920_v45, %v1920_v45 }
  0x9f   : > { %v603_v38 = vsel %vm447_vm1, %v2062_v56, 0.0  ;;  %v954_v26 = vsel %vm447_vm1, %v770_v8, 0.0 }
  0xa0   : > { %v588_v39 = vadd.f32 %v587_v29, %v586_v61  ;;  %v943_v57 = vadd.f32 %v942_v48, %v941_v44  ;;  %v1463_v29 = vld [vmem:[%s1546_s21 + $0x140] sm:$0xff]   ;;  %v768_v61 = vmul.f32 %v1890_v22, %v1890_v22  ;;  %v605_v22 = vsel %vm447_vm1, %v2070_v0, 0.0  ;;  %v1466_v44 = vld [vmem:[%s1546_s21 + $0x158] sm:$0xff]  }
  0xa1   : > { %v2077_v11 = vunpack.c.l.bf16 %v1463_v29  ;;  %v2107_v48 = vunpack.c.l.bf16 %v1465_v37 }
  0xa2   : > { %v590_v5 = vadd.f32 %v589_v41, %v588_v39  ;;  %v945_v41 = vadd.f32 %v944_v33, %v943_v57  ;;  %v769_v39 = vmul.f32 %v1897_v52, %v1897_v52  ;;  %v950_v19 = vsel %vm447_vm1, %v768_v61, 0.0 }
  0xa3   : > { %v607_v52 = vsel %vm447_vm1, %v2077_v11, 0.0  ;;  %v958_v33 = vsel %vm447_vm1, %v772_v17, 0.0 }
  0xa4   : > { %v592_v55 = vadd.f32 %v591_v4, %v590_v5  ;;  %v947_v14 = vadd.f32 %v946_v63, %v945_v41  ;;  %v1464_v4 = vld [vmem:[%s1546_s21 + $0x148] sm:$0xff]   ;;  %v952_v47 = vsel %vm447_vm1, %v769_v39, 0.0  ;;  %v2122_v63 = vunpack.c.l.bf16 %v1466_v44  ;;  %v1467_v41 = vld [vmem:[%s1546_s21 + $0x160] sm:$0xff]  }
  0xa5   : > { %v2092_v34 = vunpack.c.l.bf16 %v1464_v4  ;;  %v776_v39 = vmul.f32 %v1950_v21, %v1950_v21 }
  0xa6   : > { %v594_v60 = vadd.f32 %v593_v58, %v592_v55  ;;  %v2085_v58 = vunpack.c.h.bf16 %v1463_v29  ;;  %v949_v25 = vadd.f32 %v948_v40, %v947_v14  ;;  %v771_v55 = vmul.f32 %v1912_v6, %v1912_v6 }
  0xa7   : > { %v611_v6 = vsel %vm447_vm1, %v2092_v34, 0.0  ;;  %v962_v40 = vsel %vm447_vm1, %v774_v27, 0.0 }
  0xa8   : > { %v596_v10 = vadd.f32 %v595_v59, %v594_v60  ;;  %v609_v31 = vsel %vm447_vm1, %v2085_v58, 0.0  ;;  %v951_v59 = vadd.f32 %v950_v19, %v949_v25  ;;  %v956_v54 = vsel %vm447_vm1, %v771_v55, 0.0  ;;  %v1468_v25 = vld [vmem:[%s1546_s21 + $0x168] sm:$0xff]  }
  0xa9   : > { %v2137_v19 = vunpack.c.l.bf16 %v1467_v41  ;;  %v778_v55 = vmul.f32 %v1965_v42, %v1965_v42 }
  0xaa   : > { %v598_v20 = vadd.f32 %v597_v1, %v596_v10  ;;  %v2100_v1 = vunpack.c.h.bf16 %v1464_v4  ;;  %v953_v46 = vadd.f32 %v952_v47, %v951_v59  ;;  %v773_v10 = vmul.f32 %v1927_v28, %v1927_v28 }
  0xab   : > { %v615_v28 = vsel %vm447_vm1, %v2107_v48, 0.0  ;;  %v966_v47 = vsel %vm447_vm1, %v776_v39, 0.0 }
  0xac   : > { %v600_v32 = vadd.f32 %v599_v18, %v598_v20  ;;  %v613_v45 = vsel %vm447_vm1, %v2100_v1, 0.0  ;;  %v955_v18 = vadd.f32 %v954_v26, %v953_v46  ;;  %v960_v61 = vsel %vm447_vm1, %v773_v10, 0.0  ;;  %v1469_v46 = vld [vmem:[%s1546_s21 + $0x170] sm:$0xff]  }
  0xad   : > { %v2152_v26 = vunpack.c.l.bf16 %v1468_v25  ;;  %v780_v10 = vmul.f32 %v1980_v7, %v1980_v7 }
  0xae   : > { %v602_v51 = vadd.f32 %v601_v13, %v600_v32  ;;  %v2115_v13 = vunpack.c.h.bf16 %v1465_v37  ;;  %v957_v57 = vadd.f32 %v956_v54, %v955_v18  ;;  %v775_v32 = vmul.f32 %v1942_v3, %v1942_v3 }
  0xaf   : > { %v619_v3 = vsel %vm447_vm1, %v2122_v63, 0.0  ;;  %v970_v54 = vsel %vm447_vm1, %v778_v55, 0.0 }
  0xb0   : > { %v604_v5 = vadd.f32 %v603_v38, %v602_v51  ;;  %v617_v62 = vsel %vm447_vm1, %v2115_v13, 0.0  ;;  %v959_v38 = vadd.f32 %v958_v33, %v957_v57  ;;  %v964_v8 = vsel %vm447_vm1, %v775_v32, 0.0  ;;  %v1470_v57 = vld [vmem:[%s1546_s21 + $0x178] sm:$0xff]  }
  0xb1   : > { %v2167_v33 = vunpack.c.l.bf16 %v1469_v46  ;;  %v782_v32 = vmul.f32 %v1995_v16, %v1995_v16 }
  0xb2   : > { %v606_v53 = vadd.f32 %v605_v22, %v604_v5  ;;  %v2130_v22 = vunpack.c.h.bf16 %v1466_v44  ;;  %v961_v14 = vadd.f32 %v960_v61, %v959_v38  ;;  %v777_v5 = vmul.f32 %v1957_v12, %v1957_v12 }
  0xb3   : > { %v623_v12 = vsel %vm447_vm1, %v2137_v19, 0.0  ;;  %v974_v61 = vsel %vm447_vm1, %v780_v10, 0.0 }
  0xb4   : > { %v608_v60 = vadd.f32 %v607_v52, %v606_v53  ;;  %v621_v21 = vsel %vm447_vm1, %v2130_v22, 0.0  ;;  %v963_v52 = vadd.f32 %v962_v40, %v961_v14  ;;  %v968_v17 = vsel %vm447_vm1, %v777_v5, 0.0  ;;  %v1471_v14 = vld [vmem:[%s1546_s21 + $0x180] sm:$0xff]  }
  0xb5   : > { %v2182_v40 = vunpack.c.l.bf16 %v1470_v57  ;;  %v784_v5 = vmul.f32 %v2010_v23, %v2010_v23 }
  0xb6   : > { %v610_v9 = vadd.f32 %v609_v31, %v608_v60  ;;  %v2145_v31 = vunpack.c.h.bf16 %v1467_v41  ;;  %v965_v59 = vadd.f32 %v964_v8, %v963_v52  ;;  %v779_v60 = vmul.f32 %v1972_v15, %v1972_v15 }
  0xb7   : > { %v627_v15 = vsel %vm447_vm1, %v2152_v26, 0.0  ;;  %v978_v8 = vsel %vm447_vm1, %v782_v32, 0.0 }
  0xb8   : > { %v612_v20 = vadd.f32 %v611_v6, %v610_v9  ;;  %v625_v42 = vsel %vm447_vm1, %v2145_v31, 0.0  ;;  %v967_v6 = vadd.f32 %v966_v47, %v965_v59  ;;  %v972_v27 = vsel %vm447_vm1, %v779_v60, 0.0  ;;  %v1472_v59 = vld [vmem:[%s1546_s21 + $0x188] sm:$0xff]  }
  0xb9   : > { %v2197_v47 = vunpack.c.l.bf16 %v1471_v14  ;;  %v786_v60 = vmul.f32 %v2025_v30, %v2025_v30 }
  0xba   : > { %v614_v29 = vadd.f32 %v613_v45, %v612_v20  ;;  %v2160_v45 = vunpack.c.h.bf16 %v1468_v25  ;;  %v969_v18 = vadd.f32 %v968_v17, %v967_v6  ;;  %v781_v20 = vmul.f32 %v1987_v36, %v1987_v36 }
  0xbb   : > { %v631_v36 = vsel %vm447_vm1, %v2167_v33, 0.0  ;;  %v982_v17 = vsel %vm447_vm1, %v784_v5, 0.0 }
  0xbc   : > { %v616_v51 = vadd.f32 %v615_v28, %v614_v29  ;;  %v629_v7 = vsel %vm447_vm1, %v2160_v45, 0.0  ;;  %v971_v28 = vadd.f32 %v970_v54, %v969_v18  ;;  %v976_v39 = vsel %vm447_vm1, %v781_v20, 0.0  ;;  %v1473_v18 = vld [vmem:[%s1546_s21 + $0x190] sm:$0xff]  }
  0xbd   : > { %v2212_v54 = vunpack.c.l.bf16 %v1472_v59  ;;  %v788_v20 = vmul.f32 %v2040_v35, %v2040_v35 }
  0xbe   : > { %v618_v4 = vadd.f32 %v617_v62, %v616_v51  ;;  %v2175_v62 = vunpack.c.h.bf16 %v1469_v46  ;;  %v973_v38 = vadd.f32 %v972_v27, %v971_v28  ;;  %v783_v51 = vmul.f32 %v2002_v50, %v2002_v50 }
  0xbf   : > { %v635_v50 = vsel %vm447_vm1, %v2182_v40, 0.0  ;;  %v986_v27 = vsel %vm447_vm1, %v786_v60, 0.0 }
  0xc0   : > { %v620_v53 = vadd.f32 %v619_v3, %v618_v4  ;;  %v633_v16 = vsel %vm447_vm1, %v2175_v62, 0.0  ;;  %v975_v3 = vadd.f32 %v974_v61, %v973_v38  ;;  %v980_v55 = vsel %vm447_vm1, %v783_v51, 0.0  ;;  %v1474_v38 = vld [vmem:[%s1546_s21 + $0x198] sm:$0xff]  }
  0xc1   : > { %v2227_v61 = vunpack.c.l.bf16 %v1473_v18  ;;  %v790_v51 = vmul.f32 %v2055_v49, %v2055_v49 }
  0xc2   : > { %v622_v37 = vadd.f32 %v621_v21, %v620_v53  ;;  %v2190_v21 = vunpack.c.h.bf16 %v1470_v57  ;;  %v977_v52 = vadd.f32 %v976_v39, %v975_v3  ;;  %v785_v53 = vmul.f32 %v2017_v2, %v2017_v2 }
  0xc3   : > { %v639_v2 = vsel %vm447_vm1, %v2197_v47, 0.0  ;;  %v990_v39 = vsel %vm447_vm1, %v788_v20, 0.0 }
  0xc4   : > { %v624_v9 = vadd.f32 %v623_v12, %v622_v37  ;;  %v637_v23 = vsel %vm447_vm1, %v2190_v21, 0.0  ;;  %v979_v12 = vadd.f32 %v978_v8, %v977_v52  ;;  %v984_v10 = vsel %vm447_vm1, %v785_v53, 0.0  ;;  %v1475_v52 = vld [vmem:[%s1546_s21 + $0x1a0] sm:$0xff]  }
  0xc5   : > { %v2242_v8 = vunpack.c.l.bf16 %v1474_v38  ;;  %v792_v53 = vmul.f32 %v2070_v0, %v2070_v0 }
  0xc6   : > { %v626_v44 = vadd.f32 %v625_v42, %v624_v9  ;;  %v2205_v42 = vunpack.c.h.bf16 %v1471_v14  ;;  %v981_v6 = vadd.f32 %v980_v55, %v979_v12  ;;  %v787_v9 = vmul.f32 %v2032_v24, %v2032_v24 }
  0xc7   : > { %v643_v24 = vsel %vm447_vm1, %v2212_v54, 0.0  ;;  %v994_v55 = vsel %vm447_vm1, %v790_v51, 0.0 }
  0xc8   : > { %v628_v29 = vadd.f32 %v627_v15, %v626_v44  ;;  %v641_v30 = vsel %vm447_vm1, %v2205_v42, 0.0  ;;  %v983_v15 = vadd.f32 %v982_v17, %v981_v6  ;;  %v988_v32 = vsel %vm447_vm1, %v787_v9, 0.0  ;;  %v1476_v6 = vld [vmem:[%s1546_s21 + $0x1a8] sm:$0xff]  }
  0xc9   : > { %v2257_v17 = vunpack.c.l.bf16 %v1475_v52  ;;  %v794_v9 = vmul.f32 %v2085_v58, %v2085_v58 }
  0xca   : > { %v630_v41 = vadd.f32 %v629_v7, %v628_v29  ;;  %v2220_v7 = vunpack.c.h.bf16 %v1472_v59  ;;  %v985_v28 = vadd.f32 %v984_v10, %v983_v15  ;;  %v789_v29 = vmul.f32 %v2047_v43, %v2047_v43 }
  0xcb   : > { %v647_v43 = vsel %vm447_vm1, %v2227_v61, 0.0  ;;  %v998_v10 = vsel %vm447_vm1, %v792_v53, 0.0 }
  0xcc   : > { %v632_v4 = vadd.f32 %v631_v36, %v630_v41  ;;  %v645_v35 = vsel %vm447_vm1, %v2220_v7, 0.0  ;;  %v987_v36 = vadd.f32 %v986_v27, %v985_v28  ;;  %v992_v5 = vsel %vm447_vm1, %v789_v29, 0.0  ;;  %v1477_v28 = vld [vmem:[%s1546_s21 + $0x1b0] sm:$0xff]  }
  0xcd   : > { %v2272_v27 = vunpack.c.l.bf16 %v1476_v6  ;;  %v796_v29 = vmul.f32 %v2100_v1, %v2100_v1 }
  0xce   : > { %v634_v25 = vadd.f32 %v633_v16, %v632_v4  ;;  %v2235_v16 = vunpack.c.h.bf16 %v1473_v18  ;;  %v989_v3 = vadd.f32 %v988_v32, %v987_v36  ;;  %v791_v4 = vmul.f32 %v2062_v56, %v2062_v56 }
  0xcf   : > { %v651_v56 = vsel %vm447_vm1, %v2242_v8, 0.0  ;;  %v1002_v32 = vsel %vm447_vm1, %v794_v9, 0.0 }
  0xd0   : > { %v636_v37 = vadd.f32 %v635_v50, %v634_v25  ;;  %v649_v49 = vsel %vm447_vm1, %v2235_v16, 0.0  ;;  %v991_v50 = vadd.f32 %v990_v39, %v989_v3  ;;  %v996_v60 = vsel %vm447_vm1, %v791_v4, 0.0  ;;  %v1478_v3 = vld [vmem:[%s1546_s21 + $0x1b8] sm:$0xff]  }
  0xd1   : > { %v2287_v39 = vunpack.c.l.bf16 %v1477_v28  ;;  %v798_v4 = vmul.f32 %v2115_v13, %v2115_v13 }
  0xd2   : > { %v638_v46 = vadd.f32 %v637_v23, %v636_v37  ;;  %v2250_v23 = vunpack.c.h.bf16 %v1474_v38  ;;  %v993_v12 = vadd.f32 %v992_v5, %v991_v50  ;;  %v793_v37 = vmul.f32 %v2077_v11, %v2077_v11 }
  0xd3   : > { %v655_v11 = vsel %vm447_vm1, %v2257_v17, 0.0  ;;  %v1006_v5 = vsel %vm447_vm1, %v796_v29, 0.0 }
  0xd4   : > { %v640_v44 = vadd.f32 %v639_v2, %v638_v46  ;;  %v653_v0 = vsel %vm447_vm1, %v2250_v23, 0.0  ;;  %v995_v2 = vadd.f32 %v994_v55, %v993_v12  ;;  %v1000_v20 = vsel %vm447_vm1, %v793_v37, 0.0  ;;  %v1479_v12 = vld [vmem:[%s1546_s21 + $0x1c0] sm:$0xff]  }
  0xd5   : > { %v2302_v55 = vunpack.c.l.bf16 %v1478_v3  ;;  %v800_v37 = vmul.f32 %v2130_v22, %v2130_v22 }
  0xd6   : > { %v642_v57 = vadd.f32 %v641_v30, %v640_v44  ;;  %v2265_v30 = vunpack.c.h.bf16 %v1475_v52  ;;  %v997_v15 = vadd.f32 %v996_v60, %v995_v2  ;;  %v795_v44 = vmul.f32 %v2092_v34, %v2092_v34 }
  0xd7   : > { %v659_v34 = vsel %vm447_vm1, %v2272_v27, 0.0  ;;  %v1010_v60 = vsel %vm447_vm1, %v798_v4, 0.0 }
  0xd8   : > { %v644_v41 = vadd.f32 %v643_v24, %v642_v57  ;;  %v657_v58 = vsel %vm447_vm1, %v2265_v30, 0.0  ;;  %v999_v24 = vadd.f32 %v998_v10, %v997_v15  ;;  %v1004_v51 = vsel %vm447_vm1, %v795_v44, 0.0  ;;  %v1480_v15 = vld [vmem:[%s1546_s21 + $0x1c8] sm:$0xff]  }
  0xd9   : > { %v2317_v10 = vunpack.c.l.bf16 %v1479_v12  ;;  %v802_v44 = vmul.f32 %v2145_v31, %v2145_v31 }
  0xda   : > { %v646_v14 = vadd.f32 %v645_v35, %v644_v41  ;;  %v2280_v35 = vunpack.c.h.bf16 %v1476_v6  ;;  %v1001_v36 = vadd.f32 %v1000_v20, %v999_v24  ;;  %v797_v41 = vmul.f32 %v2107_v48, %v2107_v48 }
  0xdb   : > { %v663_v48 = vsel %vm447_vm1, %v2287_v39, 0.0  ;;  %v1014_v20 = vsel %vm447_vm1, %v800_v37, 0.0 }
  0xdc   : > { %v648_v25 = vadd.f32 %v647_v43, %v646_v14  ;;  %v661_v1 = vsel %vm447_vm1, %v2280_v35, 0.0  ;;  %v1003_v43 = vadd.f32 %v1002_v32, %v1001_v36  ;;  %v1008_v53 = vsel %vm447_vm1, %v797_v41, 0.0  ;;  %v1481_v36 = vld [vmem:[%s1546_s21 + $0x1d0] sm:$0xff]  }
  0xdd   : > { %v2332_v32 = vunpack.c.l.bf16 %v1480_v15  ;;  %v804_v41 = vmul.f32 %v2160_v45, %v2160_v45 }
  0xde   : > { %v650_v59 = vadd.f32 %v649_v49, %v648_v25  ;;  %v2295_v49 = vunpack.c.h.bf16 %v1477_v28  ;;  %v1005_v50 = vadd.f32 %v1004_v51, %v1003_v43  ;;  %v799_v25 = vmul.f32 %v2122_v63, %v2122_v63 }
  0xdf   : > { %v667_v63 = vsel %vm447_vm1, %v2302_v55, 0.0  ;;  %v1018_v51 = vsel %vm447_vm1, %v802_v44, 0.0 }
  0xe0   : > { %v652_v46 = vadd.f32 %v651_v56, %v650_v59  ;;  %v665_v13 = vsel %vm447_vm1, %v2295_v49, 0.0  ;;  %v1007_v56 = vadd.f32 %v1006_v5, %v1005_v50  ;;  %v1012_v9 = vsel %vm447_vm1, %v799_v25, 0.0  ;;  %v1482_v50 = vld [vmem:[%s1546_s21 + $0x1d8] sm:$0xff]  }
  0xe1   : > { %v2347_v5 = vunpack.c.l.bf16 %v1481_v36  ;;  %v806_v25 = vmul.f32 %v2175_v62, %v2175_v62 }
  0xe2   : > { %v654_v18 = vadd.f32 %v653_v0, %v652_v46  ;;  %v2310_v0 = vunpack.c.h.bf16 %v1478_v3  ;;  %v1009_v2 = vadd.f32 %v1008_v53, %v1007_v56  ;;  %v801_v46 = vmul.f32 %v2137_v19, %v2137_v19 }
  0xe3   : > { %v671_v19 = vsel %vm447_vm1, %v2317_v10, 0.0  ;;  %v1022_v53 = vsel %vm447_vm1, %v804_v41, 0.0 }
  0xe4   : > { %v656_v57 = vadd.f32 %v655_v11, %v654_v18  ;;  %v669_v22 = vsel %vm447_vm1, %v2310_v0, 0.0  ;;  %v1011_v11 = vadd.f32 %v1010_v60, %v1009_v2  ;;  %v1016_v29 = vsel %vm447_vm1, %v801_v46, 0.0  ;;  %v1483_v2 = vld [vmem:[%s1546_s21 + $0x1e0] sm:$0xff]  }
  0xe5   : > { %v2362_v60 = vunpack.c.l.bf16 %v1482_v50  ;;  %v808_v46 = vmul.f32 %v2190_v21, %v2190_v21 }
  0xe6   : > { %v658_v38 = vadd.f32 %v657_v58, %v656_v57  ;;  %v2325_v58 = vunpack.c.h.bf16 %v1479_v12  ;;  %v1013_v24 = vadd.f32 %v1012_v9, %v1011_v11  ;;  %v803_v57 = vmul.f32 %v2152_v26, %v2152_v26 }
  0xe7   : > { %v675_v26 = vsel %vm447_vm1, %v2332_v32, 0.0  ;;  %v1026_v9 = vsel %vm447_vm1, %v806_v25, 0.0 }
  0xe8   : > { %v660_v14 = vadd.f32 %v659_v34, %v658_v38  ;;  %v673_v31 = vsel %vm447_vm1, %v2325_v58, 0.0  ;;  %v1015_v34 = vadd.f32 %v1014_v20, %v1013_v24  ;;  %v1020_v4 = vsel %vm447_vm1, %v803_v57, 0.0  ;;  %v1484_v24 = vld [vmem:[%s1546_s21 + $0x1e8] sm:$0xff]  }
  0xe9   : > { %v2377_v20 = vunpack.c.l.bf16 %v1483_v2  ;;  %v810_v57 = vmul.f32 %v2205_v42, %v2205_v42 }
  0xea   : > { %v662_v52 = vadd.f32 %v661_v1, %v660_v14  ;;  %v2340_v1 = vunpack.c.h.bf16 %v1480_v15  ;;  %v1017_v43 = vadd.f32 %v1016_v29, %v1015_v34  ;;  %v805_v14 = vmul.f32 %v2167_v33, %v2167_v33 }
  0xeb   : > { %v679_v33 = vsel %vm447_vm1, %v2347_v5, 0.0  ;;  %v1030_v29 = vsel %vm447_vm1, %v808_v46, 0.0 }
  0xec   : > { %v664_v59 = vadd.f32 %v663_v48, %v662_v52  ;;  %v677_v45 = vsel %vm447_vm1, %v2340_v1, 0.0  ;;  %v1019_v48 = vadd.f32 %v1018_v51, %v1017_v43  ;;  %v1024_v37 = vsel %vm447_vm1, %v805_v14, 0.0  ;;  %v1485_v43 = vld [vmem:[%s1546_s21 + $0x1f0] sm:$0xff]  }
  0xed   : > { %v2392_v51 = vunpack.c.l.bf16 %v1484_v24  ;;  %v812_v14 = vmul.f32 %v2220_v7, %v2220_v7 }
  0xee   : > { %v666_v6 = vadd.f32 %v665_v13, %v664_v59  ;;  %v2355_v13 = vunpack.c.h.bf16 %v1481_v36  ;;  %v1021_v56 = vadd.f32 %v1020_v4, %v1019_v48  ;;  %v807_v59 = vmul.f32 %v2182_v40, %v2182_v40 }
  0xef   : > { %v683_v40 = vsel %vm447_vm1, %v2362_v60, 0.0  ;;  %v1034_v4 = vsel %vm447_vm1, %v810_v57, 0.0 }
  0xf0   : > { %v668_v18 = vadd.f32 %v667_v63, %v666_v6  ;;  %v681_v62 = vsel %vm447_vm1, %v2355_v13, 0.0  ;;  %v1023_v63 = vadd.f32 %v1022_v53, %v1021_v56  ;;  %v1028_v44 = vsel %vm447_vm1, %v807_v59, 0.0  ;;  %v1486_v56 = vld [vmem:[%s1546_s21 + $0x1f8] sm:$0xff]  }
  0xf1   : > { %v2407_v53 = vunpack.c.l.bf16 %v1485_v43  ;;  %v814_v59 = vmul.f32 %v2235_v16, %v2235_v16 }
  0xf2   : > { %v670_v28 = vadd.f32 %v669_v22, %v668_v18  ;;  %v2370_v22 = vunpack.c.h.bf16 %v1482_v50  ;;  %v1025_v11 = vadd.f32 %v1024_v37, %v1023_v63  ;;  %v809_v18 = vmul.f32 %v2197_v47, %v2197_v47 }
  0xf3   : > { %v687_v47 = vsel %vm447_vm1, %v2377_v20, 0.0  ;;  %v1038_v37 = vsel %vm447_vm1, %v812_v14, 0.0 }
  0xf4   : > { %v672_v38 = vadd.f32 %v671_v19, %v670_v28  ;;  %v685_v21 = vsel %vm447_vm1, %v2370_v22, 0.0  ;;  %v1027_v19 = vadd.f32 %v1026_v9, %v1025_v11  ;;  %v1032_v41 = vsel %vm447_vm1, %v809_v18, 0.0 }
  0xf5   : > { %v2422_v9 = vunpack.c.l.bf16 %v1486_v56  ;;  %v1042_v18 = vsel %vm447_vm1, %v814_v59, 0.0 }
  0xf6   : > { %v674_v3 = vadd.f32 %v673_v31, %v672_v38  ;;  %v2385_v31 = vunpack.c.h.bf16 %v1483_v2  ;;  %v1029_v34 = vadd.f32 %v1028_v44, %v1027_v19  ;;  %v811_v38 = vmul.f32 %v2212_v54, %v2212_v54 }
  0xf7   : > { %v691_v54 = vsel %vm447_vm1, %v2392_v51, 0.0  ;;  %v2429_v44 = vunpack.c.h.bf16 %v1486_v56 }
  0xf8   : > { %v676_v52 = vadd.f32 %v675_v26, %v674_v3  ;;  %v689_v42 = vsel %vm447_vm1, %v2385_v31, 0.0  ;;  %v1031_v26 = vadd.f32 %v1030_v29, %v1029_v34  ;;  %v1036_v25 = vsel %vm447_vm1, %v811_v38, 0.0 }
  0xf9   : > { %v701_v57 = vsel %vm447_vm1, %v2429_v44, 0.0 }
  0xfa   : > { %v678_v12 = vadd.f32 %v677_v45, %v676_v52  ;;  %v2400_v45 = vunpack.c.h.bf16 %v1484_v24  ;;  %v1033_v48 = vadd.f32 %v1032_v41, %v1031_v26  ;;  %v813_v52 = vmul.f32 %v2227_v61, %v2227_v61 }
  0xfb   : > { %v695_v61 = vsel %vm447_vm1, %v2407_v53, 0.0  ;;  %v817_v24 = vmul.f32 %v2257_v17, %v2257_v17  ;;  %v819_v41 = vmul.f32 %v2272_v27, %v2272_v27  ;;  %v822_v27 = vmul.f32 %v2295_v49, %v2295_v49 }
  0xfc   : > { %v680_v6 = vadd.f32 %v679_v33, %v678_v12  ;;  %v693_v33 = vsel %vm447_vm1, %v2400_v45, 0.0  ;;  %v1035_v7 = vadd.f32 %v1034_v4, %v1033_v48  ;;  %v1040_v46 = vsel %vm447_vm1, %v813_v52, 0.0 }
  0xfd   : > { %v1058_v59 = vsel %vm447_vm1, %v822_v27, 0.0  ;;  %v825_v49 = vmul.f32 %v2317_v10, %v2317_v10  ;;  %v828_v10 = vmul.f32 %v2340_v1, %v2340_v1 }
  0xfe   : > { %v682_v15 = vadd.f32 %v681_v62, %v680_v6  ;;  %v2415_v62 = vunpack.c.h.bf16 %v1485_v43  ;;  %v1037_v63 = vadd.f32 %v1036_v25, %v1035_v7  ;;  %v815_v6 = vmul.f32 %v2242_v8, %v2242_v8 }
  0xff   : > { %v820_v43 = vmul.f32 %v2280_v35, %v2280_v35  ;;  %v823_v35 = vmul.f32 %v2302_v55, %v2302_v55 }
 0x100   : > { %v684_v28 = vadd.f32 %v683_v40, %v682_v15  ;;  %v697_v40 = vsel %vm447_vm1, %v2415_v62, 0.0  ;;  %v1039_v16 = vadd.f32 %v1038_v37, %v1037_v63  ;;  %v816_v15 = vmul.f32 %v2250_v23, %v2250_v23  ;;  %v446_v37 = vld [vmem:[#allocation2] sm:$0x1] }
 0x101   : > { %v818_v23 = vmul.f32 %v2265_v30, %v2265_v30  ;;  %v821_v30 = vmul.f32 %v2287_v39, %v2287_v39  ;;  %v1054_v52 = vsel %vm447_vm1, %v820_v43, 0.0  ;;  %v824_v39 = vmul.f32 %v2310_v0, %v2310_v0 }
 0x102   : > { %v686_v36 = vadd.f32 %v685_v21, %v684_v28  ;;  %v699_v21 = vsel %vm447_vm1, %v2422_v9, 0.0  ;;  %v1041_v8 = vadd.f32 %v1040_v46, %v1039_v16  ;;  %v1044_v28 = vsel %vm447_vm1, %v815_v6, 0.0 }
 0x103   : > { %v1046_v34 = vsel %vm447_vm1, %v816_v15, 0.0  ;;  %v1056_v7 = vsel %vm447_vm1, %v821_v30, 0.0  ;;  %v826_v46 = vmul.f32 %v2325_v58, %v2325_v58  ;;  %v827_v0 = vmul.f32 %v2332_v32, %v2332_v32 }
 0x104   : > { %v688_v3 = vadd.f32 %v687_v47, %v686_v36  ;;  %v1043_v29 = vadd.f32 %v1042_v18, %v1041_v8  ;;  %v829_v58 = vmul.f32 %v2347_v5, %v2347_v5  ;;  %v1070_v32 = vsel %vm447_vm1, %v828_v10, 0.0 }
 0x105   : > { %v1066_v18 = vsel %vm447_vm1, %v826_v46, 0.0  ;;  %v1068_v8 = vsel %vm447_vm1, %v827_v0, 0.0 }
 0x106   : > { %v690_v50 = vadd.f32 %v689_v42, %v688_v3  ;;  %v1045_v36 = vadd.f32 %v1044_v28, %v1043_v29  ;;  %v1048_v42 = vsel %vm447_vm1, %v817_v24, 0.0  ;;  %v1050_v3 = vsel %vm447_vm1, %v818_v23, 0.0 }
 0x107   : > { %v830_v24 = vmul.f32 %v2355_v13, %v2355_v13  ;;  %v1072_v1 = vsel %vm447_vm1, %v829_v58, 0.0 }
 0x108   : > { %v692_v12 = vadd.f32 %v691_v54, %v690_v50  ;;  %v1047_v17 = vadd.f32 %v1046_v34, %v1045_v36  ;;  %v1052_v54 = vsel %vm447_vm1, %v819_v41, 0.0  ;;  %v833_v34 = vmul.f32 %v2377_v20, %v2377_v20 }
 0x109   : > { %v1074_v5 = vsel %vm447_vm1, %v830_v24, 0.0 }
 0x10a   : > { %v694_v2 = vadd.f32 %v693_v33, %v692_v12  ;;  %v1049_v14 = vadd.f32 %v1048_v42, %v1047_v17  ;;  %v835_v42 = vmul.f32 %v2392_v51, %v2392_v51 }
 0x10c   : > { %v696_v11 = vadd.f32 %v695_v61, %v694_v2  ;;  %v1051_v48 = vadd.f32 %v1050_v3, %v1049_v14  ;;  %v1060_v2 = vsel %vm447_vm1, %v823_v35, 0.0  ;;  %v837_v3 = vmul.f32 %v2407_v53, %v2407_v53 }
 0x10e   : > { %v698_v19 = vadd.f32 %v697_v40, %v696_v11  ;;  %v1053_v25 = vadd.f32 %v1052_v54, %v1051_v48  ;;  %v1062_v40 = vsel %vm447_vm1, %v824_v39, 0.0  ;;  %v1064_v11 = vsel %vm447_vm1, %v825_v49, 0.0 }
 0x10f   : > { %v839_v54 = vmul.f32 %v2422_v9, %v2422_v9 }
 0x110   : > { %v700_v47 = vadd.f32 %v699_v21, %v698_v19  ;;  %v1055_v56 = vadd.f32 %v1054_v52, %v1053_v25 }
 0x111   : > { %v1092_v52 = vsel %vm447_vm1, %v839_v54, 0.0 }
 0x112   : > { %v702_v38 = vadd.f32 %v701_v57, %v700_v47  ;;  %v1057_v61 = vadd.f32 %v1056_v7, %v1055_v56  ;;  %v831_v57 = vmul.f32 %v2362_v60, %v2362_v60  ;;  %v832_v47 = vmul.f32 %v2370_v22, %v2370_v22 }
 0x113   : > { %v1080_v22 = vsel %vm447_vm1, %v833_v34, 0.0 }
 0x114   : > { %v703_v26 = vrot.slane %v702_v38, 4  ;;  %v1059_v6 = vadd.f32 %v1058_v59, %v1057_v61  ;;  %v1076_v13 = vsel %vm447_vm1, %v831_v57, 0.0  ;;  %v1078_v60 = vsel %vm447_vm1, %v832_v47, 0.0  ;;  %v712_v59 = vld [vmem:[#allocation3] sm:$0x1] }
 0x116   : > { %v704_v4 = vadd.f32 %v703_v26, %v702_v38  ;;  %v1061_v16 = vadd.f32 %v1060_v2, %v1059_v6  ;;  %v834_v38 = vmul.f32 %v2385_v31, %v2385_v31  ;;  %v836_v26 = vmul.f32 %v2400_v45, %v2400_v45 }
 0x117   : > { %v1084_v31 = vsel %vm447_vm1, %v835_v42, 0.0  ;;  %v1088_v45 = vsel %vm447_vm1, %v837_v3, 0.0 }
 0x118   : > { %v705_v50 = vrot.slane %v704_v4, 2  ;;  %v1063_v15 = vadd.f32 %v1062_v40, %v1061_v16  ;;  %v1082_v20 = vsel %vm447_vm1, %v834_v38, 0.0  ;;  %v1086_v51 = vsel %vm447_vm1, %v836_v26, 0.0 }
 0x11a   : > { %v706_v33 = vadd.f32 %v705_v50, %v704_v4  ;;  %v1065_v21 = vadd.f32 %v1064_v11, %v1063_v15  ;;  %v838_v4 = vmul.f32 %v2415_v62, %v2415_v62  ;;  %v840_v50 = vmul.f32 %v2429_v44, %v2429_v44 }
 0x11c   : > { %v707_v12 = vrot.slane %v706_v33, 1  ;;  %v1067_v19 = vadd.f32 %v1066_v18, %v1065_v21  ;;  %v1090_v53 = vsel %vm447_vm1, %v838_v4, 0.0  ;;  %v1094_v62 = vsel %vm447_vm1, %v840_v50, 0.0 }
 0x11e   : > { %v708_v63 = vadd.f32 %v707_v12, %v706_v33  ;;  %v1069_v28 = vadd.f32 %v1068_v8, %v1067_v19 }
 0x120   : > { %v709_v55 = vadd.f32 %v708_v63, %v446_v37  ;;  %v1071_v29 = vadd.f32 %v1070_v32, %v1069_v28 }
 0x122   : > { %711 = vst.msk [vmem:[#allocation2] sm:$0x1] %vm710_vm2, %v709_v55  ;;  %v1073_v23 = vadd.f32 %v1072_v1, %v1071_v29 }
 0x124   : > { %v1075_v36 = vadd.f32 %v1074_v5, %v1073_v23 }
 0x126   : > { %v1077_v41 = vadd.f32 %v1076_v13, %v1075_v36 }
 0x128   : > { %v1079_v17 = vadd.f32 %v1078_v60, %v1077_v41 }
 0x12a   : > { %v1081_v43 = vadd.f32 %v1080_v22, %v1079_v17 }
 0x12c   : > { %v1083_v14 = vadd.f32 %v1082_v20, %v1081_v43 }
 0x12e   : > { %v1085_v30 = vadd.f32 %v1084_v31, %v1083_v14 }
 0x130   : > { %v1087_v48 = vadd.f32 %v1086_v51, %v1085_v30 }
 0x132   : > { %v1089_v27 = vadd.f32 %v1088_v45, %v1087_v48 }
 0x134   : > { %v1091_v25 = vadd.f32 %v1090_v53, %v1089_v27 }
 0x136   : > { %v1093_v33 = vadd.f32 %v1092_v52, %v1091_v25 }
 0x138   : > { %v1095_v35 = vadd.f32 %v1094_v62, %v1093_v33 }
 0x13a   : > { %v1096_v7 = vrot.slane %v1095_v35, 4 }
 0x13c   : > { %v1097_v56 = vadd.f32 %v1096_v7, %v1095_v35 }
 0x13e   : > { %v1098_v12 = vrot.slane %v1097_v56, 2 }
 0x140   : > { %v1099_v9 = vadd.f32 %v1098_v12, %v1097_v56 }
 0x142   : > { %v1100_v39 = vrot.slane %v1099_v9, 1 }
 0x144   : > { %v1101_v37 = vadd.f32 %v1100_v39, %v1099_v9  ;;  %1107 = sbr.rel (%p1165_p5) target bundleno = 365 (0x16d), region = 40 }
 0x146   : > { %v1102_v61 = vadd.f32 %v1101_v37, %v712_v59 }
 0x148   : > { %1103 = vst.msk [vmem:[#allocation3] sm:$0x1] %vm710_vm2, %v1102_v61 }
 0x149   : > { %v1108_v44 = vld [vmem:[#allocation2] sm:$0x1] }
 0x14a   : > { %v1109_v49 = vmul.f32 0.00048828125, %v1108_v44  ;;  %v1115_v16 = vld [vmem:[%s2530_s1] sm:$0x1] }
 0x14b   : > { %v1120_v15 = vld [vmem:[%s2531_s2] sm:$0x1] }
 0x14c   : > { %v1112_v6 = vmul.f32 %v1109_v49, %v1109_v49 }
 0x14f   : > { %v1110_v63 = vld [vmem:[#allocation3] sm:$0x1] }
 0x150   : > { %v1111_v2 = vmul.f32 0.00048828125, %v1110_v63 }
 0x152   : > { %v1113_v55 = vsub.f32 %v1111_v2, %v1112_v6 }
 0x154   : > { %v1114_v46 = vmax.f32 %v1113_v55, 0.0 }
 0x156   : > { %v1116_v40 = vadd.f32 1e-05, %v1114_v46 }
 0x158   : > { %1496 = vrsqrt.f32 %v1116_v40 }
 0x165   : > { %v1497_v0 = vpop.eup %1496 }
 0x166   : > { %v1118_v11 = vmul.f32 %v1497_v0, %v1115_v16 }
 0x168   : > { %1119 = vst.msk [vmem:[%s2532_s3] sm:$0x1] %vm710_vm2, %v1118_v11  ;;  %v1121_v10 = vmul.f32 %v1118_v11, %v1109_v49 }
 0x16a   : > { %v1122_v18 = vsub.f32 %v1120_v15, %v1121_v10 }
 0x16c   : > { %1123 = vst.msk [vmem:[%s2533_s4] sm:$0x1] %vm710_vm2, %v1122_v18 }
 0x16d PF: > { %s15_s15 = sadd.s32 1, %s1504_s15  }
 0x16e   : > { %p12_p6 = scmp.ge.s32.totalorder %s15_s15, 4  }
 0x170   :  { %14 = sbr.rel (!%p12_p6) target bundleno = 1 (0x1), region = 74 }

// kernel: acgan_generator_forward.18
= control target key start
LH: loop header
LB: loop body
LE: loop exit
PB: predicated region body
PF: predicated region fallthrough
CT: control target
= control target key end

     0   :  { %s1580_s15 = smov 0   ;;  %s1582_s16 = smov 0   ;;  %s1963_s0 = inlined_call_operand.vmem [shape: f32[1,64], index: 0, kind: input, shape index: {}]   ;;  %s1964_s1 = inlined_call_operand.vmem [shape: f32[1,64], index: 1, kind: input, shape index: {}]   ;;  %s1965_s2 = inlined_call_operand.vmem [shape: bf16[2048,64], index: 2, kind: input, shape index: {}]   ;;  %s1966_s3 = inlined_call_operand.vmem [shape: bf16[64,48], index: 3, kind: input, shape index: {}]   ;;  %s1967_s4 = inlined_call_operand.vmem [shape: f32[2048,48], index: 4, kind: output, shape index: {}]  }
   0x1   :  { %s1584_s17 = smov 0  }
   0x2 LB: > { %s26_s18 = sadd.s32 1, %s1549_s16  ;;  %p1183_p0 = scmp.ge.s32.totalorder %s1553_s17, 1  ;;  %s1553_s17 = sphi %s1584_s17, %s14_s17   ;;  %s1549_s16 = sphi %s1582_s16, %s1969_s16   ;;  %s1545_s15 = sphi %s1580_s15, %s1968_s15  }
   0x3   : > { %p28_p1 = scmp.ge.s32.totalorder %s26_s18, 4  ;;  %p186_p2 = scmp.lt.s32.totalorder %s1553_s17, 5 }
   0x5   : > { %s1971_s18 = smov (%p28_p1, %s26_s18), 0  ;;  %p187_p3 = pnand %p1183_p0, %p186_p2 }
   0x6   : > { %s1184_s21 = sshll.u32 (!%p187_p3), %s1545_s15, 6 }
   0x7   : > { %190 = sbr.rel (%p187_p3) target bundleno = 293 (0x125), region = 36  ;;  %p220_p4 = scmp.lt.s32.totalorder (!%p187_p3), %s1184_s21, 255 }
   0xc   : > { %v1527_v0 = vld [vmem:[%s1966_s3 + $0x18] sm:$0xff]   ;;  %v1528_v1 = vld [vmem:[%s1966_s3 + $0x10] sm:$0xff]   ;;  %s1973_s21 = smov (!%p220_p4, %s1184_s21), 255  ;;  %v1529_v2 = vld [vmem:[%s1966_s3 + $0x8] sm:$0xff]   ;;  %vm637_vm0 = vcmask 523264   ;;  %vm1023_vm1 = vcmask 392192  }
   0xd   : > { %1423 = vmatprep.subr.bf16.mxu0 %v1527_v0  ;;  %1495 = vmatprep.subr.bf16.mxu1 %v1527_v0  ;;  %s1185_s26 = sshll.u32 %s1973_s21, 2  ;;  %v1618_v3 = vld [vmem:[%s1963_s0] ss:$0 sm:$0xff]  ;;  %s1187_s10 = sshll.u32 %s1973_s21, 3 }
   0xe   : > { %1424 = vmatpush3.bf16.msra.mxu0 %v1527_v0  ;;  %1499 = vmatpush3.bf16.msra.mxu1 %v1527_v0  ;;  %s1613_s29 = scalar_lea.vmem %s1965_s2, %s1185_s26  ;;  %v1530_v7 = vld [vmem:[%s1966_s3] sm:$0xff]   ;;  %s1824_s13 = scalar_lea.vmem %s1967_s4, %s1187_s10 }
   0xf   : > { %1425 = vmatprep.subr.bf16.mxu0 %v1528_v1  ;;  %1496 = vmatprep.subr.bf16.mxu1 %v1528_v1  ;;  %v1229_v4 = vld [vmem:[%s1613_s29] sm:$0xff]   ;;  %v1356_v6 = vld [vmem:[%s1613_s29 + $0x8] sm:$0xff]   ;;  %v1357_v13 = vld [vmem:[%s1613_s29 + $0x10] sm:$0xff]  }
  0x10   : > { %v1371_v5 = vld [vmem:[%s1613_s29 + $0x80] sm:$0xff]   ;;  %v1230_v8 = vunpack.c.l.bf16 %v1229_v4  ;;  %v1231_v9 = vunpack.c.h.bf16 %v1229_v4  ;;  %v1372_v12 = vld [vmem:[%s1613_s29 + $0x88] sm:$0xff]   ;;  %v1234_v15 = vunpack.c.l.bf16 %v1356_v6  ;;  %v1235_v16 = vunpack.c.h.bf16 %v1356_v6  ;;  %v1373_v39 = vld [vmem:[%s1613_s29 + $0x90] sm:$0xff]  }
  0x11   : > { %v1294_v10 = vunpack.c.l.bf16 %v1371_v5  ;;  %v1295_v11 = vunpack.c.h.bf16 %v1371_v5  ;;  %v1631_v14 = vld [vmem:[%s1964_s1] ss:$0 sm:$0xff]  ;;  %v1298_v17 = vunpack.c.l.bf16 %v1372_v12  ;;  %v1299_v18 = vunpack.c.h.bf16 %v1372_v12  ;;  %v1358_v44 = vld [vmem:[%s1613_s29 + $0x18] sm:$0xff]  }
  0x12   : > { %1426 = vmatpush3.bf16.msra.mxu0 %v1528_v1  ;;  %1500 = vmatpush3.bf16.msra.mxu1 %v1528_v1  ;;  %v374_v19 = vmul.f32 %v1230_v8, %v1618_v3  ;;  %v375_v20 = vmul.f32 %v1231_v9, %v1618_v3  ;;  %v376_v23 = vmul.f32 %v1234_v15, %v1618_v3  ;;  %v1238_v26 = vunpack.c.l.bf16 %v1357_v13  ;;  %v1374_v49 = vld [vmem:[%s1613_s29 + $0x98] sm:$0xff]   ;;  %v1359_v62 = vld [vmem:[%s1613_s29 + $0x20] sm:$0xff]  }
  0x13   : > { %1427 = vmatprep.subr.bf16.mxu0 %v1529_v2  ;;  %1497 = vmatprep.subr.bf16.mxu1 %v1529_v2  ;;  %v406_v21 = vmul.f32 %v1294_v10, %v1618_v3  ;;  %v407_v22 = vmul.f32 %v1295_v11, %v1618_v3  ;;  %v377_v24 = vmul.f32 %v1235_v16, %v1618_v3  ;;  %v1239_v30 = vunpack.c.h.bf16 %v1357_v13  ;;  %v1375_v12 = vld [vmem:[%s1613_s29 + $0xa0] sm:$0xff]  }
  0x14   : > { %v408_v25 = vmul.f32 %v1298_v17, %v1618_v3  ;;  %v445_v27 = vadd.f32 %v1631_v14, %v374_v19  ;;  %v446_v28 = vadd.f32 %v1631_v14, %v375_v20  ;;  %v447_v32 = vadd.f32 %v1631_v14, %v376_v23 }
  0x15   : > { %v477_v29 = vadd.f32 %v1631_v14, %v406_v21  ;;  %v478_v31 = vadd.f32 %v1631_v14, %v407_v22  ;;  %v448_v33 = vadd.f32 %v1631_v14, %v377_v24  ;;  %v409_v34 = vmul.f32 %v1299_v18, %v1618_v3  ;;  %v1360_v22 = vld [vmem:[%s1613_s29 + $0x28] sm:$0xff]  }
  0x16   : > { %1428 = vmatpush3.bf16.msra.mxu0 %v1529_v2  ;;  %1501 = vmatpush3.bf16.msra.mxu1 %v1529_v2  ;;  %v509_v35 = vmax.f32 %v445_v27, 0.0  ;;  %v510_v36 = vmax.f32 %v446_v28, 0.0  ;;  %v479_v38 = vadd.f32 %v1631_v14, %v408_v25  ;;  %v511_v41 = vmax.f32 %v447_v32, 0.0 }
  0x17   : > { %1429 = vmatprep.subr.bf16.mxu0 %v1530_v7  ;;  %1498 = vmatprep.subr.bf16.mxu1 %v1530_v7  ;;  %v541_v37 = vmax.f32 %v477_v29, 0.0  ;;  %v542_v40 = vmax.f32 %v478_v31, 0.0  ;;  %v512_v42 = vmax.f32 %v448_v33, 0.0  ;;  %v480_v43 = vadd.f32 %v1631_v14, %v409_v34  ;;  %v1376_v31 = vld [vmem:[%s1613_s29 + $0xa8] sm:$0xff]  }
  0x18   : > { %v573_v45 = vpack.c.bf16 %v510_v36, %v509_v35  ;;  %v543_v46 = vmax.f32 %v479_v38, 0.0  ;;  %v378_v47 = vmul.f32 %v1238_v26, %v1618_v3  ;;  %v379_v48 = vmul.f32 %v1239_v30, %v1618_v3 }
  0x19   : > { %v589_v50 = vpack.c.bf16 %v542_v40, %v541_v37  ;;  %v574_v51 = vpack.c.bf16 %v512_v42, %v511_v41  ;;  %v544_v52 = vmax.f32 %v480_v43, 0.0  ;;  %v1302_v53 = vunpack.c.l.bf16 %v1373_v39  ;;  %v1361_v40 = vld [vmem:[%s1613_s29 + $0x30] sm:$0xff]  }
  0x1a   : > { %1430 = vmatpush3.bf16.msra.mxu0 %v1530_v7  ;;  %1502 = vmatpush3.bf16.msra.mxu1 %v1530_v7  ;;  %v449_v54 = vadd.f32 %v1631_v14, %v378_v47  ;;  %v450_v55 = vadd.f32 %v1631_v14, %v379_v48  ;;  %v1303_v56 = vunpack.c.h.bf16 %v1373_v39  ;;  %v1242_v57 = vunpack.c.l.bf16 %v1358_v44 }
  0x1b   : > { %1431 = vmatprep.mubr.msk.bf16.mxu0 %vm637_vm0, %v573_v45  ;;  %1463 = vmatprep.mubr.msk.bf16.mxu1 %vm637_vm0, %v589_v50  ;;  %v590_v58 = vpack.c.bf16 %v544_v52, %v543_v46  ;;  %v410_v59 = vmul.f32 %v1302_v53, %v1618_v3  ;;  %v1243_v60 = vunpack.c.h.bf16 %v1358_v44  ;;  %v1306_v61 = vunpack.c.l.bf16 %v1374_v49  ;;  %v1377_v53 = vld [vmem:[%s1613_s29 + $0xb0] sm:$0xff]  }
  0x1c   : > { %v513_v63 = vmax.f32 %v449_v54, 0.0  ;;  %v514_v0 = vmax.f32 %v450_v55, 0.0  ;;  %v411_v1 = vmul.f32 %v1303_v56, %v1618_v3  ;;  %v380_v2 = vmul.f32 %v1242_v57, %v1618_v3 }
  0x1d   : > { %1432 = vmatmul.mubr.msk.bf16.vlgmr.msra.gmra.mxu0 %vm637_vm0, %v574_v51  ;;  %1464 = vmatmul.mubr.msk.bf16.vlgmr.msra.gmra.mxu1 %vm637_vm0, %v590_v58  ;;  %v481_v4 = vadd.f32 %v1631_v14, %v410_v59  ;;  %v381_v5 = vmul.f32 %v1243_v60, %v1618_v3  ;;  %v1307_v6 = vunpack.c.h.bf16 %v1374_v49  ;;  %v412_v7 = vmul.f32 %v1306_v61, %v1618_v3 }
  0x1e   : > { %v575_v8 = vpack.c.bf16 %v514_v0, %v513_v63  ;;  %v482_v9 = vadd.f32 %v1631_v14, %v411_v1  ;;  %v451_v10 = vadd.f32 %v1631_v14, %v380_v2  ;;  %v1246_v11 = vunpack.c.l.bf16 %v1359_v62 }
  0x1f   : > { %v545_v13 = vmax.f32 %v481_v4, 0.0  ;;  %v452_v15 = vadd.f32 %v1631_v14, %v381_v5  ;;  %v413_v16 = vmul.f32 %v1307_v6, %v1618_v3  ;;  %v483_v17 = vadd.f32 %v1631_v14, %v412_v7 }
  0x20   : > { %1435 = vmatprep.mubr.msk.bf16.mxu0 %vm637_vm0, %v575_v8  ;;  %v546_v18 = vmax.f32 %v482_v9, 0.0  ;;  %v515_v19 = vmax.f32 %v451_v10, 0.0  ;;  %v1247_v20 = vunpack.c.h.bf16 %v1359_v62  ;;  %v382_v21 = vmul.f32 %v1246_v11, %v1618_v3  ;;  %v1362_v62 = vld [vmem:[%s1613_s29 + $0x38] sm:$0xff]  }
  0x21   : > { %v516_v23 = vmax.f32 %v452_v15, 0.0  ;;  %v484_v24 = vadd.f32 %v1631_v14, %v413_v16  ;;  %v547_v25 = vmax.f32 %v483_v17, 0.0  ;;  %v1310_v26 = vunpack.c.l.bf16 %v1375_v12  ;;  %v1378_v8 = vld [vmem:[%s1613_s29 + $0xb8] sm:$0xff]  }
  0x22   : > { %v591_v27 = vpack.c.bf16 %v546_v18, %v545_v13  ;;  %v383_v28 = vmul.f32 %v1247_v20, %v1618_v3  ;;  %v453_v29 = vadd.f32 %v1631_v14, %v382_v21  ;;  %v1311_v30 = vunpack.c.h.bf16 %v1375_v12  ;;  %v1363_v18 = vld [vmem:[%s1613_s29 + $0x40] sm:$0xff]  }
  0x23   : > { %v576_v32 = vpack.c.bf16 %v516_v23, %v515_v19  ;;  %v548_v33 = vmax.f32 %v484_v24, 0.0  ;;  %v414_v34 = vmul.f32 %v1310_v26, %v1618_v3  ;;  %v1250_v35 = vunpack.c.l.bf16 %v1360_v22 }
  0x24   : > { %1467 = vmatprep.mubr.msk.bf16.mxu1 %vm637_vm0, %v591_v27  ;;  %v454_v36 = vadd.f32 %v1631_v14, %v383_v28  ;;  %v517_v37 = vmax.f32 %v453_v29, 0.0  ;;  %v415_v38 = vmul.f32 %v1311_v30, %v1618_v3  ;;  %v1251_v39 = vunpack.c.h.bf16 %v1360_v22 }
  0x25   : > { %1436 = vmatmul.mubr.msk.bf16.gmra.mxu0 %vm637_vm0, %v576_v32  ;;  %v592_v41 = vpack.c.bf16 %v548_v33, %v547_v25  ;;  %v485_v42 = vadd.f32 %v1631_v14, %v414_v34  ;;  %v384_v43 = vmul.f32 %v1250_v35, %v1618_v3  ;;  %v1314_v44 = vunpack.c.l.bf16 %v1376_v31 }
  0x26   : > { %v518_v45 = vmax.f32 %v454_v36, 0.0  ;;  %v486_v46 = vadd.f32 %v1631_v14, %v415_v38  ;;  %v385_v47 = vmul.f32 %v1251_v39, %v1618_v3  ;;  %v1315_v48 = vunpack.c.h.bf16 %v1376_v31  ;;  %v1379_v31 = vld [vmem:[%s1613_s29 + $0xc0] sm:$0xff]  }
  0x27   : > { %1468 = vmatmul.mubr.msk.bf16.gmra.mxu1 %vm637_vm0, %v592_v41  ;;  %v549_v49 = vmax.f32 %v485_v42, 0.0  ;;  %v455_v50 = vadd.f32 %v1631_v14, %v384_v43  ;;  %v416_v51 = vmul.f32 %v1314_v44, %v1618_v3  ;;  %v1254_v52 = vunpack.c.l.bf16 %v1361_v40 }
  0x28   : > { %v577_v54 = vpack.c.bf16 %v518_v45, %v517_v37  ;;  %v550_v55 = vmax.f32 %v486_v46, 0.0  ;;  %v456_v56 = vadd.f32 %v1631_v14, %v385_v47  ;;  %v417_v57 = vmul.f32 %v1315_v48, %v1618_v3 }
  0x29   : > { %v519_v58 = vmax.f32 %v455_v50, 0.0  ;;  %v487_v59 = vadd.f32 %v1631_v14, %v416_v51  ;;  %v1255_v60 = vunpack.c.h.bf16 %v1361_v40  ;;  %v386_v61 = vmul.f32 %v1254_v52, %v1618_v3  ;;  %v1364_v40 = vld [vmem:[%s1613_s29 + $0x48] sm:$0xff]  }
  0x2a   : > { %1439 = vmatprep.mubr.msk.bf16.mxu0 %vm637_vm0, %v577_v54  ;;  %v593_v63 = vpack.c.bf16 %v550_v55, %v549_v49  ;;  %v520_v0 = vmax.f32 %v456_v56, 0.0  ;;  %v488_v1 = vadd.f32 %v1631_v14, %v417_v57  ;;  %v1318_v2 = vunpack.c.l.bf16 %v1377_v53  ;;  %v1380_v49 = vld [vmem:[%s1613_s29 + $0xc8] sm:$0xff]  }
  0x2b   : > { %v551_v4 = vmax.f32 %v487_v59, 0.0  ;;  %v387_v5 = vmul.f32 %v1255_v60, %v1618_v3  ;;  %v457_v6 = vadd.f32 %v1631_v14, %v386_v61  ;;  %v1319_v7 = vunpack.c.h.bf16 %v1377_v53 }
  0x2c   : > { %1471 = vmatprep.mubr.msk.bf16.mxu1 %vm637_vm0, %v593_v63  ;;  %v578_v9 = vpack.c.bf16 %v520_v0, %v519_v58  ;;  %v552_v10 = vmax.f32 %v488_v1, 0.0  ;;  %v418_v11 = vmul.f32 %v1318_v2, %v1618_v3  ;;  %v1258_v12 = vunpack.c.l.bf16 %v1362_v62  ;;  %v1365_v58 = vld [vmem:[%s1613_s29 + $0x50] sm:$0xff]  }
  0x2d   : > { %v458_v13 = vadd.f32 %v1631_v14, %v387_v5  ;;  %v521_v15 = vmax.f32 %v457_v6, 0.0  ;;  %v419_v16 = vmul.f32 %v1319_v7, %v1618_v3  ;;  %v1259_v17 = vunpack.c.h.bf16 %v1362_v62 }
  0x2e   : > { %1440 = vmatmul.mubr.msk.bf16.gmra.mxu0 %vm637_vm0, %v578_v9  ;;  %v594_v19 = vpack.c.bf16 %v552_v10, %v551_v4  ;;  %v489_v20 = vadd.f32 %v1631_v14, %v418_v11  ;;  %v388_v21 = vmul.f32 %v1258_v12, %v1618_v3  ;;  %v1322_v22 = vunpack.c.l.bf16 %v1378_v8 }
  0x2f   : > { %v522_v23 = vmax.f32 %v458_v13, 0.0  ;;  %v490_v24 = vadd.f32 %v1631_v14, %v419_v16  ;;  %v389_v25 = vmul.f32 %v1259_v17, %v1618_v3  ;;  %v1323_v26 = vunpack.c.h.bf16 %v1378_v8  ;;  %v1381_v8 = vld [vmem:[%s1613_s29 + $0xd0] sm:$0xff]  }
  0x30   : > { %1472 = vmatmul.mubr.msk.bf16.gmra.mxu1 %vm637_vm0, %v594_v19  ;;  %v553_v27 = vmax.f32 %v489_v20, 0.0  ;;  %v459_v28 = vadd.f32 %v1631_v14, %v388_v21  ;;  %v420_v29 = vmul.f32 %v1322_v22, %v1618_v3  ;;  %v1262_v30 = vunpack.c.l.bf16 %v1363_v18 }
  0x31   : > { %v579_v32 = vpack.c.bf16 %v522_v23, %v521_v15  ;;  %v554_v33 = vmax.f32 %v490_v24, 0.0  ;;  %v460_v34 = vadd.f32 %v1631_v14, %v389_v25  ;;  %v421_v35 = vmul.f32 %v1323_v26, %v1618_v3 }
  0x32   : > { %v523_v36 = vmax.f32 %v459_v28, 0.0  ;;  %v491_v37 = vadd.f32 %v1631_v14, %v420_v29  ;;  %v1263_v38 = vunpack.c.h.bf16 %v1363_v18  ;;  %v390_v39 = vmul.f32 %v1262_v30, %v1618_v3  ;;  %v1366_v18 = vld [vmem:[%s1613_s29 + $0x58] sm:$0xff]  }
  0x33   : > { %1443 = vmatprep.mubr.msk.bf16.mxu0 %vm637_vm0, %v579_v32  ;;  %v595_v41 = vpack.c.bf16 %v554_v33, %v553_v27  ;;  %v524_v42 = vmax.f32 %v460_v34, 0.0  ;;  %v492_v43 = vadd.f32 %v1631_v14, %v421_v35  ;;  %v1326_v44 = vunpack.c.l.bf16 %v1379_v31  ;;  %v1382_v27 = vld [vmem:[%s1613_s29 + $0xd8] sm:$0xff]  }
  0x34   : > { %v555_v45 = vmax.f32 %v491_v37, 0.0  ;;  %v391_v46 = vmul.f32 %v1263_v38, %v1618_v3  ;;  %v461_v47 = vadd.f32 %v1631_v14, %v390_v39  ;;  %v1327_v48 = vunpack.c.h.bf16 %v1379_v31 }
  0x35   : > { %1475 = vmatprep.mubr.msk.bf16.mxu1 %vm637_vm0, %v595_v41  ;;  %v580_v50 = vpack.c.bf16 %v524_v42, %v523_v36  ;;  %v556_v51 = vmax.f32 %v492_v43, 0.0  ;;  %v422_v52 = vmul.f32 %v1326_v44, %v1618_v3  ;;  %v1266_v53 = vunpack.c.l.bf16 %v1364_v40  ;;  %v1367_v36 = vld [vmem:[%s1613_s29 + $0x60] sm:$0xff]  }
  0x36   : > { %v462_v54 = vadd.f32 %v1631_v14, %v391_v46  ;;  %v525_v55 = vmax.f32 %v461_v47, 0.0  ;;  %v423_v56 = vmul.f32 %v1327_v48, %v1618_v3  ;;  %v1267_v57 = vunpack.c.h.bf16 %v1364_v40 }
  0x37   : > { %1444 = vmatmul.mubr.msk.bf16.gmra.mxu0 %vm637_vm0, %v580_v50  ;;  %v596_v59 = vpack.c.bf16 %v556_v51, %v555_v45  ;;  %v493_v60 = vadd.f32 %v1631_v14, %v422_v52  ;;  %v392_v61 = vmul.f32 %v1266_v53, %v1618_v3  ;;  %v1330_v62 = vunpack.c.l.bf16 %v1380_v49 }
  0x38   : > { %v526_v63 = vmax.f32 %v462_v54, 0.0  ;;  %v494_v0 = vadd.f32 %v1631_v14, %v423_v56  ;;  %v393_v1 = vmul.f32 %v1267_v57, %v1618_v3  ;;  %v1331_v2 = vunpack.c.h.bf16 %v1380_v49  ;;  %v1383_v49 = vld [vmem:[%s1613_s29 + $0xe0] sm:$0xff]  }
  0x39   : > { %1476 = vmatmul.mubr.msk.bf16.gmra.mxu1 %vm637_vm0, %v596_v59  ;;  %v557_v4 = vmax.f32 %v493_v60, 0.0  ;;  %v463_v5 = vadd.f32 %v1631_v14, %v392_v61  ;;  %v424_v6 = vmul.f32 %v1330_v62, %v1618_v3  ;;  %v1270_v7 = vunpack.c.l.bf16 %v1365_v58 }
  0x3a   : > { %v581_v9 = vpack.c.bf16 %v526_v63, %v525_v55  ;;  %v558_v10 = vmax.f32 %v494_v0, 0.0  ;;  %v464_v11 = vadd.f32 %v1631_v14, %v393_v1  ;;  %v425_v12 = vmul.f32 %v1331_v2, %v1618_v3 }
  0x3b   : > { %v527_v13 = vmax.f32 %v463_v5, 0.0  ;;  %v495_v15 = vadd.f32 %v1631_v14, %v424_v6  ;;  %v1271_v16 = vunpack.c.h.bf16 %v1365_v58  ;;  %v394_v17 = vmul.f32 %v1270_v7, %v1618_v3  ;;  %v1368_v58 = vld [vmem:[%s1613_s29 + $0x68] sm:$0xff]  }
  0x3c   : > { %1447 = vmatprep.mubr.msk.bf16.mxu0 %vm637_vm0, %v581_v9  ;;  %v597_v19 = vpack.c.bf16 %v558_v10, %v557_v4  ;;  %v528_v20 = vmax.f32 %v464_v11, 0.0  ;;  %v496_v21 = vadd.f32 %v1631_v14, %v425_v12  ;;  %v1334_v22 = vunpack.c.l.bf16 %v1381_v8  ;;  %v1384_v4 = vld [vmem:[%s1613_s29 + $0xe8] sm:$0xff]  }
  0x3d   : > { %v559_v23 = vmax.f32 %v495_v15, 0.0  ;;  %v395_v24 = vmul.f32 %v1271_v16, %v1618_v3  ;;  %v465_v25 = vadd.f32 %v1631_v14, %v394_v17  ;;  %v1335_v26 = vunpack.c.h.bf16 %v1381_v8 }
  0x3e   : > { %1479 = vmatprep.mubr.msk.bf16.mxu1 %vm637_vm0, %v597_v19  ;;  %v582_v28 = vpack.c.bf16 %v528_v20, %v527_v13  ;;  %v560_v29 = vmax.f32 %v496_v21, 0.0  ;;  %v426_v30 = vmul.f32 %v1334_v22, %v1618_v3  ;;  %v1274_v31 = vunpack.c.l.bf16 %v1366_v18  ;;  %v1369_v13 = vld [vmem:[%s1613_s29 + $0x70] sm:$0xff]  }
  0x3f   : > { %v466_v32 = vadd.f32 %v1631_v14, %v395_v24  ;;  %v529_v33 = vmax.f32 %v465_v25, 0.0  ;;  %v427_v34 = vmul.f32 %v1335_v26, %v1618_v3  ;;  %v1275_v35 = vunpack.c.h.bf16 %v1366_v18 }
  0x40   : > { %1448 = vmatmul.mubr.msk.bf16.gmra.mxu0 %vm637_vm0, %v582_v28  ;;  %v598_v37 = vpack.c.bf16 %v560_v29, %v559_v23  ;;  %v497_v38 = vadd.f32 %v1631_v14, %v426_v30  ;;  %v396_v39 = vmul.f32 %v1274_v31, %v1618_v3  ;;  %v1338_v40 = vunpack.c.l.bf16 %v1382_v27 }
  0x41   : > { %v530_v41 = vmax.f32 %v466_v32, 0.0  ;;  %v498_v42 = vadd.f32 %v1631_v14, %v427_v34  ;;  %v397_v43 = vmul.f32 %v1275_v35, %v1618_v3  ;;  %v1339_v44 = vunpack.c.h.bf16 %v1382_v27  ;;  %v1385_v27 = vld [vmem:[%s1613_s29 + $0xf0] sm:$0xff]  }
  0x42   : > { %1480 = vmatmul.mubr.msk.bf16.gmra.mxu1 %vm637_vm0, %v598_v37  ;;  %v561_v45 = vmax.f32 %v497_v38, 0.0  ;;  %v467_v46 = vadd.f32 %v1631_v14, %v396_v39  ;;  %v428_v47 = vmul.f32 %v1338_v40, %v1618_v3  ;;  %v1278_v48 = vunpack.c.l.bf16 %v1367_v36 }
  0x43   : > { %v583_v50 = vpack.c.bf16 %v530_v41, %v529_v33  ;;  %v562_v51 = vmax.f32 %v498_v42, 0.0  ;;  %v468_v52 = vadd.f32 %v1631_v14, %v397_v43  ;;  %v429_v53 = vmul.f32 %v1339_v44, %v1618_v3 }
  0x44   : > { %v531_v54 = vmax.f32 %v467_v46, 0.0  ;;  %v499_v55 = vadd.f32 %v1631_v14, %v428_v47  ;;  %v1279_v56 = vunpack.c.h.bf16 %v1367_v36  ;;  %v398_v57 = vmul.f32 %v1278_v48, %v1618_v3  ;;  %v1370_v36 = vld [vmem:[%s1613_s29 + $0x78] sm:$0xff]  }
  0x45   : > { %1451 = vmatprep.mubr.msk.bf16.mxu0 %vm637_vm0, %v583_v50  ;;  %v599_v59 = vpack.c.bf16 %v562_v51, %v561_v45  ;;  %v532_v60 = vmax.f32 %v468_v52, 0.0  ;;  %v500_v61 = vadd.f32 %v1631_v14, %v429_v53  ;;  %v1342_v62 = vunpack.c.l.bf16 %v1383_v49  ;;  %v1386_v45 = vld [vmem:[%s1613_s29 + $0xf8] sm:$0xff]  }
  0x46   : > { %v563_v63 = vmax.f32 %v499_v55, 0.0  ;;  %v399_v0 = vmul.f32 %v1279_v56, %v1618_v3  ;;  %v469_v1 = vadd.f32 %v1631_v14, %v398_v57  ;;  %v1343_v2 = vunpack.c.h.bf16 %v1383_v49 }
  0x47   : > { %1483 = vmatprep.mubr.msk.bf16.mxu1 %vm637_vm0, %v599_v59  ;;  %v584_v5 = vpack.c.bf16 %v532_v60, %v531_v54  ;;  %v564_v6 = vmax.f32 %v500_v61, 0.0  ;;  %v430_v7 = vmul.f32 %v1342_v62, %v1618_v3  ;;  %v1282_v8 = vunpack.c.l.bf16 %v1368_v58 }
  0x48   : > { %v470_v9 = vadd.f32 %v1631_v14, %v399_v0  ;;  %v533_v10 = vmax.f32 %v469_v1, 0.0  ;;  %v431_v11 = vmul.f32 %v1343_v2, %v1618_v3  ;;  %v1283_v12 = vunpack.c.h.bf16 %v1368_v58 }
  0x49   : > { %1452 = vmatmul.mubr.msk.bf16.gmra.mxu0 %vm637_vm0, %v584_v5  ;;  %v600_v15 = vpack.c.bf16 %v564_v6, %v563_v63  ;;  %v501_v16 = vadd.f32 %v1631_v14, %v430_v7  ;;  %v400_v17 = vmul.f32 %v1282_v8, %v1618_v3  ;;  %v1346_v18 = vunpack.c.l.bf16 %v1384_v4 }
  0x4a   : > { %v534_v19 = vmax.f32 %v470_v9, 0.0  ;;  %v502_v20 = vadd.f32 %v1631_v14, %v431_v11  ;;  %v401_v21 = vmul.f32 %v1283_v12, %v1618_v3  ;;  %v1347_v22 = vunpack.c.h.bf16 %v1384_v4 }
  0x4b   : > { %1484 = vmatmul.mubr.msk.bf16.gmra.mxu1 %vm637_vm0, %v600_v15  ;;  %v565_v23 = vmax.f32 %v501_v16, 0.0  ;;  %v471_v24 = vadd.f32 %v1631_v14, %v400_v17  ;;  %v432_v25 = vmul.f32 %v1346_v18, %v1618_v3  ;;  %v1286_v26 = vunpack.c.l.bf16 %v1369_v13 }
  0x4c   : > { %v585_v28 = vpack.c.bf16 %v534_v19, %v533_v10  ;;  %v566_v29 = vmax.f32 %v502_v20, 0.0  ;;  %v472_v30 = vadd.f32 %v1631_v14, %v401_v21  ;;  %v433_v31 = vmul.f32 %v1347_v22, %v1618_v3 }
  0x4d   : > { %v535_v32 = vmax.f32 %v471_v24, 0.0  ;;  %v503_v33 = vadd.f32 %v1631_v14, %v432_v25  ;;  %v1287_v34 = vunpack.c.h.bf16 %v1369_v13  ;;  %v402_v35 = vmul.f32 %v1286_v26, %v1618_v3 }
  0x4e   : > { %1455 = vmatprep.mubr.msk.bf16.mxu0 %vm637_vm0, %v585_v28  ;;  %v601_v37 = vpack.c.bf16 %v566_v29, %v565_v23  ;;  %v536_v38 = vmax.f32 %v472_v30, 0.0  ;;  %v504_v39 = vadd.f32 %v1631_v14, %v433_v31  ;;  %v1350_v40 = vunpack.c.l.bf16 %v1385_v27 }
  0x4f   : > { %v567_v41 = vmax.f32 %v503_v33, 0.0  ;;  %v403_v42 = vmul.f32 %v1287_v34, %v1618_v3  ;;  %v473_v43 = vadd.f32 %v1631_v14, %v402_v35  ;;  %v1351_v44 = vunpack.c.h.bf16 %v1385_v27 }
  0x50   : > { %1487 = vmatprep.mubr.msk.bf16.mxu1 %vm637_vm0, %v601_v37  ;;  %v586_v46 = vpack.c.bf16 %v536_v38, %v535_v32  ;;  %v568_v47 = vmax.f32 %v504_v39, 0.0  ;;  %v434_v48 = vmul.f32 %v1350_v40, %v1618_v3  ;;  %v1290_v49 = vunpack.c.l.bf16 %v1370_v36 }
  0x51   : > { %v474_v50 = vadd.f32 %v1631_v14, %v403_v42  ;;  %v537_v51 = vmax.f32 %v473_v43, 0.0  ;;  %v435_v52 = vmul.f32 %v1351_v44, %v1618_v3  ;;  %v1291_v53 = vunpack.c.h.bf16 %v1370_v36 }
  0x52   : > { %1456 = vmatmul.mubr.msk.bf16.gmra.mxu0 %vm637_vm0, %v586_v46  ;;  %v602_v54 = vpack.c.bf16 %v568_v47, %v567_v41  ;;  %v505_v55 = vadd.f32 %v1631_v14, %v434_v48  ;;  %v404_v56 = vmul.f32 %v1290_v49, %v1618_v3  ;;  %v1354_v57 = vunpack.c.l.bf16 %v1386_v45 }
  0x53   : > { %v538_v58 = vmax.f32 %v474_v50, 0.0  ;;  %v506_v59 = vadd.f32 %v1631_v14, %v435_v52  ;;  %v405_v60 = vmul.f32 %v1291_v53, %v1618_v3  ;;  %v1355_v61 = vunpack.c.h.bf16 %v1386_v45 }
  0x54   : > { %1488 = vmatmul.mubr.msk.bf16.gmra.mxu1 %vm637_vm0, %v602_v54  ;;  %v569_v62 = vmax.f32 %v505_v55, 0.0  ;;  %v475_v63 = vadd.f32 %v1631_v14, %v404_v56  ;;  %v436_v0 = vmul.f32 %v1354_v57, %v1618_v3 }
  0x55   : > { %v587_v1 = vpack.c.bf16 %v538_v58, %v537_v51  ;;  %v570_v2 = vmax.f32 %v506_v59, 0.0  ;;  %v476_v4 = vadd.f32 %v1631_v14, %v405_v60  ;;  %v437_v5 = vmul.f32 %v1355_v61, %v1618_v3 }
  0x56   : > { %v539_v6 = vmax.f32 %v475_v63, 0.0  ;;  %v507_v7 = vadd.f32 %v1631_v14, %v436_v0 }
  0x57   : > { %1459 = vmatprep.mubr.msk.bf16.mxu0 %vm637_vm0, %v587_v1  ;;  %v603_v8 = vpack.c.bf16 %v570_v2, %v569_v62  ;;  %v540_v9 = vmax.f32 %v476_v4, 0.0  ;;  %v508_v10 = vadd.f32 %v1631_v14, %v437_v5 }
  0x58   : > { %v571_v11 = vmax.f32 %v507_v7, 0.0 }
  0x59   : > { %1491 = vmatprep.mubr.msk.bf16.mxu1 %vm637_vm0, %v603_v8  ;;  %v588_v12 = vpack.c.bf16 %v540_v9, %v539_v6  ;;  %v572_v13 = vmax.f32 %v508_v10, 0.0 }
  0x5b   : > { %1460 = vmatmul.mubr.msk.bf16.gmra.mxu0 %vm637_vm0, %v588_v12  ;;  %v604_v15 = vpack.c.bf16 %v572_v13, %v571_v11 }
  0x5d   : > { %1492 = vmatmul.mubr.msk.bf16.gmra.mxu1 %vm637_vm0, %v604_v15 }
  0xdd   : > { %v1433_v3 = vpop.f32.mrf.mxu0  ;;  %v1465_v14 = vpop.f32.mrf.mxu1 }
  0xde   : > { %1026 = vst.msk [vmem:[%s1824_s13 + $0x10] sm:$0xff] %vm1023_vm1, %v1433_v3  ;;  %1058 = vst.msk [vmem:[%s1824_s13 + $0x110] sm:$0xff] %vm1023_vm1, %v1465_v14 }
  0xdf   : > { %v768_v16 = vpop.f32.mrf.mxu0  ;;  %v896_v17 = vpop.f32.mrf.mxu1 }
  0xe0   : > { %1024 = vst.msk [vmem:[%s1824_s13] sm:$0xff] %vm1023_vm1, %v768_v16  ;;  %1056 = vst.msk [vmem:[%s1824_s13 + $0x100] sm:$0xff] %vm1023_vm1, %v896_v17 }
  0xe1   : > { %v1434_v18 = vpop.f32.mrf.mxu0  ;;  %v1466_v19 = vpop.f32.mrf.mxu1 }
  0xe2   : > { %1027 = vst.msk [vmem:[%s1824_s13 + $0x18] sm:$0xff] %vm1023_vm1, %v1434_v18  ;;  %1059 = vst.msk [vmem:[%s1824_s13 + $0x118] sm:$0xff] %vm1023_vm1, %v1466_v19 }
  0xe3   : > { %v771_v20 = vpop.f32.mrf.mxu0  ;;  %v899_v21 = vpop.f32.mrf.mxu1 }
  0xe4   : > { %1025 = vst.msk [vmem:[%s1824_s13 + $0x8] sm:$0xff] %vm1023_vm1, %v771_v20  ;;  %1057 = vst.msk [vmem:[%s1824_s13 + $0x108] sm:$0xff] %vm1023_vm1, %v899_v21 }
  0xe5   : > { %v1437_v22 = vpop.f32.mrf.mxu0 }
  0xe6   : > { %1030 = vst.msk [vmem:[%s1824_s13 + $0x30] sm:$0xff] %vm1023_vm1, %v1437_v22 }
  0xe7   : > { %v1469_v23 = vpop.f32.mrf.mxu1  ;;  %v784_v24 = vpop.f32.mrf.mxu0 }
  0xe8   : > { %1062 = vst.msk [vmem:[%s1824_s13 + $0x130] sm:$0xff] %vm1023_vm1, %v1469_v23  ;;  %1028 = vst.msk [vmem:[%s1824_s13 + $0x20] sm:$0xff] %vm1023_vm1, %v784_v24 }
  0xe9   : > { %v912_v25 = vpop.f32.mrf.mxu1  ;;  %v1438_v26 = vpop.f32.mrf.mxu0 }
  0xea   : > { %1060 = vst.msk [vmem:[%s1824_s13 + $0x120] sm:$0xff] %vm1023_vm1, %v912_v25  ;;  %1031 = vst.msk [vmem:[%s1824_s13 + $0x38] sm:$0xff] %vm1023_vm1, %v1438_v26 }
  0xeb   : > { %v1470_v27 = vpop.f32.mrf.mxu1  ;;  %v787_v28 = vpop.f32.mrf.mxu0 }
  0xec   : > { %1063 = vst.msk [vmem:[%s1824_s13 + $0x138] sm:$0xff] %vm1023_vm1, %v1470_v27  ;;  %1029 = vst.msk [vmem:[%s1824_s13 + $0x28] sm:$0xff] %vm1023_vm1, %v787_v28 }
  0xed   : > { %v915_v29 = vpop.f32.mrf.mxu1 }
  0xee   : > { %1061 = vst.msk [vmem:[%s1824_s13 + $0x128] sm:$0xff] %vm1023_vm1, %v915_v29  ;;  %v1441_v30 = vpop.f32.mrf.mxu0 }
  0xef   : > { %1034 = vst.msk [vmem:[%s1824_s13 + $0x50] sm:$0xff] %vm1023_vm1, %v1441_v30 }
  0xf0   : > { %v1473_v31 = vpop.f32.mrf.mxu1  ;;  %v800_v32 = vpop.f32.mrf.mxu0 }
  0xf1   : > { %1066 = vst.msk [vmem:[%s1824_s13 + $0x150] sm:$0xff] %vm1023_vm1, %v1473_v31  ;;  %1032 = vst.msk [vmem:[%s1824_s13 + $0x40] sm:$0xff] %vm1023_vm1, %v800_v32 }
  0xf2   : > { %v928_v33 = vpop.f32.mrf.mxu1  ;;  %v1442_v34 = vpop.f32.mrf.mxu0 }
  0xf3   : > { %1064 = vst.msk [vmem:[%s1824_s13 + $0x140] sm:$0xff] %vm1023_vm1, %v928_v33  ;;  %1035 = vst.msk [vmem:[%s1824_s13 + $0x58] sm:$0xff] %vm1023_vm1, %v1442_v34 }
  0xf4   : > { %v1474_v35 = vpop.f32.mrf.mxu1  ;;  %v803_v36 = vpop.f32.mrf.mxu0 }
  0xf5   : > { %1067 = vst.msk [vmem:[%s1824_s13 + $0x158] sm:$0xff] %vm1023_vm1, %v1474_v35  ;;  %1033 = vst.msk [vmem:[%s1824_s13 + $0x48] sm:$0xff] %vm1023_vm1, %v803_v36 }
  0xf6   : > { %v931_v37 = vpop.f32.mrf.mxu1 }
  0xf7   : > { %1065 = vst.msk [vmem:[%s1824_s13 + $0x148] sm:$0xff] %vm1023_vm1, %v931_v37  ;;  %v1445_v38 = vpop.f32.mrf.mxu0 }
  0xf8   : > { %1038 = vst.msk [vmem:[%s1824_s13 + $0x70] sm:$0xff] %vm1023_vm1, %v1445_v38 }
  0xf9   : > { %v1477_v39 = vpop.f32.mrf.mxu1  ;;  %v816_v40 = vpop.f32.mrf.mxu0 }
  0xfa   : > { %1070 = vst.msk [vmem:[%s1824_s13 + $0x170] sm:$0xff] %vm1023_vm1, %v1477_v39  ;;  %1036 = vst.msk [vmem:[%s1824_s13 + $0x60] sm:$0xff] %vm1023_vm1, %v816_v40 }
  0xfb   : > { %v944_v41 = vpop.f32.mrf.mxu1  ;;  %v1446_v42 = vpop.f32.mrf.mxu0 }
  0xfc   : > { %1068 = vst.msk [vmem:[%s1824_s13 + $0x160] sm:$0xff] %vm1023_vm1, %v944_v41  ;;  %1039 = vst.msk [vmem:[%s1824_s13 + $0x78] sm:$0xff] %vm1023_vm1, %v1446_v42 }
  0xfd   : > { %v1478_v43 = vpop.f32.mrf.mxu1  ;;  %v819_v44 = vpop.f32.mrf.mxu0 }
  0xfe   : > { %1071 = vst.msk [vmem:[%s1824_s13 + $0x178] sm:$0xff] %vm1023_vm1, %v1478_v43  ;;  %1037 = vst.msk [vmem:[%s1824_s13 + $0x68] sm:$0xff] %vm1023_vm1, %v819_v44 }
  0xff   : > { %v947_v45 = vpop.f32.mrf.mxu1 }
 0x100   : > { %1069 = vst.msk [vmem:[%s1824_s13 + $0x168] sm:$0xff] %vm1023_vm1, %v947_v45  ;;  %v1449_v46 = vpop.f32.mrf.mxu0 }
 0x101   : > { %1042 = vst.msk [vmem:[%s1824_s13 + $0x90] sm:$0xff] %vm1023_vm1, %v1449_v46 }
 0x102   : > { %v1481_v47 = vpop.f32.mrf.mxu1  ;;  %v832_v48 = vpop.f32.mrf.mxu0 }
 0x103   : > { %1074 = vst.msk [vmem:[%s1824_s13 + $0x190] sm:$0xff] %vm1023_vm1, %v1481_v47  ;;  %1040 = vst.msk [vmem:[%s1824_s13 + $0x80] sm:$0xff] %vm1023_vm1, %v832_v48 }
 0x104   : > { %v960_v49 = vpop.f32.mrf.mxu1  ;;  %v1450_v50 = vpop.f32.mrf.mxu0 }
 0x105   : > { %1072 = vst.msk [vmem:[%s1824_s13 + $0x180] sm:$0xff] %vm1023_vm1, %v960_v49  ;;  %1043 = vst.msk [vmem:[%s1824_s13 + $0x98] sm:$0xff] %vm1023_vm1, %v1450_v50 }
 0x106   : > { %v1482_v51 = vpop.f32.mrf.mxu1  ;;  %v835_v52 = vpop.f32.mrf.mxu0 }
 0x107   : > { %1075 = vst.msk [vmem:[%s1824_s13 + $0x198] sm:$0xff] %vm1023_vm1, %v1482_v51  ;;  %1041 = vst.msk [vmem:[%s1824_s13 + $0x88] sm:$0xff] %vm1023_vm1, %v835_v52 }
 0x108   : > { %v963_v53 = vpop.f32.mrf.mxu1 }
 0x109   : > { %1073 = vst.msk [vmem:[%s1824_s13 + $0x188] sm:$0xff] %vm1023_vm1, %v963_v53  ;;  %v1453_v54 = vpop.f32.mrf.mxu0 }
 0x10a   : > { %1046 = vst.msk [vmem:[%s1824_s13 + $0xb0] sm:$0xff] %vm1023_vm1, %v1453_v54 }
 0x10b   : > { %v1485_v55 = vpop.f32.mrf.mxu1  ;;  %v848_v56 = vpop.f32.mrf.mxu0 }
 0x10c   : > { %1078 = vst.msk [vmem:[%s1824_s13 + $0x1b0] sm:$0xff] %vm1023_vm1, %v1485_v55  ;;  %1044 = vst.msk [vmem:[%s1824_s13 + $0xa0] sm:$0xff] %vm1023_vm1, %v848_v56 }
 0x10d   : > { %v976_v57 = vpop.f32.mrf.mxu1  ;;  %v1454_v58 = vpop.f32.mrf.mxu0 }
 0x10e   : > { %1076 = vst.msk [vmem:[%s1824_s13 + $0x1a0] sm:$0xff] %vm1023_vm1, %v976_v57  ;;  %1047 = vst.msk [vmem:[%s1824_s13 + $0xb8] sm:$0xff] %vm1023_vm1, %v1454_v58 }
 0x10f   : > { %v1486_v59 = vpop.f32.mrf.mxu1  ;;  %v851_v60 = vpop.f32.mrf.mxu0 }
 0x110   : > { %1079 = vst.msk [vmem:[%s1824_s13 + $0x1b8] sm:$0xff] %vm1023_vm1, %v1486_v59  ;;  %1045 = vst.msk [vmem:[%s1824_s13 + $0xa8] sm:$0xff] %vm1023_vm1, %v851_v60 }
 0x111   : > { %v979_v61 = vpop.f32.mrf.mxu1 }
 0x112   : > { %1077 = vst.msk [vmem:[%s1824_s13 + $0x1a8] sm:$0xff] %vm1023_vm1, %v979_v61  ;;  %v1457_v62 = vpop.f32.mrf.mxu0 }
 0x113   : > { %1050 = vst.msk [vmem:[%s1824_s13 + $0xd0] sm:$0xff] %vm1023_vm1, %v1457_v62 }
 0x114   : > { %v1489_v63 = vpop.f32.mrf.mxu1  ;;  %v864_v0 = vpop.f32.mrf.mxu0 }
 0x115   : > { %1082 = vst.msk [vmem:[%s1824_s13 + $0x1d0] sm:$0xff] %vm1023_vm1, %v1489_v63  ;;  %1048 = vst.msk [vmem:[%s1824_s13 + $0xc0] sm:$0xff] %vm1023_vm1, %v864_v0 }
 0x116   : > { %v992_v1 = vpop.f32.mrf.mxu1  ;;  %v1458_v2 = vpop.f32.mrf.mxu0 }
 0x117   : > { %1080 = vst.msk [vmem:[%s1824_s13 + $0x1c0] sm:$0xff] %vm1023_vm1, %v992_v1  ;;  %1051 = vst.msk [vmem:[%s1824_s13 + $0xd8] sm:$0xff] %vm1023_vm1, %v1458_v2 }
 0x118   : > { %v1490_v4 = vpop.f32.mrf.mxu1  ;;  %v867_v5 = vpop.f32.mrf.mxu0 }
 0x119   : > { %1083 = vst.msk [vmem:[%s1824_s13 + $0x1d8] sm:$0xff] %vm1023_vm1, %v1490_v4  ;;  %1049 = vst.msk [vmem:[%s1824_s13 + $0xc8] sm:$0xff] %vm1023_vm1, %v867_v5 }
 0x11a   : > { %v995_v6 = vpop.f32.mrf.mxu1 }
 0x11b   : > { %1081 = vst.msk [vmem:[%s1824_s13 + $0x1c8] sm:$0xff] %vm1023_vm1, %v995_v6  ;;  %v1461_v7 = vpop.f32.mrf.mxu0 }
 0x11c   : > { %1054 = vst.msk [vmem:[%s1824_s13 + $0xf0] sm:$0xff] %vm1023_vm1, %v1461_v7 }
 0x11d   : > { %v1493_v8 = vpop.f32.mrf.mxu1  ;;  %v880_v9 = vpop.f32.mrf.mxu0 }
 0x11e   : > { %1086 = vst.msk [vmem:[%s1824_s13 + $0x1f0] sm:$0xff] %vm1023_vm1, %v1493_v8  ;;  %1052 = vst.msk [vmem:[%s1824_s13 + $0xe0] sm:$0xff] %vm1023_vm1, %v880_v9 }
 0x11f   : > { %v1008_v10 = vpop.f32.mrf.mxu1  ;;  %v1462_v11 = vpop.f32.mrf.mxu0 }
 0x120   : > { %1084 = vst.msk [vmem:[%s1824_s13 + $0x1e0] sm:$0xff] %vm1023_vm1, %v1008_v10  ;;  %1055 = vst.msk [vmem:[%s1824_s13 + $0xf8] sm:$0xff] %vm1023_vm1, %v1462_v11 }
 0x121   : > { %v1494_v12 = vpop.f32.mrf.mxu1  ;;  %v883_v13 = vpop.f32.mrf.mxu0 }
 0x122   : > { %1087 = vst.msk [vmem:[%s1824_s13 + $0x1f8] sm:$0xff] %vm1023_vm1, %v1494_v12  ;;  %1053 = vst.msk [vmem:[%s1824_s13 + $0xe8] sm:$0xff] %vm1023_vm1, %v883_v13 }
 0x123   : > { %v1011_v15 = vpop.f32.mrf.mxu1 }
 0x124   : > { %1085 = vst.msk [vmem:[%s1824_s13 + $0x1e8] sm:$0xff] %vm1023_vm1, %v1011_v15 }
 0x125 PF: > { %s14_s17 = sadd.s32 1, %s1553_s17   ;;  %s1968_s15 = smov %s1549_s16 }
 0x126   : > { %p11_p5 = scmp.ge.s32.totalorder %s14_s17, 6   ;;  %s1969_s16 = smov %s1971_s18 }
 0x128   :  { %13 = sbr.rel (!%p11_p5) target bundleno = 2 (0x2), region = 69 }

// kernel: acgan_generator_forward.19
= control target key start
LH: loop header
LB: loop body
LE: loop exit
PB: predicated region body
PF: predicated region fallthrough
CT: control target
= control target key end

     0   :  { %s374_s0 = inlined_call_operand.vmem [shape: f32[6,4096], index: 0, kind: input, shape index: {}]   ;;  %s375_s1 = inlined_call_operand.vmem [shape: f32[6,4096], index: 1, kind: output, shape index: {}]  }
   0x1   :  { %v8_v0 = vld [vmem:[%s374_s0] sm:$0x3f]  ;;  %v9_v1 = vld [vmem:[%s374_s0 + $0x8] sm:$0x3f]  ;;  %v10_v2 = vld [vmem:[%s374_s0 + $0x10] sm:$0x3f] }
   0x2   :  { %108 = vtanh.f32 %v8_v0  ;;  %v11_v3 = vld [vmem:[%s374_s0 + $0x18] sm:$0x3f]  ;;  %v12_v4 = vld [vmem:[%s374_s0 + $0x20] sm:$0x3f]  ;;  %v13_v5 = vld [vmem:[%s374_s0 + $0x28] sm:$0x3f] }
   0x3   :  { %110 = vtanh.f32 %v9_v1  ;;  %v14_v6 = vld [vmem:[%s374_s0 + $0x30] sm:$0x3f]  ;;  %v15_v7 = vld [vmem:[%s374_s0 + $0x38] sm:$0x3f]  ;;  %v16_v8 = vld [vmem:[%s374_s0 + $0x40] sm:$0x3f] }
   0x4   :  { %112 = vtanh.f32 %v10_v2  ;;  %v17_v9 = vld [vmem:[%s374_s0 + $0x48] sm:$0x3f]  ;;  %v18_v10 = vld [vmem:[%s374_s0 + $0x50] sm:$0x3f]  ;;  %v19_v11 = vld [vmem:[%s374_s0 + $0x58] sm:$0x3f] }
   0x5   :  { %114 = vtanh.f32 %v11_v3  ;;  %v20_v12 = vld [vmem:[%s374_s0 + $0x60] sm:$0x3f]  ;;  %v21_v13 = vld [vmem:[%s374_s0 + $0x68] sm:$0x3f]  ;;  %v22_v14 = vld [vmem:[%s374_s0 + $0x70] sm:$0x3f] }
   0x6   :  { %116 = vtanh.f32 %v12_v4  ;;  %v23_v15 = vld [vmem:[%s374_s0 + $0x78] sm:$0x3f]  ;;  %v24_v17 = vld [vmem:[%s374_s0 + $0x80] sm:$0x3f]  ;;  %v25_v19 = vld [vmem:[%s374_s0 + $0x88] sm:$0x3f] }
   0x7   :  { %118 = vtanh.f32 %v13_v5  ;;  %v26_v21 = vld [vmem:[%s374_s0 + $0x90] sm:$0x3f]  ;;  %v27_v23 = vld [vmem:[%s374_s0 + $0x98] sm:$0x3f]  ;;  %v28_v25 = vld [vmem:[%s374_s0 + $0xa0] sm:$0x3f] }
   0x8   :  { %120 = vtanh.f32 %v14_v6  ;;  %v29_v27 = vld [vmem:[%s374_s0 + $0xa8] sm:$0x3f]  ;;  %v30_v29 = vld [vmem:[%s374_s0 + $0xb0] sm:$0x3f]  ;;  %v31_v31 = vld [vmem:[%s374_s0 + $0xb8] sm:$0x3f] }
   0x9   :  { %122 = vtanh.f32 %v15_v7  ;;  %v32_v33 = vld [vmem:[%s374_s0 + $0xc0] sm:$0x3f]  ;;  %v33_v35 = vld [vmem:[%s374_s0 + $0xc8] sm:$0x3f]  ;;  %v34_v37 = vld [vmem:[%s374_s0 + $0xd0] sm:$0x3f] }
   0xa   :  { %124 = vtanh.f32 %v16_v8  ;;  %v35_v39 = vld [vmem:[%s374_s0 + $0xd8] sm:$0x3f]  ;;  %v36_v41 = vld [vmem:[%s374_s0 + $0xe0] sm:$0x3f]  ;;  %v37_v43 = vld [vmem:[%s374_s0 + $0xe8] sm:$0x3f] }
   0xb   :  { %126 = vtanh.f32 %v17_v9  ;;  %v38_v45 = vld [vmem:[%s374_s0 + $0xf0] sm:$0x3f]  ;;  %v39_v47 = vld [vmem:[%s374_s0 + $0xf8] sm:$0x3f] }
   0xc   :  { %128 = vtanh.f32 %v18_v10 }
   0xd   :  { %130 = vtanh.f32 %v19_v11 }
   0xe   :  { %132 = vtanh.f32 %v20_v12 }
   0xf   :  { %v109_v16 = vpop.eup %108  ;;  %134 = vtanh.f32 %v21_v13 }
  0x10   :  { %v111_v18 = vpop.eup %110  ;;  %72 = vst [vmem:[%s375_s1] sm:$0x3f] %v109_v16  ;;  %136 = vtanh.f32 %v22_v14 }
  0x11   :  { %v113_v20 = vpop.eup %112  ;;  %73 = vst [vmem:[%s375_s1 + $0x8] sm:$0x3f] %v111_v18  ;;  %138 = vtanh.f32 %v23_v15 }
  0x12   :  { %v115_v22 = vpop.eup %114  ;;  %74 = vst [vmem:[%s375_s1 + $0x10] sm:$0x3f] %v113_v20  ;;  %140 = vtanh.f32 %v24_v17 }
  0x13   :  { %v117_v24 = vpop.eup %116  ;;  %75 = vst [vmem:[%s375_s1 + $0x18] sm:$0x3f] %v115_v22  ;;  %142 = vtanh.f32 %v25_v19 }
  0x14   :  { %v119_v26 = vpop.eup %118  ;;  %76 = vst [vmem:[%s375_s1 + $0x20] sm:$0x3f] %v117_v24  ;;  %144 = vtanh.f32 %v26_v21 }
  0x15   :  { %v121_v28 = vpop.eup %120  ;;  %77 = vst [vmem:[%s375_s1 + $0x28] sm:$0x3f] %v119_v26  ;;  %146 = vtanh.f32 %v27_v23 }
  0x16   :  { %v123_v30 = vpop.eup %122  ;;  %78 = vst [vmem:[%s375_s1 + $0x30] sm:$0x3f] %v121_v28  ;;  %148 = vtanh.f32 %v28_v25 }
  0x17   :  { %v125_v32 = vpop.eup %124  ;;  %79 = vst [vmem:[%s375_s1 + $0x38] sm:$0x3f] %v123_v30  ;;  %150 = vtanh.f32 %v29_v27 }
  0x18   :  { %v127_v34 = vpop.eup %126  ;;  %80 = vst [vmem:[%s375_s1 + $0x40] sm:$0x3f] %v125_v32  ;;  %152 = vtanh.f32 %v30_v29 }
  0x19   :  { %v129_v36 = vpop.eup %128  ;;  %81 = vst [vmem:[%s375_s1 + $0x48] sm:$0x3f] %v127_v34  ;;  %154 = vtanh.f32 %v31_v31 }
  0x1a   :  { %v131_v38 = vpop.eup %130  ;;  %82 = vst [vmem:[%s375_s1 + $0x50] sm:$0x3f] %v129_v36  ;;  %156 = vtanh.f32 %v32_v33 }
  0x1b   :  { %v133_v40 = vpop.eup %132  ;;  %83 = vst [vmem:[%s375_s1 + $0x58] sm:$0x3f] %v131_v38  ;;  %158 = vtanh.f32 %v33_v35 }
  0x1c   :  { %v135_v42 = vpop.eup %134  ;;  %84 = vst [vmem:[%s375_s1 + $0x60] sm:$0x3f] %v133_v40  ;;  %160 = vtanh.f32 %v34_v37 }
  0x1d   :  { %v137_v44 = vpop.eup %136  ;;  %85 = vst [vmem:[%s375_s1 + $0x68] sm:$0x3f] %v135_v42  ;;  %162 = vtanh.f32 %v35_v39 }
  0x1e   :  { %v139_v46 = vpop.eup %138  ;;  %86 = vst [vmem:[%s375_s1 + $0x70] sm:$0x3f] %v137_v44  ;;  %164 = vtanh.f32 %v36_v41 }
  0x1f   :  { %v141_v48 = vpop.eup %140  ;;  %87 = vst [vmem:[%s375_s1 + $0x78] sm:$0x3f] %v139_v46  ;;  %166 = vtanh.f32 %v37_v43 }
  0x20   :  { %v143_v49 = vpop.eup %142  ;;  %88 = vst [vmem:[%s375_s1 + $0x80] sm:$0x3f] %v141_v48  ;;  %168 = vtanh.f32 %v38_v45 }
  0x21   :  { %v145_v50 = vpop.eup %144  ;;  %89 = vst [vmem:[%s375_s1 + $0x88] sm:$0x3f] %v143_v49  ;;  %170 = vtanh.f32 %v39_v47 }
  0x22   :  { %v147_v51 = vpop.eup %146  ;;  %90 = vst [vmem:[%s375_s1 + $0x90] sm:$0x3f] %v145_v50 }
  0x23   :  { %v149_v52 = vpop.eup %148  ;;  %91 = vst [vmem:[%s375_s1 + $0x98] sm:$0x3f] %v147_v51 }
  0x24   :  { %v151_v53 = vpop.eup %150  ;;  %92 = vst [vmem:[%s375_s1 + $0xa0] sm:$0x3f] %v149_v52 }
  0x25   :  { %v153_v54 = vpop.eup %152  ;;  %93 = vst [vmem:[%s375_s1 + $0xa8] sm:$0x3f] %v151_v53 }
  0x26   :  { %v155_v55 = vpop.eup %154  ;;  %94 = vst [vmem:[%s375_s1 + $0xb0] sm:$0x3f] %v153_v54 }
  0x27   :  { %v157_v56 = vpop.eup %156  ;;  %95 = vst [vmem:[%s375_s1 + $0xb8] sm:$0x3f] %v155_v55 }
  0x28   :  { %v159_v57 = vpop.eup %158  ;;  %96 = vst [vmem:[%s375_s1 + $0xc0] sm:$0x3f] %v157_v56 }
  0x29   :  { %v161_v58 = vpop.eup %160  ;;  %97 = vst [vmem:[%s375_s1 + $0xc8] sm:$0x3f] %v159_v57 }
  0x2a   :  { %v163_v59 = vpop.eup %162  ;;  %98 = vst [vmem:[%s375_s1 + $0xd0] sm:$0x3f] %v161_v58 }
  0x2b   :  { %v165_v60 = vpop.eup %164  ;;  %99 = vst [vmem:[%s375_s1 + $0xd8] sm:$0x3f] %v163_v59 }
  0x2c   :  { %v167_v61 = vpop.eup %166  ;;  %100 = vst [vmem:[%s375_s1 + $0xe0] sm:$0x3f] %v165_v60 }
  0x2d   :  { %v169_v62 = vpop.eup %168  ;;  %101 = vst [vmem:[%s375_s1 + $0xe8] sm:$0x3f] %v167_v61 }
  0x2e   :  { %v171_v63 = vpop.eup %170  ;;  %102 = vst [vmem:[%s375_s1 + $0xf0] sm:$0x3f] %v169_v62 }
  0x2f   :  { %103 = vst [vmem:[%s375_s1 + $0xf8] sm:$0x3f] %v171_v63 }

</bundles_post_ra>
